<compile_context>
chip_gen: v7x
topology: tpu7x:2x2x1
jax: 0.10.0
libtpu: 0.0.40
codegen_flags: <defaults>
</compile_context>

<pallas_src>
import math

import numpy as np
import jax
import jax.numpy as jnp
from jax import lax
from jax.experimental import pallas as pl
from jax.experimental.pallas import tpu as pltpu

# ----------------------------- configuration -----------------------------
BATCH = 2
IMG_CH = 3
IMG_SIZE = 32
PATCH = 8
GRID_HW = IMG_SIZE // PATCH            # 4
N_PATCHES = GRID_HW * GRID_HW          # 16
N_VIS = N_PATCHES + 1                  # cls + patches = 17
PATCH_DIM = IMG_CH * PATCH * PATCH     # 192

ENC_DIM = 64
ENC_HEADS = 4
ENC_DEPTH = 2
ENC_MLP = 4 * ENC_DIM                  # 256
DEC_DIM = 64
DEC_HEADS = 4
DEC_DEPTH = 2
DEC_MLP = 4 * DEC_DIM
VOCAB = 128
DEC_SEQ = 8
ENC_HEAD_DIM = ENC_DIM // ENC_HEADS    # 16
DEC_HEAD_DIM = DEC_DIM // DEC_HEADS    # 16
ROPE_BASE = 10000.0
LN_EPS = 1e-6      # VLMo/timm LayerNorm convention (nn.LayerNorm default is 1e-5)
RMS_EPS = 1e-6     # decoder_config norm_eps default
NEG_INF = -1e9
DTYPE = jnp.float32

# MXU input dtype.  float32 keeps exact parity with the f32 PyTorch reference (and keeps
# every elementwise path f32, which v5e requires anyway).  Set to jnp.bfloat16 on v6e/v7x
# for 2x MXU width / half the VMEM traffic; accumulation always stays f32.
MXU_DTYPE = jnp.float32


# ----------------------------- in-kernel helpers -----------------------------
def _mm(a, b):
    return jnp.dot(a.astype(MXU_DTYPE), b.astype(MXU_DTYPE),
                   preferred_element_type=jnp.float32)


def _layernorm(x, g, b, eps):
    mu = jnp.mean(x, axis=-1, keepdims=True)
    var = jnp.mean((x - mu) ** 2, axis=-1, keepdims=True)
    return (x - mu) * lax.rsqrt(var + eps) * g + b


def _rmsnorm(x, g, eps):
    ms = jnp.mean(x * x, axis=-1, keepdims=True)
    return x * lax.rsqrt(ms + eps) * g


def _gelu(x):
    # TODO(synk): PyTorch nn.GELU defaults to the exact erf form; the tanh approximation
    # is used here because it has a guaranteed Mosaic lowering (EUP tanh).
    return jax.nn.gelu(x, approximate=True)


def _attn_merge_proj(q, k, v, w_o, bias, num_heads, head_dim, scale):
    """Multi-head attention with the head-merge folded into the output projection.

    q:(Nq,D)  k,v:(Nk,D)  w_o:(D,Do)  bias:(Nq,Nk) additive or None  ->  (Nq,Do)
    (output-projection bias is added by the caller).  Heads are a static unrolled
    loop on VMEM values; scores contract the last axes (no K transpose); the softmax
    divide runs on the EUP via pl.reciprocal(approx=True).
    """
    nq = q.shape[0]
    d_out = w_o.shape[1]
    acc = jnp.zeros((nq, d_out), jnp.float32)
    for h in range(num_heads):
        sl = slice(h * head_dim, (h + 1) * head_dim)
        qh, kh, vh = q[:, sl], k[:, sl], v[:, sl]
        s = lax.dot_general(qh, kh, (((1,), (1,)), ((), ())),
                            preferred_element_type=jnp.float32) * scale
        if bias is not None:
            s = s + bias
        s = s - jnp.max(s, axis=-1, keepdims=True)
        p = jnp.exp(s)
        p = p * pl.reciprocal(jnp.sum(p, axis=-1, keepdims=True), approx=True)
        oh = jnp.dot(p, vh, preferred_element_type=jnp.float32)
        acc = acc + _mm(oh, w_o[sl, :])          # fold head-merge into the projection
    return acc


# ----------------------------- fused encoder kernel -----------------------------
def _encoder_kernel(
    patches_ref, embed_bias_ref, patch_w_ref,
    ln1_g_ref, ln1_b_ref, qkv_w_ref, qkv_b_ref, proj_w_ref, proj_b_ref,
    ln2_g_ref, ln2_b_ref, fc1_w_ref, fc1_b_ref, fc2_w_ref, fc2_b_ref,
    norm_g_ref, norm_b_ref,
    ctx_ref,
):
    scale = 1.0 / math.sqrt(ENC_HEAD_DIM)
    # Fused patch-embed + cls token: row 0 of `patches` is zero and row 0 of the
    # per-row embed bias is the cls token; rows 1.. carry the conv bias.
    x = _mm(patches_ref[0], patch_w_ref[...]) + embed_bias_ref[...]        # (N_VIS, D)
    # TODO(synk): Rope2DPosEmb (2D rotary for image tokens) source not provided; omitted.
    for l in range(ENC_DEPTH):
        h = _layernorm(x, ln1_g_ref[l], ln1_b_ref[l], LN_EPS)
        qkv = _mm(h, qkv_w_ref[l]) + qkv_b_ref[l]
        q = qkv[:, 0:ENC_DIM]
        k = qkv[:, ENC_DIM:2 * ENC_DIM]
        v = qkv[:, 2 * ENC_DIM:3 * ENC_DIM]
        # vis_mask is all-ones on the image-only path -> no attention bias needed.
        attn = _attn_merge_proj(q, k, v, proj_w_ref[l], None,
                                ENC_HEADS, ENC_HEAD_DIM, scale) + proj_b_ref[l]
        x = x + attn
        h = _layernorm(x, ln2_g_ref[l], ln2_b_ref[l], LN_EPS)
        mid = _gelu(_mm(h, fc1_w_ref[l]) + fc1_b_ref[l])
        x = x + _mm(mid, fc2_w_ref[l]) + fc2_b_ref[l]
    ctx_ref[0] = _layernorm(x, norm_g_ref[...], norm_b_ref[...], LN_EPS).astype(ctx_ref.dtype)


# ----------------------------- fused decoder kernel -----------------------------
def _decoder_kernel(
    x0_ref, ctx_ref, keymask_ref, cos_ref, sin_ref, rot_ref,
    rms1_g_ref, qkv_w_ref, qkv_b_ref, sproj_w_ref, sproj_b_ref,
    rms2_g_ref, q_w_ref, q_b_ref, kv_w_ref, kv_b_ref, cproj_w_ref, cproj_b_ref,
    rms3_g_ref, fc1_w_ref, fc1_b_ref, fc2_w_ref, fc2_b_ref,
    norm_g_ref, head_w_ref, head_b_ref,
    logits_ref, hidden_ref,
):
    T = x0_ref.shape[1]
    scale = 1.0 / math.sqrt(DEC_HEAD_DIM)
    x = x0_ref[0]                                 # (T, D)
    ctx = ctx_ref[0]                              # (N_VIS, D_enc)
    cos = cos_ref[...]
    sin = sin_ref[...]
    rot = rot_ref[...]

    # Causal + key-padding bias built in-kernel (shared across layers / heads).
    row = lax.broadcasted_iota(jnp.int32, (T, T), 0)
    col = lax.broadcasted_iota(jnp.int32, (T, T), 1)
    key_ok = jnp.broadcast_to(keymask_ref[0] > 0.5, (T, T))
    self_bias = jnp.where((col <= row) & key_ok, 0.0, NEG_INF).astype(jnp.float32)

    for l in range(DEC_DEPTH):
        # --- causal self-attention with in-kernel RoPE (RMSNorm pre-norm) ---
        h = _rmsnorm(x, rms1_g_ref[l], RMS_EPS)
        qkv = _mm(h, qkv_w_ref[l]) + qkv_b_ref[l]
        q = qkv[:, 0:DEC_DIM]
        k = qkv[:, DEC_DIM:2 * DEC_DIM]
        v = qkv[:, 2 * DEC_DIM:3 * DEC_DIM]
        q = q * cos + _mm(q, rot) * sin           # rotate_half via signed permutation matmul
        k = k * cos + _mm(k, rot) * sin
        sa = _attn_merge_proj(q, k, v, sproj_w_ref[l], self_bias,
                              DEC_HEADS, DEC_HEAD_DIM, scale) + sproj_b_ref[l]
        x = x + sa

        # --- cross-attention to encoder context (vis context_mask is all-ones -> no bias) ---
        h = _rmsnorm(x, rms2_g_ref[l], RMS_EPS)
        qc = _mm(h, q_w_ref[l]) + q_b_ref[l]
        kv = _mm(ctx, kv_w_ref[l]) + kv_b_ref[l]
        kc = kv[:, 0:DEC_DIM]
        vc = kv[:, DEC_DIM:2 * DEC_DIM]
        ca = _attn_merge_proj(qc, kc, vc, cproj_w_ref[l], None,
                              DEC_HEADS, DEC_HEAD_DIM, scale) + cproj_b_ref[l]
        x = x + ca

        # --- MLP ---
        # TODO(synk): decoder MoE (num_experts=2) routing and layer-scale source not
        # provided; dense MLP used, MoE aux losses returned as zeros by the wrapper.
        h = _rmsnorm(x, rms3_g_ref[l], RMS_EPS)
        mid = _gelu(_mm(h, fc1_w_ref[l]) + fc1_b_ref[l])
        x = x + _mm(mid, fc2_w_ref[l]) + fc2_b_ref[l]

    hid = _rmsnorm(x, norm_g_ref[...], RMS_EPS)
    hidden_ref[0] = hid.astype(hidden_ref.dtype)
    logits_ref[0] = (_mm(hid, head_w_ref[...]) + head_b_ref[...]).astype(logits_ref.dtype)


# ----------------------------- wrappers -----------------------------
def _rep(shape):
    """Whole-array BlockSpec replicated across the batch grid (DMA'd once)."""
    if len(shape) == 2:
        return pl.BlockSpec(shape, lambda b: (0, 0))
    return pl.BlockSpec(shape, lambda b: (0, 0, 0))


def encoder_forward(params, image):
    B, C, Hh, Ww = image.shape
    gh, gw = Hh // PATCH, Ww // PATCH
    # NCHW -> (B, gh*gw, C*ph*pw) with (C, ph, pw) flatten order, matching PyTorch
    # Conv2d weight.reshape(out, in*kh*kw).T.
    patches = image.reshape(B, C, gh, PATCH, gw, PATCH)
    patches = patches.transpose(0, 2, 4, 1, 3, 5).reshape(B, gh * gw, C * PATCH * PATCH)
    patches_ext = jnp.pad(patches, ((0, 0), (1, 0), (0, 0)))           # zero row for cls slot
    embed_bias = jnp.concatenate(
        [params["cls_token"],
         jnp.broadcast_to(params["patch_b"].reshape(1, ENC_DIM), (N_PATCHES, ENC_DIM))],
        axis=0)                                                         # (N_VIS, D)

    e = params["enc"]
    ctx = pl.pallas_call(
        _encoder_kernel,
        out_shape=jax.ShapeDtypeStruct((B, N_VIS, ENC_DIM), DTYPE),
        grid=(B,),
        in_specs=[
            pl.BlockSpec((1, N_VIS, PATCH_DIM), lambda b: (b, 0, 0)),
            _rep((N_VIS, ENC_DIM)),
            _rep((PATCH_DIM, ENC_DIM)),
            _rep(e["ln1_g"].shape), _rep(e["ln1_b"].shape),
            _rep(e["qkv_w"].shape), _rep(e["qkv_b"].shape),
            _rep(e["proj_w"].shape), _rep(e["proj_b"].shape),
            _rep(e["ln2_g"].shape), _rep(e["ln2_b"].shape),
            _rep(e["fc1_w"].shape), _rep(e["fc1_b"].shape),
            _rep(e["fc2_w"].shape), _rep(e["fc2_b"].shape),
            _rep(params["enc_norm_g"].shape), _rep(params["enc_norm_b"].shape),
        ],
        out_specs=pl.BlockSpec((1, N_VIS, ENC_DIM), lambda b: (b, 0, 0)),
        compiler_params=pltpu.CompilerParams(dimension_semantics=("parallel",)),
    )(patches_ext, embed_bias, params["patch_w"],
      e["ln1_g"], e["ln1_b"], e["qkv_w"], e["qkv_b"], e["proj_w"], e["proj_b"],
      e["ln2_g"], e["ln2_b"], e["fc1_w"], e["fc1_b"], e["fc2_w"], e["fc2_b"],
      params["enc_norm_g"], params["enc_norm_b"])
    return ctx


def _rope_tables(seq_len, num_heads, head_dim, base=ROPE_BASE):
    """cos/sin tiled to full model width + signed rotate_half permutation matrix R
    such that rotate_half(x)*sin == (x @ R) * sin_full (per head)."""
    half = head_dim // 2
    inv_freq = 1.0 / (base ** (np.arange(0, head_dim, 2, dtype=np.float32) / head_dim))
    t = np.arange(seq_len, dtype=np.float32)
    freqs = np.outer(t, inv_freq)                                # (T, half)
    cos = np.cos(np.concatenate([freqs, freqs], axis=-1))        # (T, head_dim)
    sin = np.sin(freqs)                                          # (T, half)
    sin_signed = np.concatenate([-sin, sin], axis=-1)            # (T, head_dim)
    cos_full = np.tile(cos, (1, num_heads)).astype(np.float32)   # (T, D)
    sin_full = np.tile(sin_signed, (1, num_heads)).astype(np.float32)
    D = num_heads * head_dim
    R = np.zeros((D, D), np.float32)
    for h in range(num_heads):
        b0 = h * head_dim
        for j in range(half):
            R[b0 + j + half, b0 + j] = 1.0        # first half of output  <- x2
            R[b0 + j, b0 + j + half] = 1.0        # second half of output <- x1
    return jnp.asarray(cos_full), jnp.asarray(sin_full), jnp.asarray(R)


def decoder_forward(params, input_ids, attention_mask, context):
    B, T = input_ids.shape
    x0 = params["tok_emb"][input_ids]                              # (B, T, D) XLA gather
    keymask = attention_mask.astype(DTYPE).reshape(B, 1, T)        # 1 = attend, 0 = pad
    cos_full, sin_full, rot = _rope_tables(T, DEC_HEADS, DEC_HEAD_DIM)
    d = params["dec"]
    logits, hidden = pl.pallas_call(
        _decoder_kernel,
        out_shape=(jax.ShapeDtypeStruct((B, T, VOCAB), DTYPE),
                   jax.ShapeDtypeStruct((B, T, DEC_DIM), DTYPE)),
        grid=(B,),
        in_specs=[
            pl.BlockSpec((1, T, DEC_DIM), lambda b: (b, 0, 0)),        # token embeddings
            pl.BlockSpec((1, N_VIS, ENC_DIM), lambda b: (b, 0, 0)),    # encoder context
            pl.BlockSpec((1, 1, T), lambda b: (b, 0, 0)),              # key padding mask
            _rep((T, DEC_DIM)), _rep((T, DEC_DIM)), _rep((DEC_DIM, DEC_DIM)),  # cos, sin, R
            _rep(d["rms1_g"].shape),
            _rep(d["qkv_w"].shape), _rep(d["qkv_b"].shape),
            _rep(d["sproj_w"].shape), _rep(d["sproj_b"].shape),
            _rep(d["rms2_g"].shape),
            _rep(d["q_w"].shape), _rep(d["q_b"].shape),
            _rep(d["kv_w"].shape), _rep(d["kv_b"].shape),
            _rep(d["cproj_w"].shape), _rep(d["cproj_b"].shape),
            _rep(d["rms3_g"].shape),
            _rep(d["fc1_w"].shape), _rep(d["fc1_b"].shape),
            _rep(d["fc2_w"].shape), _rep(d["fc2_b"].shape),
            _rep(params["dec_norm_g"].shape),
            _rep(params["head_w"].shape), _rep(params["head_b"].shape),
        ],
        out_specs=(pl.BlockSpec((1, T, VOCAB), lambda b: (b, 0, 0)),
                   pl.BlockSpec((1, T, DEC_DIM), lambda b: (b, 0, 0))),
        compiler_params=pltpu.CompilerParams(dimension_semantics=("parallel",)),
    )(x0, context, keymask, cos_full, sin_full, rot,
      d["rms1_g"], d["qkv_w"], d["qkv_b"], d["sproj_w"], d["sproj_b"],
      d["rms2_g"], d["q_w"], d["q_b"], d["kv_w"], d["kv_b"], d["cproj_w"], d["cproj_b"],
      d["rms3_g"], d["fc1_w"], d["fc1_b"], d["fc2_w"], d["fc2_b"],
      params["dec_norm_g"], params["head_w"], params["head_b"])
    return logits, hidden


# ----------------------------- parameters -----------------------------
def _normal(key, shape, std=0.02):
    return std * jax.random.normal(key, shape, dtype=DTYPE)


def init_params(key):
    keys = iter(jax.random.split(key, 64))
    nk = lambda: next(keys)
    D, Hm = ENC_DIM, ENC_MLP
    p = {}
    # --- encoder (MultiWayTransformer, vision path) ---
    p["patch_w"] = _normal(nk(), (PATCH_DIM, D))
    p["patch_b"] = jnp.zeros((D,), DTYPE)
    p["cls_token"] = _normal(nk(), (1, D))
    p["enc"] = {
        "ln1_g": jnp.ones((ENC_DEPTH, 1, D), DTYPE), "ln1_b": jnp.zeros((ENC_DEPTH, 1, D), DTYPE),
        "qkv_w": _normal(nk(), (ENC_DEPTH, D, 3 * D)), "qkv_b": jnp.zeros((ENC_DEPTH, 1, 3 * D), DTYPE),
        "proj_w": _normal(nk(), (ENC_DEPTH, D, D)), "proj_b": jnp.zeros((ENC_DEPTH, 1, D), DTYPE),
        "ln2_g": jnp.ones((ENC_DEPTH, 1, D), DTYPE), "ln2_b": jnp.zeros((ENC_DEPTH, 1, D), DTYPE),
        "fc1_w": _normal(nk(), (ENC_DEPTH, D, Hm)), "fc1_b": jnp.zeros((ENC_DEPTH, 1, Hm), DTYPE),
        "fc2_w": _normal(nk(), (ENC_DEPTH, Hm, D)), "fc2_b": jnp.zeros((ENC_DEPTH, 1, D), DTYPE),
    }
    p["enc_norm_g"] = jnp.ones((1, D), DTYPE)
    p["enc_norm_b"] = jnp.zeros((1, D), DTYPE)
    p["token_type_emb"] = _normal(nk(), (2, D))   # parity with the module; unused image-only

    # --- decoder (TransformerDecoder, RMSNorm, self + cross attention) ---
    Dd, Hd = DEC_DIM, DEC_MLP
    p["tok_emb"] = _normal(nk(), (VOCAB, Dd))
    p["dec"] = {
        "rms1_g": jnp.ones((DEC_DEPTH, 1, Dd), DTYPE),
        "qkv_w": _normal(nk(), (DEC_DEPTH, Dd, 3 * Dd)), "qkv_b": jnp.zeros((DEC_DEPTH, 1, 3 * Dd), DTYPE),
        "sproj_w": _normal(nk(), (DEC_DEPTH, Dd, Dd)), "sproj_b": jnp.zeros((DEC_DEPTH, 1, Dd), DTYPE),
        "rms2_g": jnp.ones((DEC_DEPTH, 1, Dd), DTYPE),
        "q_w": _normal(nk(), (DEC_DEPTH, Dd, Dd)), "q_b": jnp.zeros((DEC_DEPTH, 1, Dd), DTYPE),
        "kv_w": _normal(nk(), (DEC_DEPTH, ENC_DIM, 2 * Dd)), "kv_b": jnp.zeros((DEC_DEPTH, 1, 2 * Dd), DTYPE),
        "cproj_w": _normal(nk(), (DEC_DEPTH, Dd, Dd)), "cproj_b": jnp.zeros((DEC_DEPTH, 1, Dd), DTYPE),
        "rms3_g": jnp.ones((DEC_DEPTH, 1, Dd), DTYPE),
        "fc1_w": _normal(nk(), (DEC_DEPTH, Dd, Hd)), "fc1_b": jnp.zeros((DEC_DEPTH, 1, Hd), DTYPE),
        "fc2_w": _normal(nk(), (DEC_DEPTH, Hd, Dd)), "fc2_b": jnp.zeros((DEC_DEPTH, 1, Dd), DTYPE),
    }
    p["dec_norm_g"] = jnp.ones((1, Dd), DTYPE)
    p["head_w"] = _normal(nk(), (Dd, VOCAB))
    p["head_b"] = jnp.zeros((1, VOCAB), DTYPE)
    return p


# ----------------------------- full model forward -----------------------------
def vlmo_encoder_decoder_forward(params, image, decoder_input_ids, decoder_attention_mask):
    """Mirrors VLMoEncoderDecoder.forward(image=..., decoder_input_ids=..., use_cache=False):
    returns (logits, hidden_states, moe_losses)."""
    context = encoder_forward(params, image)
    logits, hidden = decoder_forward(params, decoder_input_ids, decoder_attention_mask, context)
    moe_losses = (jnp.zeros((), DTYPE), jnp.zeros((), DTYPE))
    return logits, hidden, moe_losses


# ----------------------------- main -----------------------------
if __name__ == "__main__":
    key = jax.random.PRNGKey(0)
    k_param, k_img, k_ids = jax.random.split(key, 3)

    params = init_params(k_param)
    image = jax.random.normal(k_img, (BATCH, IMG_CH, IMG_SIZE, IMG_SIZE), dtype=DTYPE)
    decoder_input_ids = jax.random.randint(k_ids, (BATCH, DEC_SEQ), 0, VOCAB, dtype=jnp.int32)
    decoder_attention_mask = jnp.ones((BATCH, DEC_SEQ), dtype=jnp.int32)

    fwd = jax.jit(vlmo_encoder_decoder_forward)
    logits, hidden, moe_losses = fwd(params, image, decoder_input_ids, decoder_attention_mask)
    jax.block_until_ready(logits)
    jax.block_until_ready(hidden)

    assert logits.shape == (BATCH, DEC_SEQ, VOCAB)
    assert hidden.shape == (BATCH, DEC_SEQ, DEC_DIM)
    print("KERNEL_OK")
</pallas_src>

<mosaic_0001>
module attributes {stable_mosaic.version = 11 : i64} {
  func.func @_encoder_kernel(%arg0: i32, %arg1: memref<1x17x192xf32, #tpu.memory_space<vmem>>, %arg2: memref<17x64xf32, #tpu.memory_space<vmem>>, %arg3: memref<192x64xf32, #tpu.memory_space<vmem>>, %arg4: memref<2x1x64xf32, #tpu.memory_space<vmem>>, %arg5: memref<2x1x64xf32, #tpu.memory_space<vmem>>, %arg6: memref<2x64x192xf32, #tpu.memory_space<vmem>>, %arg7: memref<2x1x192xf32, #tpu.memory_space<vmem>>, %arg8: memref<2x64x64xf32, #tpu.memory_space<vmem>>, %arg9: memref<2x1x64xf32, #tpu.memory_space<vmem>>, %arg10: memref<2x1x64xf32, #tpu.memory_space<vmem>>, %arg11: memref<2x1x64xf32, #tpu.memory_space<vmem>>, %arg12: memref<2x64x256xf32, #tpu.memory_space<vmem>>, %arg13: memref<2x1x256xf32, #tpu.memory_space<vmem>>, %arg14: memref<2x256x64xf32, #tpu.memory_space<vmem>>, %arg15: memref<2x1x64xf32, #tpu.memory_space<vmem>>, %arg16: memref<1x64xf32, #tpu.memory_space<vmem>>, %arg17: memref<1x64xf32, #tpu.memory_space<vmem>>, %arg18: memref<1x17x64xf32, #tpu.memory_space<vmem>>) attributes {dimension_semantics = [#tpu.dimension_semantics<parallel>], iteration_bounds = array<i64: 2>, scalar_prefetch = 0 : i64, scratch_operands = 0 : i64, tpu.core_type = #tpu.core_type<tc>, window_params = [{transform_indices = @transform_0, window_bounds = array<i64: 1, 17, 192>}, {pipeline_mode = #tpu.pipeline_mode<synchronous>, transform_indices = @transform_1, window_bounds = array<i64: 17, 64>}, {pipeline_mode = #tpu.pipeline_mode<synchronous>, transform_indices = @transform_2, window_bounds = array<i64: 192, 64>}, {pipeline_mode = #tpu.pipeline_mode<synchronous>, transform_indices = @transform_3, window_bounds = array<i64: 2, 1, 64>}, {pipeline_mode = #tpu.pipeline_mode<synchronous>, transform_indices = @transform_4, window_bounds = array<i64: 2, 1, 64>}, {pipeline_mode = #tpu.pipeline_mode<synchronous>, transform_indices = @transform_5, window_bounds = array<i64: 2, 64, 192>}, {pipeline_mode = #tpu.pipeline_mode<synchronous>, transform_indices = @transform_6, window_bounds = array<i64: 2, 1, 192>}, {pipeline_mode = #tpu.pipeline_mode<synchronous>, transform_indices = @transform_7, window_bounds = array<i64: 2, 64, 64>}, {pipeline_mode = #tpu.pipeline_mode<synchronous>, transform_indices = @transform_8, window_bounds = array<i64: 2, 1, 64>}, {pipeline_mode = #tpu.pipeline_mode<synchronous>, transform_indices = @transform_9, window_bounds = array<i64: 2, 1, 64>}, {pipeline_mode = #tpu.pipeline_mode<synchronous>, transform_indices = @transform_10, window_bounds = array<i64: 2, 1, 64>}, {pipeline_mode = #tpu.pipeline_mode<synchronous>, transform_indices = @transform_11, window_bounds = array<i64: 2, 64, 256>}, {pipeline_mode = #tpu.pipeline_mode<synchronous>, transform_indices = @transform_12, window_bounds = array<i64: 2, 1, 256>}, {pipeline_mode = #tpu.pipeline_mode<synchronous>, transform_indices = @transform_13, window_bounds = array<i64: 2, 256, 64>}, {pipeline_mode = #tpu.pipeline_mode<synchronous>, transform_indices = @transform_14, window_bounds = array<i64: 2, 1, 64>}, {pipeline_mode = #tpu.pipeline_mode<synchronous>, transform_indices = @transform_15, window_bounds = array<i64: 1, 64>}, {pipeline_mode = #tpu.pipeline_mode<synchronous>, transform_indices = @transform_16, window_bounds = array<i64: 1, 64>}, {transform_indices = @transform_17, window_bounds = array<i64: 1, 17, 64>}]} {
    %c0 = arith.constant 0 : index
    %c0_0 = arith.constant 0 : index
    %c0_1 = arith.constant 0 : index
    %0 = vector.load %arg1[%c0, %c0_0, %c0_1] : memref<1x17x192xf32, #tpu.memory_space<vmem>>, vector<1x17x192xf32>
    %1 = vector.shape_cast %0 : vector<1x17x192xf32> to vector<17x192xf32>
    %c0_2 = arith.constant 0 : index
    %c0_3 = arith.constant 0 : index
    %2 = vector.load %arg3[%c0_2, %c0_3] : memref<192x64xf32, #tpu.memory_space<vmem>>, vector<192x64xf32>
    %cst = arith.constant dense<0.000000e+00> : vector<17x64xf32>
    %3 = tpu.matmul %1, %2, %cst {dimension_numbers = #tpu.dot_dimension_numbers<[1], [0], [0], [1], [0, 0, 1, 1], [], []>} : vector<17x192xf32>, vector<192x64xf32>, vector<17x64xf32> -> vector<17x64xf32>
    %c0_4 = arith.constant 0 : index
    %c0_5 = arith.constant 0 : index
    %4 = vector.load %arg2[%c0_4, %c0_5] : memref<17x64xf32, #tpu.memory_space<vmem>>, vector<17x64xf32>
    %5 = arith.addf %3, %4 : vector<17x64xf32>
    %c0_6 = arith.constant 0 : index
    %c0_7 = arith.constant 0 : index
    %c0_8 = arith.constant 0 : index
    %6 = vector.load %arg4[%c0_6, %c0_7, %c0_8] : memref<2x1x64xf32, #tpu.memory_space<vmem>>, vector<1x1x64xf32>
    %7 = vector.shape_cast %6 : vector<1x1x64xf32> to vector<1x64xf32>
    %c0_9 = arith.constant 0 : index
    %c0_10 = arith.constant 0 : index
    %c0_11 = arith.constant 0 : index
    %8 = vector.load %arg5[%c0_9, %c0_10, %c0_11] : memref<2x1x64xf32, #tpu.memory_space<vmem>>, vector<1x1x64xf32>
    %9 = vector.shape_cast %8 : vector<1x1x64xf32> to vector<1x64xf32>
    %cst_12 = arith.constant dense<0.000000e+00> : vector<17xf32>
    %10 = vector.multi_reduction <add>, %5, %cst_12 [1] : vector<17x64xf32> to vector<17xf32>
    %11 = vector.shape_cast %10 : vector<17xf32> to vector<17x1xf32>
    %cst_13 = arith.constant 6.400000e+01 : f32
    %12 = vector.broadcast %cst_13 : f32 to vector<17x1xf32>
    %13 = arith.divf %11, %12 : vector<17x1xf32>
    %14 = vector.broadcast %13 : vector<17x1xf32> to vector<17x64xf32>
    %15 = arith.subf %5, %14 : vector<17x64xf32>
    %16 = arith.mulf %15, %15 : vector<17x64xf32>
    %cst_14 = arith.constant dense<0.000000e+00> : vector<17xf32>
    %17 = vector.multi_reduction <add>, %16, %cst_14 [1] : vector<17x64xf32> to vector<17xf32>
    %18 = vector.shape_cast %17 : vector<17xf32> to vector<17x1xf32>
    %cst_15 = arith.constant 6.400000e+01 : f32
    %19 = vector.broadcast %cst_15 : f32 to vector<17x1xf32>
    %20 = arith.divf %18, %19 : vector<17x1xf32>
    %21 = vector.broadcast %13 : vector<17x1xf32> to vector<17x64xf32>
    %22 = arith.subf %5, %21 : vector<17x64xf32>
    %cst_16 = arith.constant 9.99999997E-7 : f32
    %23 = vector.broadcast %cst_16 : f32 to vector<17x1xf32>
    %24 = arith.addf %20, %23 : vector<17x1xf32>
    %25 = math.rsqrt %24 : vector<17x1xf32>
    %26 = vector.broadcast %25 : vector<17x1xf32> to vector<17x64xf32>
    %27 = arith.mulf %22, %26 : vector<17x64xf32>
    %28 = vector.broadcast %7 : vector<1x64xf32> to vector<17x64xf32>
    %29 = arith.mulf %27, %28 : vector<17x64xf32>
    %30 = vector.broadcast %9 : vector<1x64xf32> to vector<17x64xf32>
    %31 = arith.addf %29, %30 : vector<17x64xf32>
    %c0_17 = arith.constant 0 : index
    %c0_18 = arith.constant 0 : index
    %c0_19 = arith.constant 0 : index
    %32 = vector.load %arg6[%c0_17, %c0_18, %c0_19] : memref<2x64x192xf32, #tpu.memory_space<vmem>>, vector<1x64x192xf32>
    %33 = vector.shape_cast %32 : vector<1x64x192xf32> to vector<64x192xf32>
    %cst_20 = arith.constant dense<0.000000e+00> : vector<17x192xf32>
    %34 = tpu.matmul %31, %33, %cst_20 {dimension_numbers = #tpu.dot_dimension_numbers<[1], [0], [0], [1], [0, 0, 1, 1], [], []>} : vector<17x64xf32>, vector<64x192xf32>, vector<17x192xf32> -> vector<17x192xf32>
    %c0_21 = arith.constant 0 : index
    %c0_22 = arith.constant 0 : index
    %c0_23 = arith.constant 0 : index
    %35 = vector.load %arg7[%c0_21, %c0_22, %c0_23] : memref<2x1x192xf32, #tpu.memory_space<vmem>>, vector<1x1x192xf32>
    %36 = vector.shape_cast %35 : vector<1x1x192xf32> to vector<1x192xf32>
    %37 = vector.broadcast %36 : vector<1x192xf32> to vector<17x192xf32>
    %38 = arith.addf %34, %37 : vector<17x192xf32>
    %39 = vector.extract_strided_slice %38 {offsets = [0, 0], sizes = [17, 64], strides = [1, 1]} : vector<17x192xf32> to vector<17x64xf32>
    %40 = vector.extract_strided_slice %38 {offsets = [0, 64], sizes = [17, 64], strides = [1, 1]} : vector<17x192xf32> to vector<17x64xf32>
    %41 = vector.extract_strided_slice %38 {offsets = [0, 128], sizes = [17, 64], strides = [1, 1]} : vector<17x192xf32> to vector<17x64xf32>
    %c0_24 = arith.constant 0 : index
    %c0_25 = arith.constant 0 : index
    %c0_26 = arith.constant 0 : index
    %42 = vector.load %arg8[%c0_24, %c0_25, %c0_26] : memref<2x64x64xf32, #tpu.memory_space<vmem>>, vector<1x64x64xf32>
    %43 = vector.shape_cast %42 : vector<1x64x64xf32> to vector<64x64xf32>
    %cst_27 = arith.constant 0.000000e+00 : f32
    %44 = vector.broadcast %cst_27 : f32 to vector<17x64xf32>
    %45 = vector.extract_strided_slice %39 {offsets = [0, 0], sizes = [17, 16], strides = [1, 1]} : vector<17x64xf32> to vector<17x16xf32>
    %46 = vector.extract_strided_slice %40 {offsets = [0, 0], sizes = [17, 16], strides = [1, 1]} : vector<17x64xf32> to vector<17x16xf32>
    %47 = vector.extract_strided_slice %41 {offsets = [0, 0], sizes = [17, 16], strides = [1, 1]} : vector<17x64xf32> to vector<17x16xf32>
    %cst_28 = arith.constant dense<0.000000e+00> : vector<17x17xf32>
    %48 = tpu.matmul %45, %46, %cst_28 {dimension_numbers = #tpu.dot_dimension_numbers<[1], [1], [0], [0], [0, 0, 1, 0], [], []>} : vector<17x16xf32>, vector<17x16xf32>, vector<17x17xf32> -> vector<17x17xf32>
    %cst_29 = arith.constant 2.500000e-01 : f32
    %49 = vector.broadcast %cst_29 : f32 to vector<17x17xf32>
    %50 = arith.mulf %48, %49 : vector<17x17xf32>
    %cst_30 = arith.constant dense<0xFF800000> : vector<17xf32>
    %51 = vector.multi_reduction <maximumf>, %50, %cst_30 [1] : vector<17x17xf32> to vector<17xf32>
    %52 = vector.shape_cast %51 : vector<17xf32> to vector<17x1xf32>
    %53 = vector.broadcast %52 : vector<17x1xf32> to vector<17x17xf32>
    %54 = arith.subf %50, %53 : vector<17x17xf32>
    %55 = math.exp %54 : vector<17x17xf32>
    %cst_31 = arith.constant dense<0.000000e+00> : vector<17xf32>
    %56 = vector.multi_reduction <add>, %55, %cst_31 [1] : vector<17x17xf32> to vector<17xf32>
    %57 = vector.shape_cast %56 : vector<17xf32> to vector<17x1xf32>
    %58 = tpu.reciprocal %57 {approx = true} : vector<17x1xf32> -> vector<17x1xf32>
    %59 = vector.broadcast %58 : vector<17x1xf32> to vector<17x17xf32>
    %60 = arith.mulf %55, %59 : vector<17x17xf32>
    %cst_32 = arith.constant dense<0.000000e+00> : vector<17x16xf32>
    %61 = tpu.matmul %60, %47, %cst_32 {dimension_numbers = #tpu.dot_dimension_numbers<[1], [0], [0], [1], [0, 0, 1, 1], [], []>} : vector<17x17xf32>, vector<17x16xf32>, vector<17x16xf32> -> vector<17x16xf32>
    %62 = vector.extract_strided_slice %43 {offsets = [0, 0], sizes = [16, 64], strides = [1, 1]} : vector<64x64xf32> to vector<16x64xf32>
    %cst_33 = arith.constant dense<0.000000e+00> : vector<17x64xf32>
    %63 = tpu.matmul %61, %62, %cst_33 {dimension_numbers = #tpu.dot_dimension_numbers<[1], [0], [0], [1], [0, 0, 1, 1], [], []>} : vector<17x16xf32>, vector<16x64xf32>, vector<17x64xf32> -> vector<17x64xf32>
    %64 = arith.addf %44, %63 : vector<17x64xf32>
    %65 = vector.extract_strided_slice %39 {offsets = [0, 16], sizes = [17, 16], strides = [1, 1]} : vector<17x64xf32> to vector<17x16xf32>
    %66 = vector.extract_strided_slice %40 {offsets = [0, 16], sizes = [17, 16], strides = [1, 1]} : vector<17x64xf32> to vector<17x16xf32>
    %67 = vector.extract_strided_slice %41 {offsets = [0, 16], sizes = [17, 16], strides = [1, 1]} : vector<17x64xf32> to vector<17x16xf32>
    %cst_34 = arith.constant dense<0.000000e+00> : vector<17x17xf32>
    %68 = tpu.matmul %65, %66, %cst_34 {dimension_numbers = #tpu.dot_dimension_numbers<[1], [1], [0], [0], [0, 0, 1, 0], [], []>} : vector<17x16xf32>, vector<17x16xf32>, vector<17x17xf32> -> vector<17x17xf32>
    %cst_35 = arith.constant 2.500000e-01 : f32
    %69 = vector.broadcast %cst_35 : f32 to vector<17x17xf32>
    %70 = arith.mulf %68, %69 : vector<17x17xf32>
    %cst_36 = arith.constant dense<0xFF800000> : vector<17xf32>
    %71 = vector.multi_reduction <maximumf>, %70, %cst_36 [1] : vector<17x17xf32> to vector<17xf32>
    %72 = vector.shape_cast %71 : vector<17xf32> to vector<17x1xf32>
    %73 = vector.broadcast %72 : vector<17x1xf32> to vector<17x17xf32>
    %74 = arith.subf %70, %73 : vector<17x17xf32>
    %75 = math.exp %74 : vector<17x17xf32>
    %cst_37 = arith.constant dense<0.000000e+00> : vector<17xf32>
    %76 = vector.multi_reduction <add>, %75, %cst_37 [1] : vector<17x17xf32> to vector<17xf32>
    %77 = vector.shape_cast %76 : vector<17xf32> to vector<17x1xf32>
    %78 = tpu.reciprocal %77 {approx = true} : vector<17x1xf32> -> vector<17x1xf32>
    %79 = vector.broadcast %78 : vector<17x1xf32> to vector<17x17xf32>
    %80 = arith.mulf %75, %79 : vector<17x17xf32>
    %cst_38 = arith.constant dense<0.000000e+00> : vector<17x16xf32>
    %81 = tpu.matmul %80, %67, %cst_38 {dimension_numbers = #tpu.dot_dimension_numbers<[1], [0], [0], [1], [0, 0, 1, 1], [], []>} : vector<17x17xf32>, vector<17x16xf32>, vector<17x16xf32> -> vector<17x16xf32>
    %82 = vector.extract_strided_slice %43 {offsets = [16, 0], sizes = [16, 64], strides = [1, 1]} : vector<64x64xf32> to vector<16x64xf32>
    %cst_39 = arith.constant dense<0.000000e+00> : vector<17x64xf32>
    %83 = tpu.matmul %81, %82, %cst_39 {dimension_numbers = #tpu.dot_dimension_numbers<[1], [0], [0], [1], [0, 0, 1, 1], [], []>} : vector<17x16xf32>, vector<16x64xf32>, vector<17x64xf32> -> vector<17x64xf32>
    %84 = arith.addf %64, %83 : vector<17x64xf32>
    %85 = vector.extract_strided_slice %39 {offsets = [0, 32], sizes = [17, 16], strides = [1, 1]} : vector<17x64xf32> to vector<17x16xf32>
    %86 = vector.extract_strided_slice %40 {offsets = [0, 32], sizes = [17, 16], strides = [1, 1]} : vector<17x64xf32> to vector<17x16xf32>
    %87 = vector.extract_strided_slice %41 {offsets = [0, 32], sizes = [17, 16], strides = [1, 1]} : vector<17x64xf32> to vector<17x16xf32>
    %cst_40 = arith.constant dense<0.000000e+00> : vector<17x17xf32>
    %88 = tpu.matmul %85, %86, %cst_40 {dimension_numbers = #tpu.dot_dimension_numbers<[1], [1], [0], [0], [0, 0, 1, 0], [], []>} : vector<17x16xf32>, vector<17x16xf32>, vector<17x17xf32> -> vector<17x17xf32>
    %cst_41 = arith.constant 2.500000e-01 : f32
    %89 = vector.broadcast %cst_41 : f32 to vector<17x17xf32>
    %90 = arith.mulf %88, %89 : vector<17x17xf32>
    %cst_42 = arith.constant dense<0xFF800000> : vector<17xf32>
    %91 = vector.multi_reduction <maximumf>, %90, %cst_42 [1] : vector<17x17xf32> to vector<17xf32>
    %92 = vector.shape_cast %91 : vector<17xf32> to vector<17x1xf32>
    %93 = vector.broadcast %92 : vector<17x1xf32> to vector<17x17xf32>
    %94 = arith.subf %90, %93 : vector<17x17xf32>
    %95 = math.exp %94 : vector<17x17xf32>
    %cst_43 = arith.constant dense<0.000000e+00> : vector<17xf32>
    %96 = vector.multi_reduction <add>, %95, %cst_43 [1] : vector<17x17xf32> to vector<17xf32>
    %97 = vector.shape_cast %96 : vector<17xf32> to vector<17x1xf32>
    %98 = tpu.reciprocal %97 {approx = true} : vector<17x1xf32> -> vector<17x1xf32>
    %99 = vector.broadcast %98 : vector<17x1xf32> to vector<17x17xf32>
    %100 = arith.mulf %95, %99 : vector<17x17xf32>
    %cst_44 = arith.constant dense<0.000000e+00> : vector<17x16xf32>
    %101 = tpu.matmul %100, %87, %cst_44 {dimension_numbers = #tpu.dot_dimension_numbers<[1], [0], [0], [1], [0, 0, 1, 1], [], []>} : vector<17x17xf32>, vector<17x16xf32>, vector<17x16xf32> -> vector<17x16xf32>
    %102 = vector.extract_strided_slice %43 {offsets = [32, 0], sizes = [16, 64], strides = [1, 1]} : vector<64x64xf32> to vector<16x64xf32>
    %cst_45 = arith.constant dense<0.000000e+00> : vector<17x64xf32>
    %103 = tpu.matmul %101, %102, %cst_45 {dimension_numbers = #tpu.dot_dimension_numbers<[1], [0], [0], [1], [0, 0, 1, 1], [], []>} : vector<17x16xf32>, vector<16x64xf32>, vector<17x64xf32> -> vector<17x64xf32>
    %104 = arith.addf %84, %103 : vector<17x64xf32>
    %105 = vector.extract_strided_slice %39 {offsets = [0, 48], sizes = [17, 16], strides = [1, 1]} : vector<17x64xf32> to vector<17x16xf32>
    %106 = vector.extract_strided_slice %40 {offsets = [0, 48], sizes = [17, 16], strides = [1, 1]} : vector<17x64xf32> to vector<17x16xf32>
    %107 = vector.extract_strided_slice %41 {offsets = [0, 48], sizes = [17, 16], strides = [1, 1]} : vector<17x64xf32> to vector<17x16xf32>
    %cst_46 = arith.constant dense<0.000000e+00> : vector<17x17xf32>
    %108 = tpu.matmul %105, %106, %cst_46 {dimension_numbers = #tpu.dot_dimension_numbers<[1], [1], [0], [0], [0, 0, 1, 0], [], []>} : vector<17x16xf32>, vector<17x16xf32>, vector<17x17xf32> -> vector<17x17xf32>
    %cst_47 = arith.constant 2.500000e-01 : f32
    %109 = vector.broadcast %cst_47 : f32 to vector<17x17xf32>
    %110 = arith.mulf %108, %109 : vector<17x17xf32>
    %cst_48 = arith.constant dense<0xFF800000> : vector<17xf32>
    %111 = vector.multi_reduction <maximumf>, %110, %cst_48 [1] : vector<17x17xf32> to vector<17xf32>
    %112 = vector.shape_cast %111 : vector<17xf32> to vector<17x1xf32>
    %113 = vector.broadcast %112 : vector<17x1xf32> to vector<17x17xf32>
    %114 = arith.subf %110, %113 : vector<17x17xf32>
    %115 = math.exp %114 : vector<17x17xf32>
    %cst_49 = arith.constant dense<0.000000e+00> : vector<17xf32>
    %116 = vector.multi_reduction <add>, %115, %cst_49 [1] : vector<17x17xf32> to vector<17xf32>
    %117 = vector.shape_cast %116 : vector<17xf32> to vector<17x1xf32>
    %118 = tpu.reciprocal %117 {approx = true} : vector<17x1xf32> -> vector<17x1xf32>
    %119 = vector.broadcast %118 : vector<17x1xf32> to vector<17x17xf32>
    %120 = arith.mulf %115, %119 : vector<17x17xf32>
    %cst_50 = arith.constant dense<0.000000e+00> : vector<17x16xf32>
    %121 = tpu.matmul %120, %107, %cst_50 {dimension_numbers = #tpu.dot_dimension_numbers<[1], [0], [0], [1], [0, 0, 1, 1], [], []>} : vector<17x17xf32>, vector<17x16xf32>, vector<17x16xf32> -> vector<17x16xf32>
    %122 = vector.extract_strided_slice %43 {offsets = [48, 0], sizes = [16, 64], strides = [1, 1]} : vector<64x64xf32> to vector<16x64xf32>
    %cst_51 = arith.constant dense<0.000000e+00> : vector<17x64xf32>
    %123 = tpu.matmul %121, %122, %cst_51 {dimension_numbers = #tpu.dot_dimension_numbers<[1], [0], [0], [1], [0, 0, 1, 1], [], []>} : vector<17x16xf32>, vector<16x64xf32>, vector<17x64xf32> -> vector<17x64xf32>
    %124 = arith.addf %104, %123 : vector<17x64xf32>
    %c0_52 = arith.constant 0 : index
    %c0_53 = arith.constant 0 : index
    %c0_54 = arith.constant 0 : index
    %125 = vector.load %arg9[%c0_52, %c0_53, %c0_54] : memref<2x1x64xf32, #tpu.memory_space<vmem>>, vector<1x1x64xf32>
    %126 = vector.shape_cast %125 : vector<1x1x64xf32> to vector<1x64xf32>
    %127 = vector.broadcast %126 : vector<1x64xf32> to vector<17x64xf32>
    %128 = arith.addf %124, %127 : vector<17x64xf32>
    %129 = arith.addf %5, %128 : vector<17x64xf32>
    %c0_55 = arith.constant 0 : index
    %c0_56 = arith.constant 0 : index
    %c0_57 = arith.constant 0 : index
    %130 = vector.load %arg10[%c0_55, %c0_56, %c0_57] : memref<2x1x64xf32, #tpu.memory_space<vmem>>, vector<1x1x64xf32>
    %131 = vector.shape_cast %130 : vector<1x1x64xf32> to vector<1x64xf32>
    %c0_58 = arith.constant 0 : index
    %c0_59 = arith.constant 0 : index
    %c0_60 = arith.constant 0 : index
    %132 = vector.load %arg11[%c0_58, %c0_59, %c0_60] : memref<2x1x64xf32, #tpu.memory_space<vmem>>, vector<1x1x64xf32>
    %133 = vector.shape_cast %132 : vector<1x1x64xf32> to vector<1x64xf32>
    %cst_61 = arith.constant dense<0.000000e+00> : vector<17xf32>
    %134 = vector.multi_reduction <add>, %129, %cst_61 [1] : vector<17x64xf32> to vector<17xf32>
    %135 = vector.shape_cast %134 : vector<17xf32> to vector<17x1xf32>
    %cst_62 = arith.constant 6.400000e+01 : f32
    %136 = vector.broadcast %cst_62 : f32 to vector<17x1xf32>
    %137 = arith.divf %135, %136 : vector<17x1xf32>
    %138 = vector.broadcast %137 : vector<17x1xf32> to vector<17x64xf32>
    %139 = arith.subf %129, %138 : vector<17x64xf32>
    %140 = arith.mulf %139, %139 : vector<17x64xf32>
    %cst_63 = arith.constant dense<0.000000e+00> : vector<17xf32>
    %141 = vector.multi_reduction <add>, %140, %cst_63 [1] : vector<17x64xf32> to vector<17xf32>
    %142 = vector.shape_cast %141 : vector<17xf32> to vector<17x1xf32>
    %cst_64 = arith.constant 6.400000e+01 : f32
    %143 = vector.broadcast %cst_64 : f32 to vector<17x1xf32>
    %144 = arith.divf %142, %143 : vector<17x1xf32>
    %145 = vector.broadcast %137 : vector<17x1xf32> to vector<17x64xf32>
    %146 = arith.subf %129, %145 : vector<17x64xf32>
    %cst_65 = arith.constant 9.99999997E-7 : f32
    %147 = vector.broadcast %cst_65 : f32 to vector<17x1xf32>
    %148 = arith.addf %144, %147 : vector<17x1xf32>
    %149 = math.rsqrt %148 : vector<17x1xf32>
    %150 = vector.broadcast %149 : vector<17x1xf32> to vector<17x64xf32>
    %151 = arith.mulf %146, %150 : vector<17x64xf32>
    %152 = vector.broadcast %131 : vector<1x64xf32> to vector<17x64xf32>
    %153 = arith.mulf %151, %152 : vector<17x64xf32>
    %154 = vector.broadcast %133 : vector<1x64xf32> to vector<17x64xf32>
    %155 = arith.addf %153, %154 : vector<17x64xf32>
    %c0_66 = arith.constant 0 : index
    %c0_67 = arith.constant 0 : index
    %c0_68 = arith.constant 0 : index
    %156 = vector.load %arg12[%c0_66, %c0_67, %c0_68] : memref<2x64x256xf32, #tpu.memory_space<vmem>>, vector<1x64x256xf32>
    %157 = vector.shape_cast %156 : vector<1x64x256xf32> to vector<64x256xf32>
    %cst_69 = arith.constant dense<0.000000e+00> : vector<17x256xf32>
    %158 = tpu.matmul %155, %157, %cst_69 {dimension_numbers = #tpu.dot_dimension_numbers<[1], [0], [0], [1], [0, 0, 1, 1], [], []>} : vector<17x64xf32>, vector<64x256xf32>, vector<17x256xf32> -> vector<17x256xf32>
    %c0_70 = arith.constant 0 : index
    %c0_71 = arith.constant 0 : index
    %c0_72 = arith.constant 0 : index
    %159 = vector.load %arg13[%c0_70, %c0_71, %c0_72] : memref<2x1x256xf32, #tpu.memory_space<vmem>>, vector<1x1x256xf32>
    %160 = vector.shape_cast %159 : vector<1x1x256xf32> to vector<1x256xf32>
    %161 = vector.broadcast %160 : vector<1x256xf32> to vector<17x256xf32>
    %162 = arith.addf %158, %161 : vector<17x256xf32>
    %163 = arith.mulf %162, %162 : vector<17x256xf32>
    %164 = arith.mulf %162, %163 : vector<17x256xf32>
    %cst_73 = arith.constant 4.471500e-02 : f32
    %165 = vector.broadcast %cst_73 : f32 to vector<17x256xf32>
    %166 = arith.mulf %165, %164 : vector<17x256xf32>
    %167 = arith.addf %162, %166 : vector<17x256xf32>
    %cst_74 = arith.constant 0.797884583 : f32
    %168 = vector.broadcast %cst_74 : f32 to vector<17x256xf32>
    %169 = arith.mulf %168, %167 : vector<17x256xf32>
    %170 = math.tanh %169 : vector<17x256xf32>
    %cst_75 = arith.constant 1.000000e+00 : f32
    %171 = vector.broadcast %cst_75 : f32 to vector<17x256xf32>
    %172 = arith.addf %171, %170 : vector<17x256xf32>
    %cst_76 = arith.constant 5.000000e-01 : f32
    %173 = vector.broadcast %cst_76 : f32 to vector<17x256xf32>
    %174 = arith.mulf %173, %172 : vector<17x256xf32>
    %175 = arith.mulf %162, %174 : vector<17x256xf32>
    %c0_77 = arith.constant 0 : index
    %c0_78 = arith.constant 0 : index
    %c0_79 = arith.constant 0 : index
    %176 = vector.load %arg14[%c0_77, %c0_78, %c0_79] : memref<2x256x64xf32, #tpu.memory_space<vmem>>, vector<1x256x64xf32>
    %177 = vector.shape_cast %176 : vector<1x256x64xf32> to vector<256x64xf32>
    %cst_80 = arith.constant dense<0.000000e+00> : vector<17x64xf32>
    %178 = tpu.matmul %175, %177, %cst_80 {dimension_numbers = #tpu.dot_dimension_numbers<[1], [0], [0], [1], [0, 0, 1, 1], [], []>} : vector<17x256xf32>, vector<256x64xf32>, vector<17x64xf32> -> vector<17x64xf32>
    %179 = arith.addf %129, %178 : vector<17x64xf32>
    %c0_81 = arith.constant 0 : index
    %c0_82 = arith.constant 0 : index
    %c0_83 = arith.constant 0 : index
    %180 = vector.load %arg15[%c0_81, %c0_82, %c0_83] : memref<2x1x64xf32, #tpu.memory_space<vmem>>, vector<1x1x64xf32>
    %181 = vector.shape_cast %180 : vector<1x1x64xf32> to vector<1x64xf32>
    %182 = vector.broadcast %181 : vector<1x64xf32> to vector<17x64xf32>
    %183 = arith.addf %179, %182 : vector<17x64xf32>
    %c1 = arith.constant 1 : index
    %c0_84 = arith.constant 0 : index
    %c0_85 = arith.constant 0 : index
    %184 = vector.load %arg4[%c1, %c0_84, %c0_85] : memref<2x1x64xf32, #tpu.memory_space<vmem>>, vector<1x1x64xf32>
    %185 = vector.shape_cast %184 : vector<1x1x64xf32> to vector<1x64xf32>
    %c1_86 = arith.constant 1 : index
    %c0_87 = arith.constant 0 : index
    %c0_88 = arith.constant 0 : index
    %186 = vector.load %arg5[%c1_86, %c0_87, %c0_88] : memref<2x1x64xf32, #tpu.memory_space<vmem>>, vector<1x1x64xf32>
    %187 = vector.shape_cast %186 : vector<1x1x64xf32> to vector<1x64xf32>
    %cst_89 = arith.constant dense<0.000000e+00> : vector<17xf32>
    %188 = vector.multi_reduction <add>, %183, %cst_89 [1] : vector<17x64xf32> to vector<17xf32>
    %189 = vector.shape_cast %188 : vector<17xf32> to vector<17x1xf32>
    %cst_90 = arith.constant 6.400000e+01 : f32
    %190 = vector.broadcast %cst_90 : f32 to vector<17x1xf32>
    %191 = arith.divf %189, %190 : vector<17x1xf32>
    %192 = vector.broadcast %191 : vector<17x1xf32> to vector<17x64xf32>
    %193 = arith.subf %183, %192 : vector<17x64xf32>
    %194 = arith.mulf %193, %193 : vector<17x64xf32>
    %cst_91 = arith.constant dense<0.000000e+00> : vector<17xf32>
    %195 = vector.multi_reduction <add>, %194, %cst_91 [1] : vector<17x64xf32> to vector<17xf32>
    %196 = vector.shape_cast %195 : vector<17xf32> to vector<17x1xf32>
    %cst_92 = arith.constant 6.400000e+01 : f32
    %197 = vector.broadcast %cst_92 : f32 to vector<17x1xf32>
    %198 = arith.divf %196, %197 : vector<17x1xf32>
    %199 = vector.broadcast %191 : vector<17x1xf32> to vector<17x64xf32>
    %200 = arith.subf %183, %199 : vector<17x64xf32>
    %cst_93 = arith.constant 9.99999997E-7 : f32
    %201 = vector.broadcast %cst_93 : f32 to vector<17x1xf32>
    %202 = arith.addf %198, %201 : vector<17x1xf32>
    %203 = math.rsqrt %202 : vector<17x1xf32>
    %204 = vector.broadcast %203 : vector<17x1xf32> to vector<17x64xf32>
    %205 = arith.mulf %200, %204 : vector<17x64xf32>
    %206 = vector.broadcast %185 : vector<1x64xf32> to vector<17x64xf32>
    %207 = arith.mulf %205, %206 : vector<17x64xf32>
    %208 = vector.broadcast %187 : vector<1x64xf32> to vector<17x64xf32>
    %209 = arith.addf %207, %208 : vector<17x64xf32>
    %c1_94 = arith.constant 1 : index
    %c0_95 = arith.constant 0 : index
    %c0_96 = arith.constant 0 : index
    %210 = vector.load %arg6[%c1_94, %c0_95, %c0_96] : memref<2x64x192xf32, #tpu.memory_space<vmem>>, vector<1x64x192xf32>
    %211 = vector.shape_cast %210 : vector<1x64x192xf32> to vector<64x192xf32>
    %cst_97 = arith.constant dense<0.000000e+00> : vector<17x192xf32>
    %212 = tpu.matmul %209, %211, %cst_97 {dimension_numbers = #tpu.dot_dimension_numbers<[1], [0], [0], [1], [0, 0, 1, 1], [], []>} : vector<17x64xf32>, vector<64x192xf32>, vector<17x192xf32> -> vector<17x192xf32>
    %c1_98 = arith.constant 1 : index
    %c0_99 = arith.constant 0 : index
    %c0_100 = arith.constant 0 : index
    %213 = vector.load %arg7[%c1_98, %c0_99, %c0_100] : memref<2x1x192xf32, #tpu.memory_space<vmem>>, vector<1x1x192xf32>
    %214 = vector.shape_cast %213 : vector<1x1x192xf32> to vector<1x192xf32>
    %215 = vector.broadcast %214 : vector<1x192xf32> to vector<17x192xf32>
    %216 = arith.addf %212, %215 : vector<17x192xf32>
    %217 = vector.extract_strided_slice %216 {offsets = [0, 0], sizes = [17, 64], strides = [1, 1]} : vector<17x192xf32> to vector<17x64xf32>
    %218 = vector.extract_strided_slice %216 {offsets = [0, 64], sizes = [17, 64], strides = [1, 1]} : vector<17x192xf32> to vector<17x64xf32>
    %219 = vector.extract_strided_slice %216 {offsets = [0, 128], sizes = [17, 64], strides = [1, 1]} : vector<17x192xf32> to vector<17x64xf32>
    %c1_101 = arith.constant 1 : index
    %c0_102 = arith.constant 0 : index
    %c0_103 = arith.constant 0 : index
    %220 = vector.load %arg8[%c1_101, %c0_102, %c0_103] : memref<2x64x64xf32, #tpu.memory_space<vmem>>, vector<1x64x64xf32>
    %221 = vector.shape_cast %220 : vector<1x64x64xf32> to vector<64x64xf32>
    %cst_104 = arith.constant 0.000000e+00 : f32
    %222 = vector.broadcast %cst_104 : f32 to vector<17x64xf32>
    %223 = vector.extract_strided_slice %217 {offsets = [0, 0], sizes = [17, 16], strides = [1, 1]} : vector<17x64xf32> to vector<17x16xf32>
    %224 = vector.extract_strided_slice %218 {offsets = [0, 0], sizes = [17, 16], strides = [1, 1]} : vector<17x64xf32> to vector<17x16xf32>
    %225 = vector.extract_strided_slice %219 {offsets = [0, 0], sizes = [17, 16], strides = [1, 1]} : vector<17x64xf32> to vector<17x16xf32>
    %cst_105 = arith.constant dense<0.000000e+00> : vector<17x17xf32>
    %226 = tpu.matmul %223, %224, %cst_105 {dimension_numbers = #tpu.dot_dimension_numbers<[1], [1], [0], [0], [0, 0, 1, 0], [], []>} : vector<17x16xf32>, vector<17x16xf32>, vector<17x17xf32> -> vector<17x17xf32>
    %cst_106 = arith.constant 2.500000e-01 : f32
    %227 = vector.broadcast %cst_106 : f32 to vector<17x17xf32>
    %228 = arith.mulf %226, %227 : vector<17x17xf32>
    %cst_107 = arith.constant dense<0xFF800000> : vector<17xf32>
    %229 = vector.multi_reduction <maximumf>, %228, %cst_107 [1] : vector<17x17xf32> to vector<17xf32>
    %230 = vector.shape_cast %229 : vector<17xf32> to vector<17x1xf32>
    %231 = vector.broadcast %230 : vector<17x1xf32> to vector<17x17xf32>
    %232 = arith.subf %228, %231 : vector<17x17xf32>
    %233 = math.exp %232 : vector<17x17xf32>
    %cst_108 = arith.constant dense<0.000000e+00> : vector<17xf32>
    %234 = vector.multi_reduction <add>, %233, %cst_108 [1] : vector<17x17xf32> to vector<17xf32>
    %235 = vector.shape_cast %234 : vector<17xf32> to vector<17x1xf32>
    %236 = tpu.reciprocal %235 {approx = true} : vector<17x1xf32> -> vector<17x1xf32>
    %237 = vector.broadcast %236 : vector<17x1xf32> to vector<17x17xf32>
    %238 = arith.mulf %233, %237 : vector<17x17xf32>
    %cst_109 = arith.constant dense<0.000000e+00> : vector<17x16xf32>
    %239 = tpu.matmul %238, %225, %cst_109 {dimension_numbers = #tpu.dot_dimension_numbers<[1], [0], [0], [1], [0, 0, 1, 1], [], []>} : vector<17x17xf32>, vector<17x16xf32>, vector<17x16xf32> -> vector<17x16xf32>
    %240 = vector.extract_strided_slice %221 {offsets = [0, 0], sizes = [16, 64], strides = [1, 1]} : vector<64x64xf32> to vector<16x64xf32>
    %cst_110 = arith.constant dense<0.000000e+00> : vector<17x64xf32>
    %241 = tpu.matmul %239, %240, %cst_110 {dimension_numbers = #tpu.dot_dimension_numbers<[1], [0], [0], [1], [0, 0, 1, 1], [], []>} : vector<17x16xf32>, vector<16x64xf32>, vector<17x64xf32> -> vector<17x64xf32>
    %242 = arith.addf %222, %241 : vector<17x64xf32>
    %243 = vector.extract_strided_slice %217 {offsets = [0, 16], sizes = [17, 16], strides = [1, 1]} : vector<17x64xf32> to vector<17x16xf32>
    %244 = vector.extract_strided_slice %218 {offsets = [0, 16], sizes = [17, 16], strides = [1, 1]} : vector<17x64xf32> to vector<17x16xf32>
    %245 = vector.extract_strided_slice %219 {offsets = [0, 16], sizes = [17, 16], strides = [1, 1]} : vector<17x64xf32> to vector<17x16xf32>
    %cst_111 = arith.constant dense<0.000000e+00> : vector<17x17xf32>
    %246 = tpu.matmul %243, %244, %cst_111 {dimension_numbers = #tpu.dot_dimension_numbers<[1], [1], [0], [0], [0, 0, 1, 0], [], []>} : vector<17x16xf32>, vector<17x16xf32>, vector<17x17xf32> -> vector<17x17xf32>
    %cst_112 = arith.constant 2.500000e-01 : f32
    %247 = vector.broadcast %cst_112 : f32 to vector<17x17xf32>
    %248 = arith.mulf %246, %247 : vector<17x17xf32>
    %cst_113 = arith.constant dense<0xFF800000> : vector<17xf32>
    %249 = vector.multi_reduction <maximumf>, %248, %cst_113 [1] : vector<17x17xf32> to vector<17xf32>
    %250 = vector.shape_cast %249 : vector<17xf32> to vector<17x1xf32>
    %251 = vector.broadcast %250 : vector<17x1xf32> to vector<17x17xf32>
    %252 = arith.subf %248, %251 : vector<17x17xf32>
    %253 = math.exp %252 : vector<17x17xf32>
    %cst_114 = arith.constant dense<0.000000e+00> : vector<17xf32>
    %254 = vector.multi_reduction <add>, %253, %cst_114 [1] : vector<17x17xf32> to vector<17xf32>
    %255 = vector.shape_cast %254 : vector<17xf32> to vector<17x1xf32>
    %256 = tpu.reciprocal %255 {approx = true} : vector<17x1xf32> -> vector<17x1xf32>
    %257 = vector.broadcast %256 : vector<17x1xf32> to vector<17x17xf32>
    %258 = arith.mulf %253, %257 : vector<17x17xf32>
    %cst_115 = arith.constant dense<0.000000e+00> : vector<17x16xf32>
    %259 = tpu.matmul %258, %245, %cst_115 {dimension_numbers = #tpu.dot_dimension_numbers<[1], [0], [0], [1], [0, 0, 1, 1], [], []>} : vector<17x17xf32>, vector<17x16xf32>, vector<17x16xf32> -> vector<17x16xf32>
    %260 = vector.extract_strided_slice %221 {offsets = [16, 0], sizes = [16, 64], strides = [1, 1]} : vector<64x64xf32> to vector<16x64xf32>
    %cst_116 = arith.constant dense<0.000000e+00> : vector<17x64xf32>
    %261 = tpu.matmul %259, %260, %cst_116 {dimension_numbers = #tpu.dot_dimension_numbers<[1], [0], [0], [1], [0, 0, 1, 1], [], []>} : vector<17x16xf32>, vector<16x64xf32>, vector<17x64xf32> -> vector<17x64xf32>
    %262 = arith.addf %242, %261 : vector<17x64xf32>
    %263 = vector.extract_strided_slice %217 {offsets = [0, 32], sizes = [17, 16], strides = [1, 1]} : vector<17x64xf32> to vector<17x16xf32>
    %264 = vector.extract_strided_slice %218 {offsets = [0, 32], sizes = [17, 16], strides = [1, 1]} : vector<17x64xf32> to vector<17x16xf32>
    %265 = vector.extract_strided_slice %219 {offsets = [0, 32], sizes = [17, 16], strides = [1, 1]} : vector<17x64xf32> to vector<17x16xf32>
    %cst_117 = arith.constant dense<0.000000e+00> : vector<17x17xf32>
    %266 = tpu.matmul %263, %264, %cst_117 {dimension_numbers = #tpu.dot_dimension_numbers<[1], [1], [0], [0], [0, 0, 1, 0], [], []>} : vector<17x16xf32>, vector<17x16xf32>, vector<17x17xf32> -> vector<17x17xf32>
    %cst_118 = arith.constant 2.500000e-01 : f32
    %267 = vector.broadcast %cst_118 : f32 to vector<17x17xf32>
    %268 = arith.mulf %266, %267 : vector<17x17xf32>
    %cst_119 = arith.constant dense<0xFF800000> : vector<17xf32>
    %269 = vector.multi_reduction <maximumf>, %268, %cst_119 [1] : vector<17x17xf32> to vector<17xf32>
    %270 = vector.shape_cast %269 : vector<17xf32> to vector<17x1xf32>
    %271 = vector.broadcast %270 : vector<17x1xf32> to vector<17x17xf32>
    %272 = arith.subf %268, %271 : vector<17x17xf32>
    %273 = math.exp %272 : vector<17x17xf32>
    %cst_120 = arith.constant dense<0.000000e+00> : vector<17xf32>
    %274 = vector.multi_reduction <add>, %273, %cst_120 [1] : vector<17x17xf32> to vector<17xf32>
    %275 = vector.shape_cast %274 : vector<17xf32> to vector<17x1xf32>
    %276 = tpu.reciprocal %275 {approx = true} : vector<17x1xf32> -> vector<17x1xf32>
    %277 = vector.broadcast %276 : vector<17x1xf32> to vector<17x17xf32>
    %278 = arith.mulf %273, %277 : vector<17x17xf32>
    %cst_121 = arith.constant dense<0.000000e+00> : vector<17x16xf32>
    %279 = tpu.matmul %278, %265, %cst_121 {dimension_numbers = #tpu.dot_dimension_numbers<[1], [0], [0], [1], [0, 0, 1, 1], [], []>} : vector<17x17xf32>, vector<17x16xf32>, vector<17x16xf32> -> vector<17x16xf32>
    %280 = vector.extract_strided_slice %221 {offsets = [32, 0], sizes = [16, 64], strides = [1, 1]} : vector<64x64xf32> to vector<16x64xf32>
    %cst_122 = arith.constant dense<0.000000e+00> : vector<17x64xf32>
    %281 = tpu.matmul %279, %280, %cst_122 {dimension_numbers = #tpu.dot_dimension_numbers<[1], [0], [0], [1], [0, 0, 1, 1], [], []>} : vector<17x16xf32>, vector<16x64xf32>, vector<17x64xf32> -> vector<17x64xf32>
    %282 = arith.addf %262, %281 : vector<17x64xf32>
    %283 = vector.extract_strided_slice %217 {offsets = [0, 48], sizes = [17, 16], strides = [1, 1]} : vector<17x64xf32> to vector<17x16xf32>
    %284 = vector.extract_strided_slice %218 {offsets = [0, 48], sizes = [17, 16], strides = [1, 1]} : vector<17x64xf32> to vector<17x16xf32>
    %285 = vector.extract_strided_slice %219 {offsets = [0, 48], sizes = [17, 16], strides = [1, 1]} : vector<17x64xf32> to vector<17x16xf32>
    %cst_123 = arith.constant dense<0.000000e+00> : vector<17x17xf32>
    %286 = tpu.matmul %283, %284, %cst_123 {dimension_numbers = #tpu.dot_dimension_numbers<[1], [1], [0], [0], [0, 0, 1, 0], [], []>} : vector<17x16xf32>, vector<17x16xf32>, vector<17x17xf32> -> vector<17x17xf32>
    %cst_124 = arith.constant 2.500000e-01 : f32
    %287 = vector.broadcast %cst_124 : f32 to vector<17x17xf32>
    %288 = arith.mulf %286, %287 : vector<17x17xf32>
    %cst_125 = arith.constant dense<0xFF800000> : vector<17xf32>
    %289 = vector.multi_reduction <maximumf>, %288, %cst_125 [1] : vector<17x17xf32> to vector<17xf32>
    %290 = vector.shape_cast %289 : vector<17xf32> to vector<17x1xf32>
    %291 = vector.broadcast %290 : vector<17x1xf32> to vector<17x17xf32>
    %292 = arith.subf %288, %291 : vector<17x17xf32>
    %293 = math.exp %292 : vector<17x17xf32>
    %cst_126 = arith.constant dense<0.000000e+00> : vector<17xf32>
    %294 = vector.multi_reduction <add>, %293, %cst_126 [1] : vector<17x17xf32> to vector<17xf32>
    %295 = vector.shape_cast %294 : vector<17xf32> to vector<17x1xf32>
    %296 = tpu.reciprocal %295 {approx = true} : vector<17x1xf32> -> vector<17x1xf32>
    %297 = vector.broadcast %296 : vector<17x1xf32> to vector<17x17xf32>
    %298 = arith.mulf %293, %297 : vector<17x17xf32>
    %cst_127 = arith.constant dense<0.000000e+00> : vector<17x16xf32>
    %299 = tpu.matmul %298, %285, %cst_127 {dimension_numbers = #tpu.dot_dimension_numbers<[1], [0], [0], [1], [0, 0, 1, 1], [], []>} : vector<17x17xf32>, vector<17x16xf32>, vector<17x16xf32> -> vector<17x16xf32>
    %300 = vector.extract_strided_slice %221 {offsets = [48, 0], sizes = [16, 64], strides = [1, 1]} : vector<64x64xf32> to vector<16x64xf32>
    %cst_128 = arith.constant dense<0.000000e+00> : vector<17x64xf32>
    %301 = tpu.matmul %299, %300, %cst_128 {dimension_numbers = #tpu.dot_dimension_numbers<[1], [0], [0], [1], [0, 0, 1, 1], [], []>} : vector<17x16xf32>, vector<16x64xf32>, vector<17x64xf32> -> vector<17x64xf32>
    %302 = arith.addf %282, %301 : vector<17x64xf32>
    %c1_129 = arith.constant 1 : index
    %c0_130 = arith.constant 0 : index
    %c0_131 = arith.constant 0 : index
    %303 = vector.load %arg9[%c1_129, %c0_130, %c0_131] : memref<2x1x64xf32, #tpu.memory_space<vmem>>, vector<1x1x64xf32>
    %304 = vector.shape_cast %303 : vector<1x1x64xf32> to vector<1x64xf32>
    %305 = vector.broadcast %304 : vector<1x64xf32> to vector<17x64xf32>
    %306 = arith.addf %302, %305 : vector<17x64xf32>
    %307 = arith.addf %183, %306 : vector<17x64xf32>
    %c1_132 = arith.constant 1 : index
    %c0_133 = arith.constant 0 : index
    %c0_134 = arith.constant 0 : index
    %308 = vector.load %arg10[%c1_132, %c0_133, %c0_134] : memref<2x1x64xf32, #tpu.memory_space<vmem>>, vector<1x1x64xf32>
    %309 = vector.shape_cast %308 : vector<1x1x64xf32> to vector<1x64xf32>
    %c1_135 = arith.constant 1 : index
    %c0_136 = arith.constant 0 : index
    %c0_137 = arith.constant 0 : index
    %310 = vector.load %arg11[%c1_135, %c0_136, %c0_137] : memref<2x1x64xf32, #tpu.memory_space<vmem>>, vector<1x1x64xf32>
    %311 = vector.shape_cast %310 : vector<1x1x64xf32> to vector<1x64xf32>
    %cst_138 = arith.constant dense<0.000000e+00> : vector<17xf32>
    %312 = vector.multi_reduction <add>, %307, %cst_138 [1] : vector<17x64xf32> to vector<17xf32>
    %313 = vector.shape_cast %312 : vector<17xf32> to vector<17x1xf32>
    %cst_139 = arith.constant 6.400000e+01 : f32
    %314 = vector.broadcast %cst_139 : f32 to vector<17x1xf32>
    %315 = arith.divf %313, %314 : vector<17x1xf32>
    %316 = vector.broadcast %315 : vector<17x1xf32> to vector<17x64xf32>
    %317 = arith.subf %307, %316 : vector<17x64xf32>
    %318 = arith.mulf %317, %317 : vector<17x64xf32>
    %cst_140 = arith.constant dense<0.000000e+00> : vector<17xf32>
    %319 = vector.multi_reduction <add>, %318, %cst_140 [1] : vector<17x64xf32> to vector<17xf32>
    %320 = vector.shape_cast %319 : vector<17xf32> to vector<17x1xf32>
    %cst_141 = arith.constant 6.400000e+01 : f32
    %321 = vector.broadcast %cst_141 : f32 to vector<17x1xf32>
    %322 = arith.divf %320, %321 : vector<17x1xf32>
    %323 = vector.broadcast %315 : vector<17x1xf32> to vector<17x64xf32>
    %324 = arith.subf %307, %323 : vector<17x64xf32>
    %cst_142 = arith.constant 9.99999997E-7 : f32
    %325 = vector.broadcast %cst_142 : f32 to vector<17x1xf32>
    %326 = arith.addf %322, %325 : vector<17x1xf32>
    %327 = math.rsqrt %326 : vector<17x1xf32>
    %328 = vector.broadcast %327 : vector<17x1xf32> to vector<17x64xf32>
    %329 = arith.mulf %324, %328 : vector<17x64xf32>
    %330 = vector.broadcast %309 : vector<1x64xf32> to vector<17x64xf32>
    %331 = arith.mulf %329, %330 : vector<17x64xf32>
    %332 = vector.broadcast %311 : vector<1x64xf32> to vector<17x64xf32>
    %333 = arith.addf %331, %332 : vector<17x64xf32>
    %c1_143 = arith.constant 1 : index
    %c0_144 = arith.constant 0 : index
    %c0_145 = arith.constant 0 : index
    %334 = vector.load %arg12[%c1_143, %c0_144, %c0_145] : memref<2x64x256xf32, #tpu.memory_space<vmem>>, vector<1x64x256xf32>
    %335 = vector.shape_cast %334 : vector<1x64x256xf32> to vector<64x256xf32>
    %cst_146 = arith.constant dense<0.000000e+00> : vector<17x256xf32>
    %336 = tpu.matmul %333, %335, %cst_146 {dimension_numbers = #tpu.dot_dimension_numbers<[1], [0], [0], [1], [0, 0, 1, 1], [], []>} : vector<17x64xf32>, vector<64x256xf32>, vector<17x256xf32> -> vector<17x256xf32>
    %c1_147 = arith.constant 1 : index
    %c0_148 = arith.constant 0 : index
    %c0_149 = arith.constant 0 : index
    %337 = vector.load %arg13[%c1_147, %c0_148, %c0_149] : memref<2x1x256xf32, #tpu.memory_space<vmem>>, vector<1x1x256xf32>
    %338 = vector.shape_cast %337 : vector<1x1x256xf32> to vector<1x256xf32>
    %339 = vector.broadcast %338 : vector<1x256xf32> to vector<17x256xf32>
    %340 = arith.addf %336, %339 : vector<17x256xf32>
    %341 = arith.mulf %340, %340 : vector<17x256xf32>
    %342 = arith.mulf %340, %341 : vector<17x256xf32>
    %cst_150 = arith.constant 4.471500e-02 : f32
    %343 = vector.broadcast %cst_150 : f32 to vector<17x256xf32>
    %344 = arith.mulf %343, %342 : vector<17x256xf32>
    %345 = arith.addf %340, %344 : vector<17x256xf32>
    %cst_151 = arith.constant 0.797884583 : f32
    %346 = vector.broadcast %cst_151 : f32 to vector<17x256xf32>
    %347 = arith.mulf %346, %345 : vector<17x256xf32>
    %348 = math.tanh %347 : vector<17x256xf32>
    %cst_152 = arith.constant 1.000000e+00 : f32
    %349 = vector.broadcast %cst_152 : f32 to vector<17x256xf32>
    %350 = arith.addf %349, %348 : vector<17x256xf32>
    %cst_153 = arith.constant 5.000000e-01 : f32
    %351 = vector.broadcast %cst_153 : f32 to vector<17x256xf32>
    %352 = arith.mulf %351, %350 : vector<17x256xf32>
    %353 = arith.mulf %340, %352 : vector<17x256xf32>
    %c1_154 = arith.constant 1 : index
    %c0_155 = arith.constant 0 : index
    %c0_156 = arith.constant 0 : index
    %354 = vector.load %arg14[%c1_154, %c0_155, %c0_156] : memref<2x256x64xf32, #tpu.memory_space<vmem>>, vector<1x256x64xf32>
    %355 = vector.shape_cast %354 : vector<1x256x64xf32> to vector<256x64xf32>
    %cst_157 = arith.constant dense<0.000000e+00> : vector<17x64xf32>
    %356 = tpu.matmul %353, %355, %cst_157 {dimension_numbers = #tpu.dot_dimension_numbers<[1], [0], [0], [1], [0, 0, 1, 1], [], []>} : vector<17x256xf32>, vector<256x64xf32>, vector<17x64xf32> -> vector<17x64xf32>
    %357 = arith.addf %307, %356 : vector<17x64xf32>
    %c1_158 = arith.constant 1 : index
    %c0_159 = arith.constant 0 : index
    %c0_160 = arith.constant 0 : index
    %358 = vector.load %arg15[%c1_158, %c0_159, %c0_160] : memref<2x1x64xf32, #tpu.memory_space<vmem>>, vector<1x1x64xf32>
    %359 = vector.shape_cast %358 : vector<1x1x64xf32> to vector<1x64xf32>
    %360 = vector.broadcast %359 : vector<1x64xf32> to vector<17x64xf32>
    %361 = arith.addf %357, %360 : vector<17x64xf32>
    %c0_161 = arith.constant 0 : index
    %c0_162 = arith.constant 0 : index
    %362 = vector.load %arg16[%c0_161, %c0_162] : memref<1x64xf32, #tpu.memory_space<vmem>>, vector<1x64xf32>
    %c0_163 = arith.constant 0 : index
    %c0_164 = arith.constant 0 : index
    %363 = vector.load %arg17[%c0_163, %c0_164] : memref<1x64xf32, #tpu.memory_space<vmem>>, vector<1x64xf32>
    %cst_165 = arith.constant dense<0.000000e+00> : vector<17xf32>
    %364 = vector.multi_reduction <add>, %361, %cst_165 [1] : vector<17x64xf32> to vector<17xf32>
    %365 = vector.shape_cast %364 : vector<17xf32> to vector<17x1xf32>
    %cst_166 = arith.constant 6.400000e+01 : f32
    %366 = vector.broadcast %cst_166 : f32 to vector<17x1xf32>
    %367 = arith.divf %365, %366 : vector<17x1xf32>
    %368 = vector.broadcast %367 : vector<17x1xf32> to vector<17x64xf32>
    %369 = arith.subf %361, %368 : vector<17x64xf32>
    %370 = arith.mulf %369, %369 : vector<17x64xf32>
    %cst_167 = arith.constant dense<0.000000e+00> : vector<17xf32>
    %371 = vector.multi_reduction <add>, %370, %cst_167 [1] : vector<17x64xf32> to vector<17xf32>
    %372 = vector.shape_cast %371 : vector<17xf32> to vector<17x1xf32>
    %cst_168 = arith.constant 6.400000e+01 : f32
    %373 = vector.broadcast %cst_168 : f32 to vector<17x1xf32>
    %374 = arith.divf %372, %373 : vector<17x1xf32>
    %375 = vector.broadcast %367 : vector<17x1xf32> to vector<17x64xf32>
    %376 = arith.subf %361, %375 : vector<17x64xf32>
    %cst_169 = arith.constant 9.99999997E-7 : f32
    %377 = vector.broadcast %cst_169 : f32 to vector<17x1xf32>
    %378 = arith.addf %374, %377 : vector<17x1xf32>
    %379 = math.rsqrt %378 : vector<17x1xf32>
    %380 = vector.broadcast %379 : vector<17x1xf32> to vector<17x64xf32>
    %381 = arith.mulf %376, %380 : vector<17x64xf32>
    %382 = vector.broadcast %362 : vector<1x64xf32> to vector<17x64xf32>
    %383 = arith.mulf %381, %382 : vector<17x64xf32>
    %384 = vector.broadcast %363 : vector<1x64xf32> to vector<17x64xf32>
    %385 = arith.addf %383, %384 : vector<17x64xf32>
    %c0_170 = arith.constant 0 : index
    %c0_171 = arith.constant 0 : index
    %c0_172 = arith.constant 0 : index
    %386 = vector.load %arg18[%c0_170, %c0_171, %c0_172] : memref<1x17x64xf32, #tpu.memory_space<vmem>>, vector<1x17x64xf32>
    %387 = vector.shape_cast %386 : vector<1x17x64xf32> to vector<17x64xf32>
    %388 = vector.shape_cast %385 : vector<17x64xf32> to vector<1x17x64xf32>
    tpu.vector_store %arg18[%c0_170, %c0_171, %c0_172], %388 {strides = array<i32>} : memref<1x17x64xf32, #tpu.memory_space<vmem>>, vector<1x17x64xf32>,
    return
  }
  func.func @transform_0(%arg0: i32) -> (i32, i32, i32) {
    %c0_i32 = arith.constant 0 : i32
    %c0_i32_0 = arith.constant 0 : i32
    %c0_i32_1 = arith.constant 0 : i32
    return %arg0, %c0_i32, %c0_i32_0 : i32, i32, i32
  }
  func.func @transform_1(%arg0: i32) -> (i32, i32) {
    %c0_i32 = arith.constant 0 : i32
    %c0_i32_0 = arith.constant 0 : i32
    %c0_i32_1 = arith.constant 0 : i32
    return %c0_i32, %c0_i32_0 : i32, i32
  }
  func.func @transform_2(%arg0: i32) -> (i32, i32) {
    %c0_i32 = arith.constant 0 : i32
    %c0_i32_0 = arith.constant 0 : i32
    %c0_i32_1 = arith.constant 0 : i32
    return %c0_i32, %c0_i32_0 : i32, i32
  }
  func.func @transform_3(%arg0: i32) -> (i32, i32, i32) {
    %c0_i32 = arith.constant 0 : i32
    %c0_i32_0 = arith.constant 0 : i32
    %c0_i32_1 = arith.constant 0 : i32
    %c0_i32_2 = arith.constant 0 : i32
    return %c0_i32, %c0_i32_0, %c0_i32_1 : i32, i32, i32
  }
  func.func @transform_4(%arg0: i32) -> (i32, i32, i32) {
    %c0_i32 = arith.constant 0 : i32
    %c0_i32_0 = arith.constant 0 : i32
    %c0_i32_1 = arith.constant 0 : i32
    %c0_i32_2 = arith.constant 0 : i32
    return %c0_i32, %c0_i32_0, %c0_i32_1 : i32, i32, i32
  }
  func.func @transform_5(%arg0: i32) -> (i32, i32, i32) {
    %c0_i32 = arith.constant 0 : i32
    %c0_i32_0 = arith.constant 0 : i32
    %c0_i32_1 = arith.constant 0 : i32
    %c0_i32_2 = arith.constant 0 : i32
    return %c0_i32, %c0_i32_0, %c0_i32_1 : i32, i32, i32
  }
  func.func @transform_6(%arg0: i32) -> (i32, i32, i32) {
    %c0_i32 = arith.constant 0 : i32
    %c0_i32_0 = arith.constant 0 : i32
    %c0_i32_1 = arith.constant 0 : i32
    %c0_i32_2 = arith.constant 0 : i32
    return %c0_i32, %c0_i32_0, %c0_i32_1 : i32, i32, i32
  }
  func.func @transform_7(%arg0: i32) -> (i32, i32, i32) {
    %c0_i32 = arith.constant 0 : i32
    %c0_i32_0 = arith.constant 0 : i32
    %c0_i32_1 = arith.constant 0 : i32
    %c0_i32_2 = arith.constant 0 : i32
    return %c0_i32, %c0_i32_0, %c0_i32_1 : i32, i32, i32
  }
  func.func @transform_8(%arg0: i32) -> (i32, i32, i32) {
    %c0_i32 = arith.constant 0 : i32
    %c0_i32_0 = arith.constant 0 : i32
    %c0_i32_1 = arith.constant 0 : i32
    %c0_i32_2 = arith.constant 0 : i32
    return %c0_i32, %c0_i32_0, %c0_i32_1 : i32, i32, i32
  }
  func.func @transform_9(%arg0: i32) -> (i32, i32, i32) {
    %c0_i32 = arith.constant 0 : i32
    %c0_i32_0 = arith.constant 0 : i32
    %c0_i32_1 = arith.constant 0 : i32
    %c0_i32_2 = arith.constant 0 : i32
    return %c0_i32, %c0_i32_0, %c0_i32_1 : i32, i32, i32
  }
  func.func @transform_10(%arg0: i32) -> (i32, i32, i32) {
    %c0_i32 = arith.constant 0 : i32
    %c0_i32_0 = arith.constant 0 : i32
    %c0_i32_1 = arith.constant 0 : i32
    %c0_i32_2 = arith.constant 0 : i32
    return %c0_i32, %c0_i32_0, %c0_i32_1 : i32, i32, i32
  }
  func.func @transform_11(%arg0: i32) -> (i32, i32, i32) {
    %c0_i32 = arith.constant 0 : i32
    %c0_i32_0 = arith.constant 0 : i32
    %c0_i32_1 = arith.constant 0 : i32
    %c0_i32_2 = arith.constant 0 : i32
    return %c0_i32, %c0_i32_0, %c0_i32_1 : i32, i32, i32
  }
  func.func @transform_12(%arg0: i32) -> (i32, i32, i32) {
    %c0_i32 = arith.constant 0 : i32
    %c0_i32_0 = arith.constant 0 : i32
    %c0_i32_1 = arith.constant 0 : i32
    %c0_i32_2 = arith.constant 0 : i32
    return %c0_i32, %c0_i32_0, %c0_i32_1 : i32, i32, i32
  }
  func.func @transform_13(%arg0: i32) -> (i32, i32, i32) {
    %c0_i32 = arith.constant 0 : i32
    %c0_i32_0 = arith.constant 0 : i32
    %c0_i32_1 = arith.constant 0 : i32
    %c0_i32_2 = arith.constant 0 : i32
    return %c0_i32, %c0_i32_0, %c0_i32_1 : i32, i32, i32
  }
  func.func @transform_14(%arg0: i32) -> (i32, i32, i32) {
    %c0_i32 = arith.constant 0 : i32
    %c0_i32_0 = arith.constant 0 : i32
    %c0_i32_1 = arith.constant 0 : i32
    %c0_i32_2 = arith.constant 0 : i32
    return %c0_i32, %c0_i32_0, %c0_i32_1 : i32, i32, i32
  }
  func.func @transform_15(%arg0: i32) -> (i32, i32) {
    %c0_i32 = arith.constant 0 : i32
    %c0_i32_0 = arith.constant 0 : i32
    %c0_i32_1 = arith.constant 0 : i32
    return %c0_i32, %c0_i32_0 : i32, i32
  }
  func.func @transform_16(%arg0: i32) -> (i32, i32) {
    %c0_i32 = arith.constant 0 : i32
    %c0_i32_0 = arith.constant 0 : i32
    %c0_i32_1 = arith.constant 0 : i32
    return %c0_i32, %c0_i32_0 : i32, i32
  }
  func.func @transform_17(%arg0: i32) -> (i32, i32, i32) {
    %c0_i32 = arith.constant 0 : i32
    %c0_i32_0 = arith.constant 0 : i32
    %c0_i32_1 = arith.constant 0 : i32
    return %arg0, %c0_i32, %c0_i32_0 : i32, i32, i32
  }
}

module attributes {stable_mosaic.version = 11 : i64} {
  func.func @_decoder_kernel(%arg0: i32, %arg1: memref<1x8x64xf32, #tpu.memory_space<vmem>>, %arg2: memref<1x17x64xf32, #tpu.memory_space<vmem>>, %arg3: memref<1x1x8xf32, #tpu.memory_space<vmem>>, %arg4: memref<8x64xf32, #tpu.memory_space<vmem>>, %arg5: memref<8x64xf32, #tpu.memory_space<vmem>>, %arg6: memref<64x64xf32, #tpu.memory_space<vmem>>, %arg7: memref<2x1x64xf32, #tpu.memory_space<vmem>>, %arg8: memref<2x64x192xf32, #tpu.memory_space<vmem>>, %arg9: memref<2x1x192xf32, #tpu.memory_space<vmem>>, %arg10: memref<2x64x64xf32, #tpu.memory_space<vmem>>, %arg11: memref<2x1x64xf32, #tpu.memory_space<vmem>>, %arg12: memref<2x1x64xf32, #tpu.memory_space<vmem>>, %arg13: memref<2x64x64xf32, #tpu.memory_space<vmem>>, %arg14: memref<2x1x64xf32, #tpu.memory_space<vmem>>, %arg15: memref<2x64x128xf32, #tpu.memory_space<vmem>>, %arg16: memref<2x1x128xf32, #tpu.memory_space<vmem>>, %arg17: memref<2x64x64xf32, #tpu.memory_space<vmem>>, %arg18: memref<2x1x64xf32, #tpu.memory_space<vmem>>, %arg19: memref<2x1x64xf32, #tpu.memory_space<vmem>>, %arg20: memref<2x64x256xf32, #tpu.memory_space<vmem>>, %arg21: memref<2x1x256xf32, #tpu.memory_space<vmem>>, %arg22: memref<2x256x64xf32, #tpu.memory_space<vmem>>, %arg23: memref<2x1x64xf32, #tpu.memory_space<vmem>>, %arg24: memref<1x64xf32, #tpu.memory_space<vmem>>, %arg25: memref<64x128xf32, #tpu.memory_space<vmem>>, %arg26: memref<1x128xf32, #tpu.memory_space<vmem>>, %arg27: memref<1x8x128xf32, #tpu.memory_space<vmem>>, %arg28: memref<1x8x64xf32, #tpu.memory_space<vmem>>) attributes {dimension_semantics = [#tpu.dimension_semantics<parallel>], iteration_bounds = array<i64: 2>, scalar_prefetch = 0 : i64, scratch_operands = 0 : i64, tpu.core_type = #tpu.core_type<tc>, window_params = [{transform_indices = @transform_0, window_bounds = array<i64: 1, 8, 64>}, {transform_indices = @transform_1, window_bounds = array<i64: 1, 17, 64>}, {transform_indices = @transform_2, window_bounds = array<i64: 1, 1, 8>}, {pipeline_mode = #tpu.pipeline_mode<synchronous>, transform_indices = @transform_3, window_bounds = array<i64: 8, 64>}, {pipeline_mode = #tpu.pipeline_mode<synchronous>, transform_indices = @transform_4, window_bounds = array<i64: 8, 64>}, {pipeline_mode = #tpu.pipeline_mode<synchronous>, transform_indices = @transform_5, window_bounds = array<i64: 64, 64>}, {pipeline_mode = #tpu.pipeline_mode<synchronous>, transform_indices = @transform_6, window_bounds = array<i64: 2, 1, 64>}, {pipeline_mode = #tpu.pipeline_mode<synchronous>, transform_indices = @transform_7, window_bounds = array<i64: 2, 64, 192>}, {pipeline_mode = #tpu.pipeline_mode<synchronous>, transform_indices = @transform_8, window_bounds = array<i64: 2, 1, 192>}, {pipeline_mode = #tpu.pipeline_mode<synchronous>, transform_indices = @transform_9, window_bounds = array<i64: 2, 64, 64>}, {pipeline_mode = #tpu.pipeline_mode<synchronous>, transform_indices = @transform_10, window_bounds = array<i64: 2, 1, 64>}, {pipeline_mode = #tpu.pipeline_mode<synchronous>, transform_indices = @transform_11, window_bounds = array<i64: 2, 1, 64>}, {pipeline_mode = #tpu.pipeline_mode<synchronous>, transform_indices = @transform_12, window_bounds = array<i64: 2, 64, 64>}, {pipeline_mode = #tpu.pipeline_mode<synchronous>, transform_indices = @transform_13, window_bounds = array<i64: 2, 1, 64>}, {pipeline_mode = #tpu.pipeline_mode<synchronous>, transform_indices = @transform_14, window_bounds = array<i64: 2, 64, 128>}, {pipeline_mode = #tpu.pipeline_mode<synchronous>, transform_indices = @transform_15, window_bounds = array<i64: 2, 1, 128>}, {pipeline_mode = #tpu.pipeline_mode<synchronous>, transform_indices = @transform_16, window_bounds = array<i64: 2, 64, 64>}, {pipeline_mode = #tpu.pipeline_mode<synchronous>, transform_indices = @transform_17, window_bounds = array<i64: 2, 1, 64>}, {pipeline_mode = #tpu.pipeline_mode<synchronous>, transform_indices = @transform_18, window_bounds = array<i64: 2, 1, 64>}, {pipeline_mode = #tpu.pipeline_mode<synchronous>, transform_indices = @transform_19, window_bounds = array<i64: 2, 64, 256>}, {pipeline_mode = #tpu.pipeline_mode<synchronous>, transform_indices = @transform_20, window_bounds = array<i64: 2, 1, 256>}, {pipeline_mode = #tpu.pipeline_mode<synchronous>, transform_indices = @transform_21, window_bounds = array<i64: 2, 256, 64>}, {pipeline_mode = #tpu.pipeline_mode<synchronous>, transform_indices = @transform_22, window_bounds = array<i64: 2, 1, 64>}, {pipeline_mode = #tpu.pipeline_mode<synchronous>, transform_indices = @transform_23, window_bounds = array<i64: 1, 64>}, {pipeline_mode = #tpu.pipeline_mode<synchronous>, transform_indices = @transform_24, window_bounds = array<i64: 64, 128>}, {pipeline_mode = #tpu.pipeline_mode<synchronous>, transform_indices = @transform_25, window_bounds = array<i64: 1, 128>}, {transform_indices = @transform_26, window_bounds = array<i64: 1, 8, 128>}, {transform_indices = @transform_27, window_bounds = array<i64: 1, 8, 64>}]} {
    %c0 = arith.constant 0 : index
    %c0_0 = arith.constant 0 : index
    %c0_1 = arith.constant 0 : index
    %0 = vector.load %arg1[%c0, %c0_0, %c0_1] : memref<1x8x64xf32, #tpu.memory_space<vmem>>, vector<1x8x64xf32>
    %1 = vector.shape_cast %0 : vector<1x8x64xf32> to vector<8x64xf32>
    %c0_2 = arith.constant 0 : index
    %c0_3 = arith.constant 0 : index
    %c0_4 = arith.constant 0 : index
    %2 = vector.load %arg2[%c0_2, %c0_3, %c0_4] : memref<1x17x64xf32, #tpu.memory_space<vmem>>, vector<1x17x64xf32>
    %3 = vector.shape_cast %2 : vector<1x17x64xf32> to vector<17x64xf32>
    %c0_5 = arith.constant 0 : index
    %c0_6 = arith.constant 0 : index
    %4 = vector.load %arg4[%c0_5, %c0_6] : memref<8x64xf32, #tpu.memory_space<vmem>>, vector<8x64xf32>
    %c0_7 = arith.constant 0 : index
    %c0_8 = arith.constant 0 : index
    %5 = vector.load %arg5[%c0_7, %c0_8] : memref<8x64xf32, #tpu.memory_space<vmem>>, vector<8x64xf32>
    %c0_9 = arith.constant 0 : index
    %c0_10 = arith.constant 0 : index
    %6 = vector.load %arg6[%c0_9, %c0_10] : memref<64x64xf32, #tpu.memory_space<vmem>>, vector<64x64xf32>
    %7 = tpu.iota {dimensions = array<i32: 0>} : vector<8x8xi32>
    %8 = tpu.iota {dimensions = array<i32: 1>} : vector<8x8xi32>
    %c0_11 = arith.constant 0 : index
    %c0_12 = arith.constant 0 : index
    %c0_13 = arith.constant 0 : index
    %9 = vector.load %arg3[%c0_11, %c0_12, %c0_13] : memref<1x1x8xf32, #tpu.memory_space<vmem>>, vector<1x1x8xf32>
    %10 = vector.shape_cast %9 : vector<1x1x8xf32> to vector<1x8xf32>
    %cst = arith.constant 5.000000e-01 : f32
    %11 = vector.broadcast %cst : f32 to vector<1x8xf32>
    %12 = arith.cmpf ogt, %10, %11 : vector<1x8xf32>
    %13 = vector.shape_cast %12 : vector<1x8xi1> to vector<1x8xi1>
    %14 = vector.broadcast %13 : vector<1x8xi1> to vector<8x8xi1>
    %15 = arith.cmpi sle, %8, %7 : vector<8x8xi32>
    %16 = arith.andi %15, %14 : vector<8x8xi1>
    %cst_14 = arith.constant 0.000000e+00 : f32
    %cst_15 = arith.constant -1.000000e+09 : f32
    %17 = vector.broadcast %cst_14 : f32 to vector<8x8xf32>
    %18 = vector.broadcast %cst_15 : f32 to vector<8x8xf32>
    %19 = arith.select %16, %17, %18 : vector<8x8xi1>, vector<8x8xf32>
    %c0_16 = arith.constant 0 : index
    %c0_17 = arith.constant 0 : index
    %c0_18 = arith.constant 0 : index
    %20 = vector.load %arg7[%c0_16, %c0_17, %c0_18] : memref<2x1x64xf32, #tpu.memory_space<vmem>>, vector<1x1x64xf32>
    %21 = vector.shape_cast %20 : vector<1x1x64xf32> to vector<1x64xf32>
    %22 = arith.mulf %1, %1 : vector<8x64xf32>
    %cst_19 = arith.constant dense<0.000000e+00> : vector<8xf32>
    %23 = vector.multi_reduction <add>, %22, %cst_19 [1] : vector<8x64xf32> to vector<8xf32>
    %24 = vector.shape_cast %23 : vector<8xf32> to vector<8x1xf32>
    %cst_20 = arith.constant 6.400000e+01 : f32
    %25 = vector.broadcast %cst_20 : f32 to vector<8x1xf32>
    %26 = arith.divf %24, %25 : vector<8x1xf32>
    %cst_21 = arith.constant 9.99999997E-7 : f32
    %27 = vector.broadcast %cst_21 : f32 to vector<8x1xf32>
    %28 = arith.addf %26, %27 : vector<8x1xf32>
    %29 = math.rsqrt %28 : vector<8x1xf32>
    %30 = vector.broadcast %29 : vector<8x1xf32> to vector<8x64xf32>
    %31 = arith.mulf %1, %30 : vector<8x64xf32>
    %32 = vector.broadcast %21 : vector<1x64xf32> to vector<8x64xf32>
    %33 = arith.mulf %31, %32 : vector<8x64xf32>
    %c0_22 = arith.constant 0 : index
    %c0_23 = arith.constant 0 : index
    %c0_24 = arith.constant 0 : index
    %34 = vector.load %arg8[%c0_22, %c0_23, %c0_24] : memref<2x64x192xf32, #tpu.memory_space<vmem>>, vector<1x64x192xf32>
    %35 = vector.shape_cast %34 : vector<1x64x192xf32> to vector<64x192xf32>
    %cst_25 = arith.constant dense<0.000000e+00> : vector<8x192xf32>
    %36 = tpu.matmul %33, %35, %cst_25 {dimension_numbers = #tpu.dot_dimension_numbers<[1], [0], [0], [1], [0, 0, 1, 1], [], []>} : vector<8x64xf32>, vector<64x192xf32>, vector<8x192xf32> -> vector<8x192xf32>
    %c0_26 = arith.constant 0 : index
    %c0_27 = arith.constant 0 : index
    %c0_28 = arith.constant 0 : index
    %37 = vector.load %arg9[%c0_26, %c0_27, %c0_28] : memref<2x1x192xf32, #tpu.memory_space<vmem>>, vector<1x1x192xf32>
    %38 = vector.shape_cast %37 : vector<1x1x192xf32> to vector<1x192xf32>
    %39 = vector.broadcast %38 : vector<1x192xf32> to vector<8x192xf32>
    %40 = arith.addf %36, %39 : vector<8x192xf32>
    %41 = vector.extract_strided_slice %40 {offsets = [0, 0], sizes = [8, 64], strides = [1, 1]} : vector<8x192xf32> to vector<8x64xf32>
    %42 = vector.extract_strided_slice %40 {offsets = [0, 64], sizes = [8, 64], strides = [1, 1]} : vector<8x192xf32> to vector<8x64xf32>
    %43 = vector.extract_strided_slice %40 {offsets = [0, 128], sizes = [8, 64], strides = [1, 1]} : vector<8x192xf32> to vector<8x64xf32>
    %44 = arith.mulf %41, %4 : vector<8x64xf32>
    %cst_29 = arith.constant dense<0.000000e+00> : vector<8x64xf32>
    %45 = tpu.matmul %41, %6, %cst_29 {dimension_numbers = #tpu.dot_dimension_numbers<[1], [0], [0], [1], [0, 0, 1, 1], [], []>} : vector<8x64xf32>, vector<64x64xf32>, vector<8x64xf32> -> vector<8x64xf32>
    %46 = arith.mulf %45, %5 : vector<8x64xf32>
    %47 = arith.addf %44, %46 : vector<8x64xf32>
    %48 = arith.mulf %42, %4 : vector<8x64xf32>
    %cst_30 = arith.constant dense<0.000000e+00> : vector<8x64xf32>
    %49 = tpu.matmul %42, %6, %cst_30 {dimension_numbers = #tpu.dot_dimension_numbers<[1], [0], [0], [1], [0, 0, 1, 1], [], []>} : vector<8x64xf32>, vector<64x64xf32>, vector<8x64xf32> -> vector<8x64xf32>
    %50 = arith.mulf %49, %5 : vector<8x64xf32>
    %51 = arith.addf %48, %50 : vector<8x64xf32>
    %c0_31 = arith.constant 0 : index
    %c0_32 = arith.constant 0 : index
    %c0_33 = arith.constant 0 : index
    %52 = vector.load %arg10[%c0_31, %c0_32, %c0_33] : memref<2x64x64xf32, #tpu.memory_space<vmem>>, vector<1x64x64xf32>
    %53 = vector.shape_cast %52 : vector<1x64x64xf32> to vector<64x64xf32>
    %cst_34 = arith.constant 0.000000e+00 : f32
    %54 = vector.broadcast %cst_34 : f32 to vector<8x64xf32>
    %55 = vector.extract_strided_slice %47 {offsets = [0, 0], sizes = [8, 16], strides = [1, 1]} : vector<8x64xf32> to vector<8x16xf32>
    %56 = vector.extract_strided_slice %51 {offsets = [0, 0], sizes = [8, 16], strides = [1, 1]} : vector<8x64xf32> to vector<8x16xf32>
    %57 = vector.extract_strided_slice %43 {offsets = [0, 0], sizes = [8, 16], strides = [1, 1]} : vector<8x64xf32> to vector<8x16xf32>
    %cst_35 = arith.constant dense<0.000000e+00> : vector<8x8xf32>
    %58 = tpu.matmul %55, %56, %cst_35 {dimension_numbers = #tpu.dot_dimension_numbers<[1], [1], [0], [0], [0, 0, 1, 0], [], []>} : vector<8x16xf32>, vector<8x16xf32>, vector<8x8xf32> -> vector<8x8xf32>
    %cst_36 = arith.constant 2.500000e-01 : f32
    %59 = vector.broadcast %cst_36 : f32 to vector<8x8xf32>
    %60 = arith.mulf %58, %59 : vector<8x8xf32>
    %61 = arith.addf %60, %19 : vector<8x8xf32>
    %cst_37 = arith.constant dense<0xFF800000> : vector<8xf32>
    %62 = vector.multi_reduction <maximumf>, %61, %cst_37 [1] : vector<8x8xf32> to vector<8xf32>
    %63 = vector.shape_cast %62 : vector<8xf32> to vector<8x1xf32>
    %64 = vector.broadcast %63 : vector<8x1xf32> to vector<8x8xf32>
    %65 = arith.subf %61, %64 : vector<8x8xf32>
    %66 = math.exp %65 : vector<8x8xf32>
    %cst_38 = arith.constant dense<0.000000e+00> : vector<8xf32>
    %67 = vector.multi_reduction <add>, %66, %cst_38 [1] : vector<8x8xf32> to vector<8xf32>
    %68 = vector.shape_cast %67 : vector<8xf32> to vector<8x1xf32>
    %69 = tpu.reciprocal %68 {approx = true} : vector<8x1xf32> -> vector<8x1xf32>
    %70 = vector.broadcast %69 : vector<8x1xf32> to vector<8x8xf32>
    %71 = arith.mulf %66, %70 : vector<8x8xf32>
    %cst_39 = arith.constant dense<0.000000e+00> : vector<8x16xf32>
    %72 = tpu.matmul %71, %57, %cst_39 {dimension_numbers = #tpu.dot_dimension_numbers<[1], [0], [0], [1], [0, 0, 1, 1], [], []>} : vector<8x8xf32>, vector<8x16xf32>, vector<8x16xf32> -> vector<8x16xf32>
    %73 = vector.extract_strided_slice %53 {offsets = [0, 0], sizes = [16, 64], strides = [1, 1]} : vector<64x64xf32> to vector<16x64xf32>
    %cst_40 = arith.constant dense<0.000000e+00> : vector<8x64xf32>
    %74 = tpu.matmul %72, %73, %cst_40 {dimension_numbers = #tpu.dot_dimension_numbers<[1], [0], [0], [1], [0, 0, 1, 1], [], []>} : vector<8x16xf32>, vector<16x64xf32>, vector<8x64xf32> -> vector<8x64xf32>
    %75 = arith.addf %54, %74 : vector<8x64xf32>
    %76 = vector.extract_strided_slice %47 {offsets = [0, 16], sizes = [8, 16], strides = [1, 1]} : vector<8x64xf32> to vector<8x16xf32>
    %77 = vector.extract_strided_slice %51 {offsets = [0, 16], sizes = [8, 16], strides = [1, 1]} : vector<8x64xf32> to vector<8x16xf32>
    %78 = vector.extract_strided_slice %43 {offsets = [0, 16], sizes = [8, 16], strides = [1, 1]} : vector<8x64xf32> to vector<8x16xf32>
    %cst_41 = arith.constant dense<0.000000e+00> : vector<8x8xf32>
    %79 = tpu.matmul %76, %77, %cst_41 {dimension_numbers = #tpu.dot_dimension_numbers<[1], [1], [0], [0], [0, 0, 1, 0], [], []>} : vector<8x16xf32>, vector<8x16xf32>, vector<8x8xf32> -> vector<8x8xf32>
    %cst_42 = arith.constant 2.500000e-01 : f32
    %80 = vector.broadcast %cst_42 : f32 to vector<8x8xf32>
    %81 = arith.mulf %79, %80 : vector<8x8xf32>
    %82 = arith.addf %81, %19 : vector<8x8xf32>
    %cst_43 = arith.constant dense<0xFF800000> : vector<8xf32>
    %83 = vector.multi_reduction <maximumf>, %82, %cst_43 [1] : vector<8x8xf32> to vector<8xf32>
    %84 = vector.shape_cast %83 : vector<8xf32> to vector<8x1xf32>
    %85 = vector.broadcast %84 : vector<8x1xf32> to vector<8x8xf32>
    %86 = arith.subf %82, %85 : vector<8x8xf32>
    %87 = math.exp %86 : vector<8x8xf32>
    %cst_44 = arith.constant dense<0.000000e+00> : vector<8xf32>
    %88 = vector.multi_reduction <add>, %87, %cst_44 [1] : vector<8x8xf32> to vector<8xf32>
    %89 = vector.shape_cast %88 : vector<8xf32> to vector<8x1xf32>
    %90 = tpu.reciprocal %89 {approx = true} : vector<8x1xf32> -> vector<8x1xf32>
    %91 = vector.broadcast %90 : vector<8x1xf32> to vector<8x8xf32>
    %92 = arith.mulf %87, %91 : vector<8x8xf32>
    %cst_45 = arith.constant dense<0.000000e+00> : vector<8x16xf32>
    %93 = tpu.matmul %92, %78, %cst_45 {dimension_numbers = #tpu.dot_dimension_numbers<[1], [0], [0], [1], [0, 0, 1, 1], [], []>} : vector<8x8xf32>, vector<8x16xf32>, vector<8x16xf32> -> vector<8x16xf32>
    %94 = vector.extract_strided_slice %53 {offsets = [16, 0], sizes = [16, 64], strides = [1, 1]} : vector<64x64xf32> to vector<16x64xf32>
    %cst_46 = arith.constant dense<0.000000e+00> : vector<8x64xf32>
    %95 = tpu.matmul %93, %94, %cst_46 {dimension_numbers = #tpu.dot_dimension_numbers<[1], [0], [0], [1], [0, 0, 1, 1], [], []>} : vector<8x16xf32>, vector<16x64xf32>, vector<8x64xf32> -> vector<8x64xf32>
    %96 = arith.addf %75, %95 : vector<8x64xf32>
    %97 = vector.extract_strided_slice %47 {offsets = [0, 32], sizes = [8, 16], strides = [1, 1]} : vector<8x64xf32> to vector<8x16xf32>
    %98 = vector.extract_strided_slice %51 {offsets = [0, 32], sizes = [8, 16], strides = [1, 1]} : vector<8x64xf32> to vector<8x16xf32>
    %99 = vector.extract_strided_slice %43 {offsets = [0, 32], sizes = [8, 16], strides = [1, 1]} : vector<8x64xf32> to vector<8x16xf32>
    %cst_47 = arith.constant dense<0.000000e+00> : vector<8x8xf32>
    %100 = tpu.matmul %97, %98, %cst_47 {dimension_numbers = #tpu.dot_dimension_numbers<[1], [1], [0], [0], [0, 0, 1, 0], [], []>} : vector<8x16xf32>, vector<8x16xf32>, vector<8x8xf32> -> vector<8x8xf32>
    %cst_48 = arith.constant 2.500000e-01 : f32
    %101 = vector.broadcast %cst_48 : f32 to vector<8x8xf32>
    %102 = arith.mulf %100, %101 : vector<8x8xf32>
    %103 = arith.addf %102, %19 : vector<8x8xf32>
    %cst_49 = arith.constant dense<0xFF800000> : vector<8xf32>
    %104 = vector.multi_reduction <maximumf>, %103, %cst_49 [1] : vector<8x8xf32> to vector<8xf32>
    %105 = vector.shape_cast %104 : vector<8xf32> to vector<8x1xf32>
    %106 = vector.broadcast %105 : vector<8x1xf32> to vector<8x8xf32>
    %107 = arith.subf %103, %106 : vector<8x8xf32>
    %108 = math.exp %107 : vector<8x8xf32>
    %cst_50 = arith.constant dense<0.000000e+00> : vector<8xf32>
    %109 = vector.multi_reduction <add>, %108, %cst_50 [1] : vector<8x8xf32> to vector<8xf32>
    %110 = vector.shape_cast %109 : vector<8xf32> to vector<8x1xf32>
    %111 = tpu.reciprocal %110 {approx = true} : vector<8x1xf32> -> vector<8x1xf32>
    %112 = vector.broadcast %111 : vector<8x1xf32> to vector<8x8xf32>
    %113 = arith.mulf %108, %112 : vector<8x8xf32>
    %cst_51 = arith.constant dense<0.000000e+00> : vector<8x16xf32>
    %114 = tpu.matmul %113, %99, %cst_51 {dimension_numbers = #tpu.dot_dimension_numbers<[1], [0], [0], [1], [0, 0, 1, 1], [], []>} : vector<8x8xf32>, vector<8x16xf32>, vector<8x16xf32> -> vector<8x16xf32>
    %115 = vector.extract_strided_slice %53 {offsets = [32, 0], sizes = [16, 64], strides = [1, 1]} : vector<64x64xf32> to vector<16x64xf32>
    %cst_52 = arith.constant dense<0.000000e+00> : vector<8x64xf32>
    %116 = tpu.matmul %114, %115, %cst_52 {dimension_numbers = #tpu.dot_dimension_numbers<[1], [0], [0], [1], [0, 0, 1, 1], [], []>} : vector<8x16xf32>, vector<16x64xf32>, vector<8x64xf32> -> vector<8x64xf32>
    %117 = arith.addf %96, %116 : vector<8x64xf32>
    %118 = vector.extract_strided_slice %47 {offsets = [0, 48], sizes = [8, 16], strides = [1, 1]} : vector<8x64xf32> to vector<8x16xf32>
    %119 = vector.extract_strided_slice %51 {offsets = [0, 48], sizes = [8, 16], strides = [1, 1]} : vector<8x64xf32> to vector<8x16xf32>
    %120 = vector.extract_strided_slice %43 {offsets = [0, 48], sizes = [8, 16], strides = [1, 1]} : vector<8x64xf32> to vector<8x16xf32>
    %cst_53 = arith.constant dense<0.000000e+00> : vector<8x8xf32>
    %121 = tpu.matmul %118, %119, %cst_53 {dimension_numbers = #tpu.dot_dimension_numbers<[1], [1], [0], [0], [0, 0, 1, 0], [], []>} : vector<8x16xf32>, vector<8x16xf32>, vector<8x8xf32> -> vector<8x8xf32>
    %cst_54 = arith.constant 2.500000e-01 : f32
    %122 = vector.broadcast %cst_54 : f32 to vector<8x8xf32>
    %123 = arith.mulf %121, %122 : vector<8x8xf32>
    %124 = arith.addf %123, %19 : vector<8x8xf32>
    %cst_55 = arith.constant dense<0xFF800000> : vector<8xf32>
    %125 = vector.multi_reduction <maximumf>, %124, %cst_55 [1] : vector<8x8xf32> to vector<8xf32>
    %126 = vector.shape_cast %125 : vector<8xf32> to vector<8x1xf32>
    %127 = vector.broadcast %126 : vector<8x1xf32> to vector<8x8xf32>
    %128 = arith.subf %124, %127 : vector<8x8xf32>
    %129 = math.exp %128 : vector<8x8xf32>
    %cst_56 = arith.constant dense<0.000000e+00> : vector<8xf32>
    %130 = vector.multi_reduction <add>, %129, %cst_56 [1] : vector<8x8xf32> to vector<8xf32>
    %131 = vector.shape_cast %130 : vector<8xf32> to vector<8x1xf32>
    %132 = tpu.reciprocal %131 {approx = true} : vector<8x1xf32> -> vector<8x1xf32>
    %133 = vector.broadcast %132 : vector<8x1xf32> to vector<8x8xf32>
    %134 = arith.mulf %129, %133 : vector<8x8xf32>
    %cst_57 = arith.constant dense<0.000000e+00> : vector<8x16xf32>
    %135 = tpu.matmul %134, %120, %cst_57 {dimension_numbers = #tpu.dot_dimension_numbers<[1], [0], [0], [1], [0, 0, 1, 1], [], []>} : vector<8x8xf32>, vector<8x16xf32>, vector<8x16xf32> -> vector<8x16xf32>
    %136 = vector.extract_strided_slice %53 {offsets = [48, 0], sizes = [16, 64], strides = [1, 1]} : vector<64x64xf32> to vector<16x64xf32>
    %cst_58 = arith.constant dense<0.000000e+00> : vector<8x64xf32>
    %137 = tpu.matmul %135, %136, %cst_58 {dimension_numbers = #tpu.dot_dimension_numbers<[1], [0], [0], [1], [0, 0, 1, 1], [], []>} : vector<8x16xf32>, vector<16x64xf32>, vector<8x64xf32> -> vector<8x64xf32>
    %138 = arith.addf %117, %137 : vector<8x64xf32>
    %c0_59 = arith.constant 0 : index
    %c0_60 = arith.constant 0 : index
    %c0_61 = arith.constant 0 : index
    %139 = vector.load %arg11[%c0_59, %c0_60, %c0_61] : memref<2x1x64xf32, #tpu.memory_space<vmem>>, vector<1x1x64xf32>
    %140 = vector.shape_cast %139 : vector<1x1x64xf32> to vector<1x64xf32>
    %141 = vector.broadcast %140 : vector<1x64xf32> to vector<8x64xf32>
    %142 = arith.addf %138, %141 : vector<8x64xf32>
    %143 = arith.addf %1, %142 : vector<8x64xf32>
    %c0_62 = arith.constant 0 : index
    %c0_63 = arith.constant 0 : index
    %c0_64 = arith.constant 0 : index
    %144 = vector.load %arg12[%c0_62, %c0_63, %c0_64] : memref<2x1x64xf32, #tpu.memory_space<vmem>>, vector<1x1x64xf32>
    %145 = vector.shape_cast %144 : vector<1x1x64xf32> to vector<1x64xf32>
    %146 = arith.mulf %143, %143 : vector<8x64xf32>
    %cst_65 = arith.constant dense<0.000000e+00> : vector<8xf32>
    %147 = vector.multi_reduction <add>, %146, %cst_65 [1] : vector<8x64xf32> to vector<8xf32>
    %148 = vector.shape_cast %147 : vector<8xf32> to vector<8x1xf32>
    %cst_66 = arith.constant 6.400000e+01 : f32
    %149 = vector.broadcast %cst_66 : f32 to vector<8x1xf32>
    %150 = arith.divf %148, %149 : vector<8x1xf32>
    %cst_67 = arith.constant 9.99999997E-7 : f32
    %151 = vector.broadcast %cst_67 : f32 to vector<8x1xf32>
    %152 = arith.addf %150, %151 : vector<8x1xf32>
    %153 = math.rsqrt %152 : vector<8x1xf32>
    %154 = vector.broadcast %153 : vector<8x1xf32> to vector<8x64xf32>
    %155 = arith.mulf %143, %154 : vector<8x64xf32>
    %156 = vector.broadcast %145 : vector<1x64xf32> to vector<8x64xf32>
    %157 = arith.mulf %155, %156 : vector<8x64xf32>
    %c0_68 = arith.constant 0 : index
    %c0_69 = arith.constant 0 : index
    %c0_70 = arith.constant 0 : index
    %158 = vector.load %arg13[%c0_68, %c0_69, %c0_70] : memref<2x64x64xf32, #tpu.memory_space<vmem>>, vector<1x64x64xf32>
    %159 = vector.shape_cast %158 : vector<1x64x64xf32> to vector<64x64xf32>
    %cst_71 = arith.constant dense<0.000000e+00> : vector<8x64xf32>
    %160 = tpu.matmul %157, %159, %cst_71 {dimension_numbers = #tpu.dot_dimension_numbers<[1], [0], [0], [1], [0, 0, 1, 1], [], []>} : vector<8x64xf32>, vector<64x64xf32>, vector<8x64xf32> -> vector<8x64xf32>
    %c0_72 = arith.constant 0 : index
    %c0_73 = arith.constant 0 : index
    %c0_74 = arith.constant 0 : index
    %161 = vector.load %arg14[%c0_72, %c0_73, %c0_74] : memref<2x1x64xf32, #tpu.memory_space<vmem>>, vector<1x1x64xf32>
    %162 = vector.shape_cast %161 : vector<1x1x64xf32> to vector<1x64xf32>
    %163 = vector.broadcast %162 : vector<1x64xf32> to vector<8x64xf32>
    %164 = arith.addf %160, %163 : vector<8x64xf32>
    %c0_75 = arith.constant 0 : index
    %c0_76 = arith.constant 0 : index
    %c0_77 = arith.constant 0 : index
    %165 = vector.load %arg15[%c0_75, %c0_76, %c0_77] : memref<2x64x128xf32, #tpu.memory_space<vmem>>, vector<1x64x128xf32>
    %166 = vector.shape_cast %165 : vector<1x64x128xf32> to vector<64x128xf32>
    %cst_78 = arith.constant dense<0.000000e+00> : vector<17x128xf32>
    %167 = tpu.matmul %3, %166, %cst_78 {dimension_numbers = #tpu.dot_dimension_numbers<[1], [0], [0], [1], [0, 0, 1, 1], [], []>} : vector<17x64xf32>, vector<64x128xf32>, vector<17x128xf32> -> vector<17x128xf32>
    %c0_79 = arith.constant 0 : index
    %c0_80 = arith.constant 0 : index
    %c0_81 = arith.constant 0 : index
    %168 = vector.load %arg16[%c0_79, %c0_80, %c0_81] : memref<2x1x128xf32, #tpu.memory_space<vmem>>, vector<1x1x128xf32>
    %169 = vector.shape_cast %168 : vector<1x1x128xf32> to vector<1x128xf32>
    %170 = vector.broadcast %169 : vector<1x128xf32> to vector<17x128xf32>
    %171 = arith.addf %167, %170 : vector<17x128xf32>
    %172 = vector.extract_strided_slice %171 {offsets = [0, 0], sizes = [17, 64], strides = [1, 1]} : vector<17x128xf32> to vector<17x64xf32>
    %173 = vector.extract_strided_slice %171 {offsets = [0, 64], sizes = [17, 64], strides = [1, 1]} : vector<17x128xf32> to vector<17x64xf32>
    %c0_82 = arith.constant 0 : index
    %c0_83 = arith.constant 0 : index
    %c0_84 = arith.constant 0 : index
    %174 = vector.load %arg17[%c0_82, %c0_83, %c0_84] : memref<2x64x64xf32, #tpu.memory_space<vmem>>, vector<1x64x64xf32>
    %175 = vector.shape_cast %174 : vector<1x64x64xf32> to vector<64x64xf32>
    %cst_85 = arith.constant 0.000000e+00 : f32
    %176 = vector.broadcast %cst_85 : f32 to vector<8x64xf32>
    %177 = vector.extract_strided_slice %164 {offsets = [0, 0], sizes = [8, 16], strides = [1, 1]} : vector<8x64xf32> to vector<8x16xf32>
    %178 = vector.extract_strided_slice %172 {offsets = [0, 0], sizes = [17, 16], strides = [1, 1]} : vector<17x64xf32> to vector<17x16xf32>
    %179 = vector.extract_strided_slice %173 {offsets = [0, 0], sizes = [17, 16], strides = [1, 1]} : vector<17x64xf32> to vector<17x16xf32>
    %cst_86 = arith.constant dense<0.000000e+00> : vector<8x17xf32>
    %180 = tpu.matmul %177, %178, %cst_86 {dimension_numbers = #tpu.dot_dimension_numbers<[1], [1], [0], [0], [0, 0, 1, 0], [], []>} : vector<8x16xf32>, vector<17x16xf32>, vector<8x17xf32> -> vector<8x17xf32>
    %cst_87 = arith.constant 2.500000e-01 : f32
    %181 = vector.broadcast %cst_87 : f32 to vector<8x17xf32>
    %182 = arith.mulf %180, %181 : vector<8x17xf32>
    %cst_88 = arith.constant dense<0xFF800000> : vector<8xf32>
    %183 = vector.multi_reduction <maximumf>, %182, %cst_88 [1] : vector<8x17xf32> to vector<8xf32>
    %184 = vector.shape_cast %183 : vector<8xf32> to vector<8x1xf32>
    %185 = vector.broadcast %184 : vector<8x1xf32> to vector<8x17xf32>
    %186 = arith.subf %182, %185 : vector<8x17xf32>
    %187 = math.exp %186 : vector<8x17xf32>
    %cst_89 = arith.constant dense<0.000000e+00> : vector<8xf32>
    %188 = vector.multi_reduction <add>, %187, %cst_89 [1] : vector<8x17xf32> to vector<8xf32>
    %189 = vector.shape_cast %188 : vector<8xf32> to vector<8x1xf32>
    %190 = tpu.reciprocal %189 {approx = true} : vector<8x1xf32> -> vector<8x1xf32>
    %191 = vector.broadcast %190 : vector<8x1xf32> to vector<8x17xf32>
    %192 = arith.mulf %187, %191 : vector<8x17xf32>
    %cst_90 = arith.constant dense<0.000000e+00> : vector<8x16xf32>
    %193 = tpu.matmul %192, %179, %cst_90 {dimension_numbers = #tpu.dot_dimension_numbers<[1], [0], [0], [1], [0, 0, 1, 1], [], []>} : vector<8x17xf32>, vector<17x16xf32>, vector<8x16xf32> -> vector<8x16xf32>
    %194 = vector.extract_strided_slice %175 {offsets = [0, 0], sizes = [16, 64], strides = [1, 1]} : vector<64x64xf32> to vector<16x64xf32>
    %cst_91 = arith.constant dense<0.000000e+00> : vector<8x64xf32>
    %195 = tpu.matmul %193, %194, %cst_91 {dimension_numbers = #tpu.dot_dimension_numbers<[1], [0], [0], [1], [0, 0, 1, 1], [], []>} : vector<8x16xf32>, vector<16x64xf32>, vector<8x64xf32> -> vector<8x64xf32>
    %196 = arith.addf %176, %195 : vector<8x64xf32>
    %197 = vector.extract_strided_slice %164 {offsets = [0, 16], sizes = [8, 16], strides = [1, 1]} : vector<8x64xf32> to vector<8x16xf32>
    %198 = vector.extract_strided_slice %172 {offsets = [0, 16], sizes = [17, 16], strides = [1, 1]} : vector<17x64xf32> to vector<17x16xf32>
    %199 = vector.extract_strided_slice %173 {offsets = [0, 16], sizes = [17, 16], strides = [1, 1]} : vector<17x64xf32> to vector<17x16xf32>
    %cst_92 = arith.constant dense<0.000000e+00> : vector<8x17xf32>
    %200 = tpu.matmul %197, %198, %cst_92 {dimension_numbers = #tpu.dot_dimension_numbers<[1], [1], [0], [0], [0, 0, 1, 0], [], []>} : vector<8x16xf32>, vector<17x16xf32>, vector<8x17xf32> -> vector<8x17xf32>
    %cst_93 = arith.constant 2.500000e-01 : f32
    %201 = vector.broadcast %cst_93 : f32 to vector<8x17xf32>
    %202 = arith.mulf %200, %201 : vector<8x17xf32>
    %cst_94 = arith.constant dense<0xFF800000> : vector<8xf32>
    %203 = vector.multi_reduction <maximumf>, %202, %cst_94 [1] : vector<8x17xf32> to vector<8xf32>
    %204 = vector.shape_cast %203 : vector<8xf32> to vector<8x1xf32>
    %205 = vector.broadcast %204 : vector<8x1xf32> to vector<8x17xf32>
    %206 = arith.subf %202, %205 : vector<8x17xf32>
    %207 = math.exp %206 : vector<8x17xf32>
    %cst_95 = arith.constant dense<0.000000e+00> : vector<8xf32>
    %208 = vector.multi_reduction <add>, %207, %cst_95 [1] : vector<8x17xf32> to vector<8xf32>
    %209 = vector.shape_cast %208 : vector<8xf32> to vector<8x1xf32>
    %210 = tpu.reciprocal %209 {approx = true} : vector<8x1xf32> -> vector<8x1xf32>
    %211 = vector.broadcast %210 : vector<8x1xf32> to vector<8x17xf32>
    %212 = arith.mulf %207, %211 : vector<8x17xf32>
    %cst_96 = arith.constant dense<0.000000e+00> : vector<8x16xf32>
    %213 = tpu.matmul %212, %199, %cst_96 {dimension_numbers = #tpu.dot_dimension_numbers<[1], [0], [0], [1], [0, 0, 1, 1], [], []>} : vector<8x17xf32>, vector<17x16xf32>, vector<8x16xf32> -> vector<8x16xf32>
    %214 = vector.extract_strided_slice %175 {offsets = [16, 0], sizes = [16, 64], strides = [1, 1]} : vector<64x64xf32> to vector<16x64xf32>
    %cst_97 = arith.constant dense<0.000000e+00> : vector<8x64xf32>
    %215 = tpu.matmul %213, %214, %cst_97 {dimension_numbers = #tpu.dot_dimension_numbers<[1], [0], [0], [1], [0, 0, 1, 1], [], []>} : vector<8x16xf32>, vector<16x64xf32>, vector<8x64xf32> -> vector<8x64xf32>
    %216 = arith.addf %196, %215 : vector<8x64xf32>
    %217 = vector.extract_strided_slice %164 {offsets = [0, 32], sizes = [8, 16], strides = [1, 1]} : vector<8x64xf32> to vector<8x16xf32>
    %218 = vector.extract_strided_slice %172 {offsets = [0, 32], sizes = [17, 16], strides = [1, 1]} : vector<17x64xf32> to vector<17x16xf32>
    %219 = vector.extract_strided_slice %173 {offsets = [0, 32], sizes = [17, 16], strides = [1, 1]} : vector<17x64xf32> to vector<17x16xf32>
    %cst_98 = arith.constant dense<0.000000e+00> : vector<8x17xf32>
    %220 = tpu.matmul %217, %218, %cst_98 {dimension_numbers = #tpu.dot_dimension_numbers<[1], [1], [0], [0], [0, 0, 1, 0], [], []>} : vector<8x16xf32>, vector<17x16xf32>, vector<8x17xf32> -> vector<8x17xf32>
    %cst_99 = arith.constant 2.500000e-01 : f32
    %221 = vector.broadcast %cst_99 : f32 to vector<8x17xf32>
    %222 = arith.mulf %220, %221 : vector<8x17xf32>
    %cst_100 = arith.constant dense<0xFF800000> : vector<8xf32>
    %223 = vector.multi_reduction <maximumf>, %222, %cst_100 [1] : vector<8x17xf32> to vector<8xf32>
    %224 = vector.shape_cast %223 : vector<8xf32> to vector<8x1xf32>
    %225 = vector.broadcast %224 : vector<8x1xf32> to vector<8x17xf32>
    %226 = arith.subf %222, %225 : vector<8x17xf32>
    %227 = math.exp %226 : vector<8x17xf32>
    %cst_101 = arith.constant dense<0.000000e+00> : vector<8xf32>
    %228 = vector.multi_reduction <add>, %227, %cst_101 [1] : vector<8x17xf32> to vector<8xf32>
    %229 = vector.shape_cast %228 : vector<8xf32> to vector<8x1xf32>
    %230 = tpu.reciprocal %229 {approx = true} : vector<8x1xf32> -> vector<8x1xf32>
    %231 = vector.broadcast %230 : vector<8x1xf32> to vector<8x17xf32>
    %232 = arith.mulf %227, %231 : vector<8x17xf32>
    %cst_102 = arith.constant dense<0.000000e+00> : vector<8x16xf32>
    %233 = tpu.matmul %232, %219, %cst_102 {dimension_numbers = #tpu.dot_dimension_numbers<[1], [0], [0], [1], [0, 0, 1, 1], [], []>} : vector<8x17xf32>, vector<17x16xf32>, vector<8x16xf32> -> vector<8x16xf32>
    %234 = vector.extract_strided_slice %175 {offsets = [32, 0], sizes = [16, 64], strides = [1, 1]} : vector<64x64xf32> to vector<16x64xf32>
    %cst_103 = arith.constant dense<0.000000e+00> : vector<8x64xf32>
    %235 = tpu.matmul %233, %234, %cst_103 {dimension_numbers = #tpu.dot_dimension_numbers<[1], [0], [0], [1], [0, 0, 1, 1], [], []>} : vector<8x16xf32>, vector<16x64xf32>, vector<8x64xf32> -> vector<8x64xf32>
    %236 = arith.addf %216, %235 : vector<8x64xf32>
    %237 = vector.extract_strided_slice %164 {offsets = [0, 48], sizes = [8, 16], strides = [1, 1]} : vector<8x64xf32> to vector<8x16xf32>
    %238 = vector.extract_strided_slice %172 {offsets = [0, 48], sizes = [17, 16], strides = [1, 1]} : vector<17x64xf32> to vector<17x16xf32>
    %239 = vector.extract_strided_slice %173 {offsets = [0, 48], sizes = [17, 16], strides = [1, 1]} : vector<17x64xf32> to vector<17x16xf32>
    %cst_104 = arith.constant dense<0.000000e+00> : vector<8x17xf32>
    %240 = tpu.matmul %237, %238, %cst_104 {dimension_numbers = #tpu.dot_dimension_numbers<[1], [1], [0], [0], [0, 0, 1, 0], [], []>} : vector<8x16xf32>, vector<17x16xf32>, vector<8x17xf32> -> vector<8x17xf32>
    %cst_105 = arith.constant 2.500000e-01 : f32
    %241 = vector.broadcast %cst_105 : f32 to vector<8x17xf32>
    %242 = arith.mulf %240, %241 : vector<8x17xf32>
    %cst_106 = arith.constant dense<0xFF800000> : vector<8xf32>
    %243 = vector.multi_reduction <maximumf>, %242, %cst_106 [1] : vector<8x17xf32> to vector<8xf32>
    %244 = vector.shape_cast %243 : vector<8xf32> to vector<8x1xf32>
    %245 = vector.broadcast %244 : vector<8x1xf32> to vector<8x17xf32>
    %246 = arith.subf %242, %245 : vector<8x17xf32>
    %247 = math.exp %246 : vector<8x17xf32>
    %cst_107 = arith.constant dense<0.000000e+00> : vector<8xf32>
    %248 = vector.multi_reduction <add>, %247, %cst_107 [1] : vector<8x17xf32> to vector<8xf32>
    %249 = vector.shape_cast %248 : vector<8xf32> to vector<8x1xf32>
    %250 = tpu.reciprocal %249 {approx = true} : vector<8x1xf32> -> vector<8x1xf32>
    %251 = vector.broadcast %250 : vector<8x1xf32> to vector<8x17xf32>
    %252 = arith.mulf %247, %251 : vector<8x17xf32>
    %cst_108 = arith.constant dense<0.000000e+00> : vector<8x16xf32>
    %253 = tpu.matmul %252, %239, %cst_108 {dimension_numbers = #tpu.dot_dimension_numbers<[1], [0], [0], [1], [0, 0, 1, 1], [], []>} : vector<8x17xf32>, vector<17x16xf32>, vector<8x16xf32> -> vector<8x16xf32>
    %254 = vector.extract_strided_slice %175 {offsets = [48, 0], sizes = [16, 64], strides = [1, 1]} : vector<64x64xf32> to vector<16x64xf32>
    %cst_109 = arith.constant dense<0.000000e+00> : vector<8x64xf32>
    %255 = tpu.matmul %253, %254, %cst_109 {dimension_numbers = #tpu.dot_dimension_numbers<[1], [0], [0], [1], [0, 0, 1, 1], [], []>} : vector<8x16xf32>, vector<16x64xf32>, vector<8x64xf32> -> vector<8x64xf32>
    %256 = arith.addf %236, %255 : vector<8x64xf32>
    %c0_110 = arith.constant 0 : index
    %c0_111 = arith.constant 0 : index
    %c0_112 = arith.constant 0 : index
    %257 = vector.load %arg18[%c0_110, %c0_111, %c0_112] : memref<2x1x64xf32, #tpu.memory_space<vmem>>, vector<1x1x64xf32>
    %258 = vector.shape_cast %257 : vector<1x1x64xf32> to vector<1x64xf32>
    %259 = vector.broadcast %258 : vector<1x64xf32> to vector<8x64xf32>
    %260 = arith.addf %256, %259 : vector<8x64xf32>
    %261 = arith.addf %143, %260 : vector<8x64xf32>
    %c0_113 = arith.constant 0 : index
    %c0_114 = arith.constant 0 : index
    %c0_115 = arith.constant 0 : index
    %262 = vector.load %arg19[%c0_113, %c0_114, %c0_115] : memref<2x1x64xf32, #tpu.memory_space<vmem>>, vector<1x1x64xf32>
    %263 = vector.shape_cast %262 : vector<1x1x64xf32> to vector<1x64xf32>
    %264 = arith.mulf %261, %261 : vector<8x64xf32>
    %cst_116 = arith.constant dense<0.000000e+00> : vector<8xf32>
    %265 = vector.multi_reduction <add>, %264, %cst_116 [1] : vector<8x64xf32> to vector<8xf32>
    %266 = vector.shape_cast %265 : vector<8xf32> to vector<8x1xf32>
    %cst_117 = arith.constant 6.400000e+01 : f32
    %267 = vector.broadcast %cst_117 : f32 to vector<8x1xf32>
    %268 = arith.divf %266, %267 : vector<8x1xf32>
    %cst_118 = arith.constant 9.99999997E-7 : f32
    %269 = vector.broadcast %cst_118 : f32 to vector<8x1xf32>
    %270 = arith.addf %268, %269 : vector<8x1xf32>
    %271 = math.rsqrt %270 : vector<8x1xf32>
    %272 = vector.broadcast %271 : vector<8x1xf32> to vector<8x64xf32>
    %273 = arith.mulf %261, %272 : vector<8x64xf32>
    %274 = vector.broadcast %263 : vector<1x64xf32> to vector<8x64xf32>
    %275 = arith.mulf %273, %274 : vector<8x64xf32>
    %c0_119 = arith.constant 0 : index
    %c0_120 = arith.constant 0 : index
    %c0_121 = arith.constant 0 : index
    %276 = vector.load %arg20[%c0_119, %c0_120, %c0_121] : memref<2x64x256xf32, #tpu.memory_space<vmem>>, vector<1x64x256xf32>
    %277 = vector.shape_cast %276 : vector<1x64x256xf32> to vector<64x256xf32>
    %cst_122 = arith.constant dense<0.000000e+00> : vector<8x256xf32>
    %278 = tpu.matmul %275, %277, %cst_122 {dimension_numbers = #tpu.dot_dimension_numbers<[1], [0], [0], [1], [0, 0, 1, 1], [], []>} : vector<8x64xf32>, vector<64x256xf32>, vector<8x256xf32> -> vector<8x256xf32>
    %c0_123 = arith.constant 0 : index
    %c0_124 = arith.constant 0 : index
    %c0_125 = arith.constant 0 : index
    %279 = vector.load %arg21[%c0_123, %c0_124, %c0_125] : memref<2x1x256xf32, #tpu.memory_space<vmem>>, vector<1x1x256xf32>
    %280 = vector.shape_cast %279 : vector<1x1x256xf32> to vector<1x256xf32>
    %281 = vector.broadcast %280 : vector<1x256xf32> to vector<8x256xf32>
    %282 = arith.addf %278, %281 : vector<8x256xf32>
    %283 = arith.mulf %282, %282 : vector<8x256xf32>
    %284 = arith.mulf %282, %283 : vector<8x256xf32>
    %cst_126 = arith.constant 4.471500e-02 : f32
    %285 = vector.broadcast %cst_126 : f32 to vector<8x256xf32>
    %286 = arith.mulf %285, %284 : vector<8x256xf32>
    %287 = arith.addf %282, %286 : vector<8x256xf32>
    %cst_127 = arith.constant 0.797884583 : f32
    %288 = vector.broadcast %cst_127 : f32 to vector<8x256xf32>
    %289 = arith.mulf %288, %287 : vector<8x256xf32>
    %290 = math.tanh %289 : vector<8x256xf32>
    %cst_128 = arith.constant 1.000000e+00 : f32
    %291 = vector.broadcast %cst_128 : f32 to vector<8x256xf32>
    %292 = arith.addf %291, %290 : vector<8x256xf32>
    %cst_129 = arith.constant 5.000000e-01 : f32
    %293 = vector.broadcast %cst_129 : f32 to vector<8x256xf32>
    %294 = arith.mulf %293, %292 : vector<8x256xf32>
    %295 = arith.mulf %282, %294 : vector<8x256xf32>
    %c0_130 = arith.constant 0 : index
    %c0_131 = arith.constant 0 : index
    %c0_132 = arith.constant 0 : index
    %296 = vector.load %arg22[%c0_130, %c0_131, %c0_132] : memref<2x256x64xf32, #tpu.memory_space<vmem>>, vector<1x256x64xf32>
    %297 = vector.shape_cast %296 : vector<1x256x64xf32> to vector<256x64xf32>
    %cst_133 = arith.constant dense<0.000000e+00> : vector<8x64xf32>
    %298 = tpu.matmul %295, %297, %cst_133 {dimension_numbers = #tpu.dot_dimension_numbers<[1], [0], [0], [1], [0, 0, 1, 1], [], []>} : vector<8x256xf32>, vector<256x64xf32>, vector<8x64xf32> -> vector<8x64xf32>
    %299 = arith.addf %261, %298 : vector<8x64xf32>
    %c0_134 = arith.constant 0 : index
    %c0_135 = arith.constant 0 : index
    %c0_136 = arith.constant 0 : index
    %300 = vector.load %arg23[%c0_134, %c0_135, %c0_136] : memref<2x1x64xf32, #tpu.memory_space<vmem>>, vector<1x1x64xf32>
    %301 = vector.shape_cast %300 : vector<1x1x64xf32> to vector<1x64xf32>
    %302 = vector.broadcast %301 : vector<1x64xf32> to vector<8x64xf32>
    %303 = arith.addf %299, %302 : vector<8x64xf32>
    %c1 = arith.constant 1 : index
    %c0_137 = arith.constant 0 : index
    %c0_138 = arith.constant 0 : index
    %304 = vector.load %arg7[%c1, %c0_137, %c0_138] : memref<2x1x64xf32, #tpu.memory_space<vmem>>, vector<1x1x64xf32>
    %305 = vector.shape_cast %304 : vector<1x1x64xf32> to vector<1x64xf32>
    %306 = arith.mulf %303, %303 : vector<8x64xf32>
    %cst_139 = arith.constant dense<0.000000e+00> : vector<8xf32>
    %307 = vector.multi_reduction <add>, %306, %cst_139 [1] : vector<8x64xf32> to vector<8xf32>
    %308 = vector.shape_cast %307 : vector<8xf32> to vector<8x1xf32>
    %cst_140 = arith.constant 6.400000e+01 : f32
    %309 = vector.broadcast %cst_140 : f32 to vector<8x1xf32>
    %310 = arith.divf %308, %309 : vector<8x1xf32>
    %cst_141 = arith.constant 9.99999997E-7 : f32
    %311 = vector.broadcast %cst_141 : f32 to vector<8x1xf32>
    %312 = arith.addf %310, %311 : vector<8x1xf32>
    %313 = math.rsqrt %312 : vector<8x1xf32>
    %314 = vector.broadcast %313 : vector<8x1xf32> to vector<8x64xf32>
    %315 = arith.mulf %303, %314 : vector<8x64xf32>
    %316 = vector.broadcast %305 : vector<1x64xf32> to vector<8x64xf32>
    %317 = arith.mulf %315, %316 : vector<8x64xf32>
    %c1_142 = arith.constant 1 : index
    %c0_143 = arith.constant 0 : index
    %c0_144 = arith.constant 0 : index
    %318 = vector.load %arg8[%c1_142, %c0_143, %c0_144] : memref<2x64x192xf32, #tpu.memory_space<vmem>>, vector<1x64x192xf32>
    %319 = vector.shape_cast %318 : vector<1x64x192xf32> to vector<64x192xf32>
    %cst_145 = arith.constant dense<0.000000e+00> : vector<8x192xf32>
    %320 = tpu.matmul %317, %319, %cst_145 {dimension_numbers = #tpu.dot_dimension_numbers<[1], [0], [0], [1], [0, 0, 1, 1], [], []>} : vector<8x64xf32>, vector<64x192xf32>, vector<8x192xf32> -> vector<8x192xf32>
    %c1_146 = arith.constant 1 : index
    %c0_147 = arith.constant 0 : index
    %c0_148 = arith.constant 0 : index
    %321 = vector.load %arg9[%c1_146, %c0_147, %c0_148] : memref<2x1x192xf32, #tpu.memory_space<vmem>>, vector<1x1x192xf32>
    %322 = vector.shape_cast %321 : vector<1x1x192xf32> to vector<1x192xf32>
    %323 = vector.broadcast %322 : vector<1x192xf32> to vector<8x192xf32>
    %324 = arith.addf %320, %323 : vector<8x192xf32>
    %325 = vector.extract_strided_slice %324 {offsets = [0, 0], sizes = [8, 64], strides = [1, 1]} : vector<8x192xf32> to vector<8x64xf32>
    %326 = vector.extract_strided_slice %324 {offsets = [0, 64], sizes = [8, 64], strides = [1, 1]} : vector<8x192xf32> to vector<8x64xf32>
    %327 = vector.extract_strided_slice %324 {offsets = [0, 128], sizes = [8, 64], strides = [1, 1]} : vector<8x192xf32> to vector<8x64xf32>
    %328 = arith.mulf %325, %4 : vector<8x64xf32>
    %cst_149 = arith.constant dense<0.000000e+00> : vector<8x64xf32>
    %329 = tpu.matmul %325, %6, %cst_149 {dimension_numbers = #tpu.dot_dimension_numbers<[1], [0], [0], [1], [0, 0, 1, 1], [], []>} : vector<8x64xf32>, vector<64x64xf32>, vector<8x64xf32> -> vector<8x64xf32>
    %330 = arith.mulf %329, %5 : vector<8x64xf32>
    %331 = arith.addf %328, %330 : vector<8x64xf32>
    %332 = arith.mulf %326, %4 : vector<8x64xf32>
    %cst_150 = arith.constant dense<0.000000e+00> : vector<8x64xf32>
    %333 = tpu.matmul %326, %6, %cst_150 {dimension_numbers = #tpu.dot_dimension_numbers<[1], [0], [0], [1], [0, 0, 1, 1], [], []>} : vector<8x64xf32>, vector<64x64xf32>, vector<8x64xf32> -> vector<8x64xf32>
    %334 = arith.mulf %333, %5 : vector<8x64xf32>
    %335 = arith.addf %332, %334 : vector<8x64xf32>
    %c1_151 = arith.constant 1 : index
    %c0_152 = arith.constant 0 : index
    %c0_153 = arith.constant 0 : index
    %336 = vector.load %arg10[%c1_151, %c0_152, %c0_153] : memref<2x64x64xf32, #tpu.memory_space<vmem>>, vector<1x64x64xf32>
    %337 = vector.shape_cast %336 : vector<1x64x64xf32> to vector<64x64xf32>
    %cst_154 = arith.constant 0.000000e+00 : f32
    %338 = vector.broadcast %cst_154 : f32 to vector<8x64xf32>
    %339 = vector.extract_strided_slice %331 {offsets = [0, 0], sizes = [8, 16], strides = [1, 1]} : vector<8x64xf32> to vector<8x16xf32>
    %340 = vector.extract_strided_slice %335 {offsets = [0, 0], sizes = [8, 16], strides = [1, 1]} : vector<8x64xf32> to vector<8x16xf32>
    %341 = vector.extract_strided_slice %327 {offsets = [0, 0], sizes = [8, 16], strides = [1, 1]} : vector<8x64xf32> to vector<8x16xf32>
    %cst_155 = arith.constant dense<0.000000e+00> : vector<8x8xf32>
    %342 = tpu.matmul %339, %340, %cst_155 {dimension_numbers = #tpu.dot_dimension_numbers<[1], [1], [0], [0], [0, 0, 1, 0], [], []>} : vector<8x16xf32>, vector<8x16xf32>, vector<8x8xf32> -> vector<8x8xf32>
    %cst_156 = arith.constant 2.500000e-01 : f32
    %343 = vector.broadcast %cst_156 : f32 to vector<8x8xf32>
    %344 = arith.mulf %342, %343 : vector<8x8xf32>
    %345 = arith.addf %344, %19 : vector<8x8xf32>
    %cst_157 = arith.constant dense<0xFF800000> : vector<8xf32>
    %346 = vector.multi_reduction <maximumf>, %345, %cst_157 [1] : vector<8x8xf32> to vector<8xf32>
    %347 = vector.shape_cast %346 : vector<8xf32> to vector<8x1xf32>
    %348 = vector.broadcast %347 : vector<8x1xf32> to vector<8x8xf32>
    %349 = arith.subf %345, %348 : vector<8x8xf32>
    %350 = math.exp %349 : vector<8x8xf32>
    %cst_158 = arith.constant dense<0.000000e+00> : vector<8xf32>
    %351 = vector.multi_reduction <add>, %350, %cst_158 [1] : vector<8x8xf32> to vector<8xf32>
    %352 = vector.shape_cast %351 : vector<8xf32> to vector<8x1xf32>
    %353 = tpu.reciprocal %352 {approx = true} : vector<8x1xf32> -> vector<8x1xf32>
    %354 = vector.broadcast %353 : vector<8x1xf32> to vector<8x8xf32>
    %355 = arith.mulf %350, %354 : vector<8x8xf32>
    %cst_159 = arith.constant dense<0.000000e+00> : vector<8x16xf32>
    %356 = tpu.matmul %355, %341, %cst_159 {dimension_numbers = #tpu.dot_dimension_numbers<[1], [0], [0], [1], [0, 0, 1, 1], [], []>} : vector<8x8xf32>, vector<8x16xf32>, vector<8x16xf32> -> vector<8x16xf32>
    %357 = vector.extract_strided_slice %337 {offsets = [0, 0], sizes = [16, 64], strides = [1, 1]} : vector<64x64xf32> to vector<16x64xf32>
    %cst_160 = arith.constant dense<0.000000e+00> : vector<8x64xf32>
    %358 = tpu.matmul %356, %357, %cst_160 {dimension_numbers = #tpu.dot_dimension_numbers<[1], [0], [0], [1], [0, 0, 1, 1], [], []>} : vector<8x16xf32>, vector<16x64xf32>, vector<8x64xf32> -> vector<8x64xf32>
    %359 = arith.addf %338, %358 : vector<8x64xf32>
    %360 = vector.extract_strided_slice %331 {offsets = [0, 16], sizes = [8, 16], strides = [1, 1]} : vector<8x64xf32> to vector<8x16xf32>
    %361 = vector.extract_strided_slice %335 {offsets = [0, 16], sizes = [8, 16], strides = [1, 1]} : vector<8x64xf32> to vector<8x16xf32>
    %362 = vector.extract_strided_slice %327 {offsets = [0, 16], sizes = [8, 16], strides = [1, 1]} : vector<8x64xf32> to vector<8x16xf32>
    %cst_161 = arith.constant dense<0.000000e+00> : vector<8x8xf32>
    %363 = tpu.matmul %360, %361, %cst_161 {dimension_numbers = #tpu.dot_dimension_numbers<[1], [1], [0], [0], [0, 0, 1, 0], [], []>} : vector<8x16xf32>, vector<8x16xf32>, vector<8x8xf32> -> vector<8x8xf32>
    %cst_162 = arith.constant 2.500000e-01 : f32
    %364 = vector.broadcast %cst_162 : f32 to vector<8x8xf32>
    %365 = arith.mulf %363, %364 : vector<8x8xf32>
    %366 = arith.addf %365, %19 : vector<8x8xf32>
    %cst_163 = arith.constant dense<0xFF800000> : vector<8xf32>
    %367 = vector.multi_reduction <maximumf>, %366, %cst_163 [1] : vector<8x8xf32> to vector<8xf32>
    %368 = vector.shape_cast %367 : vector<8xf32> to vector<8x1xf32>
    %369 = vector.broadcast %368 : vector<8x1xf32> to vector<8x8xf32>
    %370 = arith.subf %366, %369 : vector<8x8xf32>
    %371 = math.exp %370 : vector<8x8xf32>
    %cst_164 = arith.constant dense<0.000000e+00> : vector<8xf32>
    %372 = vector.multi_reduction <add>, %371, %cst_164 [1] : vector<8x8xf32> to vector<8xf32>
    %373 = vector.shape_cast %372 : vector<8xf32> to vector<8x1xf32>
    %374 = tpu.reciprocal %373 {approx = true} : vector<8x1xf32> -> vector<8x1xf32>
    %375 = vector.broadcast %374 : vector<8x1xf32> to vector<8x8xf32>
    %376 = arith.mulf %371, %375 : vector<8x8xf32>
    %cst_165 = arith.constant dense<0.000000e+00> : vector<8x16xf32>
    %377 = tpu.matmul %376, %362, %cst_165 {dimension_numbers = #tpu.dot_dimension_numbers<[1], [0], [0], [1], [0, 0, 1, 1], [], []>} : vector<8x8xf32>, vector<8x16xf32>, vector<8x16xf32> -> vector<8x16xf32>
    %378 = vector.extract_strided_slice %337 {offsets = [16, 0], sizes = [16, 64], strides = [1, 1]} : vector<64x64xf32> to vector<16x64xf32>
    %cst_166 = arith.constant dense<0.000000e+00> : vector<8x64xf32>
    %379 = tpu.matmul %377, %378, %cst_166 {dimension_numbers = #tpu.dot_dimension_numbers<[1], [0], [0], [1], [0, 0, 1, 1], [], []>} : vector<8x16xf32>, vector<16x64xf32>, vector<8x64xf32> -> vector<8x64xf32>
    %380 = arith.addf %359, %379 : vector<8x64xf32>
    %381 = vector.extract_strided_slice %331 {offsets = [0, 32], sizes = [8, 16], strides = [1, 1]} : vector<8x64xf32> to vector<8x16xf32>
    %382 = vector.extract_strided_slice %335 {offsets = [0, 32], sizes = [8, 16], strides = [1, 1]} : vector<8x64xf32> to vector<8x16xf32>
    %383 = vector.extract_strided_slice %327 {offsets = [0, 32], sizes = [8, 16], strides = [1, 1]} : vector<8x64xf32> to vector<8x16xf32>
    %cst_167 = arith.constant dense<0.000000e+00> : vector<8x8xf32>
    %384 = tpu.matmul %381, %382, %cst_167 {dimension_numbers = #tpu.dot_dimension_numbers<[1], [1], [0], [0], [0, 0, 1, 0], [], []>} : vector<8x16xf32>, vector<8x16xf32>, vector<8x8xf32> -> vector<8x8xf32>
    %cst_168 = arith.constant 2.500000e-01 : f32
    %385 = vector.broadcast %cst_168 : f32 to vector<8x8xf32>
    %386 = arith.mulf %384, %385 : vector<8x8xf32>
    %387 = arith.addf %386, %19 : vector<8x8xf32>
    %cst_169 = arith.constant dense<0xFF800000> : vector<8xf32>
    %388 = vector.multi_reduction <maximumf>, %387, %cst_169 [1] : vector<8x8xf32> to vector<8xf32>
    %389 = vector.shape_cast %388 : vector<8xf32> to vector<8x1xf32>
    %390 = vector.broadcast %389 : vector<8x1xf32> to vector<8x8xf32>
    %391 = arith.subf %387, %390 : vector<8x8xf32>
    %392 = math.exp %391 : vector<8x8xf32>
    %cst_170 = arith.constant dense<0.000000e+00> : vector<8xf32>
    %393 = vector.multi_reduction <add>, %392, %cst_170 [1] : vector<8x8xf32> to vector<8xf32>
    %394 = vector.shape_cast %393 : vector<8xf32> to vector<8x1xf32>
    %395 = tpu.reciprocal %394 {approx = true} : vector<8x1xf32> -> vector<8x1xf32>
    %396 = vector.broadcast %395 : vector<8x1xf32> to vector<8x8xf32>
    %397 = arith.mulf %392, %396 : vector<8x8xf32>
    %cst_171 = arith.constant dense<0.000000e+00> : vector<8x16xf32>
    %398 = tpu.matmul %397, %383, %cst_171 {dimension_numbers = #tpu.dot_dimension_numbers<[1], [0], [0], [1], [0, 0, 1, 1], [], []>} : vector<8x8xf32>, vector<8x16xf32>, vector<8x16xf32> -> vector<8x16xf32>
    %399 = vector.extract_strided_slice %337 {offsets = [32, 0], sizes = [16, 64], strides = [1, 1]} : vector<64x64xf32> to vector<16x64xf32>
    %cst_172 = arith.constant dense<0.000000e+00> : vector<8x64xf32>
    %400 = tpu.matmul %398, %399, %cst_172 {dimension_numbers = #tpu.dot_dimension_numbers<[1], [0], [0], [1], [0, 0, 1, 1], [], []>} : vector<8x16xf32>, vector<16x64xf32>, vector<8x64xf32> -> vector<8x64xf32>
    %401 = arith.addf %380, %400 : vector<8x64xf32>
    %402 = vector.extract_strided_slice %331 {offsets = [0, 48], sizes = [8, 16], strides = [1, 1]} : vector<8x64xf32> to vector<8x16xf32>
    %403 = vector.extract_strided_slice %335 {offsets = [0, 48], sizes = [8, 16], strides = [1, 1]} : vector<8x64xf32> to vector<8x16xf32>
    %404 = vector.extract_strided_slice %327 {offsets = [0, 48], sizes = [8, 16], strides = [1, 1]} : vector<8x64xf32> to vector<8x16xf32>
    %cst_173 = arith.constant dense<0.000000e+00> : vector<8x8xf32>
    %405 = tpu.matmul %402, %403, %cst_173 {dimension_numbers = #tpu.dot_dimension_numbers<[1], [1], [0], [0], [0, 0, 1, 0], [], []>} : vector<8x16xf32>, vector<8x16xf32>, vector<8x8xf32> -> vector<8x8xf32>
    %cst_174 = arith.constant 2.500000e-01 : f32
    %406 = vector.broadcast %cst_174 : f32 to vector<8x8xf32>
    %407 = arith.mulf %405, %406 : vector<8x8xf32>
    %408 = arith.addf %407, %19 : vector<8x8xf32>
    %cst_175 = arith.constant dense<0xFF800000> : vector<8xf32>
    %409 = vector.multi_reduction <maximumf>, %408, %cst_175 [1] : vector<8x8xf32> to vector<8xf32>
    %410 = vector.shape_cast %409 : vector<8xf32> to vector<8x1xf32>
    %411 = vector.broadcast %410 : vector<8x1xf32> to vector<8x8xf32>
    %412 = arith.subf %408, %411 : vector<8x8xf32>
    %413 = math.exp %412 : vector<8x8xf32>
    %cst_176 = arith.constant dense<0.000000e+00> : vector<8xf32>
    %414 = vector.multi_reduction <add>, %413, %cst_176 [1] : vector<8x8xf32> to vector<8xf32>
    %415 = vector.shape_cast %414 : vector<8xf32> to vector<8x1xf32>
    %416 = tpu.reciprocal %415 {approx = true} : vector<8x1xf32> -> vector<8x1xf32>
    %417 = vector.broadcast %416 : vector<8x1xf32> to vector<8x8xf32>
    %418 = arith.mulf %413, %417 : vector<8x8xf32>
    %cst_177 = arith.constant dense<0.000000e+00> : vector<8x16xf32>
    %419 = tpu.matmul %418, %404, %cst_177 {dimension_numbers = #tpu.dot_dimension_numbers<[1], [0], [0], [1], [0, 0, 1, 1], [], []>} : vector<8x8xf32>, vector<8x16xf32>, vector<8x16xf32> -> vector<8x16xf32>
    %420 = vector.extract_strided_slice %337 {offsets = [48, 0], sizes = [16, 64], strides = [1, 1]} : vector<64x64xf32> to vector<16x64xf32>
    %cst_178 = arith.constant dense<0.000000e+00> : vector<8x64xf32>
    %421 = tpu.matmul %419, %420, %cst_178 {dimension_numbers = #tpu.dot_dimension_numbers<[1], [0], [0], [1], [0, 0, 1, 1], [], []>} : vector<8x16xf32>, vector<16x64xf32>, vector<8x64xf32> -> vector<8x64xf32>
    %422 = arith.addf %401, %421 : vector<8x64xf32>
    %c1_179 = arith.constant 1 : index
    %c0_180 = arith.constant 0 : index
    %c0_181 = arith.constant 0 : index
    %423 = vector.load %arg11[%c1_179, %c0_180, %c0_181] : memref<2x1x64xf32, #tpu.memory_space<vmem>>, vector<1x1x64xf32>
    %424 = vector.shape_cast %423 : vector<1x1x64xf32> to vector<1x64xf32>
    %425 = vector.broadcast %424 : vector<1x64xf32> to vector<8x64xf32>
    %426 = arith.addf %422, %425 : vector<8x64xf32>
    %427 = arith.addf %303, %426 : vector<8x64xf32>
    %c1_182 = arith.constant 1 : index
    %c0_183 = arith.constant 0 : index
    %c0_184 = arith.constant 0 : index
    %428 = vector.load %arg12[%c1_182, %c0_183, %c0_184] : memref<2x1x64xf32, #tpu.memory_space<vmem>>, vector<1x1x64xf32>
    %429 = vector.shape_cast %428 : vector<1x1x64xf32> to vector<1x64xf32>
    %430 = arith.mulf %427, %427 : vector<8x64xf32>
    %cst_185 = arith.constant dense<0.000000e+00> : vector<8xf32>
    %431 = vector.multi_reduction <add>, %430, %cst_185 [1] : vector<8x64xf32> to vector<8xf32>
    %432 = vector.shape_cast %431 : vector<8xf32> to vector<8x1xf32>
    %cst_186 = arith.constant 6.400000e+01 : f32
    %433 = vector.broadcast %cst_186 : f32 to vector<8x1xf32>
    %434 = arith.divf %432, %433 : vector<8x1xf32>
    %cst_187 = arith.constant 9.99999997E-7 : f32
    %435 = vector.broadcast %cst_187 : f32 to vector<8x1xf32>
    %436 = arith.addf %434, %435 : vector<8x1xf32>
    %437 = math.rsqrt %436 : vector<8x1xf32>
    %438 = vector.broadcast %437 : vector<8x1xf32> to vector<8x64xf32>
    %439 = arith.mulf %427, %438 : vector<8x64xf32>
    %440 = vector.broadcast %429 : vector<1x64xf32> to vector<8x64xf32>
    %441 = arith.mulf %439, %440 : vector<8x64xf32>
    %c1_188 = arith.constant 1 : index
    %c0_189 = arith.constant 0 : index
    %c0_190 = arith.constant 0 : index
    %442 = vector.load %arg13[%c1_188, %c0_189, %c0_190] : memref<2x64x64xf32, #tpu.memory_space<vmem>>, vector<1x64x64xf32>
    %443 = vector.shape_cast %442 : vector<1x64x64xf32> to vector<64x64xf32>
    %cst_191 = arith.constant dense<0.000000e+00> : vector<8x64xf32>
    %444 = tpu.matmul %441, %443, %cst_191 {dimension_numbers = #tpu.dot_dimension_numbers<[1], [0], [0], [1], [0, 0, 1, 1], [], []>} : vector<8x64xf32>, vector<64x64xf32>, vector<8x64xf32> -> vector<8x64xf32>
    %c1_192 = arith.constant 1 : index
    %c0_193 = arith.constant 0 : index
    %c0_194 = arith.constant 0 : index
    %445 = vector.load %arg14[%c1_192, %c0_193, %c0_194] : memref<2x1x64xf32, #tpu.memory_space<vmem>>, vector<1x1x64xf32>
    %446 = vector.shape_cast %445 : vector<1x1x64xf32> to vector<1x64xf32>
    %447 = vector.broadcast %446 : vector<1x64xf32> to vector<8x64xf32>
    %448 = arith.addf %444, %447 : vector<8x64xf32>
    %c1_195 = arith.constant 1 : index
    %c0_196 = arith.constant 0 : index
    %c0_197 = arith.constant 0 : index
    %449 = vector.load %arg15[%c1_195, %c0_196, %c0_197] : memref<2x64x128xf32, #tpu.memory_space<vmem>>, vector<1x64x128xf32>
    %450 = vector.shape_cast %449 : vector<1x64x128xf32> to vector<64x128xf32>
    %cst_198 = arith.constant dense<0.000000e+00> : vector<17x128xf32>
    %451 = tpu.matmul %3, %450, %cst_198 {dimension_numbers = #tpu.dot_dimension_numbers<[1], [0], [0], [1], [0, 0, 1, 1], [], []>} : vector<17x64xf32>, vector<64x128xf32>, vector<17x128xf32> -> vector<17x128xf32>
    %c1_199 = arith.constant 1 : index
    %c0_200 = arith.constant 0 : index
    %c0_201 = arith.constant 0 : index
    %452 = vector.load %arg16[%c1_199, %c0_200, %c0_201] : memref<2x1x128xf32, #tpu.memory_space<vmem>>, vector<1x1x128xf32>
    %453 = vector.shape_cast %452 : vector<1x1x128xf32> to vector<1x128xf32>
    %454 = vector.broadcast %453 : vector<1x128xf32> to vector<17x128xf32>
    %455 = arith.addf %451, %454 : vector<17x128xf32>
    %456 = vector.extract_strided_slice %455 {offsets = [0, 0], sizes = [17, 64], strides = [1, 1]} : vector<17x128xf32> to vector<17x64xf32>
    %457 = vector.extract_strided_slice %455 {offsets = [0, 64], sizes = [17, 64], strides = [1, 1]} : vector<17x128xf32> to vector<17x64xf32>
    %c1_202 = arith.constant 1 : index
    %c0_203 = arith.constant 0 : index
    %c0_204 = arith.constant 0 : index
    %458 = vector.load %arg17[%c1_202, %c0_203, %c0_204] : memref<2x64x64xf32, #tpu.memory_space<vmem>>, vector<1x64x64xf32>
    %459 = vector.shape_cast %458 : vector<1x64x64xf32> to vector<64x64xf32>
    %cst_205 = arith.constant 0.000000e+00 : f32
    %460 = vector.broadcast %cst_205 : f32 to vector<8x64xf32>
    %461 = vector.extract_strided_slice %448 {offsets = [0, 0], sizes = [8, 16], strides = [1, 1]} : vector<8x64xf32> to vector<8x16xf32>
    %462 = vector.extract_strided_slice %456 {offsets = [0, 0], sizes = [17, 16], strides = [1, 1]} : vector<17x64xf32> to vector<17x16xf32>
    %463 = vector.extract_strided_slice %457 {offsets = [0, 0], sizes = [17, 16], strides = [1, 1]} : vector<17x64xf32> to vector<17x16xf32>
    %cst_206 = arith.constant dense<0.000000e+00> : vector<8x17xf32>
    %464 = tpu.matmul %461, %462, %cst_206 {dimension_numbers = #tpu.dot_dimension_numbers<[1], [1], [0], [0], [0, 0, 1, 0], [], []>} : vector<8x16xf32>, vector<17x16xf32>, vector<8x17xf32> -> vector<8x17xf32>
    %cst_207 = arith.constant 2.500000e-01 : f32
    %465 = vector.broadcast %cst_207 : f32 to vector<8x17xf32>
    %466 = arith.mulf %464, %465 : vector<8x17xf32>
    %cst_208 = arith.constant dense<0xFF800000> : vector<8xf32>
    %467 = vector.multi_reduction <maximumf>, %466, %cst_208 [1] : vector<8x17xf32> to vector<8xf32>
    %468 = vector.shape_cast %467 : vector<8xf32> to vector<8x1xf32>
    %469 = vector.broadcast %468 : vector<8x1xf32> to vector<8x17xf32>
    %470 = arith.subf %466, %469 : vector<8x17xf32>
    %471 = math.exp %470 : vector<8x17xf32>
    %cst_209 = arith.constant dense<0.000000e+00> : vector<8xf32>
    %472 = vector.multi_reduction <add>, %471, %cst_209 [1] : vector<8x17xf32> to vector<8xf32>
    %473 = vector.shape_cast %472 : vector<8xf32> to vector<8x1xf32>
    %474 = tpu.reciprocal %473 {approx = true} : vector<8x1xf32> -> vector<8x1xf32>
    %475 = vector.broadcast %474 : vector<8x1xf32> to vector<8x17xf32>
    %476 = arith.mulf %471, %475 : vector<8x17xf32>
    %cst_210 = arith.constant dense<0.000000e+00> : vector<8x16xf32>
    %477 = tpu.matmul %476, %463, %cst_210 {dimension_numbers = #tpu.dot_dimension_numbers<[1], [0], [0], [1], [0, 0, 1, 1], [], []>} : vector<8x17xf32>, vector<17x16xf32>, vector<8x16xf32> -> vector<8x16xf32>
    %478 = vector.extract_strided_slice %459 {offsets = [0, 0], sizes = [16, 64], strides = [1, 1]} : vector<64x64xf32> to vector<16x64xf32>
    %cst_211 = arith.constant dense<0.000000e+00> : vector<8x64xf32>
    %479 = tpu.matmul %477, %478, %cst_211 {dimension_numbers = #tpu.dot_dimension_numbers<[1], [0], [0], [1], [0, 0, 1, 1], [], []>} : vector<8x16xf32>, vector<16x64xf32>, vector<8x64xf32> -> vector<8x64xf32>
    %480 = arith.addf %460, %479 : vector<8x64xf32>
    %481 = vector.extract_strided_slice %448 {offsets = [0, 16], sizes = [8, 16], strides = [1, 1]} : vector<8x64xf32> to vector<8x16xf32>
    %482 = vector.extract_strided_slice %456 {offsets = [0, 16], sizes = [17, 16], strides = [1, 1]} : vector<17x64xf32> to vector<17x16xf32>
    %483 = vector.extract_strided_slice %457 {offsets = [0, 16], sizes = [17, 16], strides = [1, 1]} : vector<17x64xf32> to vector<17x16xf32>
    %cst_212 = arith.constant dense<0.000000e+00> : vector<8x17xf32>
    %484 = tpu.matmul %481, %482, %cst_212 {dimension_numbers = #tpu.dot_dimension_numbers<[1], [1], [0], [0], [0, 0, 1, 0], [], []>} : vector<8x16xf32>, vector<17x16xf32>, vector<8x17xf32> -> vector<8x17xf32>
    %cst_213 = arith.constant 2.500000e-01 : f32
    %485 = vector.broadcast %cst_213 : f32 to vector<8x17xf32>
    %486 = arith.mulf %484, %485 : vector<8x17xf32>
    %cst_214 = arith.constant dense<0xFF800000> : vector<8xf32>
    %487 = vector.multi_reduction <maximumf>, %486, %cst_214 [1] : vector<8x17xf32> to vector<8xf32>
    %488 = vector.shape_cast %487 : vector<8xf32> to vector<8x1xf32>
    %489 = vector.broadcast %488 : vector<8x1xf32> to vector<8x17xf32>
    %490 = arith.subf %486, %489 : vector<8x17xf32>
    %491 = math.exp %490 : vector<8x17xf32>
    %cst_215 = arith.constant dense<0.000000e+00> : vector<8xf32>
    %492 = vector.multi_reduction <add>, %491, %cst_215 [1] : vector<8x17xf32> to vector<8xf32>
    %493 = vector.shape_cast %492 : vector<8xf32> to vector<8x1xf32>
    %494 = tpu.reciprocal %493 {approx = true} : vector<8x1xf32> -> vector<8x1xf32>
    %495 = vector.broadcast %494 : vector<8x1xf32> to vector<8x17xf32>
    %496 = arith.mulf %491, %495 : vector<8x17xf32>
    %cst_216 = arith.constant dense<0.000000e+00> : vector<8x16xf32>
    %497 = tpu.matmul %496, %483, %cst_216 {dimension_numbers = #tpu.dot_dimension_numbers<[1], [0], [0], [1], [0, 0, 1, 1], [], []>} : vector<8x17xf32>, vector<17x16xf32>, vector<8x16xf32> -> vector<8x16xf32>
    %498 = vector.extract_strided_slice %459 {offsets = [16, 0], sizes = [16, 64], strides = [1, 1]} : vector<64x64xf32> to vector<16x64xf32>
    %cst_217 = arith.constant dense<0.000000e+00> : vector<8x64xf32>
    %499 = tpu.matmul %497, %498, %cst_217 {dimension_numbers = #tpu.dot_dimension_numbers<[1], [0], [0], [1], [0, 0, 1, 1], [], []>} : vector<8x16xf32>, vector<16x64xf32>, vector<8x64xf32> -> vector<8x64xf32>
    %500 = arith.addf %480, %499 : vector<8x64xf32>
    %501 = vector.extract_strided_slice %448 {offsets = [0, 32], sizes = [8, 16], strides = [1, 1]} : vector<8x64xf32> to vector<8x16xf32>
    %502 = vector.extract_strided_slice %456 {offsets = [0, 32], sizes = [17, 16], strides = [1, 1]} : vector<17x64xf32> to vector<17x16xf32>
    %503 = vector.extract_strided_slice %457 {offsets = [0, 32], sizes = [17, 16], strides = [1, 1]} : vector<17x64xf32> to vector<17x16xf32>
    %cst_218 = arith.constant dense<0.000000e+00> : vector<8x17xf32>
    %504 = tpu.matmul %501, %502, %cst_218 {dimension_numbers = #tpu.dot_dimension_numbers<[1], [1], [0], [0], [0, 0, 1, 0], [], []>} : vector<8x16xf32>, vector<17x16xf32>, vector<8x17xf32> -> vector<8x17xf32>
    %cst_219 = arith.constant 2.500000e-01 : f32
    %505 = vector.broadcast %cst_219 : f32 to vector<8x17xf32>
    %506 = arith.mulf %504, %505 : vector<8x17xf32>
    %cst_220 = arith.constant dense<0xFF800000> : vector<8xf32>
    %507 = vector.multi_reduction <maximumf>, %506, %cst_220 [1] : vector<8x17xf32> to vector<8xf32>
    %508 = vector.shape_cast %507 : vector<8xf32> to vector<8x1xf32>
    %509 = vector.broadcast %508 : vector<8x1xf32> to vector<8x17xf32>
    %510 = arith.subf %506, %509 : vector<8x17xf32>
    %511 = math.exp %510 : vector<8x17xf32>
    %cst_221 = arith.constant dense<0.000000e+00> : vector<8xf32>
    %512 = vector.multi_reduction <add>, %511, %cst_221 [1] : vector<8x17xf32> to vector<8xf32>
    %513 = vector.shape_cast %512 : vector<8xf32> to vector<8x1xf32>
    %514 = tpu.reciprocal %513 {approx = true} : vector<8x1xf32> -> vector<8x1xf32>
    %515 = vector.broadcast %514 : vector<8x1xf32> to vector<8x17xf32>
    %516 = arith.mulf %511, %515 : vector<8x17xf32>
    %cst_222 = arith.constant dense<0.000000e+00> : vector<8x16xf32>
    %517 = tpu.matmul %516, %503, %cst_222 {dimension_numbers = #tpu.dot_dimension_numbers<[1], [0], [0], [1], [0, 0, 1, 1], [], []>} : vector<8x17xf32>, vector<17x16xf32>, vector<8x16xf32> -> vector<8x16xf32>
    %518 = vector.extract_strided_slice %459 {offsets = [32, 0], sizes = [16, 64], strides = [1, 1]} : vector<64x64xf32> to vector<16x64xf32>
    %cst_223 = arith.constant dense<0.000000e+00> : vector<8x64xf32>
    %519 = tpu.matmul %517, %518, %cst_223 {dimension_numbers = #tpu.dot_dimension_numbers<[1], [0], [0], [1], [0, 0, 1, 1], [], []>} : vector<8x16xf32>, vector<16x64xf32>, vector<8x64xf32> -> vector<8x64xf32>
    %520 = arith.addf %500, %519 : vector<8x64xf32>
    %521 = vector.extract_strided_slice %448 {offsets = [0, 48], sizes = [8, 16], strides = [1, 1]} : vector<8x64xf32> to vector<8x16xf32>
    %522 = vector.extract_strided_slice %456 {offsets = [0, 48], sizes = [17, 16], strides = [1, 1]} : vector<17x64xf32> to vector<17x16xf32>
    %523 = vector.extract_strided_slice %457 {offsets = [0, 48], sizes = [17, 16], strides = [1, 1]} : vector<17x64xf32> to vector<17x16xf32>
    %cst_224 = arith.constant dense<0.000000e+00> : vector<8x17xf32>
    %524 = tpu.matmul %521, %522, %cst_224 {dimension_numbers = #tpu.dot_dimension_numbers<[1], [1], [0], [0], [0, 0, 1, 0], [], []>} : vector<8x16xf32>, vector<17x16xf32>, vector<8x17xf32> -> vector<8x17xf32>
    %cst_225 = arith.constant 2.500000e-01 : f32
    %525 = vector.broadcast %cst_225 : f32 to vector<8x17xf32>
    %526 = arith.mulf %524, %525 : vector<8x17xf32>
    %cst_226 = arith.constant dense<0xFF800000> : vector<8xf32>
    %527 = vector.multi_reduction <maximumf>, %526, %cst_226 [1] : vector<8x17xf32> to vector<8xf32>
    %528 = vector.shape_cast %527 : vector<8xf32> to vector<8x1xf32>
    %529 = vector.broadcast %528 : vector<8x1xf32> to vector<8x17xf32>
    %530 = arith.subf %526, %529 : vector<8x17xf32>
    %531 = math.exp %530 : vector<8x17xf32>
    %cst_227 = arith.constant dense<0.000000e+00> : vector<8xf32>
    %532 = vector.multi_reduction <add>, %531, %cst_227 [1] : vector<8x17xf32> to vector<8xf32>
    %533 = vector.shape_cast %532 : vector<8xf32> to vector<8x1xf32>
    %534 = tpu.reciprocal %533 {approx = true} : vector<8x1xf32> -> vector<8x1xf32>
    %535 = vector.broadcast %534 : vector<8x1xf32> to vector<8x17xf32>
    %536 = arith.mulf %531, %535 : vector<8x17xf32>
    %cst_228 = arith.constant dense<0.000000e+00> : vector<8x16xf32>
    %537 = tpu.matmul %536, %523, %cst_228 {dimension_numbers = #tpu.dot_dimension_numbers<[1], [0], [0], [1], [0, 0, 1, 1], [], []>} : vector<8x17xf32>, vector<17x16xf32>, vector<8x16xf32> -> vector<8x16xf32>
    %538 = vector.extract_strided_slice %459 {offsets = [48, 0], sizes = [16, 64], strides = [1, 1]} : vector<64x64xf32> to vector<16x64xf32>
    %cst_229 = arith.constant dense<0.000000e+00> : vector<8x64xf32>
    %539 = tpu.matmul %537, %538, %cst_229 {dimension_numbers = #tpu.dot_dimension_numbers<[1], [0], [0], [1], [0, 0, 1, 1], [], []>} : vector<8x16xf32>, vector<16x64xf32>, vector<8x64xf32> -> vector<8x64xf32>
    %540 = arith.addf %520, %539 : vector<8x64xf32>
    %c1_230 = arith.constant 1 : index
    %c0_231 = arith.constant 0 : index
    %c0_232 = arith.constant 0 : index
    %541 = vector.load %arg18[%c1_230, %c0_231, %c0_232] : memref<2x1x64xf32, #tpu.memory_space<vmem>>, vector<1x1x64xf32>
    %542 = vector.shape_cast %541 : vector<1x1x64xf32> to vector<1x64xf32>
    %543 = vector.broadcast %542 : vector<1x64xf32> to vector<8x64xf32>
    %544 = arith.addf %540, %543 : vector<8x64xf32>
    %545 = arith.addf %427, %544 : vector<8x64xf32>
    %c1_233 = arith.constant 1 : index
    %c0_234 = arith.constant 0 : index
    %c0_235 = arith.constant 0 : index
    %546 = vector.load %arg19[%c1_233, %c0_234, %c0_235] : memref<2x1x64xf32, #tpu.memory_space<vmem>>, vector<1x1x64xf32>
    %547 = vector.shape_cast %546 : vector<1x1x64xf32> to vector<1x64xf32>
    %548 = arith.mulf %545, %545 : vector<8x64xf32>
    %cst_236 = arith.constant dense<0.000000e+00> : vector<8xf32>
    %549 = vector.multi_reduction <add>, %548, %cst_236 [1] : vector<8x64xf32> to vector<8xf32>
    %550 = vector.shape_cast %549 : vector<8xf32> to vector<8x1xf32>
    %cst_237 = arith.constant 6.400000e+01 : f32
    %551 = vector.broadcast %cst_237 : f32 to vector<8x1xf32>
    %552 = arith.divf %550, %551 : vector<8x1xf32>
    %cst_238 = arith.constant 9.99999997E-7 : f32
    %553 = vector.broadcast %cst_238 : f32 to vector<8x1xf32>
    %554 = arith.addf %552, %553 : vector<8x1xf32>
    %555 = math.rsqrt %554 : vector<8x1xf32>
    %556 = vector.broadcast %555 : vector<8x1xf32> to vector<8x64xf32>
    %557 = arith.mulf %545, %556 : vector<8x64xf32>
    %558 = vector.broadcast %547 : vector<1x64xf32> to vector<8x64xf32>
    %559 = arith.mulf %557, %558 : vector<8x64xf32>
    %c1_239 = arith.constant 1 : index
    %c0_240 = arith.constant 0 : index
    %c0_241 = arith.constant 0 : index
    %560 = vector.load %arg20[%c1_239, %c0_240, %c0_241] : memref<2x64x256xf32, #tpu.memory_space<vmem>>, vector<1x64x256xf32>
    %561 = vector.shape_cast %560 : vector<1x64x256xf32> to vector<64x256xf32>
    %cst_242 = arith.constant dense<0.000000e+00> : vector<8x256xf32>
    %562 = tpu.matmul %559, %561, %cst_242 {dimension_numbers = #tpu.dot_dimension_numbers<[1], [0], [0], [1], [0, 0, 1, 1], [], []>} : vector<8x64xf32>, vector<64x256xf32>, vector<8x256xf32> -> vector<8x256xf32>
    %c1_243 = arith.constant 1 : index
    %c0_244 = arith.constant 0 : index
    %c0_245 = arith.constant 0 : index
    %563 = vector.load %arg21[%c1_243, %c0_244, %c0_245] : memref<2x1x256xf32, #tpu.memory_space<vmem>>, vector<1x1x256xf32>
    %564 = vector.shape_cast %563 : vector<1x1x256xf32> to vector<1x256xf32>
    %565 = vector.broadcast %564 : vector<1x256xf32> to vector<8x256xf32>
    %566 = arith.addf %562, %565 : vector<8x256xf32>
    %567 = arith.mulf %566, %566 : vector<8x256xf32>
    %568 = arith.mulf %566, %567 : vector<8x256xf32>
    %cst_246 = arith.constant 4.471500e-02 : f32
    %569 = vector.broadcast %cst_246 : f32 to vector<8x256xf32>
    %570 = arith.mulf %569, %568 : vector<8x256xf32>
    %571 = arith.addf %566, %570 : vector<8x256xf32>
    %cst_247 = arith.constant 0.797884583 : f32
    %572 = vector.broadcast %cst_247 : f32 to vector<8x256xf32>
    %573 = arith.mulf %572, %571 : vector<8x256xf32>
    %574 = math.tanh %573 : vector<8x256xf32>
    %cst_248 = arith.constant 1.000000e+00 : f32
    %575 = vector.broadcast %cst_248 : f32 to vector<8x256xf32>
    %576 = arith.addf %575, %574 : vector<8x256xf32>
    %cst_249 = arith.constant 5.000000e-01 : f32
    %577 = vector.broadcast %cst_249 : f32 to vector<8x256xf32>
    %578 = arith.mulf %577, %576 : vector<8x256xf32>
    %579 = arith.mulf %566, %578 : vector<8x256xf32>
    %c1_250 = arith.constant 1 : index
    %c0_251 = arith.constant 0 : index
    %c0_252 = arith.constant 0 : index
    %580 = vector.load %arg22[%c1_250, %c0_251, %c0_252] : memref<2x256x64xf32, #tpu.memory_space<vmem>>, vector<1x256x64xf32>
    %581 = vector.shape_cast %580 : vector<1x256x64xf32> to vector<256x64xf32>
    %cst_253 = arith.constant dense<0.000000e+00> : vector<8x64xf32>
    %582 = tpu.matmul %579, %581, %cst_253 {dimension_numbers = #tpu.dot_dimension_numbers<[1], [0], [0], [1], [0, 0, 1, 1], [], []>} : vector<8x256xf32>, vector<256x64xf32>, vector<8x64xf32> -> vector<8x64xf32>
    %583 = arith.addf %545, %582 : vector<8x64xf32>
    %c1_254 = arith.constant 1 : index
    %c0_255 = arith.constant 0 : index
    %c0_256 = arith.constant 0 : index
    %584 = vector.load %arg23[%c1_254, %c0_255, %c0_256] : memref<2x1x64xf32, #tpu.memory_space<vmem>>, vector<1x1x64xf32>
    %585 = vector.shape_cast %584 : vector<1x1x64xf32> to vector<1x64xf32>
    %586 = vector.broadcast %585 : vector<1x64xf32> to vector<8x64xf32>
    %587 = arith.addf %583, %586 : vector<8x64xf32>
    %c0_257 = arith.constant 0 : index
    %c0_258 = arith.constant 0 : index
    %588 = vector.load %arg24[%c0_257, %c0_258] : memref<1x64xf32, #tpu.memory_space<vmem>>, vector<1x64xf32>
    %589 = arith.mulf %587, %587 : vector<8x64xf32>
    %cst_259 = arith.constant dense<0.000000e+00> : vector<8xf32>
    %590 = vector.multi_reduction <add>, %589, %cst_259 [1] : vector<8x64xf32> to vector<8xf32>
    %591 = vector.shape_cast %590 : vector<8xf32> to vector<8x1xf32>
    %cst_260 = arith.constant 6.400000e+01 : f32
    %592 = vector.broadcast %cst_260 : f32 to vector<8x1xf32>
    %593 = arith.divf %591, %592 : vector<8x1xf32>
    %cst_261 = arith.constant 9.99999997E-7 : f32
    %594 = vector.broadcast %cst_261 : f32 to vector<8x1xf32>
    %595 = arith.addf %593, %594 : vector<8x1xf32>
    %596 = math.rsqrt %595 : vector<8x1xf32>
    %597 = vector.broadcast %596 : vector<8x1xf32> to vector<8x64xf32>
    %598 = arith.mulf %587, %597 : vector<8x64xf32>
    %599 = vector.broadcast %588 : vector<1x64xf32> to vector<8x64xf32>
    %600 = arith.mulf %598, %599 : vector<8x64xf32>
    %c0_262 = arith.constant 0 : index
    %c0_263 = arith.constant 0 : index
    %c0_264 = arith.constant 0 : index
    %601 = vector.load %arg28[%c0_262, %c0_263, %c0_264] : memref<1x8x64xf32, #tpu.memory_space<vmem>>, vector<1x8x64xf32>
    %602 = vector.shape_cast %601 : vector<1x8x64xf32> to vector<8x64xf32>
    %603 = vector.shape_cast %600 : vector<8x64xf32> to vector<1x8x64xf32>
    tpu.vector_store %arg28[%c0_262, %c0_263, %c0_264], %603 {strides = array<i32>} : memref<1x8x64xf32, #tpu.memory_space<vmem>>, vector<1x8x64xf32>,
    %c0_265 = arith.constant 0 : index
    %c0_266 = arith.constant 0 : index
    %604 = vector.load %arg25[%c0_265, %c0_266] : memref<64x128xf32, #tpu.memory_space<vmem>>, vector<64x128xf32>
    %cst_267 = arith.constant dense<0.000000e+00> : vector<8x128xf32>
    %605 = tpu.matmul %600, %604, %cst_267 {dimension_numbers = #tpu.dot_dimension_numbers<[1], [0], [0], [1], [0, 0, 1, 1], [], []>} : vector<8x64xf32>, vector<64x128xf32>, vector<8x128xf32> -> vector<8x128xf32>
    %c0_268 = arith.constant 0 : index
    %c0_269 = arith.constant 0 : index
    %606 = vector.load %arg26[%c0_268, %c0_269] : memref<1x128xf32, #tpu.memory_space<vmem>>, vector<1x128xf32>
    %607 = vector.broadcast %606 : vector<1x128xf32> to vector<8x128xf32>
    %608 = arith.addf %605, %607 : vector<8x128xf32>
    %c0_270 = arith.constant 0 : index
    %c0_271 = arith.constant 0 : index
    %c0_272 = arith.constant 0 : index
    %609 = vector.load %arg27[%c0_270, %c0_271, %c0_272] : memref<1x8x128xf32, #tpu.memory_space<vmem>>, vector<1x8x128xf32>
    %610 = vector.shape_cast %609 : vector<1x8x128xf32> to vector<8x128xf32>
    %611 = vector.shape_cast %608 : vector<8x128xf32> to vector<1x8x128xf32>
    tpu.vector_store %arg27[%c0_270, %c0_271, %c0_272], %611 {strides = array<i32>} : memref<1x8x128xf32, #tpu.memory_space<vmem>>, vector<1x8x128xf32>,
    return
  }
  func.func @transform_0(%arg0: i32) -> (i32, i32, i32) {
    %c0_i32 = arith.constant 0 : i32
    %c0_i32_0 = arith.constant 0 : i32
    %c0_i32_1 = arith.constant 0 : i32
    return %arg0, %c0_i32, %c0_i32_0 : i32, i32, i32
  }
  func.func @transform_1(%arg0: i32) -> (i32, i32, i32) {
    %c0_i32 = arith.constant 0 : i32
    %c0_i32_0 = arith.constant 0 : i32
    %c0_i32_1 = arith.constant 0 : i32
    return %arg0, %c0_i32, %c0_i32_0 : i32, i32, i32
  }
  func.func @transform_2(%arg0: i32) -> (i32, i32, i32) {
    %c0_i32 = arith.constant 0 : i32
    %c0_i32_0 = arith.constant 0 : i32
    %c0_i32_1 = arith.constant 0 : i32
    return %arg0, %c0_i32, %c0_i32_0 : i32, i32, i32
  }
  func.func @transform_3(%arg0: i32) -> (i32, i32) {
    %c0_i32 = arith.constant 0 : i32
    %c0_i32_0 = arith.constant 0 : i32
    %c0_i32_1 = arith.constant 0 : i32
    return %c0_i32, %c0_i32_0 : i32, i32
  }
  func.func @transform_4(%arg0: i32) -> (i32, i32) {
    %c0_i32 = arith.constant 0 : i32
    %c0_i32_0 = arith.constant 0 : i32
    %c0_i32_1 = arith.constant 0 : i32
    return %c0_i32, %c0_i32_0 : i32, i32
  }
  func.func @transform_5(%arg0: i32) -> (i32, i32) {
    %c0_i32 = arith.constant 0 : i32
    %c0_i32_0 = arith.constant 0 : i32
    %c0_i32_1 = arith.constant 0 : i32
    return %c0_i32, %c0_i32_0 : i32, i32
  }
  func.func @transform_6(%arg0: i32) -> (i32, i32, i32) {
    %c0_i32 = arith.constant 0 : i32
    %c0_i32_0 = arith.constant 0 : i32
    %c0_i32_1 = arith.constant 0 : i32
    %c0_i32_2 = arith.constant 0 : i32
    return %c0_i32, %c0_i32_0, %c0_i32_1 : i32, i32, i32
  }
  func.func @transform_7(%arg0: i32) -> (i32, i32, i32) {
    %c0_i32 = arith.constant 0 : i32
    %c0_i32_0 = arith.constant 0 : i32
    %c0_i32_1 = arith.constant 0 : i32
    %c0_i32_2 = arith.constant 0 : i32
    return %c0_i32, %c0_i32_0, %c0_i32_1 : i32, i32, i32
  }
  func.func @transform_8(%arg0: i32) -> (i32, i32, i32) {
    %c0_i32 = arith.constant 0 : i32
    %c0_i32_0 = arith.constant 0 : i32
    %c0_i32_1 = arith.constant 0 : i32
    %c0_i32_2 = arith.constant 0 : i32
    return %c0_i32, %c0_i32_0, %c0_i32_1 : i32, i32, i32
  }
  func.func @transform_9(%arg0: i32) -> (i32, i32, i32) {
    %c0_i32 = arith.constant 0 : i32
    %c0_i32_0 = arith.constant 0 : i32
    %c0_i32_1 = arith.constant 0 : i32
    %c0_i32_2 = arith.constant 0 : i32
    return %c0_i32, %c0_i32_0, %c0_i32_1 : i32, i32, i32
  }
  func.func @transform_10(%arg0: i32) -> (i32, i32, i32) {
    %c0_i32 = arith.constant 0 : i32
    %c0_i32_0 = arith.constant 0 : i32
    %c0_i32_1 = arith.constant 0 : i32
    %c0_i32_2 = arith.constant 0 : i32
    return %c0_i32, %c0_i32_0, %c0_i32_1 : i32, i32, i32
  }
  func.func @transform_11(%arg0: i32) -> (i32, i32, i32) {
    %c0_i32 = arith.constant 0 : i32
    %c0_i32_0 = arith.constant 0 : i32
    %c0_i32_1 = arith.constant 0 : i32
    %c0_i32_2 = arith.constant 0 : i32
    return %c0_i32, %c0_i32_0, %c0_i32_1 : i32, i32, i32
  }
  func.func @transform_12(%arg0: i32) -> (i32, i32, i32) {
    %c0_i32 = arith.constant 0 : i32
    %c0_i32_0 = arith.constant 0 : i32
    %c0_i32_1 = arith.constant 0 : i32
    %c0_i32_2 = arith.constant 0 : i32
    return %c0_i32, %c0_i32_0, %c0_i32_1 : i32, i32, i32
  }
  func.func @transform_13(%arg0: i32) -> (i32, i32, i32) {
    %c0_i32 = arith.constant 0 : i32
    %c0_i32_0 = arith.constant 0 : i32
    %c0_i32_1 = arith.constant 0 : i32
    %c0_i32_2 = arith.constant 0 : i32
    return %c0_i32, %c0_i32_0, %c0_i32_1 : i32, i32, i32
  }
  func.func @transform_14(%arg0: i32) -> (i32, i32, i32) {
    %c0_i32 = arith.constant 0 : i32
    %c0_i32_0 = arith.constant 0 : i32
    %c0_i32_1 = arith.constant 0 : i32
    %c0_i32_2 = arith.constant 0 : i32
    return %c0_i32, %c0_i32_0, %c0_i32_1 : i32, i32, i32
  }
  func.func @transform_15(%arg0: i32) -> (i32, i32, i32) {
    %c0_i32 = arith.constant 0 : i32
    %c0_i32_0 = arith.constant 0 : i32
    %c0_i32_1 = arith.constant 0 : i32
    %c0_i32_2 = arith.constant 0 : i32
    return %c0_i32, %c0_i32_0, %c0_i32_1 : i32, i32, i32
  }
  func.func @transform_16(%arg0: i32) -> (i32, i32, i32) {
    %c0_i32 = arith.constant 0 : i32
    %c0_i32_0 = arith.constant 0 : i32
    %c0_i32_1 = arith.constant 0 : i32
    %c0_i32_2 = arith.constant 0 : i32
    return %c0_i32, %c0_i32_0, %c0_i32_1 : i32, i32, i32
  }
  func.func @transform_17(%arg0: i32) -> (i32, i32, i32) {
    %c0_i32 = arith.constant 0 : i32
    %c0_i32_0 = arith.constant 0 : i32
    %c0_i32_1 = arith.constant 0 : i32
    %c0_i32_2 = arith.constant 0 : i32
    return %c0_i32, %c0_i32_0, %c0_i32_1 : i32, i32, i32
  }
  func.func @transform_18(%arg0: i32) -> (i32, i32, i32) {
    %c0_i32 = arith.constant 0 : i32
    %c0_i32_0 = arith.constant 0 : i32
    %c0_i32_1 = arith.constant 0 : i32
    %c0_i32_2 = arith.constant 0 : i32
    return %c0_i32, %c0_i32_0, %c0_i32_1 : i32, i32, i32
  }
  func.func @transform_19(%arg0: i32) -> (i32, i32, i32) {
    %c0_i32 = arith.constant 0 : i32
    %c0_i32_0 = arith.constant 0 : i32
    %c0_i32_1 = arith.constant 0 : i32
    %c0_i32_2 = arith.constant 0 : i32
    return %c0_i32, %c0_i32_0, %c0_i32_1 : i32, i32, i32
  }
  func.func @transform_20(%arg0: i32) -> (i32, i32, i32) {
    %c0_i32 = arith.constant 0 : i32
    %c0_i32_0 = arith.constant 0 : i32
    %c0_i32_1 = arith.constant 0 : i32
    %c0_i32_2 = arith.constant 0 : i32
    return %c0_i32, %c0_i32_0, %c0_i32_1 : i32, i32, i32
  }
  func.func @transform_21(%arg0: i32) -> (i32, i32, i32) {
    %c0_i32 = arith.constant 0 : i32
    %c0_i32_0 = arith.constant 0 : i32
    %c0_i32_1 = arith.constant 0 : i32
    %c0_i32_2 = arith.constant 0 : i32
    return %c0_i32, %c0_i32_0, %c0_i32_1 : i32, i32, i32
  }
  func.func @transform_22(%arg0: i32) -> (i32, i32, i32) {
    %c0_i32 = arith.constant 0 : i32
    %c0_i32_0 = arith.constant 0 : i32
    %c0_i32_1 = arith.constant 0 : i32
    %c0_i32_2 = arith.constant 0 : i32
    return %c0_i32, %c0_i32_0, %c0_i32_1 : i32, i32, i32
  }
  func.func @transform_23(%arg0: i32) -> (i32, i32) {
    %c0_i32 = arith.constant 0 : i32
    %c0_i32_0 = arith.constant 0 : i32
    %c0_i32_1 = arith.constant 0 : i32
    return %c0_i32, %c0_i32_0 : i32, i32
  }
  func.func @transform_24(%arg0: i32) -> (i32, i32) {
    %c0_i32 = arith.constant 0 : i32
    %c0_i32_0 = arith.constant 0 : i32
    %c0_i32_1 = arith.constant 0 : i32
    return %c0_i32, %c0_i32_0 : i32, i32
  }
  func.func @transform_25(%arg0: i32) -> (i32, i32) {
    %c0_i32 = arith.constant 0 : i32
    %c0_i32_0 = arith.constant 0 : i32
    %c0_i32_1 = arith.constant 0 : i32
    return %c0_i32, %c0_i32_0 : i32, i32
  }
  func.func @transform_26(%arg0: i32) -> (i32, i32, i32) {
    %c0_i32 = arith.constant 0 : i32
    %c0_i32_0 = arith.constant 0 : i32
    %c0_i32_1 = arith.constant 0 : i32
    return %arg0, %c0_i32, %c0_i32_0 : i32, i32, i32
  }
  func.func @transform_27(%arg0: i32) -> (i32, i32, i32) {
    %c0_i32 = arith.constant 0 : i32
    %c0_i32_0 = arith.constant 0 : i32
    %c0_i32_1 = arith.constant 0 : i32
    return %arg0, %c0_i32, %c0_i32_0 : i32, i32, i32
  }
}

</mosaic_0001>

<bundles_post_ra>
// kernel: vlmo_encoder_decoder_forward.2
= control target key start
LH: loop header
LB: loop body
LE: loop exit
PB: predicated region body
PF: predicated region fallthrough
CT: control target
= control target key end

     0   :  { %s5919_s24 = smov 0   ;;  %s7206_s0 = inlined_call_operand.vmem [shape: f32[2,17,192], index: 0, kind: input, shape index: {}]   ;;  %s7207_s1 = inlined_call_operand.vmem [shape: f32[17,64], index: 1, kind: input, shape index: {}]   ;;  %s7208_s2 = inlined_call_operand.vmem [shape: f32[192,64], index: 2, kind: input, shape index: {}]   ;;  %s7209_s3 = inlined_call_operand.vmem [shape: f32[2,1,64], index: 3, kind: input, shape index: {}]   ;;  %s7210_s4 = inlined_call_operand.vmem [shape: f32[2,1,64], index: 4, kind: input, shape index: {}]   ;;  %s7211_s5 = inlined_call_operand.vmem [shape: f32[2,64,192], index: 5, kind: input, shape index: {}]   ;;  %s7212_s6 = inlined_call_operand.vmem [shape: f32[2,1,192], index: 6, kind: input, shape index: {}]   ;;  %s7213_s7 = inlined_call_operand.vmem [shape: f32[2,64,64], index: 7, kind: input, shape index: {}]   ;;  %s7214_s8 = inlined_call_operand.vmem [shape: f32[2,1,64], index: 8, kind: input, shape index: {}]   ;;  %s7215_s9 = inlined_call_operand.vmem [shape: f32[2,1,64], index: 9, kind: input, shape index: {}]   ;;  %s7216_s10 = inlined_call_operand.vmem [shape: f32[2,1,64], index: 10, kind: input, shape index: {}]   ;;  %s7217_s11 = inlined_call_operand.vmem [shape: f32[2,64,256], index: 11, kind: input, shape index: {}]   ;;  %s7218_s12 = inlined_call_operand.vmem [shape: f32[2,1,256], index: 12, kind: input, shape index: {}]   ;;  %s7219_s13 = inlined_call_operand.vmem [shape: f32[2,256,64], index: 13, kind: input, shape index: {}]   ;;  %s7220_s14 = inlined_call_operand.vmem [shape: f32[2,1,64], index: 14, kind: input, shape index: {}]   ;;  %s7221_s15 = inlined_call_operand.vmem [shape: f32[1,64], index: 15, kind: input, shape index: {}]   ;;  %s7222_s16 = inlined_call_operand.vmem [shape: f32[1,64], index: 16, kind: input, shape index: {}]   ;;  %s7223_s17 = inlined_call_operand.vmem [shape: f32[2,17,64], index: 17, kind: output, shape index: {}]  }
   0x1   :  { %7235 = sst [smem:[#allocation2_spill]] %s7206_s0 }
   0x2   :  { %7236 = sst [smem:[#allocation3_spill]] %s7207_s1 }
   0x3 LB: > { %s4543_s25 = sadd.s32 4294967295, %s5817_s24   ;;  %p4547_p0 = scmp.ge.s32.totalorder %s5817_s24, 1  ;;  %s5817_s24 = sphi %s5919_s24, %s27_s24  }
   0x4   : > { %p487_p1 = scmp.lt.s32.totalorder %s5817_s24, 3 }
   0x6   : > { %p488_p2 = pnand %p4547_p0, %p487_p1 }
   0x7   : > { %v555_v0 = vld [vmem:[%s7208_s2] sm:$0xff] (!%p488_p2)  ;;  %v556_v1 = vld [vmem:[%s7208_s2 + $0x8] sm:$0xff] (!%p488_p2)  ;;  %v557_v2 = vld [vmem:[%s7208_s2 + $0x10] sm:$0xff] (!%p488_p2)  ;;  %p539_p3 = scmp.lt.s32.totalorder (!%p488_p2), %s4543_s25, 1  ;;  %v5819_v3 = vmov (!%p488_p2), 0.0|0.0   ;;  %s7237_s28 = sld [smem:[#allocation2_spill]] (!%p488_p2) }
   0x8   : > { %491 = sbr.rel (%p488_p2) target bundleno = 8600 (0x2198), region = 88  ;;  %5327 = vmatprep.subr.bf16.mxu0 (!%p488_p2), %v5819_v3  ;;  %v5328_v4 = vpack.c.bf16 (!%p488_p2), %v556_v1, %v555_v0  ;;  %v558_v5 = vld [vmem:[%s7208_s2 + $0x18] sm:$0xff] (!%p488_p2)  ;;  %v559_v7 = vld [vmem:[%s7208_s2 + $0x20] sm:$0xff] (!%p488_p2)  ;;  %v560_v8 = vld [vmem:[%s7208_s2 + $0x28] sm:$0xff] (!%p488_p2)  ;;  %vm582_vm0 = vcmask (!%p488_p2), 523264   ;;  %s7238_s18 = sld [smem:[#allocation3_spill]] (!%p488_p2) }
   0x9   : > { %v5331_v6 = vpack.c.bf16 (!%p488_p2), %v558_v5, %v557_v2  ;;  %v5334_v9 = vpack.c.bf16 (!%p488_p2), %v560_v8, %v559_v7  ;;  %v561_v10 = vld [vmem:[%s7208_s2 + $0x30] sm:$0xff] (!%p488_p2)  ;;  %v562_v11 = vld [vmem:[%s7208_s2 + $0x38] sm:$0xff] (!%p488_p2)  ;;  %v563_v14 = vld [vmem:[%s7208_s2 + $0x40] sm:$0xff] (!%p488_p2)  ;;  %vm680_vm1 = vcmask (!%p488_p2), 516096   ;;  %vm5822_vm2 = vmmov (!%p488_p2), 0   ;;  %s5823_s26 = smov (!%p488_p2), 48  }
   0xa   : > { %5329 = vmatpush1.bf16.msra.mxu0 (!%p488_p2), %v5328_v4  ;;  %v5337_v13 = vpack.c.bf16 (!%p488_p2), %v562_v11, %v561_v10  ;;  %v564_v15 = vld [vmem:[%s7208_s2 + $0x48] sm:$0xff] (!%p488_p2)  ;;  %v565_v17 = vld [vmem:[%s7208_s2 + $0x50] sm:$0xff] (!%p488_p2)  ;;  %v566_v18 = vld [vmem:[%s7208_s2 + $0x58] sm:$0xff] (!%p488_p2)  ;;  %vm870_vm3 = vcmask (!%p488_p2), 130048   ;;  %vm1010_vm5 = vcmask (!%p488_p2), 1040384   ;;  %vm966_vm6 = vcmask (!%p488_p2), 138240  }
   0xb   : > { %5330 = vmatprep.subr.bf16.mxu0 (!%p488_p2), %v5819_v3  ;;  %v5340_v16 = vpack.c.bf16 (!%p488_p2), %v564_v15, %v563_v14  ;;  %v5343_v19 = vpack.c.bf16 (!%p488_p2), %v566_v18, %v565_v17  ;;  %v567_v20 = vld [vmem:[%s7208_s2 + $0x60] sm:$0xff] (!%p488_p2)  ;;  %v568_v21 = vld [vmem:[%s7208_s2 + $0x68] sm:$0xff] (!%p488_p2)  ;;  %v569_v23 = vld [vmem:[%s7208_s2 + $0x70] sm:$0xff] (!%p488_p2)  ;;  %vm973_vm7 = vcmask (!%p488_p2), 131072   ;;  %s7233_s27 = smov (!%p488_p2), 112   ;;  %s7231_s1 = smov (!%p488_p2), 32  }
   0xc   : > { %v5346_v22 = vpack.c.bf16 (!%p488_p2), %v568_v21, %v567_v20  ;;  %v570_v24 = vld [vmem:[%s7208_s2 + $0x78] sm:$0xff] (!%p488_p2)  ;;  %v571_v26 = vld [vmem:[%s7208_s2 + $0x80] sm:$0xff] (!%p488_p2)  ;;  %v572_v27 = vld [vmem:[%s7208_s2 + $0x88] sm:$0xff] (!%p488_p2)  ;;  %s7227_s0 = smov (!%p488_p2), 16   ;;  %s7225_s30 = smov (!%p488_p2), 80  }
   0xd   : > { %v5349_v25 = vpack.c.bf16 (!%p488_p2), %v570_v24, %v569_v23  ;;  %v5352_v28 = vpack.c.bf16 (!%p488_p2), %v572_v27, %v571_v26  ;;  %v573_v29 = vld [vmem:[%s7208_s2 + $0x90] sm:$0xff] (!%p488_p2)  ;;  %v574_v30 = vld [vmem:[%s7208_s2 + $0x98] sm:$0xff] (!%p488_p2)  ;;  %v575_v32 = vld [vmem:[%s7208_s2 + $0xa0] sm:$0xff] (!%p488_p2)  ;;  %s7241_s21 = smov (!%p488_p2), 112   ;;  %s7244_s20 = smov (!%p488_p2), 16  }
   0xe   : > { %5332 = vmatpush1.bf16.msra.mxu0 (!%p488_p2), %v5331_v6  ;;  %v5355_v31 = vpack.c.bf16 (!%p488_p2), %v574_v30, %v573_v29  ;;  %v576_v33 = vld [vmem:[%s7208_s2 + $0xa8] sm:$0xff] (!%p488_p2)  ;;  %v577_v35 = vld [vmem:[%s7208_s2 + $0xb0] sm:$0xff] (!%p488_p2)  ;;  %v578_v36 = vld [vmem:[%s7208_s2 + $0xb8] sm:$0xff] (!%p488_p2) }
   0xf   : > { %s7247_s25 = smov (!%p539_p3, %s4543_s25), 1  ;;  %5333 = vmatprep.subr.bf16.mxu0 %v5819_v3  ;;  %v5358_v34 = vpack.c.bf16 %v576_v33, %v575_v32  ;;  %v5361_v37 = vpack.c.bf16 %v578_v36, %v577_v35  ;;  %v579_v43 = vld [vmem:[%s7238_s18] sm:$0xff]  ;;  %v580_v47 = vld [vmem:[%s7238_s18 + $0x8] sm:$0xff]  ;;  %v581_v52 = vld [vmem:[%s7238_s18 + $0x10] sm:$0x1]  ;;  %v5820_v33 = vmov 0.0  }
  0x10   : > { %s5571_s23 = smul.u32 48, %s7247_s25  ;;  %v734_v10 = vld [vmem:[%s7211_s5 + $0x8] sm:$0xff]  ;;  %v736_v11 = vld [vmem:[%s7211_s5 + $0x18] sm:$0xff]  ;;  %v735_v14 = vld [vmem:[%s7211_s5 + $0x10] sm:$0xff]  ;;  %834 = vmatprep.mubr.f32.mxu1 %v5820_v33 }
  0x11   : > { %v740_v17 = vld [vmem:[%s7211_s5 + $0x38] sm:$0xff]  ;;  %v739_v20 = vld [vmem:[%s7211_s5 + $0x30] sm:$0xff]  ;;  %v745_v30 = vld [vmem:[%s7211_s5 + $0x60] sm:$0xff] }
  0x12   : > { %s5953_s29 = scalar_lea.vmem %s7237_s28, %s5571_s23  ;;  %5335 = vmatpush1.bf16.msra.mxu0 %v5334_v9  ;;  %v744_v23 = vld [vmem:[%s7211_s5 + $0x58] sm:$0xff]  ;;  %v743_v26 = vld [vmem:[%s7211_s5 + $0x50] sm:$0xff]  ;;  %s5821_s23 = smov 64   ;;  %vm6163_vm4 = vmpackc.low %vm870_vm3, %vm870_vm3 }
  0x13   : > { %v550_v12 = vld [vmem:[%s5953_s29 + $0x8] sm:$0xff]  ;;  %5336 = vmatprep.subr.bf16.mxu0 %v5819_v3  ;;  %v549_v38 = vld [vmem:[%s5953_s29] sm:$0xff]  ;;  %v552_v39 = vld [vmem:[%s5953_s29 + $0x18] sm:$0xff] }
  0x14   : > { %4550 = vmatprep.mubr.msk.f32.mxu0 %vm582_vm0, %v550_v12  ;;  %v551_v40 = vld [vmem:[%s5953_s29 + $0x10] sm:$0xff]  ;;  %v554_v41 = vld [vmem:[%s5953_s29 + $0x28] sm:$0x1]  ;;  %v553_v42 = vld [vmem:[%s5953_s29 + $0x20] sm:$0x1]  ;;  %v5363_v12 = vpack.c.bf16 %v736_v11, %v734_v10  ;;  %s7229_s29 = smov 96  }
  0x15   : > { %v748_v29 = vld [vmem:[%s7211_s5 + $0x78] sm:$0xff]  ;;  %v747_v32 = vld [vmem:[%s7211_s5 + $0x70] sm:$0xff] }
  0x16   : > { %5338 = vmatpush1.bf16.msra.mxu0 %v5337_v13  ;;  %v733_v13 = vld [vmem:[%s7211_s5] sm:$0xff]  ;;  %5364 = vmatprep.subr.bf16.mxu1 %v5363_v12 }
  0x17   : > { %5339 = vmatprep.subr.bf16.mxu0 %v5819_v3  ;;  %v5365_v15 = vpack.c.bf16 %v735_v14, %v733_v13 }
  0x19   : > { %5366 = vmatpush1.bf16.msra.mxu1 %v5365_v15 }
  0x1a   : > { %5341 = vmatpush1.bf16.msra.mxu0 %v5340_v16  ;;  %v738_v16 = vld [vmem:[%s7211_s5 + $0x28] sm:$0xff] }
  0x1b   : > { %5342 = vmatprep.subr.bf16.mxu0 %v5819_v3  ;;  %v5367_v18 = vpack.c.bf16 %v740_v17, %v738_v16 }
  0x1d   : > { %5368 = vmatprep.subr.bf16.mxu1 %v5367_v18 }
  0x1e   : > { %5344 = vmatpush1.bf16.msra.mxu0 %v5343_v19  ;;  %v737_v19 = vld [vmem:[%s7211_s5 + $0x20] sm:$0xff] }
  0x1f   : > { %5345 = vmatprep.subr.bf16.mxu0 %v5819_v3  ;;  %v5369_v21 = vpack.c.bf16 %v739_v20, %v737_v19 }
  0x21   : > { %5370 = vmatpush1.bf16.msra.mxu1 %v5369_v21 }
  0x22   : > { %5347 = vmatpush1.bf16.msra.mxu0 %v5346_v22  ;;  %v742_v22 = vld [vmem:[%s7211_s5 + $0x48] sm:$0xff] }
  0x23   : > { %5348 = vmatprep.subr.bf16.mxu0 %v5819_v3  ;;  %v5371_v24 = vpack.c.bf16 %v744_v23, %v742_v22 }
  0x25   : > { %5372 = vmatprep.subr.bf16.mxu1 %v5371_v24 }
  0x26   : > { %5350 = vmatpush1.bf16.msra.mxu0 %v5349_v25  ;;  %v741_v25 = vld [vmem:[%s7211_s5 + $0x40] sm:$0xff] }
  0x27   : > { %5351 = vmatprep.subr.bf16.mxu0 %v5819_v3  ;;  %v5373_v27 = vpack.c.bf16 %v743_v26, %v741_v25 }
  0x29   : > { %5374 = vmatpush1.bf16.msra.mxu1 %v5373_v27 }
  0x2a   : > { %5353 = vmatpush1.bf16.msra.mxu0 %v5352_v28  ;;  %v746_v28 = vld [vmem:[%s7211_s5 + $0x68] sm:$0xff] }
  0x2b   : > { %5354 = vmatprep.subr.bf16.mxu0 %v5819_v3 }
  0x2e   : > { %5356 = vmatpush1.bf16.msra.mxu0 %v5355_v31  ;;  %v5375_v31 = vpack.c.bf16 %v748_v29, %v746_v28 }
  0x2f   : > { %5357 = vmatprep.subr.bf16.mxu0 %v5819_v3 }
  0x30   : > { %5376 = vmatprep.subr.bf16.mxu1 %v5375_v31 }
  0x32   : > { %5359 = vmatpush1.bf16.msra.mxu0 %v5358_v34  ;;  %v5377_v34 = vpack.c.bf16 %v747_v32, %v745_v30 }
  0x33   : > { %5360 = vmatprep.subr.bf16.mxu0 %v5819_v3 }
  0x34   : > { %5378 = vmatpush1.bf16.msra.mxu1 %v5377_v34 }
  0x35   : > { %5379 = vmatprep.subr.bf16.mxu1 %v5819_v3 }
  0x36   : > { %5362 = vmatpush1.bf16.msra.mxu0 %v5361_v37 }
  0x37   : > { %5396 = vmatprep.subr.bf16.mxu0 %v5819_v3 }
  0x39   : > { %657 = vmatmul.mubr.f32.vlgmr.msra.gmra.mrb[0].mxu0 %v549_v38 }
  0x3a   : > { %4551 = vmatprep.mubr.msk.f32.mxu0 %vm582_vm0, %v552_v39 }
  0x3d   : > { %662 = vmatmul.mubr.f32.gmra.mrb[2].mxu0 %v551_v40 }
  0x3e   : > { %4552 = vmatprep.mubr.msk.f32.mxu0 %vm582_vm0, %v554_v41 }
  0x41   : > { %667 = vmatmul.mubr.f32.gmra.mrb[4].mxu0 %v553_v42 }
  0x42   : > { %5060 = vmatprep.mubr.msk.f32.mxu0 %vm5822_vm2, %v5820_v33 }
 0x10c   : > { %v658_v44 = vpop.f32.mrb[0].mxu0 }
 0x10d   : > { %v6032_v45 = vadd.f32 %v658_v44, %v579_v43  ;;  %v660_v46 = vpop.f32.mrb[1].mxu0 }
 0x10e   : > { %v4553_v46 = vld [vmem:[%s7209_s3] ss:$0 sm:$0xff] }
 0x10f   : > { %v674_v48 = vsel %vm582_vm0, %v6032_v45, 0.0 }
 0x110   : > { %v663_v49 = vpop.f32.mrb[2].mxu0  ;;  %675 = vadd.xlane.f32.xlu0 %v674_v48  ;;  %v4554_v48 = vld [vmem:[%s7210_s4] ss:$0 sm:$0xff] }
 0x111   : > { %v6039_v50 = vadd.f32 %v663_v49, %v580_v47  ;;  %v665_v51 = vpop.f32.mrb[3].mxu0 }
 0x113   : > { %v677_v53 = vsel %vm582_vm0, %v6039_v50, 0.0 }
 0x114   : > { %v668_v54 = vpop.f32.mrb[4].mxu0  ;;  %678 = vadd.xlane.f32.xlu0 %v677_v53 }
 0x115   : > { %v6046_v55 = vadd.f32 %v668_v54, %v581_v52  ;;  %v670_v56 = vpop.f32.mrb[5].mxu0 }
 0x117   : > { %v681_v57 = vsel %vm680_vm1, %v6046_v55, 0.0 }
 0x118   : > { %682 = vadd.xlane.f32.xlu1 %v681_v57 }
 0x19d   : > { %v676_v58 = vpop.xlane.xlu0 %675 }
 0x19e   : > { %v685_v59 = vmul.f32 0.015625, %v676_v58 }
 0x1a0   : > { %v6051_v60 = vsub.f32 %v6032_v45, %v685_v59 }
 0x1a1   : > { %v679_v61 = vpop.xlane.xlu0 %678 }
 0x1a2   : > { %v686_v62 = vmul.f32 0.015625, %v679_v61  ;;  %v691_v63 = vmul.f32 %v6051_v60, %v6051_v60  ;;  %v751_v61 = vlaneseq }
 0x1a4   : > { %v6056_v0 = vsub.f32 %v6039_v50, %v686_v62  ;;  %v694_v1 = vsel %vm582_vm0, %v691_v63, 0.0  ;;  %v752_v62 = vshrl.u32 %v751_v61, 7 }
 0x1a5   : > { %v683_v2 = vpop.xlane.xlu1 %682  ;;  %695 = vadd.xlane.f32.xlu1 %v694_v1 }
 0x1a6   : > { %v687_v4 = vmul.f32 0.015625, %v683_v2  ;;  %v692_v5 = vmul.f32 %v6056_v0, %v6056_v0  ;;  %v6132_v63 = vsub.s32 0, %v752_v62  ;;  %v6137_v1 = vsub.s32 1, %v752_v62 }
 0x1a8   : > { %v6062_v6 = vsub.f32 %v6046_v55, %v687_v4  ;;  %v697_v7 = vsel %vm582_vm0, %v692_v5, 0.0 }
 0x1a9   : > { %698 = vadd.xlane.f32.xlu0 %v697_v7 }
 0x1aa   : > { %v693_v8 = vmul.f32 %v6062_v6, %v6062_v6 }
 0x1ac   : > { %v700_v9 = vsel %vm680_vm1, %v693_v8, 0.0 }
 0x1ad   : > { %701 = vadd.xlane.f32.xlu1 %v700_v9 }
 0x232   : > { %v696_v35 = vpop.xlane.xlu1 %695 }
 0x233   : > { %v703_v36 = vmul.f32 0.015625, %v696_v35 }
 0x235   : > { %v706_v37 = vadd.f32 1e-06, %v703_v36 }
 0x236   : > { %v699_v38 = vpop.xlane.xlu0 %698 }
 0x237   : > { %5661 = vrsqrt.f32 %v706_v37  ;;  %v704_v39 = vmul.f32 0.015625, %v699_v38 }
 0x239   : > { %v707_v40 = vadd.f32 1e-06, %v704_v39 }
 0x23a   : > { %v702_v41 = vpop.xlane.xlu1 %701 }
 0x23b   : > { %5663 = vrsqrt.f32 %v707_v40  ;;  %v705_v42 = vmul.f32 0.015625, %v702_v41 }
 0x23d   : > { %v708_v43 = vadd.f32 1e-06, %v705_v42 }
 0x23f   : > { %5665 = vrsqrt.f32 %v708_v43 }
 0x241   : > { %v5662_v44 = vpop.eup %5661 }
 0x242   : > { %v712_v47 = vmul.f32 %v5662_v44, %v6051_v60 }
 0x244   : > { %v721_v49 = vmul.f32 %v4553_v46, %v712_v47 }
 0x245   : > { %v5664_v51 = vpop.eup %5663 }
 0x246   : > { %v730_v52 = vadd.f32 %v4554_v48, %v721_v49  ;;  %v713_v53 = vmul.f32 %v5664_v51, %v6056_v0  ;;  %v749_v0 = vld [vmem:[%s7212_s6] sm:$0x3] }
 0x247   : > { %v754_v4 = vrot.slane %v749_v0, %v6132_v63 }
 0x248   : > { %4555 = vmatmul.mubr.msk.f32.vlgmr.msra.gmra.mrb[0].mxu1 %vm582_vm0, %v730_v52  ;;  %v722_v54 = vmul.f32 %v4553_v46, %v713_v53 }
 0x249   : > { %v5666_v56 = vpop.eup %5665  ;;  %840 = vmatprep.mubr.f32.mxu1 %v5820_v33 }
 0x24a   : > { %v731_v57 = vadd.f32 %v4554_v48, %v722_v54  ;;  %v714_v58 = vmul.f32 %v5666_v56, %v6062_v6  ;;  %v758_v6 = vrot.slane %v749_v0, %v6137_v1 }
 0x24c   : > { %4556 = vmatmul.mubr.msk.f32.gmra.mrb[2].mxu1 %vm582_vm0, %v731_v57  ;;  %v723_v59 = vmul.f32 %v4553_v46, %v714_v58  ;;  %v853_v57 = vld [vmem:[%s7213_s7] sm:$0xff]  ;;  %v854_v58 = vld [vmem:[%s7213_s7 + $0x8] sm:$0xff] }
 0x24d   : > { %846 = vmatprep.mubr.f32.mxu1 %v5820_v33 }
 0x24e   : > { %v732_v60 = vadd.f32 %v4554_v48, %v723_v59  ;;  %v5397_v59 = vpack.c.bf16 %v854_v58, %v853_v57 }
 0x250   : > { %4557 = vmatmul.mubr.msk.f32.gmra.mrb[4].mxu1 %vm582_vm0, %v732_v60  ;;  %5398 = vmatpush3.bf16.msra.mxu0 %v5397_v59 }
 0x251   : > { %4989 = vmatprep.mubr.msk.f32.mxu1 %vm5822_vm2, %v5820_v33  ;;  %5403 = vmatprep.subr.bf16.mxu0 %v5819_v3 }
 0x31b   : > { %v836_v2 = vpop.f32.mrb[0].mxu1 }
 0x31c   : > { %v838_v5 = vpop.f32.mrb[1].mxu1  ;;  %v6141_v8 = vadd.f32 %v836_v2, %v754_v4 }
 0x31d   : > { %v839_v11 = vadd.f32 %v838_v5, %v758_v6 }
 0x31f   : > { %v842_v7 = vpop.f32.mrb[2].mxu1 }
 0x320   : > { %v6143_v9 = vadd.f32 %v842_v7, %v754_v4  ;;  %v844_v10 = vpop.f32.mrb[3].mxu1 }
 0x321   : > { %v845_v12 = vadd.f32 %v844_v10, %v758_v6 }
 0x322   : > { %v6147_v13 = vpack.i.bf16 %v6143_v9, %v6141_v8 }
 0x323   : > { %v848_v14 = vpop.f32.mrb[4].mxu1  ;;  %v5384_v15 = vpack.c.bf16 %v845_v12, %v839_v11  ;;  %v6149_v16 = vpack.i.bf16 %v845_v12, %v839_v11 }
 0x324   : > { %v6151_v17 = vadd.f32 %v848_v14, %v754_v4  ;;  %v850_v18 = vpop.f32.mrb[5].mxu1  ;;  %5592 = vrot.lane.b32.xlu0 %v6147_v13, %s5821_s23 }
 0x325   : > { %v6177_v25 = vadd.f32 %v850_v18, %v758_v6 }
 0x326   : > { %868 = vrot.lane.b32.xlu1 %v6151_v17, %s5821_s23 }
 0x396   : > { %v5593_v19 = vpop.permute.xlu0 %5592 }
 0x397   : > { %v5595_v20 = vunpack.i.h.bf16 %v5593_v19  ;;  %v5594_v21 = vunpack.i.l.bf16 %v5593_v19 }
 0x398   : > { %v869_v24 = vpop.permute.xlu1 %868 }
 0x399   : > { %v5380_v23 = vpack.c.bf16 %v5595_v20, %v5594_v21 }
 0x39b   : > { %5382 = vmatpush3.bf16.xpose.msk.msra.mxu1 %vm6163_vm4, %v5380_v23 }
 0x39c   : > { %4987 = vmatprep.subr.mxu1 %v5820_v33 }
 0x3a3   : > { %4988 = vmatpush3.xpose.msk.msra.mxu1 %vm870_vm3, %v869_v24 }
 0x3a4   : > { %5383 = vmatprep.subr.bf16.mxu1 %v5819_v3 }
 0x3a6   : > { %4990 = vmatmul.mubr.msk.f32.vlgmr.msra.gmra.mrb[6].mxu1 %vm870_vm3, %v6141_v8 }
 0x3a7   : > { %5385 = vmatpush3.bf16.msra.mxu1 %v5384_v15  ;;  %4992 = vmatprep.mubr.msk.f32.mxu1 %vm5822_vm2, %v5820_v33 }
 0x3a8   : > { %5002 = vmatprep.subr.mxu1 %v5820_v33 }
 0x3aa   : > { %4993 = vmatmul.mubr.msk.f32.gmra.mrb[8].mxu1 %vm870_vm3, %v6143_v9 }
 0x3ab   : > { %5003 = vmatpush3.msk.msra.mxu1 %vm1010_vm5, %v6177_v25  ;;  %4995 = vmatprep.mubr.msk.f32.mxu1 %vm5822_vm2, %v5820_v33 }
 0x3ac   : > { %5386 = vmatprep.subr.bf16.mxu1 %v5819_v3 }
 0x3ae   : > { %4996 = vmatmul.mubr.msk.f32.gmra.mrb[10].mxu1 %vm870_vm3, %v6151_v17 }
 0x3af   : > { %5004 = vmatprep.mubr.msk.f32.mxu1 %vm5822_vm2, %v5820_v33 }
 0x479   : > { %v949_v26 = vpop.f32.mrb[6].mxu1 }
 0x47a   : > { %v963_v27 = vmul.f32 0.25, %v949_v26  ;;  %v4991_v28 = vpop.f32.mrb[7].mxu1 }
 0x47c   : > { %v967_v29 = vsel %vm966_vm6, %v963_v27, -inf }
 0x47d   : > { %968 = vmax.xlane.f32.xlu1 %v967_v29  ;;  %v954_v30 = vpop.f32.mrb[8].mxu1 }
 0x47e   : > { %v964_v31 = vmul.f32 0.25, %v954_v30  ;;  %v4994_v32 = vpop.f32.mrb[9].mxu1 }
 0x480   : > { %v970_v34 = vsel %vm966_vm6, %v964_v31, -inf }
 0x481   : > { %971 = vmax.xlane.f32.xlu0 %v970_v34  ;;  %v959_v35 = vpop.f32.mrb[10].mxu1 }
 0x482   : > { %v965_v36 = vmul.f32 0.25, %v959_v35  ;;  %v4997_v37 = vpop.f32.mrb[11].mxu1 }
 0x484   : > { %v974_v38 = vsel %vm973_vm7, %v965_v36, -inf }
 0x485   : > { %975 = vmax.xlane.f32.xlu0 %v974_v38 }
 0x50a   : > { %v969_v39 = vpop.xlane.xlu1 %968 }
 0x50b   : > { %v977_v40 = vsub.f32 %v963_v27, %v969_v39 }
 0x50d   : > { %v980_v41 = vmul.f32 1.442695, %v977_v40 }
 0x50e   : > { %v972_v42 = vpop.xlane.xlu0 %971 }
 0x50f   : > { %5667 = vpow2.f32 %v980_v41  ;;  %v978_v43 = vsub.f32 %v964_v31, %v972_v42 }
 0x511   : > { %v982_v44 = vmul.f32 1.442695, %v978_v43 }
 0x512   : > { %v976_v51 = vpop.xlane.xlu0 %975 }
 0x513   : > { %5669 = vpow2.f32 %v982_v44  ;;  %v979_v52 = vsub.f32 %v965_v36, %v976_v51 }
 0x515   : > { %v984_v53 = vmul.f32 1.442695, %v979_v52 }
 0x517   : > { %5671 = vpow2.f32 %v984_v53 }
 0x519   : > { %v5668_v46 = vpop.eup %5667 }
 0x51a   : > { %v986_v47 = vsel %vm966_vm6, %v5668_v46, 0.0 }
 0x51b   : > { %987 = vadd.xlane.f32.xlu1 %v986_v47 }
 0x51d   : > { %v5670_v48 = vpop.eup %5669 }
 0x51e   : > { %v989_v49 = vsel %vm966_vm6, %v5670_v48, 0.0 }
 0x51f   : > { %990 = vadd.xlane.f32.xlu0 %v989_v49 }
 0x521   : > { %v5672_v54 = vpop.eup %5671 }
 0x522   : > { %v992_v56 = vsel %vm973_vm7, %v5672_v54, 0.0 }
 0x52c   : > { %1104 = vrot.lane.b32.xlu1 %v6151_v17, %s5823_s26 }
 0x530   : > { %1094 = vrot.lane.b32.xlu1 %v6141_v8, %s7233_s27 }
 0x535   : > { %5597 = vrot.lane.b32.xlu0 %v6147_v13, %s5823_s26 }
 0x539   : > { %1098 = vrot.lane.b32.xlu0 %v6151_v17, %s7233_s27 }
 0x554   : > { %993 = vadd.xlane.f32.xlu1 %v992_v56 }
 0x565   : > { %1096 = vrot.lane.b32.xlu1 %v6143_v9, %s7233_s27 }
 0x5a8   : > { %v988_v60 = vpop.xlane.xlu1 %987 }
 0x5a9   : > { %5673 = vrcp.f32 %v988_v60 }
 0x5ac   : > { %v991_v61 = vpop.xlane.xlu0 %990  ;;  %v1105_v11 = vpop.permute.xlu1 %1104 }
 0x5ad   : > { %5675 = vrcp.f32 %v991_v61 }
 0x5b0   : > { %v5598_v62 = vpop.permute.xlu0 %5597  ;;  %v1095_v12 = vpop.permute.xlu1 %1094 }
 0x5b1   : > { %v5600_v0 = vunpack.i.h.bf16 %v5598_v62  ;;  %v5599_v2 = vunpack.i.l.bf16 %v5598_v62 }
 0x5b3   : > { %v5674_v4 = vpop.eup %5673  ;;  %v5387_v5 = vpack.c.bf16 %v5600_v0, %v5599_v2 }
 0x5b4   : > { %v998_v6 = vmul.f32 %v5674_v4, %v5668_v46  ;;  %v1099_v20 = vpop.permute.xlu0 %1098 }
 0x5b6   : > { %5005 = vmatmul.mubr.msk.f32.vlgmr.msra.gmra.mrb[12].mxu1 %vm966_vm6, %v998_v6 }
 0x5b7   : > { %v5676_v7 = vpop.eup %5675  ;;  %5389 = vmatpush3.bf16.xpose.msk.msra.mxu1 %vm6163_vm4, %v5387_v5  ;;  %5007 = vmatprep.mubr.msk.f32.mxu1 %vm5822_vm2, %v5820_v33 }
 0x5b8   : > { %v999_v10 = vmul.f32 %v5676_v7, %v5670_v48  ;;  %5017 = vmatprep.subr.mxu1 %v5820_v33 }
 0x5ba   : > { %5008 = vmatmul.mubr.msk.f32.gmra.mrb[14].mxu1 %vm966_vm6, %v999_v10 }
 0x5bb   : > { %5010 = vmatprep.mubr.msk.f32.mxu1 %vm5822_vm2, %v5820_v33 }
 0x5bf   : > { %5018 = vmatpush3.xpose.msk.msra.mxu1 %vm870_vm3, %v1105_v11 }
 0x5c0   : > { %5390 = vmatprep.subr.bf16.mxu1 %v5819_v3 }
 0x5e1   : > { %v994_v14 = vpop.xlane.xlu1 %993 }
 0x5e2   : > { %5677 = vrcp.f32 %v994_v14 }
 0x5e5   : > { %v1097_v19 = vpop.permute.xlu1 %1096 }
 0x5ec   : > { %v5678_v15 = vpop.eup %5677 }
 0x5ed   : > { %v1000_v18 = vmul.f32 %v5678_v15, %v5672_v54  ;;  %v855_v15 = vld [vmem:[%s7213_s7 + $0x10] sm:$0xff] }
 0x5ef   : > { %5011 = vmatmul.mubr.msk.f32.gmra.mrb[16].mxu1 %vm966_vm6, %v1000_v18  ;;  %v856_v18 = vld [vmem:[%s7213_s7 + $0x18] sm:$0xff] }
 0x5f0   : > { %5019 = vmatprep.mubr.msk.f32.mxu1 %vm5822_vm2, %v5820_v33 }
 0x5f3   : > { %5020 = vmatmul.mubr.msk.f32.vlgmr.msra.gmra.mrb[18].mxu1 %vm870_vm3, %v1095_v12 }
 0x5f4   : > { %5022 = vmatprep.mubr.msk.f32.mxu1 %vm5822_vm2, %v5820_v33 }
 0x5f7   : > { %5023 = vmatmul.mubr.msk.f32.gmra.mrb[20].mxu1 %vm870_vm3, %v1097_v19 }
 0x5f8   : > { %5025 = vmatprep.mubr.msk.f32.mxu1 %vm5822_vm2, %v5820_v33 }
 0x5fb   : > { %5026 = vmatmul.mubr.msk.f32.gmra.mrb[22].mxu1 %vm870_vm3, %v1099_v20  ;;  %v5394_v20 = vpack.c.bf16 %v856_v18, %v855_v15 }
 0x5fc   : > { %5034 = vmatprep.mubr.msk.f32.mxu1 %vm5822_vm2, %v5820_v33 }
 0x689   : > { %v1080_v21 = vpop.f32.mrb[12].mxu1 }
 0x68a   : > { %v5006_v23 = vpop.f32.mrb[13].mxu1  ;;  %5061 = vmatmul.mubr.msk.f32.vlgmr.msra.gmra.mrb[6].mxu0 %vm870_vm3, %v1080_v21 }
 0x68b   : > { %5063 = vmatprep.mubr.msk.f32.mxu0 %vm5822_vm2, %v5820_v33 }
 0x68d   : > { %v1085_v24 = vpop.f32.mrb[14].mxu1 }
 0x68e   : > { %v5009_v26 = vpop.f32.mrb[15].mxu1  ;;  %5064 = vmatmul.mubr.msk.f32.gmra.mrb[8].mxu0 %vm870_vm3, %v1085_v24 }
 0x68f   : > { %5066 = vmatprep.mubr.msk.f32.mxu0 %vm5822_vm2, %v5820_v33 }
 0x6c2   : > { %v1090_v27 = vpop.f32.mrb[16].mxu1 }
 0x6c3   : > { %v5012_v28 = vpop.f32.mrb[17].mxu1  ;;  %5067 = vmatmul.mubr.msk.f32.gmra.mrb[10].mxu0 %vm870_vm3, %v1090_v27 }
 0x6c4   : > { %5090 = vmatprep.mubr.msk.f32.mxu0 %vm5822_vm2, %v5820_v33 }
 0x6c6   : > { %v1184_v29 = vpop.f32.mrb[18].mxu1 }
 0x6c7   : > { %v1198_v30 = vmul.f32 0.25, %v1184_v29  ;;  %v5021_v31 = vpop.f32.mrb[19].mxu1 }
 0x6c9   : > { %v1201_v32 = vsel %vm966_vm6, %v1198_v30, -inf }
 0x6ca   : > { %1202 = vmax.xlane.f32.xlu1 %v1201_v32  ;;  %v1189_v34 = vpop.f32.mrb[20].mxu1 }
 0x6cb   : > { %v1199_v35 = vmul.f32 0.25, %v1189_v34  ;;  %v5024_v36 = vpop.f32.mrb[21].mxu1 }
 0x6cd   : > { %v1204_v37 = vsel %vm966_vm6, %v1199_v35, -inf }
 0x6ce   : > { %1205 = vmax.xlane.f32.xlu0 %v1204_v37  ;;  %v1194_v38 = vpop.f32.mrb[22].mxu1 }
 0x6cf   : > { %v1200_v39 = vmul.f32 0.25, %v1194_v38  ;;  %v5027_v40 = vpop.f32.mrb[23].mxu1 }
 0x6d1   : > { %v1207_v41 = vsel %vm973_vm7, %v1200_v39, -inf }
 0x6d2   : > { %1208 = vmax.xlane.f32.xlu0 %v1207_v41 }
 0x757   : > { %v1203_v42 = vpop.xlane.xlu1 %1202 }
 0x758   : > { %v1210_v43 = vsub.f32 %v1198_v30, %v1203_v42 }
 0x75a   : > { %v1213_v44 = vmul.f32 1.442695, %v1210_v43 }
 0x75b   : > { %v1206_v46 = vpop.xlane.xlu0 %1205 }
 0x75c   : > { %5679 = vpow2.f32 %v1213_v44  ;;  %v1211_v47 = vsub.f32 %v1199_v35, %v1206_v46 }
 0x75d   : > { %v6248_v48 = vpop.f32.mrb[6].mxu0 }
 0x75e   : > { %v1215_v49 = vmul.f32 1.442695, %v1211_v47  ;;  %v5062_v51 = vpop.f32.mrb[7].mxu0 }
 0x75f   : > { %v1209_v52 = vpop.xlane.xlu0 %1208 }
 0x760   : > { %5681 = vpow2.f32 %v1215_v49  ;;  %v1212_v53 = vsub.f32 %v1200_v39, %v1209_v52 }
 0x761   : > { %v6250_v54 = vpop.f32.mrb[8].mxu0 }
 0x762   : > { %v1217_v56 = vmul.f32 1.442695, %v1212_v53  ;;  %v5065_v57 = vpop.f32.mrb[9].mxu0 }
 0x764   : > { %5683 = vpow2.f32 %v1217_v56 }
 0x766   : > { %v5680_v58 = vpop.eup %5679 }
 0x767   : > { %v1219_v59 = vsel %vm966_vm6, %v5680_v58, 0.0 }
 0x768   : > { %1220 = vadd.xlane.f32.xlu0 %v1219_v59 }
 0x76a   : > { %v5682_v60 = vpop.eup %5681 }
 0x76b   : > { %v1222_v61 = vsel %vm966_vm6, %v5682_v60, 0.0 }
 0x76c   : > { %1223 = vadd.xlane.f32.xlu1 %v1222_v61 }
 0x76e   : > { %v5684_v62 = vpop.eup %5683 }
 0x76f   : > { %v1225_v0 = vsel %vm973_vm7, %v5684_v62, 0.0 }
 0x770   : > { %1226 = vadd.xlane.f32.xlu0 %v1225_v0 }
 0x77d   : > { %5602 = vrot.lane.b32.xlu1 %v6149_v16, %s7233_s27 }
 0x781   : > { %5607 = vrot.lane.b32.xlu1 %v6147_v13, %s7231_s1 }
 0x785   : > { %1523 = vrot.lane.b32.xlu1 %v6151_v17, %s7231_s1 }
 0x786   : > { %1240 = vrot.lane.b32.xlu0 %v6177_v25, %s7233_s27 }
 0x789   : > { %1513 = vrot.lane.b32.xlu1 %v6141_v8, %s7229_s29 }
 0x78a   : > { %1515 = vrot.lane.b32.xlu0 %v6143_v9, %s7229_s29 }
 0x78d   : > { %1517 = vrot.lane.b32.xlu1 %v6151_v17, %s7229_s29 }
 0x796   : > { %v6269_v2 = vpop.f32.mrb[10].mxu0 }
 0x797   : > { %v5068_v4 = vpop.f32.mrb[11].mxu0 }
 0x7f5   : > { %v1221_v5 = vpop.xlane.xlu0 %1220 }
 0x7f6   : > { %5685 = vrcp.f32 %v1221_v5 }
 0x7f9   : > { %v1224_v6 = vpop.xlane.xlu1 %1223 }
 0x7fa   : > { %5687 = vrcp.f32 %v1224_v6 }
 0x7fd   : > { %v5603_v7 = vpop.permute.xlu1 %5602  ;;  %v1227_v10 = vpop.xlane.xlu0 %1226 }
 0x7fe   : > { %v5605_v11 = vunpack.i.h.bf16 %v5603_v7  ;;  %v5604_v12 = vunpack.i.l.bf16 %v5603_v7  ;;  %5689 = vrcp.f32 %v1227_v10 }
 0x800   : > { %v5391_v14 = vpack.c.bf16 %v5605_v11, %v5604_v12  ;;  %v5686_v19 = vpop.eup %5685 }
 0x801   : > { %v1231_v21 = vmul.f32 %v5686_v19, %v5680_v58  ;;  %v1241_v23 = vpop.permute.xlu0 %1240  ;;  %v5608_v29 = vpop.permute.xlu1 %5607 }
 0x802   : > { %5392 = vmatpush3.bf16.msra.mxu1 %v5391_v14  ;;  %v5610_v30 = vunpack.i.h.bf16 %v5608_v29  ;;  %v5609_v31 = vunpack.i.l.bf16 %v5608_v29  ;;  %v858_v29 = vld [vmem:[%s7213_s7 + $0x28] sm:$0xff] }
 0x803   : > { %5032 = vmatprep.subr.mxu1 %v5820_v33 }
 0x804   : > { %v5688_v24 = vpop.eup %5687  ;;  %v5400_v32 = vpack.c.bf16 %v5610_v30, %v5609_v31 }
 0x805   : > { %v1232_v26 = vmul.f32 %v5688_v24, %v5682_v60  ;;  %v1524_v38 = vpop.permute.xlu1 %1523  ;;  %v1516_v42 = vpop.permute.xlu0 %1515 }
 0x806   : > { %5033 = vmatpush3.msk.msra.mxu1 %vm1010_vm5, %v1241_v23 }
 0x807   : > { %5035 = vmatmul.mubr.msk.f32.vlgmr.msra.gmra.mrb[24].mxu1 %vm966_vm6, %v1231_v21  ;;  %5393 = vmatprep.subr.bf16.mxu1 %v5819_v3 }
 0x808   : > { %5037 = vmatprep.mubr.msk.f32.mxu1 %vm5822_vm2, %v5820_v33  ;;  %5395 = vmatpush3.bf16.msra.mxu1 %v5394_v20  ;;  %v5690_v27 = vpop.eup %5689 }
 0x809   : > { %5399 = vmatprep.subr.bf16.mxu1 %v5819_v3  ;;  %v1233_v28 = vmul.f32 %v5690_v27, %v5684_v62  ;;  %v1514_v41 = vpop.permute.xlu1 %1513 }
 0x80b   : > { %5038 = vmatmul.mubr.msk.f32.gmra.mrb[26].mxu1 %vm966_vm6, %v1232_v26 }
 0x80c   : > { %5040 = vmatprep.mubr.msk.f32.mxu1 %vm5822_vm2, %v5820_v33 }
 0x80d   : > { %v1518_v43 = vpop.permute.xlu1 %1517 }
 0x80f   : > { %5041 = vmatmul.mubr.msk.f32.gmra.mrb[28].mxu1 %vm966_vm6, %v1233_v28  ;;  %v857_v28 = vld [vmem:[%s7213_s7 + $0x20] sm:$0xff] }
 0x810   : > { %5047 = vmatprep.mubr.msk.f32.mxu1 %vm5822_vm2, %v5820_v33  ;;  %v5407_v30 = vpack.c.bf16 %v858_v29, %v857_v28 }
 0x8da   : > { %v1321_v34 = vpop.f32.mrb[24].mxu1 }
 0x8db   : > { %v5036_v35 = vpop.f32.mrb[25].mxu1  ;;  %5048 = vmatmul.mubr.msk.f32.vlgmr.msra.gmra.mrb[30].mxu1 %vm870_vm3, %v1321_v34 }
 0x8dc   : > { %5402 = vmatpush3.bf16.xpose.msk.msra.mxu1 %vm6163_vm4, %v5400_v32  ;;  %5050 = vmatprep.mubr.msk.f32.mxu1 %vm5822_vm2, %v5820_v33 }
 0x8dd   : > { %5073 = vmatprep.subr.mxu1 %v5820_v33 }
 0x8de   : > { %v1326_v36 = vpop.f32.mrb[26].mxu1 }
 0x8df   : > { %v5039_v37 = vpop.f32.mrb[27].mxu1  ;;  %5051 = vmatmul.mubr.msk.f32.gmra.mrb[32].mxu1 %vm870_vm3, %v1326_v36 }
 0x8e0   : > { %5053 = vmatprep.mubr.msk.f32.mxu1 %vm5822_vm2, %v5820_v33 }
 0x8e2   : > { %v1331_v39 = vpop.f32.mrb[28].mxu1 }
 0x8e3   : > { %v5042_v40 = vpop.f32.mrb[29].mxu1  ;;  %5054 = vmatmul.mubr.msk.f32.gmra.mrb[34].mxu1 %vm870_vm3, %v1331_v39 }
 0x8e4   : > { %5074 = vmatpush3.xpose.msk.msra.mxu1 %vm870_vm3, %v1524_v38  ;;  %5075 = vmatprep.mubr.msk.f32.mxu1 %vm5822_vm2, %v5820_v33 }
 0x8e5   : > { %5406 = vmatprep.subr.bf16.mxu1 %v5819_v3 }
 0x8e7   : > { %5076 = vmatmul.mubr.msk.f32.vlgmr.msra.gmra.mrb[36].mxu1 %vm870_vm3, %v1514_v41 }
 0x8e8   : > { %5078 = vmatprep.mubr.msk.f32.mxu1 %vm5822_vm2, %v5820_v33  ;;  %5408 = vmatpush3.bf16.msra.mxu1 %v5407_v30 }
 0x8e9   : > { %5413 = vmatprep.subr.bf16.mxu1 %v5819_v3 }
 0x8eb   : > { %5079 = vmatmul.mubr.msk.f32.gmra.mrb[38].mxu1 %vm870_vm3, %v1516_v42 }
 0x8ec   : > { %5081 = vmatprep.mubr.msk.f32.mxu1 %vm5822_vm2, %v5820_v33 }
 0x8ef   : > { %5082 = vmatmul.mubr.msk.f32.gmra.mrb[40].mxu1 %vm870_vm3, %v1518_v43 }
 0x8f0   : > { %5103 = vmatprep.mubr.msk.f32.mxu1 %vm5822_vm2, %v5820_v33 }
 0x9ae   : > { %v1410_v44 = vpop.f32.mrb[30].mxu1 }
 0x9af   : > { %v6314_v46 = vadd.f32 %v6248_v48, %v1410_v44  ;;  %v5049_v47 = vpop.f32.mrb[31].mxu1 }
 0x9b2   : > { %v1415_v49 = vpop.f32.mrb[32].mxu1 }
 0x9b3   : > { %v6317_v51 = vadd.f32 %v6250_v54, %v1415_v49  ;;  %v5052_v52 = vpop.f32.mrb[33].mxu1 }
 0x9b6   : > { %v1420_v53 = vpop.f32.mrb[34].mxu1 }
 0x9b7   : > { %v6320_v56 = vadd.f32 %v6269_v2, %v1420_v53  ;;  %v5055_v57 = vpop.f32.mrb[35].mxu1 }
 0x9ba   : > { %v1603_v58 = vpop.f32.mrb[36].mxu1 }
 0x9bb   : > { %v1617_v59 = vmul.f32 0.25, %v1603_v58  ;;  %v5077_v60 = vpop.f32.mrb[37].mxu1 }
 0x9bd   : > { %v1620_v61 = vsel %vm966_vm6, %v1617_v59, -inf }
 0x9be   : > { %1621 = vmax.xlane.f32.xlu0 %v1620_v61  ;;  %v1608_v62 = vpop.f32.mrb[38].mxu1 }
 0x9bf   : > { %v1618_v48 = vmul.f32 0.25, %v1608_v62  ;;  %v5080_v0 = vpop.f32.mrb[39].mxu1 }
 0x9c1   : > { %v1623_v4 = vsel %vm966_vm6, %v1618_v48, -inf }
 0x9c2   : > { %1624 = vmax.xlane.f32.xlu1 %v1623_v4  ;;  %v1613_v54 = vpop.f32.mrb[40].mxu1 }
 0x9c3   : > { %v1619_v5 = vmul.f32 0.25, %v1613_v54  ;;  %v5083_v6 = vpop.f32.mrb[41].mxu1 }
 0x9c5   : > { %v1626_v7 = vsel %vm973_vm7, %v1619_v5, -inf }
 0x9c6   : > { %1627 = vmax.xlane.f32.xlu0 %v1626_v7 }
 0x9d3   : > { %1657 = vrot.lane.b32.xlu1 %v6177_v25, %s7229_s29 }
 0x9d7   : > { %5617 = vrot.lane.b32.xlu1 %v6147_v13, %s7227_s0 }
 0x9db   : > { %1854 = vrot.lane.b32.xlu1 %v6151_v17, %s7227_s0  ;;  %s5572_s0 = smul.u32 24, %s7247_s25 }
 0x9dd   : > { %s548_s22 = scalar_lea.vmem %s7223_s17, %s5572_s0 }
 0xa4b   : > { %v1622_v2 = vpop.xlane.xlu0 %1621 }
 0xa4c   : > { %v1629_v10 = vsub.f32 %v1617_v59, %v1622_v2 }
 0xa4e   : > { %v1632_v11 = vmul.f32 1.442695, %v1629_v10 }
 0xa4f   : > { %v1625_v12 = vpop.xlane.xlu1 %1624 }
 0xa50   : > { %5691 = vpow2.f32 %v1632_v11  ;;  %v1630_v14 = vsub.f32 %v1618_v48, %v1625_v12 }
 0xa52   : > { %v1634_v15 = vmul.f32 1.442695, %v1630_v14 }
 0xa53   : > { %v1628_v18 = vpop.xlane.xlu0 %1627 }
 0xa54   : > { %5693 = vpow2.f32 %v1634_v15  ;;  %v1631_v19 = vsub.f32 %v1619_v5, %v1628_v18 }
 0xa56   : > { %v1636_v20 = vmul.f32 1.442695, %v1631_v19 }
 0xa58   : > { %5695 = vpow2.f32 %v1636_v20 }
 0xa5a   : > { %v5692_v21 = vpop.eup %5691 }
 0xa5b   : > { %v1638_v23 = vsel %vm966_vm6, %v5692_v21, 0.0 }
 0xa5c   : > { %1639 = vadd.xlane.f32.xlu0 %v1638_v23 }
 0xa5e   : > { %v5694_v13 = vpop.eup %5693 }
 0xa5f   : > { %v1641_v24 = vsel %vm966_vm6, %v5694_v13, 0.0 }
 0xa60   : > { %1642 = vadd.xlane.f32.xlu0 %v1641_v24 }
 0xa62   : > { %v5696_v26 = vpop.eup %5695 }
 0xa63   : > { %v1644_v27 = vsel %vm973_vm7, %v5696_v26, 0.0 }
 0xa64   : > { %1645 = vadd.xlane.f32.xlu1 %v1644_v27 }
 0xa75   : > { %1846 = vrot.lane.b32.xlu1 %v6143_v9, %s7225_s30  ;;  %v1658_v9 = vpop.permute.xlu1 %1657 }
 0xa76   : > { %5612 = vrot.lane.b32.xlu0 %v6149_v16, %s7229_s29 }
 0xa79   : > { %v5618_v31 = vpop.permute.xlu1 %5617 }
 0xa7a   : > { %1844 = vrot.lane.b32.xlu0 %v6141_v8, %s7225_s30  ;;  %v5620_v42 = vunpack.i.h.bf16 %v5618_v31  ;;  %v5619_v43 = vunpack.i.l.bf16 %v5618_v31 }
 0xa7c   : > { %v5410_v49 = vpack.c.bf16 %v5620_v42, %v5619_v43 }
 0xa7d   : > { %v1855_v8 = vpop.permute.xlu1 %1854 }
 0xa7e   : > { %1848 = vrot.lane.b32.xlu0 %v6151_v17, %s7225_s30 }
 0xae9   : > { %v1640_v32 = vpop.xlane.xlu0 %1639 }
 0xaea   : > { %5697 = vrcp.f32 %v1640_v32 }
 0xaed   : > { %v1643_v34 = vpop.xlane.xlu0 %1642 }
 0xaee   : > { %5699 = vrcp.f32 %v1643_v34 }
 0xaf1   : > { %v1646_v17 = vpop.xlane.xlu1 %1645  ;;  %v5613_v35 = vpop.permute.xlu0 %5612 }
 0xaf2   : > { %v5615_v36 = vunpack.i.h.bf16 %v5613_v35  ;;  %v5614_v37 = vunpack.i.l.bf16 %v5613_v35  ;;  %5701 = vrcp.f32 %v1646_v17 }
 0xaf4   : > { %v5404_v38 = vpack.c.bf16 %v5615_v36, %v5614_v37  ;;  %v5698_v39 = vpop.eup %5697 }
 0xaf5   : > { %v1650_v40 = vmul.f32 %v5698_v39, %v5692_v21  ;;  %v1845_v53 = vpop.permute.xlu0 %1844  ;;  %v1847_v57 = vpop.permute.xlu1 %1846  ;;  %v859_v39 = vld [vmem:[%s7213_s7 + $0x30] sm:$0xff] }
 0xaf6   : > { %5405 = vmatpush3.bf16.msra.mxu0 %v5404_v38 }
 0xaf7   : > { %5088 = vmatprep.subr.mxu0 %v5820_v33 }
 0xaf8   : > { %v5700_v41 = vpop.eup %5699 }
 0xaf9   : > { %v1651_v44 = vmul.f32 %v5700_v41, %v5694_v13  ;;  %v1849_v58 = vpop.permute.xlu0 %1848 }
 0xafa   : > { %5089 = vmatpush3.msk.msra.mxu0 %vm1010_vm5, %v1658_v9 }
 0xafb   : > { %5091 = vmatmul.mubr.msk.f32.vlgmr.msra.gmra.mrb[12].mxu0 %vm966_vm6, %v1650_v40  ;;  %5409 = vmatprep.subr.bf16.mxu0 %v5819_v3  ;;  %v860_v40 = vld [vmem:[%s7213_s7 + $0x38] sm:$0xff] }
 0xafc   : > { %5093 = vmatprep.mubr.msk.f32.mxu0 %vm5822_vm2, %v5820_v33  ;;  %v5702_v47 = vpop.eup %5701 }
 0xafd   : > { %v1652_v52 = vmul.f32 %v5702_v47, %v5696_v26 }
 0xaff   : > { %5094 = vmatmul.mubr.msk.f32.gmra.mrb[14].mxu0 %vm966_vm6, %v1651_v44 }
 0xb00   : > { %5096 = vmatprep.mubr.msk.f32.mxu0 %vm5822_vm2, %v5820_v33 }
 0xb01   : > { %5412 = vmatpush3.bf16.xpose.msk.msra.mxu0 %vm6163_vm4, %v5410_v49 }
 0xb02   : > { %5116 = vmatprep.subr.mxu0 %v5820_v33 }
 0xb03   : > { %5097 = vmatmul.mubr.msk.f32.gmra.mrb[16].mxu0 %vm966_vm6, %v1652_v52 }
 0xb04   : > { %5118 = vmatprep.mubr.msk.f32.mxu0 %vm5822_vm2, %v5820_v33 }
 0xb09   : > { %5117 = vmatpush3.xpose.msk.msra.mxu0 %vm870_vm3, %v1855_v8 }
 0xb0a   : > { %5416 = vmatprep.subr.bf16.mxu0 %v5819_v3 }
 0xb0c   : > { %5119 = vmatmul.mubr.msk.f32.vlgmr.msra.gmra.mrb[18].mxu0 %vm870_vm3, %v1845_v53 }
 0xb0d   : > { %5121 = vmatprep.mubr.msk.f32.mxu0 %vm5822_vm2, %v5820_v33 }
 0xb10   : > { %5122 = vmatmul.mubr.msk.f32.gmra.mrb[20].mxu0 %vm870_vm3, %v1847_v57 }
 0xb11   : > { %5124 = vmatprep.mubr.msk.f32.mxu0 %vm5822_vm2, %v5820_v33 }
 0xb14   : > { %5125 = vmatmul.mubr.msk.f32.gmra.mrb[22].mxu0 %vm870_vm3, %v1849_v58 }
 0xb15   : > { %5146 = vmatprep.mubr.msk.f32.mxu0 %vm5822_vm2, %v5820_v33 }
 0xbce   : > { %v1738_v59 = vpop.f32.mrb[12].mxu0 }
 0xbcf   : > { %v5092_v60 = vpop.f32.mrb[13].mxu0  ;;  %5104 = vmatmul.mubr.msk.f32.vlgmr.msra.gmra.mrb[42].mxu1 %vm870_vm3, %v1738_v59 }
 0xbd0   : > { %5106 = vmatprep.mubr.msk.f32.mxu1 %vm5822_vm2, %v5820_v33 }
 0xbd2   : > { %v1743_v61 = vpop.f32.mrb[14].mxu0 }
 0xbd3   : > { %v5095_v62 = vpop.f32.mrb[15].mxu0  ;;  %5107 = vmatmul.mubr.msk.f32.gmra.mrb[44].mxu1 %vm870_vm3, %v1743_v61 }
 0xbd4   : > { %5109 = vmatprep.mubr.msk.f32.mxu1 %vm5822_vm2, %v5820_v33 }
 0xbd6   : > { %v1748_v48 = vpop.f32.mrb[16].mxu0 }
 0xbd7   : > { %v5098_v0 = vpop.f32.mrb[17].mxu0  ;;  %5110 = vmatmul.mubr.msk.f32.gmra.mrb[46].mxu1 %vm870_vm3, %v1748_v48 }
 0xbd8   : > { %5133 = vmatprep.mubr.msk.f32.mxu1 %vm5822_vm2, %v5820_v33 }
 0xbdf   : > { %v1934_v4 = vpop.f32.mrb[18].mxu0 }
 0xbe0   : > { %v1948_v54 = vmul.f32 0.25, %v1934_v4  ;;  %v5120_v5 = vpop.f32.mrb[19].mxu0 }
 0xbe2   : > { %v1951_v6 = vsel %vm966_vm6, %v1948_v54, -inf }
 0xbe3   : > { %1952 = vmax.xlane.f32.xlu1 %v1951_v6  ;;  %v1939_v7 = vpop.f32.mrb[20].mxu0 }
 0xbe4   : > { %v1949_v2 = vmul.f32 0.25, %v1939_v7  ;;  %v5123_v10 = vpop.f32.mrb[21].mxu0  ;;  %v4610_v7 = vld [vmem:[%s7214_s8] ss:$0 sm:$0xff] }
 0xbe6   : > { %v1954_v11 = vsel %vm966_vm6, %v1949_v2, -inf }
 0xbe7   : > { %1955 = vmax.xlane.f32.xlu0 %v1954_v11  ;;  %v1944_v12 = vpop.f32.mrb[22].mxu0 }
 0xbe8   : > { %v1950_v14 = vmul.f32 0.25, %v1944_v12  ;;  %v5126_v15 = vpop.f32.mrb[23].mxu0 }
 0xbea   : > { %v1957_v18 = vsel %vm973_vm7, %v1950_v14, -inf }
 0xbeb   : > { %1958 = vmax.xlane.f32.xlu0 %v1957_v18 }
 0xc70   : > { %v1953_v19 = vpop.xlane.xlu1 %1952 }
 0xc71   : > { %v1960_v20 = vsub.f32 %v1948_v54, %v1953_v19 }
 0xc73   : > { %v1963_v21 = vmul.f32 1.442695, %v1960_v20 }
 0xc74   : > { %v1956_v23 = vpop.xlane.xlu0 %1955 }
 0xc75   : > { %5703 = vpow2.f32 %v1963_v21  ;;  %v1961_v13 = vsub.f32 %v1949_v2, %v1956_v23 }
 0xc77   : > { %v1965_v24 = vmul.f32 1.442695, %v1961_v13 }
 0xc78   : > { %v1959_v26 = vpop.xlane.xlu0 %1958 }
 0xc79   : > { %5705 = vpow2.f32 %v1965_v24  ;;  %v1962_v27 = vsub.f32 %v1950_v14, %v1959_v26 }
 0xc7b   : > { %v1967_v28 = vmul.f32 1.442695, %v1962_v27 }
 0xc7d   : > { %5707 = vpow2.f32 %v1967_v28 }
 0xc7f   : > { %v5704_v29 = vpop.eup %5703 }
 0xc80   : > { %v1969_v30 = vsel %vm966_vm6, %v5704_v29, 0.0 }
 0xc81   : > { %1970 = vadd.xlane.f32.xlu0 %v1969_v30 }
 0xc83   : > { %v5706_v9 = vpop.eup %5705 }
 0xc84   : > { %v1972_v31 = vsel %vm966_vm6, %v5706_v9, 0.0 }
 0xc85   : > { %1973 = vadd.xlane.f32.xlu1 %v1972_v31 }
 0xc87   : > { %v5708_v32 = vpop.eup %5707 }
 0xc88   : > { %v1975_v8 = vsel %vm973_vm7, %v5708_v32, 0.0 }
 0xc89   : > { %1976 = vadd.xlane.f32.xlu0 %v1975_v8 }
 0xc96   : > { %5622 = vrot.lane.b32.xlu1 %v6149_v16, %s7225_s30  ;;  %v5417_v16 = vpack.c.bf16 %v860_v40, %v859_v39  ;;  %v2248_v40 = vld [vmem:[%s7217_s11 + $0x8] sm:$0xff] }
 0xc98   : > { %5418 = vmatpush3.bf16.msra.mxu0 %v5417_v16  ;;  %v2250_v16 = vld [vmem:[%s7217_s11 + $0x18] sm:$0xff] }
 0xc9f   : > { %1988 = vrot.lane.b32.xlu0 %v6177_v25, %s7225_s30 }
 0xca2   : > { %v1827_v34 = vpop.f32.mrb[42].mxu1 }
 0xca3   : > { %v1841_v17 = vadd.f32 %v1827_v34, %v6314_v46  ;;  %v5105_v35 = vpop.f32.mrb[43].mxu1 }
 0xca6   : > { %v1832_v36 = vpop.f32.mrb[44].mxu1 }
 0xca7   : > { %v1842_v37 = vadd.f32 %v1832_v36, %v6317_v51  ;;  %v5108_v38 = vpop.f32.mrb[45].mxu1 }
 0xcaa   : > { %v1837_v41 = vpop.f32.mrb[46].mxu1 }
 0xcab   : > { %v1843_v25 = vadd.f32 %v1837_v41, %v6320_v56  ;;  %v5111_v42 = vpop.f32.mrb[47].mxu1  ;;  %v5419_v41 = vpack.c.bf16 %v2250_v16, %v2248_v40  ;;  %v2423_v40 = vld [vmem:[%s7219_s13 + $0x10] sm:$0xff]  ;;  %v2424_v16 = vld [vmem:[%s7219_s13 + $0x18] sm:$0xff] }
 0xcac   : > { %v2249_v42 = vld [vmem:[%s7217_s11 + $0x10] sm:$0xff] }
 0xd0e   : > { %v1971_v46 = vpop.xlane.xlu0 %1970 }
 0xd0f   : > { %5709 = vrcp.f32 %v1971_v46 }
 0xd12   : > { %v1974_v43 = vpop.xlane.xlu1 %1973 }
 0xd13   : > { %5711 = vrcp.f32 %v1974_v43  ;;  %v2252_v43 = vld [vmem:[%s7217_s11 + $0x28] sm:$0xff] }
 0xd16   : > { %v5623_v51 = vpop.permute.xlu1 %5622  ;;  %v1977_v44 = vpop.xlane.xlu0 %1976 }
 0xd17   : > { %v5625_v47 = vunpack.i.h.bf16 %v5623_v51  ;;  %v5624_v49 = vunpack.i.l.bf16 %v5623_v51  ;;  %5713 = vrcp.f32 %v1977_v44  ;;  %v2254_v51 = vld [vmem:[%s7217_s11 + $0x38] sm:$0xff] }
 0xd18   : > { %v5423_v44 = vpack.c.bf16 %v2254_v51, %v2252_v43  ;;  %v2425_v43 = vld [vmem:[%s7219_s13 + $0x20] sm:$0xff]  ;;  %v2426_v51 = vld [vmem:[%s7219_s13 + $0x28] sm:$0xff] }
 0xd19   : > { %v5414_v52 = vpack.c.bf16 %v5625_v47, %v5624_v49  ;;  %v5710_v53 = vpop.eup %5709  ;;  %v2251_v47 = vld [vmem:[%s7217_s11 + $0x20] sm:$0xff]  ;;  %v2253_v49 = vld [vmem:[%s7217_s11 + $0x30] sm:$0xff] }
 0xd1a   : > { %v1981_v57 = vmul.f32 %v5710_v53, %v5704_v29  ;;  %v1989_v58 = vpop.permute.xlu0 %1988  ;;  %v2256_v53 = vld [vmem:[%s7217_s11 + $0x48] sm:$0xff] }
 0xd1b   : > { %5415 = vmatpush3.bf16.msra.mxu1 %v5414_v52  ;;  %v5425_v52 = vpack.c.bf16 %v2253_v49, %v2251_v47  ;;  %v2443_v47 = vld [vmem:[%s7219_s13 + $0xb0] sm:$0xff]  ;;  %v2444_v49 = vld [vmem:[%s7219_s13 + $0xb8] sm:$0xff] }
 0xd1c   : > { %5131 = vmatprep.subr.mxu1 %v5820_v33 }
 0xd1d   : > { %v5712_v59 = vpop.eup %5711 }
 0xd1e   : > { %v1982_v56 = vmul.f32 %v5712_v59, %v5706_v9  ;;  %v2255_v59 = vld [vmem:[%s7217_s11 + $0x40] sm:$0xff] }
 0xd1f   : > { %5132 = vmatpush3.msk.msra.mxu1 %vm1010_vm5, %v1989_v58 }
 0xd20   : > { %5134 = vmatmul.mubr.msk.f32.vlgmr.msra.gmra.mrb[48].mxu1 %vm966_vm6, %v1981_v57  ;;  %5420 = vmatprep.subr.bf16.mxu1 %v5419_v41  ;;  %v2258_v57 = vld [vmem:[%s7217_s11 + $0x58] sm:$0xff]  ;;  %v5441_v41 = vpack.c.bf16 %v2424_v16, %v2423_v40 }
 0xd21   : > { %5136 = vmatprep.mubr.msk.f32.mxu1 %vm5822_vm2, %v5820_v33  ;;  %v5714_v60 = vpop.eup %5713  ;;  %v5427_v58 = vpack.c.bf16 %v2258_v57, %v2256_v53  ;;  %v2427_v53 = vld [vmem:[%s7219_s13 + $0x30] sm:$0xff]  ;;  %v2428_v57 = vld [vmem:[%s7219_s13 + $0x38] sm:$0xff] }
 0xd22   : > { %v1983_v61 = vmul.f32 %v5714_v60, %v5708_v32 }
 0xd24   : > { %5137 = vmatmul.mubr.msk.f32.gmra.mrb[50].mxu1 %vm966_vm6, %v1982_v56  ;;  %v2257_v56 = vld [vmem:[%s7217_s11 + $0x50] sm:$0xff] }
 0xd25   : > { %5139 = vmatprep.mubr.msk.f32.mxu1 %vm5822_vm2, %v5820_v33  ;;  %v5429_v60 = vpack.c.bf16 %v2257_v56, %v2255_v59  ;;  %v2445_v59 = vld [vmem:[%s7219_s13 + $0xc0] sm:$0xff]  ;;  %v2446_v56 = vld [vmem:[%s7219_s13 + $0xc8] sm:$0xff] }
 0xd28   : > { %5140 = vmatmul.mubr.msk.f32.gmra.mrb[52].mxu1 %vm966_vm6, %v1983_v61  ;;  %v2260_v61 = vld [vmem:[%s7217_s11 + $0x68] sm:$0xff] }
 0xd29   : > { %2348 = vmatprep.mubr.f32.mxu1 %v5820_v33 }
 0xdf3   : > { %v2069_v62 = vpop.f32.mrb[48].mxu1 }
 0xdf4   : > { %v5135_v48 = vpop.f32.mrb[49].mxu1  ;;  %5147 = vmatmul.mubr.msk.f32.vlgmr.msra.gmra.mrb[24].mxu0 %vm870_vm3, %v2069_v62  ;;  %v2262_v62 = vld [vmem:[%s7217_s11 + $0x78] sm:$0xff] }
 0xdf5   : > { %5149 = vmatprep.mubr.msk.f32.mxu0 %vm5822_vm2, %v5820_v33  ;;  %v5431_v48 = vpack.c.bf16 %v2262_v62, %v2260_v61  ;;  %v2429_v61 = vld [vmem:[%s7219_s13 + $0x40] sm:$0xff]  ;;  %v2430_v62 = vld [vmem:[%s7219_s13 + $0x48] sm:$0xff] }
 0xdf7   : > { %v2074_v0 = vpop.f32.mrb[50].mxu1 }
 0xdf8   : > { %v5138_v4 = vpop.f32.mrb[51].mxu1  ;;  %5150 = vmatmul.mubr.msk.f32.gmra.mrb[26].mxu0 %vm870_vm3, %v2074_v0  ;;  %v2259_v0 = vld [vmem:[%s7217_s11 + $0x60] sm:$0xff] }
 0xdf9   : > { %5152 = vmatprep.mubr.msk.f32.mxu0 %vm5822_vm2, %v5820_v33  ;;  %v2261_v4 = vld [vmem:[%s7217_s11 + $0x70] sm:$0xff] }
 0xdfb   : > { %v2079_v54 = vpop.f32.mrb[52].mxu1 }
 0xdfc   : > { %v5141_v5 = vpop.f32.mrb[53].mxu1  ;;  %5153 = vmatmul.mubr.msk.f32.gmra.mrb[28].mxu0 %vm870_vm3, %v2079_v54  ;;  %v5433_v54 = vpack.c.bf16 %v2261_v4, %v2259_v0  ;;  %v2447_v0 = vld [vmem:[%s7219_s13 + $0xd0] sm:$0xff]  ;;  %v2448_v4 = vld [vmem:[%s7219_s13 + $0xd8] sm:$0xff] }
 0xec7   : > { %v2158_v6 = vpop.f32.mrb[24].mxu0 }
 0xec8   : > { %v2172_v2 = vadd.f32 %v2158_v6, %v1841_v17  ;;  %v5148_v10 = vpop.f32.mrb[25].mxu0 }
 0xeca   : > { %v2182_v11 = vadd.f32 %v4610_v7, %v2172_v2 }
 0xecb   : > { %v2163_v12 = vpop.f32.mrb[26].mxu0 }
 0xecc   : > { %v6424_v14 = vadd.f32 %v2182_v11, %v6032_v45  ;;  %v2173_v15 = vadd.f32 %v2163_v12, %v1842_v37  ;;  %v5151_v18 = vpop.f32.mrb[27].mxu0 }
 0xece   : > { %v2183_v19 = vadd.f32 %v4610_v7, %v2173_v15  ;;  %v2190_v20 = vsel %vm582_vm0, %v6424_v14, 0.0 }
 0xecf   : > { %2191 = vadd.xlane.f32.xlu1 %v2190_v20  ;;  %v2168_v21 = vpop.f32.mrb[28].mxu0  ;;  %v4611_v20 = vld [vmem:[%s7215_s9] ss:$0 sm:$0xff] }
 0xed0   : > { %v6429_v23 = vadd.f32 %v2183_v19, %v6039_v50  ;;  %v2174_v13 = vadd.f32 %v2168_v21, %v1843_v25  ;;  %v5154_v24 = vpop.f32.mrb[29].mxu0  ;;  %v2247_v25 = vld [vmem:[%s7217_s11] sm:$0xff] }
 0xed1   : > { %v5421_v46 = vpack.c.bf16 %v2249_v42, %v2247_v25  ;;  %v2441_v25 = vld [vmem:[%s7219_s13 + $0xa0] sm:$0xff]  ;;  %v2442_v42 = vld [vmem:[%s7219_s13 + $0xa8] sm:$0xff] }
 0xed2   : > { %v2184_v26 = vadd.f32 %v4610_v7, %v2174_v13  ;;  %v2193_v27 = vsel %vm582_vm0, %v6429_v23, 0.0  ;;  %v4612_v13 = vld [vmem:[%s7216_s10] ss:$0 sm:$0xff] }
 0xed3   : > { %2194 = vadd.xlane.f32.xlu0 %v2193_v27  ;;  %5422 = vmatpush1.bf16.msra.mxu1 %v5421_v46  ;;  %v5443_v46 = vpack.c.bf16 %v2442_v42, %v2441_v25 }
 0xed4   : > { %v6434_v45 = vadd.f32 %v2184_v26, %v6046_v55  ;;  %5424 = vmatprep.subr.bf16.mxu1 %v5423_v44  ;;  %v5445_v44 = vpack.c.bf16 %v2426_v51, %v2425_v43 }
 0xed6   : > { %v2196_v28 = vsel %vm680_vm1, %v6434_v45, 0.0 }
 0xed7   : > { %2197 = vadd.xlane.f32.xlu1 %v2196_v28  ;;  %5426 = vmatpush1.bf16.msra.mxu1 %v5425_v52  ;;  %v5447_v52 = vpack.c.bf16 %v2444_v49, %v2443_v47 }
 0xed8   : > { %5428 = vmatprep.subr.bf16.mxu1 %v5427_v58  ;;  %v5449_v58 = vpack.c.bf16 %v2428_v57, %v2427_v53 }
 0xedb   : > { %5430 = vmatpush1.bf16.msra.mxu1 %v5429_v60  ;;  %v5451_v60 = vpack.c.bf16 %v2446_v56, %v2445_v59 }
 0xedc   : > { %5432 = vmatprep.subr.bf16.mxu1 %v5431_v48  ;;  %v5453_v48 = vpack.c.bf16 %v2430_v62, %v2429_v61 }
 0xedf   : > { %5434 = vmatpush1.bf16.msra.mxu1 %v5433_v54  ;;  %v5455_v54 = vpack.c.bf16 %v2448_v4, %v2447_v0 }
 0xf5c   : > { %v2192_v29 = vpop.xlane.xlu1 %2191 }
 0xf5d   : > { %v2199_v30 = vmul.f32 0.015625, %v2192_v29 }
 0xf5f   : > { %v2202_v9 = vsub.f32 %v6424_v14, %v2199_v30 }
 0xf60   : > { %v2195_v50 = vpop.xlane.xlu0 %2194 }
 0xf61   : > { %v2200_v31 = vmul.f32 0.015625, %v2195_v50  ;;  %v2205_v32 = vmul.f32 %v2202_v9, %v2202_v9 }
 0xf63   : > { %v6440_v8 = vsub.f32 %v6429_v23, %v2200_v31  ;;  %v2208_v34 = vsel %vm582_vm0, %v2205_v32, 0.0 }
 0xf64   : > { %2209 = vadd.xlane.f32.xlu0 %v2208_v34  ;;  %v2198_v17 = vpop.xlane.xlu1 %2197  ;;  %v2438_v34 = vld [vmem:[%s7219_s13 + $0x88] sm:$0xff] }
 0xf65   : > { %v2201_v55 = vmul.f32 0.015625, %v2198_v17  ;;  %v2206_v35 = vmul.f32 %v6440_v8, %v6440_v8 }
 0xf67   : > { %v6446_v36 = vsub.f32 %v6434_v45, %v2201_v55  ;;  %v2211_v37 = vsel %vm582_vm0, %v2206_v35, 0.0  ;;  %v2421_v55 = vld [vmem:[%s7219_s13] sm:$0xff]  ;;  %v2422_v35 = vld [vmem:[%s7219_s13 + $0x8] sm:$0xff] }
 0xf68   : > { %2212 = vadd.xlane.f32.xlu1 %v2211_v37  ;;  %v2439_v37 = vld [vmem:[%s7219_s13 + $0x90] sm:$0xff] }
 0xf69   : > { %v2207_v38 = vmul.f32 %v6446_v36, %v6446_v36 }
 0xf6b   : > { %v2214_v39 = vsel %vm680_vm1, %v2207_v38, 0.0  ;;  %v2440_v38 = vld [vmem:[%s7219_s13 + $0x98] sm:$0xff] }
 0xf6c   : > { %2215 = vadd.xlane.f32.xlu0 %v2214_v39  ;;  %v5439_v39 = vpack.c.bf16 %v2440_v38, %v2439_v37 }
 0xff1   : > { %v2210_v5 = vpop.xlane.xlu0 %2209 }
 0xff2   : > { %v2217_v6 = vmul.f32 0.015625, %v2210_v5  ;;  %v2431_v5 = vld [vmem:[%s7219_s13 + $0x50] sm:$0xff] }
 0xff4   : > { %v2220_v7 = vadd.f32 1e-06, %v2217_v6  ;;  %v2432_v6 = vld [vmem:[%s7219_s13 + $0x58] sm:$0xff] }
 0xff5   : > { %v2213_v2 = vpop.xlane.xlu1 %2212 }
 0xff6   : > { %5715 = vrsqrt.f32 %v2220_v7  ;;  %v2218_v10 = vmul.f32 0.015625, %v2213_v2  ;;  %v5457_v7 = vpack.c.bf16 %v2432_v6, %v2431_v5  ;;  %v2449_v2 = vld [vmem:[%s7219_s13 + $0xe0] sm:$0xff] }
 0xff8   : > { %v2221_v11 = vadd.f32 1e-06, %v2218_v10  ;;  %v2450_v10 = vld [vmem:[%s7219_s13 + $0xe8] sm:$0xff] }
 0xff9   : > { %v2216_v12 = vpop.xlane.xlu0 %2215 }
 0xffa   : > { %5717 = vrsqrt.f32 %v2221_v11  ;;  %v2219_v15 = vmul.f32 0.015625, %v2216_v12  ;;  %v5459_v11 = vpack.c.bf16 %v2450_v10, %v2449_v2  ;;  %v2433_v12 = vld [vmem:[%s7219_s13 + $0x60] sm:$0xff] }
 0xffc   : > { %v2222_v18 = vadd.f32 1e-06, %v2219_v15  ;;  %v2434_v15 = vld [vmem:[%s7219_s13 + $0x68] sm:$0xff] }
 0xffe   : > { %5719 = vrsqrt.f32 %v2222_v18  ;;  %v5461_v18 = vpack.c.bf16 %v2434_v15, %v2433_v12 }
0x1000   : > { %v5716_v19 = vpop.eup %5715 }
0x1001   : > { %v2226_v21 = vmul.f32 %v5716_v19, %v2202_v9  ;;  %v2451_v19 = vld [vmem:[%s7219_s13 + $0xf0] sm:$0xff] }
0x1003   : > { %v2235_v24 = vmul.f32 %v4611_v20, %v2226_v21 }
0x1004   : > { %v5718_v26 = vpop.eup %5717 }
0x1005   : > { %v2244_v27 = vadd.f32 %v4612_v13, %v2235_v24  ;;  %v2227_v28 = vmul.f32 %v5718_v26, %v6440_v8  ;;  %v2437_v8 = vld [vmem:[%s7219_s13 + $0x80] sm:$0xff]  ;;  %v2436_v24 = vld [vmem:[%s7219_s13 + $0x78] sm:$0xff] }
0x1006   : > { %v5435_v17 = vpack.c.bf16 %v2438_v34, %v2437_v8 }
0x1007   : > { %4613 = vmatmul.mubr.msk.f32.vlgmr.msra.gmra.mrb[54].mxu1 %vm582_vm0, %v2244_v27  ;;  %v2236_v29 = vmul.f32 %v4611_v20, %v2227_v28  ;;  %v2263_v27 = vld [vmem:[%s7218_s12] sm:$0x3] }
0x1008   : > { %v5720_v30 = vpop.eup %5719  ;;  %2354 = vmatprep.mubr.f32.mxu1 %v5820_v33  ;;  %5436 = vmatprep.subr.bf16.mxu0 %v5435_v17  ;;  %v2268_v28 = vrot.slane %v2263_v27, %v6132_v63 }
0x1009   : > { %v2245_v50 = vadd.f32 %v4612_v13, %v2236_v29  ;;  %v2228_v31 = vmul.f32 %v5720_v30, %v6446_v36  ;;  %v5437_v36 = vpack.c.bf16 %v2422_v35, %v2421_v55  ;;  %v2272_v29 = vrot.slane %v2263_v27, %v6137_v1 }
0x100b   : > { %4614 = vmatmul.mubr.msk.f32.gmra.mrb[56].mxu1 %vm582_vm0, %v2245_v50  ;;  %v2237_v9 = vmul.f32 %v4611_v20, %v2228_v31  ;;  %5438 = vmatpush3.bf16.msra.mxu0 %v5437_v36  ;;  %v2452_v20 = vld [vmem:[%s7219_s13 + $0xf8] sm:$0xff] }
0x100c   : > { %2360 = vmatprep.mubr.f32.mxu1 %v5820_v33  ;;  %5440 = vmatprep.subr.bf16.mxu0 %v5439_v39  ;;  %v5463_v21 = vpack.c.bf16 %v2452_v20, %v2451_v19 }
0x100d   : > { %v2246_v32 = vadd.f32 %v4612_v13, %v2237_v9  ;;  %v2435_v13 = vld [vmem:[%s7219_s13 + $0x70] sm:$0xff] }
0x100e   : > { %v5465_v26 = vpack.c.bf16 %v2436_v24, %v2435_v13 }
0x100f   : > { %4615 = vmatmul.mubr.msk.f32.gmra.mrb[58].mxu1 %vm582_vm0, %v2246_v32  ;;  %5442 = vmatpush3.bf16.msra.mxu0 %v5441_v41 }
0x1010   : > { %2710 = vmatprep.mubr.f32.mxu1 %v5820_v33  ;;  %5444 = vmatprep.subr.bf16.mxu0 %v5443_v46 }
0x1013   : > { %5446 = vmatpush3.bf16.msra.mxu0 %v5445_v44 }
0x1014   : > { %5448 = vmatprep.subr.bf16.mxu0 %v5447_v52 }
0x1017   : > { %5450 = vmatpush3.bf16.msra.mxu0 %v5449_v58 }
0x1018   : > { %5452 = vmatprep.subr.bf16.mxu0 %v5451_v60 }
0x101b   : > { %5454 = vmatpush3.bf16.msra.mxu0 %v5453_v48 }
0x101c   : > { %5456 = vmatprep.subr.bf16.mxu0 %v5455_v54 }
0x101f   : > { %5458 = vmatpush3.bf16.msra.mxu0 %v5457_v7 }
0x1020   : > { %5460 = vmatprep.subr.bf16.mxu0 %v5459_v11 }
0x1023   : > { %5462 = vmatpush3.bf16.msra.mxu0 %v5461_v18 }
0x1024   : > { %5464 = vmatprep.subr.bf16.mxu0 %v5463_v21 }
0x1027   : > { %5466 = vmatpush3.bf16.msra.mxu0 %v5465_v26 }
0x1028   : > { %5487 = vmatprep.subr.bf16.mxu0 %v5819_v3 }
0x10da   : > { %v2350_v30 = vpop.f32.mrb[54].mxu1 }
0x10db   : > { %v2351_v50 = vadd.f32 %v2350_v30, %v2268_v28  ;;  %v2352_v31 = vpop.f32.mrb[55].mxu1 }
0x10dc   : > { %v2353_v9 = vadd.f32 %v2352_v31, %v2272_v29 }
0x10dd   : > { %v2367_v32 = vmul.f32 %v2351_v50, %v2351_v50 }
0x10de   : > { %v2368_v8 = vmul.f32 %v2353_v9, %v2353_v9  ;;  %v2356_v34 = vpop.f32.mrb[56].mxu1 }
0x10df   : > { %v2373_v17 = vmul.f32 %v2367_v32, %v2351_v50  ;;  %v2357_v55 = vadd.f32 %v2356_v34, %v2268_v28  ;;  %v2358_v35 = vpop.f32.mrb[57].mxu1 }
0x10e0   : > { %v2374_v36 = vmul.f32 %v2368_v8, %v2353_v9  ;;  %v2359_v37 = vadd.f32 %v2358_v35, %v2272_v29 }
0x10e1   : > { %v2379_v38 = vmul.f32 0.044715, %v2373_v17  ;;  %v2369_v39 = vmul.f32 %v2357_v55, %v2357_v55 }
0x10e2   : > { %v2380_v40 = vmul.f32 0.044715, %v2374_v36  ;;  %v2370_v16 = vmul.f32 %v2359_v37, %v2359_v37  ;;  %v2362_v41 = vpop.f32.mrb[58].mxu1 }
0x10e3   : > { %v2385_v25 = vadd.f32 %v2379_v38, %v2351_v50  ;;  %v2375_v42 = vmul.f32 %v2369_v39, %v2357_v55  ;;  %v2363_v46 = vadd.f32 %v2362_v41, %v2268_v28  ;;  %v2364_v43 = vpop.f32.mrb[59].mxu1 }
0x10e4   : > { %v2386_v51 = vadd.f32 %v2380_v40, %v2353_v9  ;;  %v2376_v44 = vmul.f32 %v2370_v16, %v2359_v37  ;;  %v2365_v47 = vadd.f32 %v2364_v43, %v2272_v29 }
0x10e5   : > { %v2391_v49 = vmul.f32 0.7978846, %v2385_v25  ;;  %v2381_v52 = vmul.f32 0.044715, %v2375_v42  ;;  %v2371_v53 = vmul.f32 %v2363_v46, %v2363_v46 }
0x10e6   : > { %v2392_v57 = vmul.f32 0.7978846, %v2386_v51  ;;  %v2382_v58 = vmul.f32 0.044715, %v2376_v44  ;;  %v2372_v59 = vmul.f32 %v2365_v47, %v2365_v47 }
0x10e7   : > { %5721 = vtanh.f32 %v2391_v49  ;;  %v2387_v56 = vadd.f32 %v2381_v52, %v2357_v55  ;;  %v2377_v60 = vmul.f32 %v2371_v53, %v2363_v46 }
0x10e8   : > { %v2388_v61 = vadd.f32 %v2382_v58, %v2359_v37  ;;  %v2378_v62 = vmul.f32 %v2372_v59, %v2365_v47  ;;  %5723 = vtanh.f32 %v2392_v57 }
0x10e9   : > { %v2393_v48 = vmul.f32 0.7978846, %v2387_v56  ;;  %v2383_v0 = vmul.f32 0.044715, %v2377_v60 }
0x10ea   : > { %v2394_v4 = vmul.f32 0.7978846, %v2388_v61  ;;  %v2384_v54 = vmul.f32 0.044715, %v2378_v62 }
0x10eb   : > { %v2389_v5 = vadd.f32 %v2383_v0, %v2363_v46  ;;  %5725 = vtanh.f32 %v2393_v48 }
0x10ec   : > { %v2390_v6 = vadd.f32 %v2384_v54, %v2365_v47  ;;  %5727 = vtanh.f32 %v2394_v4 }
0x10ed   : > { %v2395_v7 = vmul.f32 0.7978846, %v2389_v5 }
0x10ee   : > { %v2396_v2 = vmul.f32 0.7978846, %v2390_v6 }
0x10ef   : > { %5729 = vtanh.f32 %v2395_v7 }
0x10f0   : > { %5731 = vtanh.f32 %v2396_v2  ;;  %v4622_v2 = vld [vmem:[%s7211_s5 + $0x88] sm:$0xff] }
0x10f1   : > { %v5722_v10 = vpop.eup %5721 }
0x10f2   : > { %v5724_v11 = vpop.eup %5723  ;;  %v2403_v12 = vadd.f32 1.0, %v5722_v10  ;;  %v4624_v10 = vld [vmem:[%s7211_s5 + $0x98] sm:$0xff] }
0x10f3   : > { %v2404_v15 = vadd.f32 1.0, %v5724_v11  ;;  %v5467_v11 = vpack.c.bf16 %v4624_v10, %v4622_v2 }
0x10f4   : > { %v2409_v18 = vmul.f32 0.5, %v2403_v12  ;;  %v4621_v12 = vld [vmem:[%s7211_s5 + $0x80] sm:$0xff] }
0x10f5   : > { %v5726_v19 = vpop.eup %5725  ;;  %v2410_v20 = vmul.f32 0.5, %v2404_v15  ;;  %v4623_v15 = vld [vmem:[%s7211_s5 + $0x90] sm:$0xff]  ;;  %5468 = vmatprep.subr.bf16.mxu1 %v5467_v11 }
0x10f6   : > { %v5728_v21 = vpop.eup %5727  ;;  %v2405_v13 = vadd.f32 1.0, %v5726_v19  ;;  %v2415_v27 = vmul.f32 %v2409_v18, %v2351_v50  ;;  %v5469_v18 = vpack.c.bf16 %v4623_v15, %v4621_v12  ;;  %v4626_v19 = vld [vmem:[%s7211_s5 + $0xa8] sm:$0xff] }
0x10f7   : > { %v2416_v24 = vmul.f32 %v2410_v20, %v2353_v9  ;;  %v2406_v26 = vadd.f32 1.0, %v5728_v21  ;;  %v4628_v20 = vld [vmem:[%s7211_s5 + $0xb8] sm:$0xff] }
0x10f8   : > { %v2411_v28 = vmul.f32 0.5, %v2405_v13  ;;  %5470 = vmatpush1.bf16.msra.mxu1 %v5469_v18  ;;  %v5471_v21 = vpack.c.bf16 %v4628_v20, %v4626_v19  ;;  %v4625_v13 = vld [vmem:[%s7211_s5 + $0xa0] sm:$0xff] }
0x10f9   : > { %v5730_v29 = vpop.eup %5729  ;;  %2517 = vmatprep.mubr.f32.mxu0 %v2416_v24  ;;  %v2412_v30 = vmul.f32 0.5, %v2406_v26  ;;  %v4627_v24 = vld [vmem:[%s7211_s5 + $0xb0] sm:$0xff] }
0x10fa   : > { %v5732_v31 = vpop.eup %5731  ;;  %2518 = vmatmul.mubr.f32.vlgmr.msra.gmra.mrb[30].mxu0 %v2415_v27  ;;  %v2407_v32 = vadd.f32 1.0, %v5730_v29  ;;  %v2417_v17 = vmul.f32 %v2411_v28, %v2357_v55  ;;  %v5473_v26 = vpack.c.bf16 %v4627_v24, %v4625_v13  ;;  %5472 = vmatprep.subr.bf16.mxu1 %v5471_v21  ;;  %v4630_v27 = vld [vmem:[%s7211_s5 + $0xc8] sm:$0xff]  ;;  %v4632_v28 = vld [vmem:[%s7211_s5 + $0xd8] sm:$0xff] }
0x10fb   : > { %v2418_v8 = vmul.f32 %v2412_v30, %v2359_v37  ;;  %v2408_v34 = vadd.f32 1.0, %v5732_v31  ;;  %v4616_v37 = vld [vmem:[%s7220_s14] ss:$0 sm:$0xff]  ;;  %v5475_v29 = vpack.c.bf16 %v4632_v28, %v4630_v27  ;;  %v4631_v31 = vld [vmem:[%s7211_s5 + $0xd0] sm:$0xff] }
0x10fc   : > { %v2413_v35 = vmul.f32 0.5, %v2407_v32  ;;  %5474 = vmatpush1.bf16.msra.mxu1 %v5473_v26  ;;  %v4629_v30 = vld [vmem:[%s7211_s5 + $0xc0] sm:$0xff] }
0x10fd   : > { %2522 = vmatprep.mubr.f32.mxu0 %v2418_v8  ;;  %v2414_v36 = vmul.f32 0.5, %v2408_v34  ;;  %v5477_v32 = vpack.c.bf16 %v4631_v31, %v4629_v30  ;;  %5476 = vmatprep.subr.bf16.mxu1 %v5475_v29  ;;  %v4634_v8 = vld [vmem:[%s7211_s5 + $0xe8] sm:$0xff]  ;;  %v4636_v34 = vld [vmem:[%s7211_s5 + $0xf8] sm:$0xff] }
0x10fe   : > { %2523 = vmatmul.mubr.f32.gmra.mrb[32].mxu0 %v2417_v17  ;;  %v2419_v39 = vmul.f32 %v2413_v35, %v2363_v46  ;;  %v5479_v17 = vpack.c.bf16 %v4636_v34, %v4634_v8  ;;  %v4633_v35 = vld [vmem:[%s7211_s5 + $0xe0] sm:$0xff] }
0x10ff   : > { %v2420_v38 = vmul.f32 %v2414_v36, %v2365_v47  ;;  %v4635_v36 = vld [vmem:[%s7211_s5 + $0xf0] sm:$0xff] }
0x1100   : > { %5478 = vmatpush1.bf16.msra.mxu1 %v5477_v32 }
0x1101   : > { %2527 = vmatprep.mubr.f32.mxu0 %v2420_v38  ;;  %v5481_v38 = vpack.c.bf16 %v4635_v36, %v4633_v35  ;;  %5480 = vmatprep.subr.bf16.mxu1 %v5479_v17 }
0x1102   : > { %2528 = vmatmul.mubr.f32.gmra.mrb[34].mxu0 %v2419_v39 }
0x1103   : > { %5176 = vmatprep.mubr.msk.f32.mxu0 %vm5822_vm2, %v5820_v33 }
0x1104   : > { %5482 = vmatpush1.bf16.msra.mxu1 %v5481_v38 }
0x1105   : > { %5483 = vmatprep.subr.bf16.mxu1 %v5819_v3 }
0x11cd   : > { %v4865_v50 = vpop.f32.mrb[30].mxu0 }
0x11ce   : > { %v4866_v9 = vpop.f32.mrb[31].mxu0 }
0x11cf   : > { %v4867_v40 = vadd.f32 %v4866_v9, %v4865_v50 }
0x11d1   : > { %v2533_v55 = vadd.f32 %v4867_v40, %v6424_v14  ;;  %v4868_v16 = vpop.f32.mrb[32].mxu0 }
0x11d2   : > { %v4869_v41 = vpop.f32.mrb[33].mxu0 }
0x11d3   : > { %v6622_v25 = vadd.f32 %v4616_v37, %v2533_v55  ;;  %v4870_v42 = vadd.f32 %v4869_v41, %v4868_v16 }
0x11d5   : > { %v2534_v46 = vadd.f32 %v4870_v42, %v6429_v23  ;;  %v4871_v43 = vpop.f32.mrb[34].mxu0  ;;  %v2550_v51 = vsel %vm582_vm0, %v6622_v25, 0.0 }
0x11d6   : > { %v4872_v44 = vpop.f32.mrb[35].mxu0  ;;  %2551 = vadd.xlane.f32.xlu1 %v2550_v51 }
0x11d7   : > { %v6627_v47 = vadd.f32 %v4616_v37, %v2534_v46  ;;  %v4873_v49 = vadd.f32 %v4872_v44, %v4871_v43  ;;  %v4619_v43 = vld [vmem:[%s7209_s3 + $0x1] ss:$0 sm:$0xff] }
0x11d8   : > { %v4620_v44 = vld [vmem:[%s7210_s4 + $0x1] ss:$0 sm:$0xff] }
0x11d9   : > { %v2535_v52 = vadd.f32 %v4873_v49, %v6434_v45  ;;  %v2553_v14 = vsel %vm582_vm0, %v6627_v47, 0.0 }
0x11da   : > { %2554 = vadd.xlane.f32.xlu0 %v2553_v14 }
0x11db   : > { %v6632_v53 = vadd.f32 %v4616_v37, %v2535_v52 }
0x11dd   : > { %v2556_v23 = vsel %vm680_vm1, %v6632_v53, 0.0 }
0x11de   : > { %2557 = vadd.xlane.f32.xlu1 %v2556_v23 }
0x1263   : > { %v2552_v57 = vpop.xlane.xlu1 %2551 }
0x1264   : > { %v2559_v58 = vmul.f32 0.015625, %v2552_v57 }
0x1266   : > { %v6637_v59 = vsub.f32 %v6622_v25, %v2559_v58 }
0x1267   : > { %v2555_v56 = vpop.xlane.xlu0 %2554 }
0x1268   : > { %v2560_v60 = vmul.f32 0.015625, %v2555_v56  ;;  %v2565_v45 = vmul.f32 %v6637_v59, %v6637_v59 }
0x126a   : > { %v6642_v61 = vsub.f32 %v6627_v47, %v2560_v60  ;;  %v2568_v62 = vsel %vm582_vm0, %v2565_v45, 0.0 }
0x126b   : > { %2569 = vadd.xlane.f32.xlu0 %v2568_v62  ;;  %v2558_v48 = vpop.xlane.xlu1 %2557 }
0x126c   : > { %v2561_v0 = vmul.f32 0.015625, %v2558_v48  ;;  %v2566_v4 = vmul.f32 %v6642_v61, %v6642_v61 }
0x126e   : > { %v6648_v54 = vsub.f32 %v6632_v53, %v2561_v0  ;;  %v2571_v5 = vsel %vm582_vm0, %v2566_v4, 0.0 }
0x126f   : > { %2572 = vadd.xlane.f32.xlu1 %v2571_v5 }
0x1270   : > { %v2567_v6 = vmul.f32 %v6648_v54, %v6648_v54 }
0x1272   : > { %v2574_v7 = vsel %vm680_vm1, %v2567_v6, 0.0 }
0x1273   : > { %2575 = vadd.xlane.f32.xlu0 %v2574_v7 }
0x12f8   : > { %v2570_v39 = vpop.xlane.xlu0 %2569 }
0x12f9   : > { %v2577_v50 = vmul.f32 0.015625, %v2570_v39 }
0x12fb   : > { %v2580_v9 = vadd.f32 1e-06, %v2577_v50 }
0x12fc   : > { %v2573_v40 = vpop.xlane.xlu1 %2572 }
0x12fd   : > { %5733 = vrsqrt.f32 %v2580_v9  ;;  %v2578_v37 = vmul.f32 0.015625, %v2573_v40 }
0x12ff   : > { %v2581_v55 = vadd.f32 1e-06, %v2578_v37 }
0x1300   : > { %v2576_v16 = vpop.xlane.xlu0 %2575 }
0x1301   : > { %5735 = vrsqrt.f32 %v2581_v55  ;;  %v2579_v41 = vmul.f32 0.015625, %v2576_v16 }
0x1303   : > { %v2582_v42 = vadd.f32 1e-06, %v2579_v41 }
0x1305   : > { %5737 = vrsqrt.f32 %v2582_v42 }
0x1307   : > { %v5734_v46 = vpop.eup %5733 }
0x1308   : > { %v2586_v51 = vmul.f32 %v5734_v46, %v6637_v59 }
0x130a   : > { %v2595_v49 = vmul.f32 %v4619_v43, %v2586_v51 }
0x130b   : > { %v5736_v52 = vpop.eup %5735 }
0x130c   : > { %v2604_v14 = vadd.f32 %v4620_v44, %v2595_v49  ;;  %v2587_v23 = vmul.f32 %v5736_v52, %v6642_v61  ;;  %v4637_v61 = vld [vmem:[%s7212_s6 + $0x2] sm:$0x3] }
0x130d   : > { %v2630_v48 = vrot.slane %v4637_v61, %v6132_v63  ;;  %v2634_v4 = vrot.slane %v4637_v61, %v6137_v1 }
0x130e   : > { %4638 = vmatmul.mubr.msk.f32.vlgmr.msra.gmra.mrb[60].mxu1 %vm582_vm0, %v2604_v14  ;;  %v2596_v57 = vmul.f32 %v4619_v43, %v2587_v23 }
0x130f   : > { %v5738_v58 = vpop.eup %5737  ;;  %2716 = vmatprep.mubr.f32.mxu1 %v5820_v33 }
0x1310   : > { %v2605_v56 = vadd.f32 %v4620_v44, %v2596_v57  ;;  %v2588_v60 = vmul.f32 %v5738_v58, %v6648_v54 }
0x1312   : > { %4639 = vmatmul.mubr.msk.f32.gmra.mrb[62].mxu1 %vm582_vm0, %v2605_v56  ;;  %v2597_v59 = vmul.f32 %v4619_v43, %v2588_v60 }
0x1313   : > { %2722 = vmatprep.mubr.f32.mxu1 %v5820_v33 }
0x1314   : > { %v2606_v45 = vadd.f32 %v4620_v44, %v2597_v59 }
0x1316   : > { %4640 = vmatmul.mubr.msk.f32.gmra.mrb[64].mxu1 %vm582_vm0, %v2606_v45 }
0x1317   : > { %5161 = vmatprep.mubr.msk.f32.mxu1 %vm5822_vm2, %v5820_v33 }
0x13e1   : > { %v2712_v62 = vpop.f32.mrb[60].mxu1 }
0x13e2   : > { %v2714_v0 = vpop.f32.mrb[61].mxu1  ;;  %v6724_v5 = vadd.f32 %v2712_v62, %v2630_v48 }
0x13e3   : > { %v2715_v2 = vadd.f32 %v2714_v0, %v2634_v4 }
0x13e5   : > { %v2718_v54 = vpop.f32.mrb[62].mxu1 }
0x13e6   : > { %v6726_v6 = vadd.f32 %v2718_v54, %v2630_v48  ;;  %v2720_v7 = vpop.f32.mrb[63].mxu1 }
0x13e7   : > { %v2721_v10 = vadd.f32 %v2720_v7, %v2634_v4 }
0x13e8   : > { %v6730_v11 = vpack.i.bf16 %v6726_v6, %v6724_v5 }
0x13e9   : > { %v2724_v12 = vpop.f32.mrb[64].mxu1  ;;  %v5488_v15 = vpack.c.bf16 %v2721_v10, %v2715_v2  ;;  %v6732_v18 = vpack.i.bf16 %v2721_v10, %v2715_v2 }
0x13ea   : > { %v6734_v19 = vadd.f32 %v2724_v12, %v2630_v48  ;;  %v2726_v20 = vpop.f32.mrb[65].mxu1  ;;  %5627 = vrot.lane.b32.xlu1 %v6730_v11, %s5821_s23 }
0x13eb   : > { %5489 = vmatpush3.bf16.msra.mxu0 %v5488_v15  ;;  %v6741_v21 = vadd.f32 %v2726_v20, %v2634_v4 }
0x13ec   : > { %2745 = vrot.lane.b32.xlu0 %v6734_v19, %s5821_s23  ;;  %5174 = vmatprep.subr.mxu0 %v5820_v33  ;;  %s7242_s23 = smov 32  }
0x13ee   : > { %5632 = vrot.lane.b32.xlu1 %v6730_v11, %s5823_s26 }
0x13ef   : > { %5175 = vmatpush3.msk.msra.mxu0 %vm1010_vm5, %v6741_v21 }
0x13f0   : > { %2969 = vrot.lane.b32.xlu0 %v6726_v6, %s7241_s21  ;;  %5494 = vmatprep.subr.bf16.mxu0 %v5819_v3 }
0x13f2   : > { %2977 = vrot.lane.b32.xlu1 %v6734_v19, %s5823_s26  ;;  %s7243_s26 = smov 96  }
0x13f6   : > { %2967 = vrot.lane.b32.xlu1 %v6724_v5, %s7241_s21 }
0x13fa   : > { %2971 = vrot.lane.b32.xlu1 %v6734_v19, %s7241_s21 }
0x145c   : > { %v5628_v13 = vpop.permute.xlu1 %5627 }
0x145d   : > { %v5630_v24 = vunpack.i.h.bf16 %v5628_v13  ;;  %v5629_v26 = vunpack.i.l.bf16 %v5628_v13 }
0x145e   : > { %v2746_v31 = vpop.permute.xlu0 %2745 }
0x145f   : > { %v5484_v27 = vpack.c.bf16 %v5630_v24, %v5629_v26 }
0x1460   : > { %v5633_v28 = vpop.permute.xlu1 %5632 }
0x1461   : > { %5486 = vmatpush3.bf16.xpose.msk.msra.mxu1 %vm6163_vm4, %v5484_v27  ;;  %v5635_v29 = vunpack.i.h.bf16 %v5633_v28  ;;  %v5634_v30 = vunpack.i.l.bf16 %v5633_v28 }
0x1462   : > { %5159 = vmatprep.subr.mxu1 %v5820_v33  ;;  %v2970_v17 = vpop.permute.xlu0 %2969 }
0x1463   : > { %v5491_v32 = vpack.c.bf16 %v5635_v29, %v5634_v30 }
0x1464   : > { %v2978_v8 = vpop.permute.xlu1 %2977 }
0x1468   : > { %v2968_v34 = vpop.permute.xlu1 %2967 }
0x1469   : > { %5160 = vmatpush3.xpose.msk.msra.mxu1 %vm870_vm3, %v2746_v31 }
0x146a   : > { %5490 = vmatprep.subr.bf16.mxu1 %v5819_v3 }
0x146c   : > { %5162 = vmatmul.mubr.msk.f32.vlgmr.msra.gmra.mrb[66].mxu1 %vm870_vm3, %v6724_v5  ;;  %v2972_v35 = vpop.permute.xlu1 %2971 }
0x146d   : > { %5493 = vmatpush3.bf16.xpose.msk.msra.mxu1 %vm6163_vm4, %v5491_v32  ;;  %5164 = vmatprep.mubr.msk.f32.mxu1 %vm5822_vm2, %v5820_v33 }
0x146e   : > { %5189 = vmatprep.subr.mxu1 %v5820_v33 }
0x1470   : > { %5165 = vmatmul.mubr.msk.f32.gmra.mrb[68].mxu1 %vm870_vm3, %v6726_v6 }
0x1471   : > { %5167 = vmatprep.mubr.msk.f32.mxu1 %vm5822_vm2, %v5820_v33 }
0x1474   : > { %5168 = vmatmul.mubr.msk.f32.gmra.mrb[70].mxu1 %vm870_vm3, %v6734_v19 }
0x1475   : > { %5190 = vmatpush3.xpose.msk.msra.mxu1 %vm870_vm3, %v2978_v8  ;;  %5191 = vmatprep.mubr.msk.f32.mxu1 %vm5822_vm2, %v5820_v33 }
0x1476   : > { %5497 = vmatprep.subr.bf16.mxu1 %v5819_v3 }
0x1478   : > { %5192 = vmatmul.mubr.msk.f32.vlgmr.msra.gmra.mrb[72].mxu1 %vm870_vm3, %v2968_v34 }
0x1479   : > { %5194 = vmatprep.mubr.msk.f32.mxu1 %vm5822_vm2, %v5820_v33 }
0x147c   : > { %5195 = vmatmul.mubr.msk.f32.gmra.mrb[74].mxu1 %vm870_vm3, %v2970_v17 }
0x147d   : > { %5197 = vmatprep.mubr.msk.f32.mxu1 %vm5822_vm2, %v5820_v33 }
0x1480   : > { %5198 = vmatmul.mubr.msk.f32.gmra.mrb[76].mxu1 %vm870_vm3, %v2972_v35 }
0x1481   : > { %5219 = vmatprep.mubr.msk.f32.mxu1 %vm5822_vm2, %v5820_v33 }
0x153f   : > { %v2825_v36 = vpop.f32.mrb[66].mxu1 }
0x1540   : > { %v2839_v38 = vmul.f32 0.25, %v2825_v36  ;;  %v5163_v39 = vpop.f32.mrb[67].mxu1 }
0x1542   : > { %v2842_v50 = vsel %vm966_vm6, %v2839_v38, -inf }
0x1543   : > { %2843 = vmax.xlane.f32.xlu0 %v2842_v50  ;;  %v2830_v9 = vpop.f32.mrb[68].mxu1 }
0x1544   : > { %v2840_v40 = vmul.f32 0.25, %v2830_v9  ;;  %v5166_v37 = vpop.f32.mrb[69].mxu1 }
0x1546   : > { %v2845_v55 = vsel %vm966_vm6, %v2840_v40, -inf }
0x1547   : > { %2846 = vmax.xlane.f32.xlu1 %v2845_v55  ;;  %v2835_v16 = vpop.f32.mrb[70].mxu1 }
0x1548   : > { %v2841_v41 = vmul.f32 0.25, %v2835_v16  ;;  %v5169_v42 = vpop.f32.mrb[71].mxu1 }
0x154a   : > { %v2848_v46 = vsel %vm973_vm7, %v2841_v41, -inf }
0x154b   : > { %2849 = vmax.xlane.f32.xlu0 %v2848_v46  ;;  %v3057_v43 = vpop.f32.mrb[72].mxu1 }
0x154c   : > { %v3071_v51 = vmul.f32 0.25, %v3057_v43  ;;  %v5193_v44 = vpop.f32.mrb[73].mxu1 }
0x154e   : > { %v3074_v49 = vsel %vm966_vm6, %v3071_v51, -inf }
0x154f   : > { %3075 = vmax.xlane.f32.xlu0 %v3074_v49  ;;  %v3062_v52 = vpop.f32.mrb[74].mxu1 }
0x1550   : > { %v3072_v14 = vmul.f32 0.25, %v3062_v52  ;;  %v5196_v23 = vpop.f32.mrb[75].mxu1 }
0x1552   : > { %v3077_v57 = vsel %vm966_vm6, %v3072_v14, -inf }
0x1553   : > { %3078 = vmax.xlane.f32.xlu0 %v3077_v57  ;;  %v3067_v58 = vpop.f32.mrb[76].mxu1 }
0x1554   : > { %v3073_v56 = vmul.f32 0.25, %v3067_v58  ;;  %v5199_v60 = vpop.f32.mrb[77].mxu1  ;;  %v4641_v58 = vld [vmem:[%s7213_s7 + $0x40] sm:$0xff] }
0x1556   : > { %v3080_v59 = vsel %vm973_vm7, %v3073_v56, -inf }
0x1557   : > { %3081 = vmax.xlane.f32.xlu1 %v3080_v59 }
0x15d0   : > { %v2844_v45 = vpop.xlane.xlu0 %2843 }
0x15d1   : > { %v2851_v61 = vsub.f32 %v2839_v38, %v2844_v45 }
0x15d3   : > { %v2854_v62 = vmul.f32 1.442695, %v2851_v61 }
0x15d4   : > { %v2847_v48 = vpop.xlane.xlu1 %2846 }
0x15d5   : > { %5739 = vpow2.f32 %v2854_v62  ;;  %v2852_v0 = vsub.f32 %v2840_v40, %v2847_v48 }
0x15d7   : > { %v2856_v4 = vmul.f32 1.442695, %v2852_v0 }
0x15d8   : > { %v2850_v54 = vpop.xlane.xlu0 %2849 }
0x15d9   : > { %5741 = vpow2.f32 %v2856_v4  ;;  %v2853_v7 = vsub.f32 %v2841_v41, %v2850_v54  ;;  %v4643_v54 = vld [vmem:[%s7213_s7 + $0x50] sm:$0xff] }
0x15db   : > { %v2858_v2 = vmul.f32 1.442695, %v2853_v7  ;;  %v4644_v7 = vld [vmem:[%s7213_s7 + $0x58] sm:$0xff] }
0x15dc   : > { %v3076_v10 = vpop.xlane.xlu0 %3075 }
0x15dd   : > { %5743 = vpow2.f32 %v2858_v2  ;;  %v3083_v12 = vsub.f32 %v3071_v51, %v3076_v10  ;;  %v5498_v2 = vpack.c.bf16 %v4644_v7, %v4643_v54 }
0x15df   : > { %v5740_v15 = vpop.eup %5739  ;;  %v3086_v20 = vmul.f32 1.442695, %v3083_v12  ;;  %5499 = vmatpush3.bf16.msra.mxu1 %v5498_v2 }
0x15e0   : > { %v3079_v13 = vpop.xlane.xlu0 %3078  ;;  %v2860_v24 = vsel %vm966_vm6, %v5740_v15, 0.0  ;;  %5503 = vmatprep.subr.bf16.mxu1 %v5819_v3 }
0x15e1   : > { %5745 = vpow2.f32 %v3086_v20  ;;  %v3084_v26 = vsub.f32 %v3072_v14, %v3079_v13  ;;  %2861 = vadd.xlane.f32.xlu0 %v2860_v24 }
0x15e3   : > { %v5742_v27 = vpop.eup %5741  ;;  %v3088_v28 = vmul.f32 1.442695, %v3084_v26 }
0x15e4   : > { %v3082_v29 = vpop.xlane.xlu1 %3081  ;;  %v2863_v30 = vsel %vm966_vm6, %v5742_v27, 0.0 }
0x15e5   : > { %5747 = vpow2.f32 %v3088_v28  ;;  %v3085_v31 = vsub.f32 %v3073_v56, %v3082_v29  ;;  %2864 = vadd.xlane.f32.xlu1 %v2863_v30  ;;  %v4642_v56 = vld [vmem:[%s7213_s7 + $0x48] sm:$0xff] }
0x15e6   : > { %v5501_v59 = vpack.c.bf16 %v4642_v56, %v4641_v58 }
0x15e7   : > { %v5744_v32 = vpop.eup %5743  ;;  %v3090_v8 = vmul.f32 1.442695, %v3085_v31 }
0x15e8   : > { %v2866_v34 = vsel %vm973_vm7, %v5744_v32, 0.0 }
0x15e9   : > { %5749 = vpow2.f32 %v3090_v8  ;;  %2867 = vadd.xlane.f32.xlu0 %v2866_v34 }
0x15eb   : > { %v5746_v17 = vpop.eup %5745 }
0x15ec   : > { %v3092_v35 = vsel %vm966_vm6, %v5746_v17, 0.0 }
0x15ed   : > { %3093 = vadd.xlane.f32.xlu1 %v3092_v35 }
0x15ef   : > { %v5748_v36 = vpop.eup %5747 }
0x15f0   : > { %v3095_v38 = vsel %vm966_vm6, %v5748_v36, 0.0 }
0x15f1   : > { %3096 = vadd.xlane.f32.xlu0 %v3095_v38 }
0x15f3   : > { %v5750_v39 = vpop.eup %5749 }
0x15f4   : > { %v3098_v50 = vsel %vm973_vm7, %v5750_v39, 0.0 }
0x15f5   : > { %3099 = vadd.xlane.f32.xlu1 %v3098_v50 }
0x1606   : > { %3113 = vrot.lane.b32.xlu1 %v6741_v21, %s7241_s21 }
0x1607   : > { %5637 = vrot.lane.b32.xlu0 %v6732_v18, %s7241_s21  ;;  %s7245_s21 = smov 80  }
0x160a   : > { %5642 = vrot.lane.b32.xlu1 %v6730_v11, %s7242_s23 }
0x160b   : > { %3386 = vrot.lane.b32.xlu0 %v6724_v5, %s7243_s26 }
0x160e   : > { %3396 = vrot.lane.b32.xlu1 %v6734_v19, %s7242_s23 }
0x160f   : > { %3390 = vrot.lane.b32.xlu0 %v6734_v19, %s7243_s26 }
0x1612   : > { %3388 = vrot.lane.b32.xlu1 %v6726_v6, %s7243_s26 }
0x166e   : > { %v2862_v9 = vpop.xlane.xlu0 %2861 }
0x166f   : > { %5751 = vrcp.f32 %v2862_v9 }
0x1672   : > { %v2865_v40 = vpop.xlane.xlu1 %2864 }
0x1673   : > { %5753 = vrcp.f32 %v2865_v40 }
0x1676   : > { %v2868_v37 = vpop.xlane.xlu0 %2867 }
0x1677   : > { %5755 = vrcp.f32 %v2868_v37 }
0x1679   : > { %v5752_v55 = vpop.eup %5751 }
0x167a   : > { %v2872_v16 = vmul.f32 %v5752_v55, %v5740_v15  ;;  %v3094_v41 = vpop.xlane.xlu1 %3093 }
0x167b   : > { %5757 = vrcp.f32 %v3094_v41 }
0x167c   : > { %5177 = vmatmul.mubr.msk.f32.vlgmr.msra.gmra.mrb[36].mxu0 %vm966_vm6, %v2872_v16 }
0x167d   : > { %v5754_v42 = vpop.eup %5753  ;;  %5179 = vmatprep.mubr.msk.f32.mxu0 %vm5822_vm2, %v5820_v33 }
0x167e   : > { %v3097_v46 = vpop.xlane.xlu0 %3096  ;;  %v2873_v43 = vmul.f32 %v5754_v42, %v5742_v27 }
0x167f   : > { %5759 = vrcp.f32 %v3097_v46 }
0x1680   : > { %5180 = vmatmul.mubr.msk.f32.gmra.mrb[38].mxu0 %vm966_vm6, %v2873_v43 }
0x1681   : > { %v5756_v51 = vpop.eup %5755  ;;  %5182 = vmatprep.mubr.msk.f32.mxu0 %vm5822_vm2, %v5820_v33 }
0x1682   : > { %v5638_v44 = vpop.permute.xlu0 %5637  ;;  %v3100_v49 = vpop.xlane.xlu1 %3099  ;;  %v2874_v52 = vmul.f32 %v5756_v51, %v5744_v32 }
0x1683   : > { %v5640_v14 = vunpack.i.h.bf16 %v5638_v44  ;;  %v5639_v23 = vunpack.i.l.bf16 %v5638_v44  ;;  %5761 = vrcp.f32 %v3100_v49 }
0x1684   : > { %5183 = vmatmul.mubr.msk.f32.gmra.mrb[40].mxu0 %vm966_vm6, %v2874_v52 }
0x1685   : > { %v5495_v57 = vpack.c.bf16 %v5640_v14, %v5639_v23  ;;  %5206 = vmatprep.mubr.msk.f32.mxu0 %vm5822_vm2, %v5820_v33  ;;  %v5758_v60 = vpop.eup %5757 }
0x1686   : > { %v3104_v45 = vmul.f32 %v5758_v60, %v5746_v17  ;;  %v3114_v61 = vpop.permute.xlu1 %3113 }
0x1687   : > { %5496 = vmatpush3.bf16.msra.mxu0 %v5495_v57 }
0x1688   : > { %5204 = vmatprep.subr.mxu0 %v5820_v33 }
0x1689   : > { %v5760_v62 = vpop.eup %5759 }
0x168a   : > { %v3105_v48 = vmul.f32 %v5760_v62, %v5748_v36  ;;  %v5643_v24 = vpop.permute.xlu1 %5642  ;;  %v3387_v36 = vpop.permute.xlu0 %3386 }
0x168b   : > { %5205 = vmatpush3.msk.msra.mxu0 %vm1010_vm5, %v3114_v61  ;;  %v5645_v27 = vunpack.i.h.bf16 %v5643_v24  ;;  %v5644_v28 = vunpack.i.l.bf16 %v5643_v24 }
0x168c   : > { %5207 = vmatmul.mubr.msk.f32.vlgmr.msra.gmra.mrb[42].mxu0 %vm966_vm6, %v3104_v45  ;;  %5500 = vmatprep.subr.bf16.mxu0 %v5819_v3 }
0x168d   : > { %5209 = vmatprep.mubr.msk.f32.mxu0 %vm5822_vm2, %v5820_v33  ;;  %5502 = vmatpush3.bf16.msra.mxu0 %v5501_v59  ;;  %v5762_v0 = vpop.eup %5761  ;;  %v5504_v29 = vpack.c.bf16 %v5645_v27, %v5644_v28 }
0x168e   : > { %5507 = vmatprep.subr.bf16.mxu0 %v5819_v3  ;;  %v3106_v4 = vmul.f32 %v5762_v0, %v5750_v39  ;;  %v3397_v17 = vpop.permute.xlu1 %3396  ;;  %v3391_v39 = vpop.permute.xlu0 %3390 }
0x1690   : > { %5210 = vmatmul.mubr.msk.f32.gmra.mrb[44].mxu0 %vm966_vm6, %v3105_v48 }
0x1691   : > { %5212 = vmatprep.mubr.msk.f32.mxu0 %vm5822_vm2, %v5820_v33 }
0x1692   : > { %v3389_v38 = vpop.permute.xlu1 %3388 }
0x1694   : > { %5213 = vmatmul.mubr.msk.f32.gmra.mrb[46].mxu0 %vm966_vm6, %v3106_v4 }
0x1695   : > { %5232 = vmatprep.mubr.msk.f32.mxu0 %vm5822_vm2, %v5820_v33 }
0x174f   : > { %v2953_v10 = vpop.f32.mrb[36].mxu0 }
0x1750   : > { %v5178_v12 = vpop.f32.mrb[37].mxu0  ;;  %5233 = vmatmul.mubr.msk.f32.vlgmr.msra.gmra.mrb[48].mxu0 %vm870_vm3, %v2953_v10 }
0x1751   : > { %5235 = vmatprep.mubr.msk.f32.mxu0 %vm5822_vm2, %v5820_v33 }
0x1753   : > { %v2958_v15 = vpop.f32.mrb[38].mxu0 }
0x1754   : > { %v5181_v20 = vpop.f32.mrb[39].mxu0  ;;  %5236 = vmatmul.mubr.msk.f32.gmra.mrb[50].mxu0 %vm870_vm3, %v2958_v15 }
0x1755   : > { %5238 = vmatprep.mubr.msk.f32.mxu0 %vm5822_vm2, %v5820_v33 }
0x1757   : > { %v2963_v13 = vpop.f32.mrb[40].mxu0 }
0x1758   : > { %v5184_v26 = vpop.f32.mrb[41].mxu0  ;;  %5239 = vmatmul.mubr.msk.f32.gmra.mrb[52].mxu0 %vm870_vm3, %v2963_v13 }
0x1759   : > { %5262 = vmatprep.mubr.msk.f32.mxu0 %vm5822_vm2, %v5820_v33 }
0x175f   : > { %v3194_v30 = vpop.f32.mrb[42].mxu0 }
0x1760   : > { %v5208_v31 = vpop.f32.mrb[43].mxu0  ;;  %5220 = vmatmul.mubr.msk.f32.vlgmr.msra.gmra.mrb[78].mxu1 %vm870_vm3, %v3194_v30 }
0x1761   : > { %5506 = vmatpush3.bf16.xpose.msk.msra.mxu1 %vm6163_vm4, %v5504_v29  ;;  %5222 = vmatprep.mubr.msk.f32.mxu1 %vm5822_vm2, %v5820_v33 }
0x1762   : > { %5245 = vmatprep.subr.mxu1 %v5820_v33 }
0x1763   : > { %v3199_v32 = vpop.f32.mrb[44].mxu0 }
0x1764   : > { %v5211_v8 = vpop.f32.mrb[45].mxu0  ;;  %5223 = vmatmul.mubr.msk.f32.gmra.mrb[80].mxu1 %vm870_vm3, %v3199_v32 }
0x1765   : > { %5225 = vmatprep.mubr.msk.f32.mxu1 %vm5822_vm2, %v5820_v33 }
0x1767   : > { %v3204_v34 = vpop.f32.mrb[46].mxu0 }
0x1768   : > { %v5214_v35 = vpop.f32.mrb[47].mxu0  ;;  %5226 = vmatmul.mubr.msk.f32.gmra.mrb[82].mxu1 %vm870_vm3, %v3204_v34 }
0x1769   : > { %5246 = vmatpush3.xpose.msk.msra.mxu1 %vm870_vm3, %v3397_v17  ;;  %5247 = vmatprep.mubr.msk.f32.mxu1 %vm5822_vm2, %v5820_v33  ;;  %v4645_v35 = vld [vmem:[%s7213_s7 + $0x60] sm:$0xff] }
0x176a   : > { %5510 = vmatprep.subr.bf16.mxu1 %v5819_v3 }
0x176c   : > { %5248 = vmatmul.mubr.msk.f32.vlgmr.msra.gmra.mrb[84].mxu1 %vm870_vm3, %v3387_v36 }
0x176d   : > { %5250 = vmatprep.mubr.msk.f32.mxu1 %vm5822_vm2, %v5820_v33 }
0x1770   : > { %5251 = vmatmul.mubr.msk.f32.gmra.mrb[86].mxu1 %vm870_vm3, %v3389_v38 }
0x1771   : > { %5253 = vmatprep.mubr.msk.f32.mxu1 %vm5822_vm2, %v5820_v33 }
0x1774   : > { %5254 = vmatmul.mubr.msk.f32.gmra.mrb[88].mxu1 %vm870_vm3, %v3391_v39 }
0x1775   : > { %5275 = vmatprep.mubr.msk.f32.mxu1 %vm5822_vm2, %v5820_v33 }
0x1823   : > { %v3372_v50 = vpop.f32.mrb[48].mxu0 }
0x1824   : > { %v5234_v9 = vpop.f32.mrb[49].mxu0 }
0x1827   : > { %v3377_v40 = vpop.f32.mrb[50].mxu0 }
0x1828   : > { %v5237_v37 = vpop.f32.mrb[51].mxu0 }
0x182b   : > { %v3382_v55 = vpop.f32.mrb[52].mxu0 }
0x182c   : > { %v5240_v16 = vpop.f32.mrb[53].mxu0 }
0x1833   : > { %v3283_v41 = vpop.f32.mrb[78].mxu1 }
0x1834   : > { %v6880_v42 = vadd.f32 %v3372_v50, %v3283_v41  ;;  %v5221_v46 = vpop.f32.mrb[79].mxu1 }
0x1837   : > { %v3288_v43 = vpop.f32.mrb[80].mxu1 }
0x1838   : > { %v6882_v51 = vadd.f32 %v3377_v40, %v3288_v43  ;;  %v5224_v44 = vpop.f32.mrb[81].mxu1 }
0x183b   : > { %v3293_v49 = vpop.f32.mrb[82].mxu1 }
0x183c   : > { %v6884_v52 = vadd.f32 %v3382_v55, %v3293_v49  ;;  %v5227_v14 = vpop.f32.mrb[83].mxu1 }
0x183f   : > { %v3476_v23 = vpop.f32.mrb[84].mxu1 }
0x1840   : > { %v3490_v57 = vmul.f32 0.25, %v3476_v23  ;;  %v5249_v58 = vpop.f32.mrb[85].mxu1 }
0x1842   : > { %v3493_v56 = vsel %vm966_vm6, %v3490_v57, -inf }
0x1843   : > { %3494 = vmax.xlane.f32.xlu1 %v3493_v56  ;;  %v3481_v60 = vpop.f32.mrb[86].mxu1 }
0x1844   : > { %v3491_v59 = vmul.f32 0.25, %v3481_v60  ;;  %v5252_v45 = vpop.f32.mrb[87].mxu1 }
0x1846   : > { %v3496_v61 = vsel %vm966_vm6, %v3491_v59, -inf }
0x1847   : > { %3497 = vmax.xlane.f32.xlu0 %v3496_v61  ;;  %v3486_v62 = vpop.f32.mrb[88].mxu1 }
0x1848   : > { %v3492_v48 = vmul.f32 0.25, %v3486_v62  ;;  %v5255_v0 = vpop.f32.mrb[89].mxu1 }
0x184a   : > { %v3499_v4 = vsel %vm973_vm7, %v3492_v48, -inf }
0x184b   : > { %3500 = vmax.xlane.f32.xlu0 %v3499_v4 }
0x1854   : > { %5647 = vrot.lane.b32.xlu1 %v6732_v18, %s7243_s26 }
0x18d0   : > { %v3495_v54 = vpop.xlane.xlu1 %3494 }
0x18d1   : > { %v3502_v7 = vsub.f32 %v3490_v57, %v3495_v54 }
0x18d3   : > { %v3505_v2 = vmul.f32 1.442695, %v3502_v7 }
0x18d4   : > { %v5648_v10 = vpop.permute.xlu1 %5647  ;;  %v3498_v12 = vpop.xlane.xlu0 %3497 }
0x18d5   : > { %5763 = vpow2.f32 %v3505_v2  ;;  %v5650_v15 = vunpack.i.h.bf16 %v5648_v10  ;;  %v5649_v20 = vunpack.i.l.bf16 %v5648_v10  ;;  %v3503_v13 = vsub.f32 %v3491_v59, %v3498_v12 }
0x18d7   : > { %v5508_v24 = vpack.c.bf16 %v5650_v15, %v5649_v20  ;;  %v3507_v26 = vmul.f32 1.442695, %v3503_v13 }
0x18d8   : > { %v3501_v27 = vpop.xlane.xlu0 %3500 }
0x18d9   : > { %5765 = vpow2.f32 %v3507_v26  ;;  %v3504_v28 = vsub.f32 %v3492_v48, %v3501_v27  ;;  %5509 = vmatpush3.bf16.msra.mxu0 %v5508_v24 }
0x18da   : > { %5260 = vmatprep.subr.mxu0 %v5820_v33 }
0x18db   : > { %v3509_v29 = vmul.f32 1.442695, %v3504_v28 }
0x18dd   : > { %5767 = vpow2.f32 %v3509_v29 }
0x18df   : > { %v5764_v30 = vpop.eup %5763 }
0x18e0   : > { %v3511_v31 = vsel %vm966_vm6, %v5764_v30, 0.0 }
0x18e1   : > { %3512 = vadd.xlane.f32.xlu0 %v3511_v31 }
0x18e3   : > { %v5766_v32 = vpop.eup %5765 }
0x18e4   : > { %v3514_v8 = vsel %vm966_vm6, %v5766_v32, 0.0 }
0x18e5   : > { %3515 = vadd.xlane.f32.xlu1 %v3514_v8 }
0x18e7   : > { %v5768_v34 = vpop.eup %5767 }
0x18e8   : > { %v3517_v17 = vsel %vm973_vm7, %v5768_v34, 0.0 }
0x18e9   : > { %3518 = vadd.xlane.f32.xlu0 %v3517_v17 }
0x18f6   : > { %5652 = vrot.lane.b32.xlu1 %v6730_v11, %s7244_s20  ;;  %v4646_v11 = vld [vmem:[%s7213_s7 + $0x68] sm:$0xff] }
0x18f7   : > { %v5511_v36 = vpack.c.bf16 %v4646_v11, %v4645_v35 }
0x18f9   : > { %5512 = vmatpush3.bf16.msra.mxu1 %v5511_v36 }
0x18fa   : > { %3727 = vrot.lane.b32.xlu1 %v6734_v19, %s7244_s20  ;;  %5517 = vmatprep.subr.bf16.mxu1 %v5819_v3 }
0x18fe   : > { %3717 = vrot.lane.b32.xlu1 %v6724_v5, %s7245_s21 }
0x18ff   : > { %3530 = vrot.lane.b32.xlu0 %v6741_v21, %s7243_s26 }
0x1902   : > { %3721 = vrot.lane.b32.xlu1 %v6734_v19, %s7245_s21 }
0x1903   : > { %3719 = vrot.lane.b32.xlu0 %v6726_v6, %s7245_s21 }
0x196e   : > { %v3513_v5 = vpop.xlane.xlu0 %3512 }
0x196f   : > { %5769 = vrcp.f32 %v3513_v5 }
0x1972   : > { %v3516_v38 = vpop.xlane.xlu1 %3515 }
0x1973   : > { %5771 = vrcp.f32 %v3516_v38 }
0x1976   : > { %v3519_v19 = vpop.xlane.xlu0 %3518  ;;  %v5653_v6 = vpop.permute.xlu1 %5652 }
0x1977   : > { %5773 = vrcp.f32 %v3519_v19  ;;  %v5655_v40 = vunpack.i.h.bf16 %v5653_v6  ;;  %v5654_v37 = vunpack.i.l.bf16 %v5653_v6  ;;  %v4647_v6 = vld [vmem:[%s7213_s7 + $0x70] sm:$0xff] }
0x1979   : > { %v5770_v39 = vpop.eup %5769  ;;  %v5514_v41 = vpack.c.bf16 %v5655_v40, %v5654_v37 }
0x197a   : > { %v3523_v50 = vmul.f32 %v5770_v39, %v5764_v30  ;;  %v3531_v9 = vpop.permute.xlu0 %3530  ;;  %v3728_v44 = vpop.permute.xlu1 %3727 }
0x197b   : > { %5261 = vmatpush3.msk.msra.mxu0 %vm1010_vm5, %v3531_v9 }
0x197c   : > { %5263 = vmatmul.mubr.msk.f32.vlgmr.msra.gmra.mrb[54].mxu0 %vm966_vm6, %v3523_v50  ;;  %5513 = vmatprep.subr.bf16.mxu0 %v5819_v3  ;;  %v4648_v50 = vld [vmem:[%s7213_s7 + $0x78] sm:$0xff] }
0x197d   : > { %v5772_v55 = vpop.eup %5771  ;;  %5265 = vmatprep.mubr.msk.f32.mxu0 %vm5822_vm2, %v5820_v33 }
0x197e   : > { %v3524_v16 = vmul.f32 %v5772_v55, %v5766_v32  ;;  %v3718_v49 = vpop.permute.xlu1 %3717  ;;  %v3720_v22 = vpop.permute.xlu0 %3719 }
0x1980   : > { %5266 = vmatmul.mubr.msk.f32.gmra.mrb[56].mxu0 %vm966_vm6, %v3524_v16 }
0x1981   : > { %v5774_v46 = vpop.eup %5773  ;;  %5268 = vmatprep.mubr.msk.f32.mxu0 %vm5822_vm2, %v5820_v33 }
0x1982   : > { %5516 = vmatpush3.bf16.xpose.msk.msra.mxu0 %vm6163_vm4, %v5514_v41  ;;  %v3525_v43 = vmul.f32 %v5774_v46, %v5768_v34  ;;  %v3722_v14 = vpop.permute.xlu1 %3721 }
0x1983   : > { %5288 = vmatprep.subr.mxu0 %v5820_v33 }
0x1984   : > { %5269 = vmatmul.mubr.msk.f32.gmra.mrb[58].mxu0 %vm966_vm6, %v3525_v43 }
0x1985   : > { %5290 = vmatprep.mubr.msk.f32.mxu0 %vm5822_vm2, %v5820_v33 }
0x198a   : > { %5289 = vmatpush3.xpose.msk.msra.mxu0 %vm870_vm3, %v3728_v44 }
0x198b   : > { %5520 = vmatprep.subr.bf16.mxu0 %v5819_v3 }
0x198d   : > { %5291 = vmatmul.mubr.msk.f32.vlgmr.msra.gmra.mrb[60].mxu0 %vm870_vm3, %v3718_v49 }
0x198e   : > { %5293 = vmatprep.mubr.msk.f32.mxu0 %vm5822_vm2, %v5820_v33 }
0x1991   : > { %5294 = vmatmul.mubr.msk.f32.gmra.mrb[62].mxu0 %vm870_vm3, %v3720_v22 }
0x1992   : > { %5296 = vmatprep.mubr.msk.f32.mxu0 %vm5822_vm2, %v5820_v33 }
0x1995   : > { %5297 = vmatmul.mubr.msk.f32.gmra.mrb[64].mxu0 %vm870_vm3, %v3722_v14 }
0x1996   : > { %5318 = vmatprep.mubr.msk.f32.mxu0 %vm5822_vm2, %v5820_v33 }
0x1a4f   : > { %v3611_v23 = vpop.f32.mrb[54].mxu0 }
0x1a50   : > { %v5264_v3 = vpop.f32.mrb[55].mxu0  ;;  %5276 = vmatmul.mubr.msk.f32.vlgmr.msra.gmra.mrb[90].mxu1 %vm870_vm3, %v3611_v23 }
0x1a51   : > { %5278 = vmatprep.mubr.msk.f32.mxu1 %vm5822_vm2, %v5820_v33 }
0x1a53   : > { %v3616_v57 = vpop.f32.mrb[56].mxu0 }
0x1a54   : > { %v5267_v58 = vpop.f32.mrb[57].mxu0  ;;  %5279 = vmatmul.mubr.msk.f32.gmra.mrb[92].mxu1 %vm870_vm3, %v3616_v57 }
0x1a55   : > { %5281 = vmatprep.mubr.msk.f32.mxu1 %vm5822_vm2, %v5820_v33 }
0x1a57   : > { %v3621_v56 = vpop.f32.mrb[58].mxu0 }
0x1a58   : > { %v5270_v60 = vpop.f32.mrb[59].mxu0  ;;  %5282 = vmatmul.mubr.msk.f32.gmra.mrb[94].mxu1 %vm870_vm3, %v3621_v56 }
0x1a59   : > { %5305 = vmatprep.mubr.msk.f32.mxu1 %vm5822_vm2, %v5820_v33 }
0x1a60   : > { %v3807_v59 = vpop.f32.mrb[60].mxu0 }
0x1a61   : > { %v3821_v45 = vmul.f32 0.25, %v3807_v59  ;;  %v5292_v61 = vpop.f32.mrb[61].mxu0 }
0x1a62   : > { %v4702_v61 = vld [vmem:[%s7214_s8 + $0x1] ss:$0 sm:$0xff] }
0x1a63   : > { %v3824_v62 = vsel %vm966_vm6, %v3821_v45, -inf }
0x1a64   : > { %3825 = vmax.xlane.f32.xlu0 %v3824_v62  ;;  %v3812_v48 = vpop.f32.mrb[62].mxu0 }
0x1a65   : > { %v3822_v0 = vmul.f32 0.25, %v3812_v48  ;;  %v5295_v4 = vpop.f32.mrb[63].mxu0 }
0x1a67   : > { %v3827_v54 = vsel %vm966_vm6, %v3822_v0, -inf }
0x1a68   : > { %3828 = vmax.xlane.f32.xlu1 %v3827_v54  ;;  %v3817_v7 = vpop.f32.mrb[64].mxu0 }
0x1a69   : > { %v3823_v2 = vmul.f32 0.25, %v3817_v7  ;;  %v5298_v10 = vpop.f32.mrb[65].mxu0 }
0x1a6b   : > { %v3830_v12 = vsel %vm973_vm7, %v3823_v2, -inf }
0x1a6c   : > { %3831 = vmax.xlane.f32.xlu0 %v3830_v12 }
0x1af1   : > { %v3826_v15 = vpop.xlane.xlu0 %3825 }
0x1af2   : > { %v3833_v20 = vsub.f32 %v3821_v45, %v3826_v15 }
0x1af4   : > { %v3836_v13 = vmul.f32 1.442695, %v3833_v20 }
0x1af5   : > { %v3829_v24 = vpop.xlane.xlu1 %3828 }
0x1af6   : > { %5775 = vpow2.f32 %v3836_v13  ;;  %v3834_v26 = vsub.f32 %v3822_v0, %v3829_v24 }
0x1af8   : > { %v3838_v27 = vmul.f32 1.442695, %v3834_v26 }
0x1af9   : > { %v3832_v28 = vpop.xlane.xlu0 %3831 }
0x1afa   : > { %5777 = vpow2.f32 %v3838_v27  ;;  %v3835_v29 = vsub.f32 %v3823_v2, %v3832_v28 }
0x1afc   : > { %v3840_v30 = vmul.f32 1.442695, %v3835_v29 }
0x1afe   : > { %5779 = vpow2.f32 %v3840_v30 }
0x1b00   : > { %v5776_v31 = vpop.eup %5775 }
0x1b01   : > { %v3842_v32 = vsel %vm966_vm6, %v5776_v31, 0.0 }
0x1b02   : > { %3843 = vadd.xlane.f32.xlu0 %v3842_v32 }
0x1b04   : > { %v5778_v8 = vpop.eup %5777 }
0x1b05   : > { %v3845_v34 = vsel %vm966_vm6, %v5778_v8, 0.0 }
0x1b06   : > { %3846 = vadd.xlane.f32.xlu0 %v3845_v34 }
0x1b08   : > { %v5780_v17 = vpop.eup %5779 }
0x1b09   : > { %v3848_v35 = vsel %vm973_vm7, %v5780_v17, 0.0 }
0x1b0a   : > { %3849 = vadd.xlane.f32.xlu1 %v3848_v35 }
0x1b1b   : > { %3861 = vrot.lane.b32.xlu1 %v6741_v21, %s7245_s21  ;;  %v5521_v21 = vpack.c.bf16 %v4648_v50, %v4647_v6  ;;  %v4710_v6 = vld [vmem:[%s7217_s11 + $0x98] sm:$0xff] }
0x1b1c   : > { %5657 = vrot.lane.b32.xlu0 %v6732_v18, %s7245_s21 }
0x1b1d   : > { %5522 = vmatpush3.bf16.msra.mxu0 %v5521_v21  ;;  %v4707_v21 = vld [vmem:[%s7217_s11 + $0x80] sm:$0xff] }
0x1b23   : > { %v3700_v11 = vpop.f32.mrb[90].mxu1 }
0x1b24   : > { %v3714_v36 = vadd.f32 %v3700_v11, %v6880_v42  ;;  %v5277_v5 = vpop.f32.mrb[91].mxu1 }
0x1b27   : > { %v3705_v38 = vpop.f32.mrb[92].mxu1 }
0x1b28   : > { %v3715_v19 = vadd.f32 %v3705_v38, %v6882_v51  ;;  %v5280_v39 = vpop.f32.mrb[93].mxu1 }
0x1b29   : > { %v4708_v39 = vld [vmem:[%s7217_s11 + $0x88] sm:$0xff] }
0x1b2a   : > { %v5523_v50 = vpack.c.bf16 %v4710_v6, %v4708_v39  ;;  %v4747_v39 = vld [vmem:[%s7219_s13 + $0x1a0] sm:$0xff]  ;;  %v4748_v6 = vld [vmem:[%s7219_s13 + $0x1a8] sm:$0xff] }
0x1b2b   : > { %v3710_v9 = vpop.f32.mrb[94].mxu1 }
0x1b2c   : > { %v3716_v18 = vadd.f32 %v3710_v9, %v6884_v52  ;;  %v5283_v40 = vpop.f32.mrb[95].mxu1  ;;  %v4709_v9 = vld [vmem:[%s7217_s11 + $0x90] sm:$0xff] }
0x1b2d   : > { %v4712_v40 = vld [vmem:[%s7217_s11 + $0xa8] sm:$0xff] }
0x1b8f   : > { %v3844_v42 = vpop.xlane.xlu0 %3843 }
0x1b90   : > { %5781 = vrcp.f32 %v3844_v42  ;;  %v4714_v42 = vld [vmem:[%s7217_s11 + $0xb8] sm:$0xff] }
0x1b93   : > { %v3847_v37 = vpop.xlane.xlu0 %3846 }
0x1b94   : > { %5783 = vrcp.f32 %v3847_v37  ;;  %v5527_v37 = vpack.c.bf16 %v4714_v42, %v4712_v40  ;;  %v4749_v40 = vld [vmem:[%s7219_s13 + $0x1b0] sm:$0xff]  ;;  %v4750_v42 = vld [vmem:[%s7219_s13 + $0x1b8] sm:$0xff] }
0x1b97   : > { %v3850_v51 = vpop.xlane.xlu1 %3849  ;;  %v5658_v55 = vpop.permute.xlu0 %5657 }
0x1b98   : > { %v5660_v16 = vunpack.i.h.bf16 %v5658_v55  ;;  %v5659_v41 = vunpack.i.l.bf16 %v5658_v55  ;;  %5785 = vrcp.f32 %v3850_v51  ;;  %v4711_v51 = vld [vmem:[%s7217_s11 + $0xa0] sm:$0xff]  ;;  %v4713_v55 = vld [vmem:[%s7217_s11 + $0xb0] sm:$0xff] }
0x1b9a   : > { %v5518_v46 = vpack.c.bf16 %v5660_v16, %v5659_v41  ;;  %v5782_v43 = vpop.eup %5781  ;;  %v5529_v16 = vpack.c.bf16 %v4713_v55, %v4711_v51  ;;  %v4716_v41 = vld [vmem:[%s7217_s11 + $0xc8] sm:$0xff]  ;;  %v4733_v51 = vld [vmem:[%s7219_s13 + $0x130] sm:$0xff]  ;;  %v4734_v55 = vld [vmem:[%s7219_s13 + $0x138] sm:$0xff] }
0x1b9b   : > { %v3854_v44 = vmul.f32 %v5782_v43, %v5776_v31  ;;  %v3862_v49 = vpop.permute.xlu1 %3861 }
0x1b9c   : > { %5519 = vmatpush3.bf16.msra.mxu1 %v5518_v46  ;;  %v4718_v46 = vld [vmem:[%s7217_s11 + $0xd8] sm:$0xff] }
0x1b9d   : > { %5303 = vmatprep.subr.mxu1 %v5820_v33  ;;  %v5531_v43 = vpack.c.bf16 %v4718_v46, %v4716_v41  ;;  %v4751_v41 = vld [vmem:[%s7219_s13 + $0x1c0] sm:$0xff]  ;;  %v4752_v46 = vld [vmem:[%s7219_s13 + $0x1c8] sm:$0xff] }
0x1b9e   : > { %v5784_v22 = vpop.eup %5783 }
0x1b9f   : > { %v3855_v52 = vmul.f32 %v5784_v22, %v5778_v8 }
0x1ba0   : > { %5304 = vmatpush3.msk.msra.mxu1 %vm1010_vm5, %v3862_v49  ;;  %v4717_v49 = vld [vmem:[%s7217_s11 + $0xd0] sm:$0xff] }
0x1ba1   : > { %5306 = vmatmul.mubr.msk.f32.vlgmr.msra.gmra.mrb[96].mxu1 %vm966_vm6, %v3854_v44  ;;  %5524 = vmatprep.subr.bf16.mxu1 %v5523_v50  ;;  %v4715_v44 = vld [vmem:[%s7217_s11 + $0xc0] sm:$0xff]  ;;  %v5547_v50 = vpack.c.bf16 %v4748_v6, %v4747_v39 }
0x1ba2   : > { %5308 = vmatprep.mubr.msk.f32.mxu1 %vm5822_vm2, %v5820_v33  ;;  %v5786_v14 = vpop.eup %5785  ;;  %v5533_v22 = vpack.c.bf16 %v4717_v49, %v4715_v44  ;;  %v4735_v44 = vld [vmem:[%s7219_s13 + $0x140] sm:$0xff]  ;;  %v4736_v49 = vld [vmem:[%s7219_s13 + $0x148] sm:$0xff] }
0x1ba3   : > { %v3856_v23 = vmul.f32 %v5786_v14, %v5780_v17  ;;  %v4722_v14 = vld [vmem:[%s7217_s11 + $0xf8] sm:$0xff] }
0x1ba5   : > { %5309 = vmatmul.mubr.msk.f32.gmra.mrb[98].mxu1 %vm966_vm6, %v3855_v52  ;;  %v4720_v52 = vld [vmem:[%s7217_s11 + $0xe8] sm:$0xff] }
0x1ba6   : > { %5311 = vmatprep.mubr.msk.f32.mxu1 %vm5822_vm2, %v5820_v33 }
0x1ba9   : > { %5312 = vmatmul.mubr.msk.f32.gmra.mrb[100].mxu1 %vm966_vm6, %v3856_v23  ;;  %v5535_v23 = vpack.c.bf16 %v4722_v14, %v4720_v52  ;;  %v4753_v52 = vld [vmem:[%s7219_s13 + $0x1d0] sm:$0xff]  ;;  %v4754_v14 = vld [vmem:[%s7219_s13 + $0x1d8] sm:$0xff] }
0x1baa   : > { %4226 = vmatprep.mubr.f32.mxu1 %v5820_v33 }
0x1c74   : > { %v3942_v3 = vpop.f32.mrb[96].mxu1 }
0x1c75   : > { %v5307_v57 = vpop.f32.mrb[97].mxu1  ;;  %5319 = vmatmul.mubr.msk.f32.vlgmr.msra.gmra.mrb[66].mxu0 %vm870_vm3, %v3942_v3  ;;  %v4719_v3 = vld [vmem:[%s7217_s11 + $0xe0] sm:$0xff] }
0x1c76   : > { %5321 = vmatprep.mubr.msk.f32.mxu0 %vm5822_vm2, %v5820_v33  ;;  %v4721_v57 = vld [vmem:[%s7217_s11 + $0xf0] sm:$0xff] }
0x1c78   : > { %v3947_v58 = vpop.f32.mrb[98].mxu1 }
0x1c79   : > { %v5310_v56 = vpop.f32.mrb[99].mxu1  ;;  %5322 = vmatmul.mubr.msk.f32.gmra.mrb[68].mxu0 %vm870_vm3, %v3947_v58  ;;  %v5537_v58 = vpack.c.bf16 %v4721_v57, %v4719_v3  ;;  %v4737_v3 = vld [vmem:[%s7219_s13 + $0x150] sm:$0xff]  ;;  %v4738_v57 = vld [vmem:[%s7219_s13 + $0x158] sm:$0xff] }
0x1c7a   : > { %5324 = vmatprep.mubr.msk.f32.mxu0 %vm5822_vm2, %v5820_v33 }
0x1c7c   : > { %v3952_v60 = vpop.f32.mrb[100].mxu1 }
0x1c7d   : > { %v5313_v59 = vpop.f32.mrb[101].mxu1  ;;  %5325 = vmatmul.mubr.msk.f32.gmra.mrb[70].mxu0 %vm870_vm3, %v3952_v60 }
0x1d48   : > { %v4031_v45 = vpop.f32.mrb[66].mxu0 }
0x1d49   : > { %v4045_v62 = vadd.f32 %v4031_v45, %v3714_v36  ;;  %v5320_v48 = vpop.f32.mrb[67].mxu0 }
0x1d4b   : > { %v4056_v0 = vadd.f32 %v4702_v61, %v4045_v62 }
0x1d4c   : > { %v4036_v4 = vpop.f32.mrb[68].mxu0 }
0x1d4d   : > { %v6988_v54 = vadd.f32 %v4056_v0, %v6622_v25  ;;  %v4046_v7 = vadd.f32 %v4036_v4, %v3715_v19  ;;  %v5323_v2 = vpop.f32.mrb[69].mxu0 }
0x1d4e   : > { %v4705_v2 = vld [vmem:[%s7215_s9 + $0x1] ss:$0 sm:$0xff] }
0x1d4f   : > { %v4057_v10 = vadd.f32 %v4702_v61, %v4046_v7  ;;  %v4066_v12 = vsel %vm582_vm0, %v6988_v54, 0.0 }
0x1d50   : > { %4067 = vadd.xlane.f32.xlu1 %v4066_v12  ;;  %v4041_v15 = vpop.f32.mrb[70].mxu0  ;;  %v4706_v12 = vld [vmem:[%s7216_s10 + $0x1] ss:$0 sm:$0xff] }
0x1d51   : > { %v6993_v20 = vadd.f32 %v4057_v10, %v6627_v47  ;;  %v4047_v13 = vadd.f32 %v4041_v15, %v3716_v18  ;;  %v5326_v24 = vpop.f32.mrb[71].mxu0  ;;  %v5525_v18 = vpack.c.bf16 %v4709_v9, %v4707_v21  ;;  %v4731_v21 = vld [vmem:[%s7219_s13 + $0x120] sm:$0xff]  ;;  %v4732_v9 = vld [vmem:[%s7219_s13 + $0x128] sm:$0xff] }
0x1d53   : > { %v4058_v26 = vadd.f32 %v4702_v61, %v4047_v13  ;;  %v4069_v27 = vsel %vm582_vm0, %v6993_v20, 0.0  ;;  %5526 = vmatpush1.bf16.msra.mxu1 %v5525_v18  ;;  %v5549_v18 = vpack.c.bf16 %v4732_v9, %v4731_v21 }
0x1d54   : > { %4070 = vadd.xlane.f32.xlu0 %v4069_v27  ;;  %5528 = vmatprep.subr.bf16.mxu1 %v5527_v37  ;;  %v5551_v37 = vpack.c.bf16 %v4750_v42, %v4749_v40 }
0x1d55   : > { %v6998_v25 = vadd.f32 %v4058_v26, %v6632_v53 }
0x1d57   : > { %v4072_v28 = vsel %vm680_vm1, %v6998_v25, 0.0  ;;  %5530 = vmatpush1.bf16.msra.mxu1 %v5529_v16  ;;  %v5553_v16 = vpack.c.bf16 %v4734_v55, %v4733_v51 }
0x1d58   : > { %4073 = vadd.xlane.f32.xlu0 %v4072_v28  ;;  %5532 = vmatprep.subr.bf16.mxu1 %v5531_v43  ;;  %v5555_v43 = vpack.c.bf16 %v4752_v46, %v4751_v41 }
0x1d5b   : > { %5534 = vmatpush1.bf16.msra.mxu1 %v5533_v22  ;;  %v5557_v22 = vpack.c.bf16 %v4736_v49, %v4735_v44 }
0x1d5c   : > { %5536 = vmatprep.subr.bf16.mxu1 %v5535_v23  ;;  %v5559_v23 = vpack.c.bf16 %v4754_v14, %v4753_v52 }
0x1d5f   : > { %5538 = vmatpush1.bf16.msra.mxu1 %v5537_v58  ;;  %v5561_v58 = vpack.c.bf16 %v4738_v57, %v4737_v3 }
0x1ddd   : > { %v4068_v29 = vpop.xlane.xlu1 %4067 }
0x1dde   : > { %v4075_v30 = vmul.f32 0.015625, %v4068_v29 }
0x1de0   : > { %v4078_v31 = vsub.f32 %v6988_v54, %v4075_v30 }
0x1de1   : > { %v4071_v47 = vpop.xlane.xlu0 %4070 }
0x1de2   : > { %v4076_v32 = vmul.f32 0.015625, %v4071_v47  ;;  %v4081_v8 = vmul.f32 %v4078_v31, %v4078_v31 }
0x1de4   : > { %v7004_v34 = vsub.f32 %v6993_v20, %v4076_v32  ;;  %v4084_v17 = vsel %vm582_vm0, %v4081_v8, 0.0  ;;  %v4743_v32 = vld [vmem:[%s7219_s13 + $0x180] sm:$0xff]  ;;  %v4744_v8 = vld [vmem:[%s7219_s13 + $0x188] sm:$0xff] }
0x1de5   : > { %4085 = vadd.xlane.f32.xlu1 %v4084_v17  ;;  %v4074_v35 = vpop.xlane.xlu0 %4073  ;;  %v4727_v17 = vld [vmem:[%s7219_s13 + $0x100] sm:$0xff] }
0x1de6   : > { %v4077_v53 = vmul.f32 0.015625, %v4074_v35  ;;  %v4082_v11 = vmul.f32 %v7004_v34, %v7004_v34 }
0x1de8   : > { %v7010_v36 = vsub.f32 %v6998_v25, %v4077_v53  ;;  %v4087_v5 = vsel %vm582_vm0, %v4082_v11, 0.0  ;;  %v4745_v53 = vld [vmem:[%s7219_s13 + $0x190] sm:$0xff]  ;;  %v4746_v11 = vld [vmem:[%s7219_s13 + $0x198] sm:$0xff] }
0x1de9   : > { %4088 = vadd.xlane.f32.xlu0 %v4087_v5  ;;  %v4729_v5 = vld [vmem:[%s7219_s13 + $0x110] sm:$0xff] }
0x1dea   : > { %v4083_v38 = vmul.f32 %v7010_v36, %v7010_v36 }
0x1dec   : > { %v4090_v19 = vsel %vm680_vm1, %v4083_v38, 0.0  ;;  %v4730_v38 = vld [vmem:[%s7219_s13 + $0x118] sm:$0xff] }
0x1ded   : > { %4091 = vadd.xlane.f32.xlu1 %v4090_v19  ;;  %v5545_v19 = vpack.c.bf16 %v4730_v38, %v4729_v5 }
0x1e72   : > { %v4086_v56 = vpop.xlane.xlu1 %4085 }
0x1e73   : > { %v4093_v60 = vmul.f32 0.015625, %v4086_v56  ;;  %v4755_v56 = vld [vmem:[%s7219_s13 + $0x1e0] sm:$0xff] }
0x1e75   : > { %v4096_v59 = vadd.f32 1e-06, %v4093_v60  ;;  %v4756_v60 = vld [vmem:[%s7219_s13 + $0x1e8] sm:$0xff] }
0x1e76   : > { %v4089_v45 = vpop.xlane.xlu0 %4088 }
0x1e77   : > { %5787 = vrsqrt.f32 %v4096_v59  ;;  %v4094_v61 = vmul.f32 0.015625, %v4089_v45  ;;  %v5563_v59 = vpack.c.bf16 %v4756_v60, %v4755_v56  ;;  %v4739_v45 = vld [vmem:[%s7219_s13 + $0x160] sm:$0xff] }
0x1e79   : > { %v4097_v62 = vadd.f32 1e-06, %v4094_v61  ;;  %v4740_v61 = vld [vmem:[%s7219_s13 + $0x168] sm:$0xff] }
0x1e7a   : > { %v4092_v48 = vpop.xlane.xlu1 %4091 }
0x1e7b   : > { %5789 = vrsqrt.f32 %v4097_v62  ;;  %v4095_v0 = vmul.f32 0.015625, %v4092_v48  ;;  %v5565_v62 = vpack.c.bf16 %v4740_v61, %v4739_v45  ;;  %v4757_v48 = vld [vmem:[%s7219_s13 + $0x1f0] sm:$0xff] }
0x1e7d   : > { %v4098_v4 = vadd.f32 1e-06, %v4095_v0  ;;  %v4758_v0 = vld [vmem:[%s7219_s13 + $0x1f8] sm:$0xff] }
0x1e7f   : > { %5791 = vrsqrt.f32 %v4098_v4  ;;  %v5567_v4 = vpack.c.bf16 %v4758_v0, %v4757_v48 }
0x1e81   : > { %v5788_v7 = vpop.eup %5787 }
0x1e82   : > { %v4102_v10 = vmul.f32 %v5788_v7, %v4078_v31  ;;  %v4741_v7 = vld [vmem:[%s7219_s13 + $0x170] sm:$0xff] }
0x1e84   : > { %v4111_v15 = vmul.f32 %v4705_v2, %v4102_v10 }
0x1e85   : > { %v5790_v13 = vpop.eup %5789 }
0x1e86   : > { %v4120_v24 = vadd.f32 %v4706_v12, %v4111_v15  ;;  %v4103_v26 = vmul.f32 %v5790_v13, %v7004_v34  ;;  %v5539_v34 = vpack.c.bf16 %v4744_v8, %v4743_v32 }
0x1e88   : > { %4724 = vmatmul.mubr.msk.f32.vlgmr.msra.gmra.mrb[102].mxu1 %vm582_vm0, %v4120_v24  ;;  %v4112_v27 = vmul.f32 %v4705_v2, %v4103_v26  ;;  %5540 = vmatprep.subr.bf16.mxu0 %v5539_v34 }
0x1e89   : > { %v5792_v28 = vpop.eup %5791  ;;  %4232 = vmatprep.mubr.f32.mxu1 %v5820_v33 }
0x1e8a   : > { %v4121_v29 = vadd.f32 %v4706_v12, %v4112_v27  ;;  %v4104_v30 = vmul.f32 %v5792_v28, %v7010_v36  ;;  %v5543_v36 = vpack.c.bf16 %v4746_v11, %v4745_v53 }
0x1e8c   : > { %4725 = vmatmul.mubr.msk.f32.gmra.mrb[104].mxu1 %vm582_vm0, %v4121_v29  ;;  %v4113_v31 = vmul.f32 %v4705_v2, %v4104_v30  ;;  %v4742_v2 = vld [vmem:[%s7219_s13 + $0x178] sm:$0xff] }
0x1e8d   : > { %4238 = vmatprep.mubr.f32.mxu1 %v5820_v33  ;;  %v4728_v33 = vld [vmem:[%s7219_s13 + $0x108] sm:$0xff]  ;;  %v5569_v10 = vpack.c.bf16 %v4742_v2, %v4741_v7 }
0x1e8e   : > { %v4122_v47 = vadd.f32 %v4706_v12, %v4113_v31  ;;  %v5541_v35 = vpack.c.bf16 %v4728_v33, %v4727_v17  ;;  %v4723_v12 = vld [vmem:[%s7218_s12 + $0x2] sm:$0x3] }
0x1e8f   : > { %v4146_v15 = vrot.slane %v4723_v12, %v6132_v63  ;;  %v4150_v13 = vrot.slane %v4723_v12, %v6137_v1 }
0x1e90   : > { %4726 = vmatmul.mubr.msk.f32.gmra.mrb[106].mxu1 %vm582_vm0, %v4122_v47  ;;  %5542 = vmatpush3.bf16.msra.mxu0 %v5541_v35 }
0x1e91   : > { %5544 = vmatprep.subr.bf16.mxu0 %v5543_v36 }
0x1e94   : > { %5546 = vmatpush3.bf16.msra.mxu0 %v5545_v19 }
0x1e95   : > { %5548 = vmatprep.subr.bf16.mxu0 %v5547_v50 }
0x1e98   : > { %5550 = vmatpush3.bf16.msra.mxu0 %v5549_v18 }
0x1e99   : > { %5552 = vmatprep.subr.bf16.mxu0 %v5551_v37 }
0x1e9c   : > { %5554 = vmatpush3.bf16.msra.mxu0 %v5553_v16 }
0x1e9d   : > { %5556 = vmatprep.subr.bf16.mxu0 %v5555_v43 }
0x1ea0   : > { %5558 = vmatpush3.bf16.msra.mxu0 %v5557_v22 }
0x1ea1   : > { %5560 = vmatprep.subr.bf16.mxu0 %v5559_v23 }
0x1ea4   : > { %5562 = vmatpush3.bf16.msra.mxu0 %v5561_v58 }
0x1ea5   : > { %5564 = vmatprep.subr.bf16.mxu0 %v5563_v59 }
0x1ea8   : > { %5566 = vmatpush3.bf16.msra.mxu0 %v5565_v62 }
0x1ea9   : > { %5568 = vmatprep.subr.bf16.mxu0 %v5567_v4 }
0x1eac   : > { %5570 = vmatpush3.bf16.msra.mxu0 %v5569_v10 }
0x1f5b   : > { %v4228_v24 = vpop.f32.mrb[102].mxu1 }
0x1f5c   : > { %v4229_v26 = vadd.f32 %v4228_v24, %v4146_v15  ;;  %v4230_v27 = vpop.f32.mrb[103].mxu1 }
0x1f5d   : > { %v4231_v28 = vadd.f32 %v4230_v27, %v4150_v13 }
0x1f5e   : > { %v4245_v29 = vmul.f32 %v4229_v26, %v4229_v26 }
0x1f5f   : > { %v4246_v30 = vmul.f32 %v4231_v28, %v4231_v28  ;;  %v4234_v31 = vpop.f32.mrb[104].mxu1 }
0x1f60   : > { %v4251_v47 = vmul.f32 %v4245_v29, %v4229_v26  ;;  %v4235_v32 = vadd.f32 %v4234_v31, %v4146_v15  ;;  %v4236_v8 = vpop.f32.mrb[105].mxu1 }
0x1f61   : > { %v4252_v34 = vmul.f32 %v4246_v30, %v4231_v28  ;;  %v4237_v17 = vadd.f32 %v4236_v8, %v4150_v13  ;;  %v4760_v8 = vld [vmem:[%s7220_s14 + $0x1] ss:$0 sm:$0xff] }
0x1f62   : > { %v4257_v33 = vmul.f32 0.044715, %v4251_v47  ;;  %v4247_v35 = vmul.f32 %v4235_v32, %v4235_v32 }
0x1f63   : > { %v4258_v53 = vmul.f32 0.044715, %v4252_v34  ;;  %v4248_v11 = vmul.f32 %v4237_v17, %v4237_v17  ;;  %v4240_v36 = vpop.f32.mrb[106].mxu1 }
0x1f64   : > { %v4263_v63 = vadd.f32 %v4257_v33, %v4229_v26  ;;  %v4253_v5 = vmul.f32 %v4247_v35, %v4235_v32  ;;  %v4241_v1 = vadd.f32 %v4240_v36, %v4146_v15  ;;  %v4242_v38 = vpop.f32.mrb[107].mxu1 }
0x1f65   : > { %v4264_v19 = vadd.f32 %v4258_v53, %v4231_v28  ;;  %v4254_v39 = vmul.f32 %v4248_v11, %v4237_v17  ;;  %v4243_v6 = vadd.f32 %v4242_v38, %v4150_v13 }
0x1f66   : > { %v4269_v50 = vmul.f32 0.7978846, %v4263_v63  ;;  %v4259_v21 = vmul.f32 0.044715, %v4253_v5  ;;  %v4249_v9 = vmul.f32 %v4241_v1, %v4241_v1 }
0x1f67   : > { %v4270_v18 = vmul.f32 0.7978846, %v4264_v19  ;;  %v4260_v40 = vmul.f32 0.044715, %v4254_v39  ;;  %v4250_v42 = vmul.f32 %v4243_v6, %v4243_v6 }
0x1f68   : > { %5793 = vtanh.f32 %v4269_v50  ;;  %v4265_v37 = vadd.f32 %v4259_v21, %v4235_v32  ;;  %v4255_v51 = vmul.f32 %v4249_v9, %v4241_v1 }
0x1f69   : > { %v4266_v55 = vadd.f32 %v4260_v40, %v4237_v17  ;;  %v4256_v16 = vmul.f32 %v4250_v42, %v4243_v6  ;;  %5795 = vtanh.f32 %v4270_v18 }
0x1f6a   : > { %v4271_v41 = vmul.f32 0.7978846, %v4265_v37  ;;  %v4261_v46 = vmul.f32 0.044715, %v4255_v51 }
0x1f6b   : > { %v4272_v43 = vmul.f32 0.7978846, %v4266_v55  ;;  %v4262_v44 = vmul.f32 0.044715, %v4256_v16 }
0x1f6c   : > { %v4267_v49 = vadd.f32 %v4261_v46, %v4241_v1  ;;  %5797 = vtanh.f32 %v4271_v41 }
0x1f6d   : > { %v4268_v22 = vadd.f32 %v4262_v44, %v4243_v6  ;;  %5799 = vtanh.f32 %v4272_v43 }
0x1f6e   : > { %v4273_v52 = vmul.f32 0.7978846, %v4267_v49 }
0x1f6f   : > { %v4274_v14 = vmul.f32 0.7978846, %v4268_v22 }
0x1f70   : > { %5801 = vtanh.f32 %v4273_v52 }
0x1f71   : > { %5803 = vtanh.f32 %v4274_v14 }
0x1f72   : > { %v5794_v23 = vpop.eup %5793 }
0x1f73   : > { %v5796_v3 = vpop.eup %5795  ;;  %v4281_v57 = vadd.f32 1.0, %v5794_v23 }
0x1f74   : > { %v4282_v58 = vadd.f32 1.0, %v5796_v3 }
0x1f75   : > { %v4287_v56 = vmul.f32 0.5, %v4281_v57 }
0x1f76   : > { %v5798_v60 = vpop.eup %5797  ;;  %v4288_v59 = vmul.f32 0.5, %v4282_v58 }
0x1f77   : > { %v5800_v45 = vpop.eup %5799  ;;  %v4283_v61 = vadd.f32 1.0, %v5798_v60  ;;  %v4293_v0 = vmul.f32 %v4287_v56, %v4229_v26  ;;  %v4761_v56 = vld [vmem:[%s7221_s15] ss:$0 sm:$0xff] }
0x1f78   : > { %v4294_v62 = vmul.f32 %v4288_v59, %v4231_v28  ;;  %v4284_v48 = vadd.f32 1.0, %v5800_v45  ;;  %v4762_v59 = vld [vmem:[%s7222_s16] ss:$0 sm:$0xff] }
0x1f79   : > { %v4289_v4 = vmul.f32 0.5, %v4283_v61 }
0x1f7a   : > { %v5802_v7 = vpop.eup %5801  ;;  %4396 = vmatprep.mubr.f32.mxu0 %v4294_v62  ;;  %v4290_v2 = vmul.f32 0.5, %v4284_v48 }
0x1f7b   : > { %v5804_v10 = vpop.eup %5803  ;;  %4397 = vmatmul.mubr.f32.vlgmr.msra.gmra.mrb[72].mxu0 %v4293_v0  ;;  %v4285_v12 = vadd.f32 1.0, %v5802_v7  ;;  %v4295_v24 = vmul.f32 %v4289_v4, %v4235_v32 }
0x1f7c   : > { %v4296_v15 = vmul.f32 %v4290_v2, %v4237_v17  ;;  %v4286_v13 = vadd.f32 1.0, %v5804_v10 }
0x1f7d   : > { %v4291_v27 = vmul.f32 0.5, %v4285_v12 }
0x1f7e   : > { %4401 = vmatprep.mubr.f32.mxu0 %v4296_v15  ;;  %v4292_v29 = vmul.f32 0.5, %v4286_v13 }
0x1f7f   : > { %4402 = vmatmul.mubr.f32.gmra.mrb[74].mxu0 %v4295_v24  ;;  %v4297_v31 = vmul.f32 %v4291_v27, %v4241_v1 }
0x1f80   : > { %v4298_v30 = vmul.f32 %v4292_v29, %v4243_v6 }
0x1f82   : > { %4406 = vmatprep.mubr.f32.mxu0 %v4298_v30 }
0x1f83   : > { %4407 = vmatmul.mubr.f32.gmra.mrb[76].mxu0 %v4297_v31 }
0x204e   : > { %v4974_v28 = vpop.f32.mrb[72].mxu0 }
0x204f   : > { %v4975_v26 = vpop.f32.mrb[73].mxu0 }
0x2050   : > { %v4976_v47 = vadd.f32 %v4975_v26, %v4974_v28 }
0x2052   : > { %v4412_v34 = vadd.f32 %v4976_v47, %v6988_v54  ;;  %v4977_v17 = vpop.f32.mrb[74].mxu0 }
0x2053   : > { %v4978_v33 = vpop.f32.mrb[75].mxu0 }
0x2054   : > { %v4979_v32 = vadd.f32 %v4978_v33, %v4977_v17  ;;  %v4423_v35 = vadd.f32 %v4760_v8, %v4412_v34 }
0x2056   : > { %v4413_v53 = vadd.f32 %v4979_v32, %v6993_v20  ;;  %v4980_v11 = vpop.f32.mrb[76].mxu0  ;;  %v4428_v36 = vsel %vm582_vm0, %v4423_v35, 0.0 }
0x2057   : > { %v4981_v63 = vpop.f32.mrb[77].mxu0  ;;  %4429 = vadd.xlane.f32.xlu0 %v4428_v36 }
0x2058   : > { %v4982_v5 = vadd.f32 %v4981_v63, %v4980_v11  ;;  %v4424_v1 = vadd.f32 %v4760_v8, %v4413_v53 }
0x205a   : > { %v4414_v38 = vadd.f32 %v4982_v5, %v6998_v25  ;;  %v4431_v19 = vsel %vm582_vm0, %v4424_v1, 0.0 }
0x205b   : > { %4432 = vadd.xlane.f32.xlu1 %v4431_v19 }
0x205c   : > { %v4425_v39 = vadd.f32 %v4760_v8, %v4414_v38 }
0x205e   : > { %v4434_v54 = vsel %vm680_vm1, %v4425_v39, 0.0 }
0x205f   : > { %4435 = vadd.xlane.f32.xlu0 %v4434_v54 }
0x20e4   : > { %v4430_v6 = vpop.xlane.xlu0 %4429 }
0x20e5   : > { %v4437_v50 = vmul.f32 0.015625, %v4430_v6 }
0x20e7   : > { %v4440_v21 = vsub.f32 %v4423_v35, %v4437_v50 }
0x20e8   : > { %v4433_v20 = vpop.xlane.xlu1 %4432 }
0x20e9   : > { %v4438_v9 = vmul.f32 0.015625, %v4433_v20  ;;  %v4443_v18 = vmul.f32 %v4440_v21, %v4440_v21 }
0x20eb   : > { %v4441_v40 = vsub.f32 %v4424_v1, %v4438_v9  ;;  %v4446_v42 = vsel %vm582_vm0, %v4443_v18, 0.0 }
0x20ec   : > { %4447 = vadd.xlane.f32.xlu1 %v4446_v42  ;;  %v4436_v37 = vpop.xlane.xlu0 %4435 }
0x20ed   : > { %v4439_v51 = vmul.f32 0.015625, %v4436_v37  ;;  %v4444_v25 = vmul.f32 %v4441_v40, %v4441_v40 }
0x20ef   : > { %v4442_v55 = vsub.f32 %v4425_v39, %v4439_v51  ;;  %v4449_v16 = vsel %vm582_vm0, %v4444_v25, 0.0 }
0x20f0   : > { %4450 = vadd.xlane.f32.xlu0 %v4449_v16 }
0x20f1   : > { %v4445_v41 = vmul.f32 %v4442_v55, %v4442_v55 }
0x20f3   : > { %v4452_v46 = vsel %vm680_vm1, %v4445_v41, 0.0 }
0x20f4   : > { %4453 = vadd.xlane.f32.xlu1 %v4452_v46 }
0x2179   : > { %v4448_v43 = vpop.xlane.xlu1 %4447 }
0x217a   : > { %v4455_v44 = vmul.f32 0.015625, %v4448_v43 }
0x217c   : > { %v4458_v49 = vadd.f32 1e-06, %v4455_v44 }
0x217d   : > { %v4451_v22 = vpop.xlane.xlu0 %4450 }
0x217e   : > { %5805 = vrsqrt.f32 %v4458_v49  ;;  %v4456_v52 = vmul.f32 0.015625, %v4451_v22 }
0x2180   : > { %v4459_v14 = vadd.f32 1e-06, %v4456_v52 }
0x2181   : > { %v4454_v23 = vpop.xlane.xlu1 %4453 }
0x2182   : > { %5807 = vrsqrt.f32 %v4459_v14  ;;  %v4457_v3 = vmul.f32 0.015625, %v4454_v23 }
0x2184   : > { %v4460_v57 = vadd.f32 1e-06, %v4457_v3 }
0x2186   : > { %5809 = vrsqrt.f32 %v4460_v57 }
0x2188   : > { %v5806_v58 = vpop.eup %5805 }
0x2189   : > { %v4464_v60 = vmul.f32 %v5806_v58, %v4440_v21 }
0x218b   : > { %v4473_v45 = vmul.f32 %v4761_v56, %v4464_v60 }
0x218c   : > { %v5808_v61 = vpop.eup %5807 }
0x218d   : > { %v4482_v62 = vadd.f32 %v4762_v59, %v4473_v45  ;;  %v4465_v48 = vmul.f32 %v5808_v61, %v4441_v40 }
0x218f   : > { %4485 = vst.msk [vmem:[%s548_s22] sm:$0xff] %vm582_vm0, %v4482_v62  ;;  %v4474_v0 = vmul.f32 %v4761_v56, %v4465_v48 }
0x2190   : > { %v5810_v4 = vpop.eup %5809 }
0x2191   : > { %v4483_v7 = vadd.f32 %v4762_v59, %v4474_v0  ;;  %v4466_v2 = vmul.f32 %v5810_v4, %v4442_v55 }
0x2193   : > { %4486 = vst.msk [vmem:[%s548_s22 + $0x8] sm:$0xff] %vm582_vm0, %v4483_v7  ;;  %v4475_v10 = vmul.f32 %v4761_v56, %v4466_v2 }
0x2195   : > { %v4484_v12 = vadd.f32 %v4762_v59, %v4475_v10 }
0x2197   : > { %4487 = vst.msk [vmem:[%s548_s22 + $0x10] sm:$0x1] %vm680_vm1, %v4484_v12 }
0x2198 PF: > { %s27_s24 = sadd.s32 1, %s5817_s24  }
0x2199   : > { %p24_p4 = scmp.ge.s32.totalorder %s27_s24, 4  }
0x219b   :  { %26 = sbr.rel (!%p24_p4) target bundleno = 3 (0x3), region = 130 }

// kernel: vlmo_encoder_decoder_forward.3
= control target key start
LH: loop header
LB: loop body
LE: loop exit
PB: predicated region body
PF: predicated region fallthrough
CT: control target
= control target key end

     0   :  { %s9980_s0 = inlined_call_operand.vmem [shape: f32[2,8,64], index: 0, kind: input, shape index: {}]   ;;  %s9981_s1 = inlined_call_operand.vmem [shape: f32[2,17,64], index: 1, kind: input, shape index: {}]   ;;  %s9982_s2 = inlined_call_operand.vmem [shape: f32[2,1,8], index: 2, kind: input, shape index: {}]   ;;  %s9983_s3 = inlined_call_operand.vmem [shape: f32[8,64], index: 3, kind: input, shape index: {}]   ;;  %s9984_s4 = inlined_call_operand.vmem [shape: f32[8,64], index: 4, kind: input, shape index: {}]   ;;  %s9985_s5 = inlined_call_operand.vmem [shape: f32[64,64], index: 5, kind: input, shape index: {}]   ;;  %s9986_s6 = inlined_call_operand.vmem [shape: f32[2,1,64], index: 6, kind: input, shape index: {}]   ;;  %s9987_s7 = inlined_call_operand.vmem [shape: f32[2,64,192], index: 7, kind: input, shape index: {}]   ;;  %s9988_s8 = inlined_call_operand.vmem [shape: f32[2,1,192], index: 8, kind: input, shape index: {}]   ;;  %s9989_s9 = inlined_call_operand.vmem [shape: f32[2,64,64], index: 9, kind: input, shape index: {}]   ;;  %s9990_s10 = inlined_call_operand.vmem [shape: f32[2,1,64], index: 10, kind: input, shape index: {}]   ;;  %s9991_s11 = inlined_call_operand.vmem [shape: f32[2,1,64], index: 11, kind: input, shape index: {}]   ;;  %s9992_s12 = inlined_call_operand.vmem [shape: f32[2,64,64], index: 12, kind: input, shape index: {}]   ;;  %s9993_s13 = inlined_call_operand.vmem [shape: f32[2,1,64], index: 13, kind: input, shape index: {}]   ;;  %s9994_s14 = inlined_call_operand.vmem [shape: f32[2,64,128], index: 14, kind: input, shape index: {}]   ;;  %s9995_s15 = inlined_call_operand.vmem [shape: f32[2,1,128], index: 15, kind: input, shape index: {}]   ;;  %s9996_s16 = inlined_call_operand.vmem [shape: f32[2,64,64], index: 16, kind: input, shape index: {}]   ;;  %s9997_s17 = inlined_call_operand.vmem [shape: f32[2,1,64], index: 17, kind: input, shape index: {}]   ;;  %s9998_s18 = inlined_call_operand.vmem [shape: f32[2,1,64], index: 18, kind: input, shape index: {}]   ;;  %s9999_s19 = inlined_call_operand.vmem [shape: f32[2,64,256], index: 19, kind: input, shape index: {}]   ;;  %s10000_s20 = inlined_call_operand.vmem [shape: f32[2,1,256], index: 20, kind: input, shape index: {}]   ;;  %s10001_s21 = inlined_call_operand.vmem [shape: f32[2,256,64], index: 21, kind: input, shape index: {}]   ;;  %s10002_s22 = inlined_call_operand.vmem [shape: f32[2,1,64], index: 22, kind: input, shape index: {}]   ;;  %s10003_s23 = inlined_call_operand.vmem [shape: f32[1,64], index: 23, kind: input, shape index: {}]   ;;  %s10004_s24 = inlined_call_operand.vmem [shape: f32[64,128], index: 24, kind: input, shape index: {}]   ;;  %s10005_s25 = inlined_call_operand.vmem [shape: f32[1,128], index: 25, kind: input, shape index: {}]   ;;  %s10006_s26 = inlined_call_operand.hbm [shape: f32[2,8,128], index: 26, kind: output, shape index: {0}]   ;;  %s10007_s27 = inlined_call_operand.hbm [shape: f32[2,8,64], index: 27, kind: output, shape index: {1}]  }
   0x1   :  { %10049 = sst [smem:[#allocation17_spill]] %s9980_s0 }
   0x2   :  { %10050 = sst [smem:[#allocation18_spill]] %s9981_s1 }
   0x3   :  { %10051 = sst [smem:[#allocation19_spill]] %s9982_s2 }
   0x4   :  { %10052 = sst [smem:[#allocation20_spill]] %s9983_s3 }
   0x5   :  { %10053 = sst [smem:[#allocation21_spill]] %s9984_s4 }
   0x6   :  { %10054 = sst [smem:[#allocation22_spill]] %s9985_s5 }
   0x7   :  { %10055 = sst [smem:[#allocation23_spill]] %s9986_s6 }
   0x8   :  { %10056 = sst [smem:[#allocation24_spill]] %s9987_s7 }
   0x9   :  { %10057 = sst [smem:[#allocation25_spill]] %s9988_s8 }
   0xa   :  { %10058 = sst [smem:[#allocation26_spill]] %s9989_s9 }
   0xb   :  { %10059 = sst [smem:[#allocation27_spill]] %s9990_s10 }
   0xc   :  { %10060 = sst [smem:[#allocation28_spill]] %s9991_s11 }
   0xd   :  { %10061 = sst [smem:[#allocation29_spill]] %s9992_s12 }
   0xe   :  { %10062 = sst [smem:[#allocation30_spill]] %s9993_s13 }
   0xf   :  { %10063 = sst [smem:[#allocation31_spill]] %s9995_s15 }
  0x10   :  { %10064 = sst [smem:[#allocation32_spill]] %s9996_s16 }
  0x11   :  { %10065 = sst [smem:[#allocation33_spill]] %s9997_s17 }
  0x12   :  { %10066 = sst [smem:[#allocation34_spill]] %s10003_s23 }
  0x13   :  { %10067 = sst [smem:[#allocation35_spill]] %s10004_s24 }
  0x14   :  { %10068 = sst [smem:[#allocation36_spill]] %s10005_s25 }
  0x15   :  { %10069 = sst [smem:[#allocation37_spill]] %s10006_s26 }
  0x16   :  { %10070 = sst [smem:[#allocation38_spill]] %s10007_s27 }
  0x17   :  { %33 = vsyncpa [#allocation3], 0 }
  0x18   :  { %35 = vsyncpa [#allocation3 + $0x1], 0 }
  0x19   :  { %36 = vsyncpa [#allocation5], 0 }
  0x1a   :  { %38 = vsyncpa [#allocation5 + $0x1], 0  ;;  %s8501_s7 = smov 0   ;;  %s8503_s4 = smov 0  }
  0x1b   :  { %s8505_s8 = smov 0   ;;  %s8507_s30 = smov 0  }
  0x1c LB: > { %10071 = sst [smem:[#allocation8_spill]] %s8333_s7  ;;  %s8522_s9 = sadd.s32 4294967295, %s8345_s30   ;;  %s8345_s30 = sphi %s8507_s30, %s10129_s30   ;;  %s8341_s8 = sphi %s8505_s8, %s10132_s8   ;;  %s8337_s4 = sphi %s8503_s4, %s10131_s4   ;;  %s8333_s7 = sphi %s8501_s7, %s10130_s7  }
  0x1d   : > { %10072 = sst [smem:[#allocation9_spill]] %s8337_s4  ;;  %s6632_s5 = sadd.s32 4294967294, %s8345_s30  }
  0x1e   : > { %10073 = sst [smem:[#allocation10_spill]] %s8341_s8  ;;  %s8526_s28 = sadd.s32 1, %s8345_s30  }
  0x1f   : > { %10074 = sst [smem:[#allocation11_spill]] %s8345_s30  ;;  %s612_s0 = sadd.s32 1, %s8341_s8 }
  0x20   : > { %10075 = sst [smem:[#allocation12_spill]] %s8522_s9  ;;  %s609_s10 = ssub.s32 %s8345_s30, %s8526_s28 }
  0x21   : > { %10076 = sst [smem:[#allocation13_spill]] %s8526_s28  ;;  %p622_p0 = scmp.ne.s32.totalorder %s8341_s8, %s8337_s4 }
  0x22   : > { %p610_p1 = scmp.eq.s32.totalorder %s609_s10, 0  ;;  %p623_p2 = scmp.eq.s32.totalorder %s8522_s9, 1 }
  0x23   : > { %p628_p3 = scmp.ne.s32.totalorder %s8337_s4, %s8333_s7  ;;  %p629_p4 = scmp.eq.s32.totalorder %s6632_s5, 1 }
  0x24   : > { %s8537_s29 = scalar_select %p610_p1, %s8341_s8, %s612_s0  }
  0x25   : > { %p8539_p5 = por %p623_p2, %p622_p0  ;;  %p8543_p6 = por %p629_p4, %p628_p3 }
  0x26   : > { %10077 = sst [smem:[#allocation14_spill]] %s8537_s29  ;;  %p6635_p7 = scmp.ge.s32.totalorder %s8345_s30, 1 }
  0x27   : > { %s10078_s1 = scalar_select %p8539_p5, 1, 0 }
  0x28   : > { %s10080_s6 = scalar_select %p8543_p6, 1, 0 }
  0x29   : > { %10079 = sst [smem:[#allocation15_spill]] %s10078_s1  ;;  %p763_p8 = scmp.lt.s32.totalorder %s8345_s30, 3 }
  0x2a   : > { %10081 = sst [smem:[#allocation16_spill]] %s10080_s6 }
  0x2b   : > { %p764_p9 = pnand %p6635_p7, %p763_p8 }
  0x2c   : > { %p847_p10 = scmp.lt.s32.totalorder (!%p764_p9), %s8522_s9, 1  ;;  %s10082_s0 = sld [smem:[#allocation17_spill]] (!%p764_p9)  ;;  %vm890_vm0 = vcmask (!%p764_p9), 523264   ;;  %v8347_v16 = vmov (!%p764_p9), 0.0   ;;  %v8349_v31 = vmov (!%p764_p9), 0.0|0.0   ;;  %vm8350_vm1 = vmmov (!%p764_p9), 0  }
  0x2d   : > { %767 = sbr.rel (%p764_p9) target bundleno = 12581 (0x3125), region = 124  ;;  %s10083_s28 = sld [smem:[#allocation24_spill]] (!%p764_p9)  ;;  %1001 = vmatprep.mubr.f32.mxu0 (!%p764_p9), %v8347_v16  ;;  %7709 = vmatprep.subr.bf16.mxu1 (!%p764_p9), %v8349_v31  ;;  %v873_v49 = vlaneseq (!%p764_p9)  ;;  %vm1180_vm2 = vcmask (!%p764_p9), 130048   ;;  %vm1258_vm7 = vcmask (!%p764_p9), 64512   ;;  %vm2447_vm9 = vcmask (!%p764_p9), 138240  }
  0x2e   : > { %s10084_s7 = sld [smem:[#allocation20_spill]] (!%p764_p9)  ;;  %s10027_s5 = smov (!%p764_p9), 64   ;;  %7190 = vmatprep.mubr.msk.f32.mxu1 (!%p764_p9), %vm8350_vm1, %v8347_v16  ;;  %vm8919_vm8 = vmpackc.low (!%p764_p9), %vm1180_vm2, %vm1180_vm2  ;;  %vm2470_vm10 = vcmask (!%p764_p9), 1040384  }
  0x2f   : > { %v874_v50 = vshrl.u32 (!%p764_p9), %v873_v49, 7  ;;  %s10091_s27 = sld [smem:[#allocation19_spill]] (!%p764_p9)  ;;  %s10029_s26 = smov (!%p764_p9), 112  }
  0x30   : > { %s10031_s30 = smov (!%p764_p9), 96   ;;  %s10034_s8 = smov (!%p764_p9), 32  }
  0x31   : > { %v8674_v51 = vsub.s32 (!%p764_p9), 0, %v874_v50  ;;  %s10097_s12 = sld [smem:[#allocation29_spill]] (!%p764_p9)  ;;  %s10098_s15 = sld [smem:[#allocation31_spill]] (!%p764_p9) }
  0x32   : > { %s10099_s25 = smov (!%p764_p9), 112   ;;  %s10103_s13 = sld [smem:[#allocation30_spill]] (!%p764_p9) }
  0x33   : > { %v907_v3 = vld [vmem:[%s10083_s28 + $0x8] sm:$0xff] (!%p764_p9)  ;;  %v909_v4 = vld [vmem:[%s10083_s28 + $0x18] sm:$0xff] (!%p764_p9)  ;;  %v906_v6 = vld [vmem:[%s10083_s28] sm:$0xff] (!%p764_p9)  ;;  %s10106_s1 = smov (!%p764_p9), 80   ;;  %s10108_s16 = sld [smem:[#allocation32_spill]] (!%p764_p9) }
  0x34   : > { %s8551_s11 = scalar_select %p847_p10, %s8522_s9, 1  ;;  %v7693_v5 = vpack.c.bf16 %v909_v4, %v907_v3  ;;  %v908_v7 = vld [vmem:[%s10083_s28 + $0x10] sm:$0xff]  ;;  %v911_v9 = vld [vmem:[%s10083_s28 + $0x28] sm:$0xff]  ;;  %v913_v10 = vld [vmem:[%s10083_s28 + $0x38] sm:$0xff] }
  0x35   : > { %v7695_v8 = vpack.c.bf16 %v908_v7, %v906_v6  ;;  %v910_v11 = vld [vmem:[%s10083_s28 + $0x20] sm:$0xff]  ;;  %v7697_v12 = vpack.c.bf16 %v913_v10, %v911_v9  ;;  %v912_v13 = vld [vmem:[%s10083_s28 + $0x30] sm:$0xff]  ;;  %v915_v14 = vld [vmem:[%s10083_s28 + $0x48] sm:$0xff]  ;;  %s10085_s6 = smov %s10084_s7  ;;  %s10110_s17 = sld [smem:[#allocation33_spill]] }
  0x36   : > { %s6638_s2 = sshll.u32 %s8551_s11, 3  ;;  %7694 = vmatprep.subr.bf16.mxu0 %v7693_v5  ;;  %v917_v15 = vld [vmem:[%s10083_s28 + $0x58] sm:$0xff]  ;;  %v7699_v17 = vpack.c.bf16 %v912_v13, %v910_v11  ;;  %v914_v19 = vld [vmem:[%s10083_s28 + $0x40] sm:$0xff]  ;;  %v916_v20 = vld [vmem:[%s10083_s28 + $0x50] sm:$0xff]  ;;  %s858_s29 = scalar_lea.vmem %s10091_s27, %s8551_s11  ;;  %v8351_v13 = vmov 0  }
  0x37   : > { %s850_s10 = scalar_lea.vmem %s10082_s0, %s6638_s2  ;;  %7696 = vmatpush1.bf16.msra.mxu0 %v7695_v8  ;;  %v7701_v18 = vpack.c.bf16 %v917_v15, %v915_v14  ;;  %v919_v21 = vld [vmem:[%s10083_s28 + $0x68] sm:$0xff]  ;;  %v921_v22 = vld [vmem:[%s10083_s28 + $0x78] sm:$0xff]  ;;  %v7703_v23 = vpack.c.bf16 %v916_v20, %v914_v19  ;;  %v918_v25 = vld [vmem:[%s10083_s28 + $0x60] sm:$0xff]  ;;  %s10086_s2 = sld [smem:[#allocation22_spill]]  ;;  %v8700_v8 = vsub.s32 1, %v874_v50  ;;  %v876_v15 = vand.u32 127, %v873_v49 }
  0x38   : > { %v8557_v0 = vld [vmem:[%s850_s10] sm:$0xff]  ;;  %7698 = vmatprep.subr.bf16.mxu0 %v7697_v12  ;;  %v7705_v24 = vpack.c.bf16 %v921_v22, %v919_v21  ;;  %v920_v26 = vld [vmem:[%s10083_s28 + $0x70] sm:$0xff]  ;;  %s10087_s0 = sld [smem:[#allocation23_spill]]  ;;  %s10090_s10 = sld [smem:[#allocation21_spill]]  ;;  %v8352_v19 = vmov -1e+09  }
  0x39   : > { %v889_v1 = vmul.f32 %v8557_v0, %v8557_v0  ;;  %v7707_v27 = vpack.c.bf16 %v920_v26, %v918_v25  ;;  %v863_v28 = vld [vmem:[%s10084_s7] sm:$0xff]  ;;  %s10088_s7 = sld [smem:[#allocation25_spill]]  ;;  %vm885_vm5 = vcmp.le.s32.totalorder %v876_v15, %v874_v50  ;;  %s10094_s27 = sld [smem:[#allocation18_spill]] }
  0x3a   : > { %1085 = vrot.lane.b32.xlu1 %v863_v28, %s10027_s5  ;;  %v877_v12 = vld [vmem:[%s858_s29] sm:$0x1]  ;;  %s10092_s29 = sld [smem:[#allocation26_spill]]  ;;  %s10111_s4 = sld [smem:[#allocation29_spill]] }
  0x3b   : > { %v891_v2 = vsel %vm890_vm0, %v889_v1, 0.0  ;;  %7700 = vmatpush1.bf16.msra.mxu0 %v7699_v17  ;;  %vm878_vm3 = vcmp.gt.f32.partialorder %v877_v12, 0.5 }
  0x3c   : > { %892 = vadd.xlane.f32.xlu0 %v891_v2  ;;  %7702 = vmatprep.subr.bf16.mxu0 %v7701_v18  ;;  %v879_v14 = vsel %vm878_vm3, 1, %v8351_v13 }
  0x3d   : > { %v865_v29 = vld [vmem:[%s10086_s2] sm:$0xff]  ;;  %v866_v30 = vld [vmem:[%s10086_s2 + $0x8] sm:$0xff]  ;;  %v867_v33 = vld [vmem:[%s10086_s2 + $0x10] sm:$0xff]  ;;  %v883_v17 = vrot.slane %v879_v14, %v8674_v51 }
  0x3e   : > { %v8622_v32 = vpack.c.bf16 %v866_v30, %v865_v29  ;;  %v868_v34 = vld [vmem:[%s10086_s2 + $0x18] sm:$0xff]  ;;  %v869_v36 = vld [vmem:[%s10086_s2 + $0x20] sm:$0xff]  ;;  %v870_v37 = vld [vmem:[%s10086_s2 + $0x28] sm:$0xff] }
  0x3f   : > { %7704 = vmatpush1.bf16.msra.mxu0 %v7703_v23  ;;  %v8632_v35 = vpack.c.bf16 %v868_v34, %v867_v33  ;;  %v8642_v38 = vpack.c.bf16 %v870_v37, %v869_v36  ;;  %v6640_v43 = vld [vmem:[%s10087_s0] ss:$0 sm:$0xff]  ;;  %v871_v46 = vld [vmem:[%s10086_s2 + $0x30] sm:$0xff]  ;;  %v872_v47 = vld [vmem:[%s10086_s2 + $0x38] sm:$0xff]  ;;  %s10089_s3 = smov %s10088_s7  ;;  %vm884_vm4 = vcmp.eq.s32.totalorder %v883_v17, 1  ;;  %s10093_s2 = smov 96  }
  0x40   : > { %7706 = vmatprep.subr.bf16.mxu0 %v7705_v24  ;;  %7711 = vmatpush3.bf16.msra.mxu1 %v8622_v32  ;;  %v8664_v48 = vpack.c.bf16 %v872_v47, %v871_v46  ;;  %v922_v52 = vld [vmem:[%s10088_s7] sm:$0x3]  ;;  %vm886_vm6 = vmand %vm885_vm5, %vm884_vm4  ;;  %s10025_s7 = smov 48  }
  0x41   : > { %7712 = vmatprep.subr.bf16.mxu1 %v8349_v31  ;;  %v927_v53 = vrot.slane %v922_v52, %v8674_v51  ;;  %v864_v58 = vld [vmem:[%s10090_s10] sm:$0xff]  ;;  %v931_v9 = vrot.slane %v922_v52, %v8700_v8  ;;  %v8718_v20 = vsel %vm886_vm6, 0.0, %v8352_v19 }
  0x43   : > { %7708 = vmatpush1.bf16.msra.mxu0 %v7707_v27 }
  0x44   : > { %7721 = vmatprep.subr.bf16.mxu0 %v8349_v31  ;;  %7714 = vmatpush3.bf16.msra.mxu1 %v8632_v35 }
  0x45   : > { %7715 = vmatprep.subr.bf16.mxu1 %v8349_v31 }
  0x48   : > { %7717 = vmatpush3.bf16.msra.mxu1 %v8642_v38 }
  0x49   : > { %7718 = vmatprep.subr.bf16.mxu1 %v8349_v31 }
  0x4c   : > { %7720 = vmatpush3.bf16.msra.mxu1 %v8664_v48 }
  0x4d   : > { %7212 = vmatprep.subr.mxu1 %v8347_v16 }
  0xac   : > { %v8693_v4 = vpop.permute.xlu1 %1085 }
  0xc9   : > { %v893_v39 = vpop.xlane.xlu0 %892 }
  0xca   : > { %v895_v40 = vmul.f32 0.015625, %v893_v39 }
  0xcc   : > { %v896_v41 = vadd.f32 1e-06, %v895_v40 }
  0xce   : > { %8160 = vrsqrt.f32 %v896_v41 }
  0xd8   : > { %v8161_v42 = vpop.eup %8160 }
  0xd9   : > { %v898_v44 = vmul.f32 %v8161_v42, %v8557_v0 }
  0xdb   : > { %v905_v45 = vmul.f32 %v6640_v43, %v898_v44 }
  0xdd   : > { %6641 = vmatmul.mubr.msk.f32.vlgmr.msra.gmra.mrb[0].mxu0 %vm890_vm0, %v905_v45 }
  0xde   : > { %7723 = vmatpush3.bf16.msra.mxu0 %v8622_v32  ;;  %7209 = vmatprep.mubr.msk.f32.mxu0 %vm8350_vm1, %v8347_v16 }
  0xdf   : > { %7724 = vmatprep.subr.bf16.mxu0 %v8349_v31 }
  0xe2   : > { %7726 = vmatpush3.bf16.msra.mxu0 %v8632_v35 }
  0xe3   : > { %7727 = vmatprep.subr.bf16.mxu0 %v8349_v31 }
  0xe6   : > { %7729 = vmatpush3.bf16.msra.mxu0 %v8642_v38 }
  0xe7   : > { %7730 = vmatprep.subr.bf16.mxu0 %v8349_v31 }
  0xea   : > { %7732 = vmatpush3.bf16.msra.mxu0 %v8664_v48 }
  0xeb   : > { %7733 = vmatprep.subr.bf16.mxu0 %v8349_v31 }
 0x1b0   : > { %v1003_v54 = vpop.f32.mrb[0].mxu0 }
 0x1b1   : > { %v1004_v55 = vadd.f32 %v1003_v54, %v927_v53  ;;  %v1005_v56 = vpop.f32.mrb[1].mxu0  ;;  %v1171_v54 = vld [vmem:[%s10092_s29 + $0x10] sm:$0xff] }
 0x1b2   : > { %v8705_v11 = vadd.f32 %v1005_v56, %v931_v9 }
 0x1b3   : > { %1089 = vrot.lane.b32.xlu0 %v1004_v55, %s10027_s5  ;;  %7191 = vmatmul.mubr.msk.f32.vlgmr.msra.gmra.mrb[0].mxu1 %vm890_vm0, %v1004_v55  ;;  %v1008_v60 = vmul.f32 %v1004_v55, %v863_v28  ;;  %v1088_v5 = vmul.f32 %v8693_v4, %v1004_v55  ;;  %v1172_v55 = vld [vmem:[%s10092_s29 + $0x18] sm:$0xff] }
 0x1b4   : > { %7214 = vmatprep.mubr.msk.f32.mxu1 %vm8350_vm1, %v8347_v16  ;;  %v7734_v56 = vpack.c.bf16 %v1172_v55, %v1171_v54 }
 0x225   : > { %v1090_v57 = vpop.permute.xlu0 %1089 }
 0x226   : > { %7210 = vmatmul.mubr.msk.f32.vlgmr.msra.gmra.mrb[2].mxu0 %vm890_vm0, %v1090_v57 }
 0x227   : > { %7236 = vmatprep.mubr.msk.f32.mxu0 %vm8350_vm1, %v8347_v16  ;;  %7735 = vmatpush3.bf16.msra.mxu0 %v7734_v56 }
 0x228   : > { %7246 = vmatprep.subr.mxu0 %v8347_v16 }
 0x286   : > { %v1078_v59 = vpop.f32.mrb[0].mxu1 }
 0x287   : > { %v1082_v61 = vmul.f32 %v1078_v59, %v864_v58  ;;  %v7192_v62 = vpop.f32.mrb[1].mxu1  ;;  %v1170_v59 = vld [vmem:[%s10092_s29 + $0x8] sm:$0xff] }
 0x289   : > { %v8690_v63 = vadd.f32 %v1082_v61, %v1008_v60 }
 0x2f9   : > { %v1159_v1 = vpop.f32.mrb[2].mxu0 }
 0x2fa   : > { %v1163_v2 = vmul.f32 %v1159_v1, %v864_v58  ;;  %v7211_v3 = vpop.f32.mrb[3].mxu0  ;;  %v1169_v58 = vld [vmem:[%s10092_s29] sm:$0xff] }
 0x2fb   : > { %v7737_v61 = vpack.c.bf16 %v1170_v59, %v1169_v58 }
 0x2fc   : > { %1165 = vrot.lane.b32.xlu1 %v1163_v2, %s10027_s5 }
 0x36e   : > { %v1166_v6 = vpop.permute.xlu1 %1165 }
 0x36f   : > { %v8696_v7 = vadd.f32 %v1166_v6, %v1088_v5 }
 0x371   : > { %1178 = vrot.lane.b32.xlu1 %v8696_v7, %s10027_s5  ;;  %s10038_s5 = smov 80  }
 0x3e3   : > { %v1179_v10 = vpop.permute.xlu1 %1178 }
 0x3e4   : > { %7213 = vmatpush3.xpose.msk.msra.mxu1 %vm1180_vm2, %v1179_v10 }
 0x3e5   : > { %7217 = vmatprep.subr.mxu1 %v8347_v16 }
 0x3e7   : > { %7215 = vmatmul.mubr.msk.f32.vlgmr.msra.gmra.mrb[2].mxu1 %vm1180_vm2, %v8690_v63 }
 0x3e8   : > { %7218 = vmatpush3.msra.mxu1 %v8705_v11  ;;  %7219 = vmatprep.mubr.msk.f32.mxu1 %vm8350_vm1, %v8347_v16 }
 0x3e9   : > { %7222 = vmatprep.subr.mxu1 %v8347_v16 }
 0x4ba   : > { %v1252_v18 = vpop.f32.mrb[2].mxu1 }
 0x4bb   : > { %v1256_v21 = vmul.f32 0.25, %v1252_v18  ;;  %v7216_v22 = vpop.f32.mrb[3].mxu1 }
 0x4bd   : > { %v1257_v23 = vadd.f32 %v1256_v21, %v8718_v20 }
 0x4bf   : > { %v1259_v24 = vsel %vm1258_vm7, %v1257_v23, -inf }
 0x4c0   : > { %1260 = vmax.xlane.f32.xlu1 %v1259_v24 }
 0x4d1   : > { %1345 = vrot.lane.b32.xlu1 %v8696_v7, %s10025_s7  ;;  %s10036_s7 = smov 16  }
 0x54d   : > { %v1261_v25 = vpop.xlane.xlu1 %1260 }
 0x54e   : > { %v1262_v26 = vsub.f32 %v1257_v23, %v1261_v25 }
 0x550   : > { %v1263_v27 = vmul.f32 1.442695, %v1262_v26 }
 0x551   : > { %v1346_v36 = vpop.permute.xlu1 %1345 }
 0x552   : > { %8162 = vpow2.f32 %v1263_v27  ;;  %v1174_v27 = vld [vmem:[%s10092_s29 + $0x28] sm:$0xff] }
 0x55c   : > { %v8163_v28 = vpop.eup %8162 }
 0x55d   : > { %v1265_v29 = vsel %vm1258_vm7, %v8163_v28, 0.0 }
 0x55e   : > { %1266 = vadd.xlane.f32.xlu0 %v1265_v29 }
 0x574   : > { %1343 = vrot.lane.b32.xlu0 %v8690_v63, %s10029_s26 }
 0x5eb   : > { %v1267_v30 = vpop.xlane.xlu0 %1266 }
 0x5ec   : > { %8164 = vrcp.f32 %v1267_v30 }
 0x5ef   : > { %v1344_v37 = vpop.permute.xlu0 %1343 }
 0x5f6   : > { %v8165_v33 = vpop.eup %8164 }
 0x5f7   : > { %v1269_v34 = vmul.f32 %v8165_v33, %v8163_v28 }
 0x5f9   : > { %7220 = vmatmul.mubr.msk.f32.vlgmr.msra.gmra.mrb[4].mxu1 %vm1258_vm7, %v1269_v34 }
 0x5fa   : > { %7223 = vmatpush3.xpose.msk.msra.mxu1 %vm1180_vm2, %v1346_v36  ;;  %7224 = vmatprep.mubr.msk.f32.mxu1 %vm8350_vm1, %v8347_v16 }
 0x5fb   : > { %7227 = vmatprep.subr.mxu1 %v8347_v16 }
 0x5fd   : > { %7225 = vmatmul.mubr.msk.f32.vlgmr.msra.gmra.mrb[6].mxu1 %vm1180_vm2, %v1344_v37 }
 0x5fe   : > { %7229 = vmatprep.mubr.msk.f32.mxu1 %vm8350_vm1, %v8347_v16 }
 0x6cc   : > { %v1339_v39 = vpop.f32.mrb[4].mxu1 }
 0x6cd   : > { %v7221_v40 = vpop.f32.mrb[5].mxu1 }
 0x6d0   : > { %v1417_v41 = vpop.f32.mrb[6].mxu1 }
 0x6d1   : > { %v1421_v42 = vmul.f32 0.25, %v1417_v41  ;;  %v7226_v43 = vpop.f32.mrb[7].mxu1 }
 0x6d3   : > { %v1422_v44 = vadd.f32 %v1421_v42, %v8718_v20 }
 0x6d5   : > { %v1423_v45 = vsel %vm1258_vm7, %v1422_v44, -inf }
 0x6d6   : > { %1424 = vmax.xlane.f32.xlu1 %v1423_v45 }
 0x6e7   : > { %1435 = vrot.lane.b32.xlu1 %v8705_v11, %s10029_s26 }
 0x6eb   : > { %1657 = vrot.lane.b32.xlu1 %v8690_v63, %s10031_s30  ;;  %s10095_s30 = sld [smem:[#allocation27_spill]] }
 0x6f1   : > { %s10096_s23 = smov %s10095_s30 }
 0x763   : > { %v1425_v46 = vpop.xlane.xlu1 %1424 }
 0x764   : > { %v1426_v47 = vsub.f32 %v1422_v44, %v1425_v46 }
 0x766   : > { %v1427_v49 = vmul.f32 1.442695, %v1426_v47 }
 0x767   : > { %v1436_v50 = vpop.permute.xlu1 %1435 }
 0x768   : > { %8166 = vpow2.f32 %v1427_v49  ;;  %7228 = vmatpush3.msra.mxu1 %v1436_v50 }
 0x769   : > { %7736 = vmatprep.subr.bf16.mxu1 %v8349_v31 }
 0x76b   : > { %v1658_v5 = vpop.permute.xlu1 %1657 }
 0x772   : > { %v8167_v52 = vpop.eup %8166 }
 0x773   : > { %v1429_v53 = vsel %vm1258_vm7, %v8167_v52, 0.0 }
 0x774   : > { %1430 = vadd.xlane.f32.xlu0 %v1429_v53 }
 0x78a   : > { %1659 = vrot.lane.b32.xlu0 %v8696_v7, %s10034_s8  ;;  %s8033_s8 = smul.u32 24, %s8551_s11  ;;  %s10100_s11 = sld [smem:[#allocation28_spill]] }
 0x78c   : > { %s8854_s26 = scalar_lea.vmem %s10094_s27, %s8033_s8  ;;  %s10105_s8 = smov 48  }
 0x78d   : > { %s10107_s27 = smov 32  }
 0x801   : > { %v1431_v57 = vpop.xlane.xlu0 %1430 }
 0x802   : > { %8168 = vrcp.f32 %v1431_v57 }
 0x805   : > { %v1660_v2 = vpop.permute.xlu0 %1659 }
 0x80c   : > { %v8169_v60 = vpop.eup %8168 }
 0x80d   : > { %v1433_v62 = vmul.f32 %v8169_v60, %v8167_v52  ;;  %v1175_v52 = vld [vmem:[%s10092_s29 + $0x30] sm:$0xff] }
 0x80f   : > { %7230 = vmatmul.mubr.msk.f32.vlgmr.msra.gmra.mrb[8].mxu1 %vm1258_vm7, %v1433_v62  ;;  %v2252_v62 = vld [vmem:[%s9994_s14] sm:$0xff] }
 0x810   : > { %7738 = vmatpush3.bf16.msra.mxu1 %v7737_v61  ;;  %7243 = vmatprep.mubr.msk.f32.mxu1 %vm8350_vm1, %v8347_v16 }
 0x811   : > { %7251 = vmatprep.subr.mxu1 %v8347_v16 }
 0x813   : > { %7244 = vmatmul.mubr.msk.f32.vlgmr.msra.gmra.mrb[10].mxu1 %vm1180_vm2, %v1339_v39 }
 0x814   : > { %7253 = vmatprep.mubr.msk.f32.mxu1 %vm8350_vm1, %v8347_v16 }
 0x8e2   : > { %v1507_v1 = vpop.f32.mrb[8].mxu1 }
 0x8e3   : > { %v7231_v3 = vpop.f32.mrb[9].mxu1  ;;  %7237 = vmatmul.mubr.msk.f32.vlgmr.msra.gmra.mrb[4].mxu0 %vm1180_vm2, %v1507_v1  ;;  %v2253_v1 = vld [vmem:[%s9994_s14 + $0x8] sm:$0xff] }
 0x8e4   : > { %7247 = vmatpush3.xpose.msk.msra.mxu0 %vm1180_vm2, %v1660_v2  ;;  %7248 = vmatprep.mubr.msk.f32.mxu0 %vm8350_vm1, %v8347_v16  ;;  %v2254_v2 = vld [vmem:[%s9994_s14 + $0x10] sm:$0xff]  ;;  %v7758_v3 = vpack.c.bf16 %v2253_v1, %v2252_v62 }
 0x8e5   : > { %7739 = vmatprep.subr.bf16.mxu0 %v8349_v31 }
 0x8e6   : > { %v1653_v6 = vpop.f32.mrb[10].mxu1 }
 0x8e7   : > { %v7245_v9 = vpop.f32.mrb[11].mxu1  ;;  %7249 = vmatmul.mubr.msk.f32.vlgmr.msra.gmra.mrb[6].mxu0 %vm1180_vm2, %v1658_v5  ;;  %v2255_v5 = vld [vmem:[%s9994_s14 + $0x18] sm:$0xff] }
 0x8e8   : > { %7260 = vmatprep.mubr.msk.f32.mxu0 %vm8350_vm1, %v8347_v16  ;;  %v2256_v9 = vld [vmem:[%s9994_s14 + $0x20] sm:$0xff] }
 0x9b6   : > { %v1580_v10 = vpop.f32.mrb[4].mxu0 }
 0x9b7   : > { %v8773_v12 = vadd.f32 %v1653_v6, %v1580_v10  ;;  %v7238_v13 = vpop.f32.mrb[5].mxu0  ;;  %v7761_v6 = vpack.c.bf16 %v2255_v5, %v2254_v2  ;;  %v2257_v10 = vld [vmem:[%s9994_s14 + $0x28] sm:$0xff]  ;;  %v6662_v5 = vld [vmem:[%s10103_s13] ss:$0 sm:$0xff]  ;;  %s10109_s13 = smov 16  }
 0x9b8   : > { %v2258_v13 = vld [vmem:[%s9994_s14 + $0x30] sm:$0xff] }
 0x9ba   : > { %v1731_v14 = vpop.f32.mrb[6].mxu0 }
 0x9bb   : > { %v1735_v15 = vmul.f32 0.25, %v1731_v14  ;;  %v7250_v17 = vpop.f32.mrb[7].mxu0  ;;  %v2259_v14 = vld [vmem:[%s9994_s14 + $0x38] sm:$0xff] }
 0x9bc   : > { %v860_v17 = vld [vmem:[%s8854_s26] sm:$0xff] }
 0x9bd   : > { %v1736_v18 = vadd.f32 %v1735_v15, %v8718_v20  ;;  %v7767_v15 = vpack.c.bf16 %v2259_v14, %v2258_v13 }
 0x9bf   : > { %v1737_v19 = vsel %vm1258_vm7, %v1736_v18, -inf }
 0x9c0   : > { %1738 = vmax.xlane.f32.xlu1 %v1737_v19 }
 0x9d1   : > { %1748 = vrot.lane.b32.xlu1 %v8705_v11, %s10093_s2 }
 0x9d5   : > { %1898 = vrot.lane.b32.xlu1 %v8690_v63, %s10038_s5  ;;  %v1173_v63 = vld [vmem:[%s10092_s29 + $0x20] sm:$0xff] }
 0x9d6   : > { %v7740_v28 = vpack.c.bf16 %v1174_v27, %v1173_v63  ;;  %v2164_v27 = vld [vmem:[%s10097_s12] sm:$0xff] }
 0x9d8   : > { %7741 = vmatpush3.bf16.msra.mxu0 %v7740_v28  ;;  %v2165_v28 = vld [vmem:[%s10097_s12 + $0x8] sm:$0xff] }
 0x9d9   : > { %7268 = vmatprep.subr.mxu0 %v8347_v16 }
 0xa4d   : > { %v1739_v21 = vpop.xlane.xlu1 %1738 }
 0xa4e   : > { %v1740_v22 = vsub.f32 %v1736_v18, %v1739_v21  ;;  %v861_v18 = vld [vmem:[%s8854_s26 + $0x8] sm:$0xff]  ;;  %v6660_v21 = vld [vmem:[%s10095_s30] ss:$0 sm:$0xff] }
 0xa50   : > { %v1741_v23 = vmul.f32 1.442695, %v1740_v22 }
 0xa51   : > { %v1749_v24 = vpop.permute.xlu1 %1748 }
 0xa52   : > { %8170 = vpow2.f32 %v1741_v23  ;;  %7252 = vmatpush3.msra.mxu1 %v1749_v24 }
 0xa53   : > { %7263 = vmatprep.subr.mxu1 %v8347_v16 }
 0xa5c   : > { %v8171_v25 = vpop.eup %8170 }
 0xa5d   : > { %v1743_v26 = vsel %vm1258_vm7, %v8171_v25, 0.0 }
 0xa5e   : > { %1744 = vadd.xlane.f32.xlu0 %v1743_v26 }
 0xa74   : > { %1900 = vrot.lane.b32.xlu0 %v8696_v7, %s10036_s7  ;;  %v1899_v7 = vpop.permute.xlu1 %1898  ;;  %s10122_s7 = sld [smem:[#allocation38_spill]] }
 0xaeb   : > { %v1745_v29 = vpop.xlane.xlu0 %1744 }
 0xaec   : > { %8172 = vrcp.f32 %v1745_v29  ;;  %v7746_v29 = vpack.c.bf16 %v2165_v28, %v2164_v27 }
 0xaef   : > { %v1901_v34 = vpop.permute.xlu0 %1900 }
 0xaf6   : > { %v8173_v30 = vpop.eup %8172 }
 0xaf7   : > { %v1747_v33 = vmul.f32 %v8173_v30, %v8171_v25  ;;  %v2167_v30 = vld [vmem:[%s10097_s12 + $0x18] sm:$0xff] }
 0xaf9   : > { %7254 = vmatmul.mubr.msk.f32.vlgmr.msra.gmra.mrb[12].mxu1 %vm1258_vm7, %v1747_v33 }
 0xafa   : > { %7264 = vmatpush3.xpose.msk.msra.mxu1 %vm1180_vm2, %v1901_v34  ;;  %7265 = vmatprep.mubr.msk.f32.mxu1 %vm8350_vm1, %v8347_v16  ;;  %v2168_v34 = vld [vmem:[%s10097_s12 + $0x20] sm:$0xff] }
 0xafb   : > { %7742 = vmatprep.subr.bf16.mxu1 %v8349_v31 }
 0xafd   : > { %7266 = vmatmul.mubr.msk.f32.vlgmr.msra.gmra.mrb[14].mxu1 %vm1180_vm2, %v1899_v7  ;;  %v2169_v7 = vld [vmem:[%s10097_s12 + $0x28] sm:$0xff] }
 0xafe   : > { %7277 = vmatprep.mubr.msk.f32.mxu1 %vm8350_vm1, %v8347_v16 }
 0xbcc   : > { %v1820_v36 = vpop.f32.mrb[12].mxu1 }
 0xbcd   : > { %v7255_v37 = vpop.f32.mrb[13].mxu1  ;;  %7261 = vmatmul.mubr.msk.f32.vlgmr.msra.gmra.mrb[8].mxu0 %vm1180_vm2, %v1820_v36  ;;  %v7752_v36 = vpack.c.bf16 %v2169_v7, %v2168_v34 }
 0xbce   : > { %7270 = vmatprep.mubr.msk.f32.mxu0 %vm8350_vm1, %v8347_v16  ;;  %v862_v37 = vld [vmem:[%s8854_s26 + $0x10] sm:$0x1] }
 0xbd0   : > { %v1972_v39 = vpop.f32.mrb[14].mxu1 }
 0xbd1   : > { %v1976_v40 = vmul.f32 0.25, %v1972_v39  ;;  %v7267_v41 = vpop.f32.mrb[15].mxu1  ;;  %v2170_v39 = vld [vmem:[%s10097_s12 + $0x30] sm:$0xff] }
 0xbd3   : > { %v1977_v42 = vadd.f32 %v1976_v40, %v8718_v20  ;;  %v2171_v40 = vld [vmem:[%s10097_s12 + $0x38] sm:$0xff] }
 0xbd4   : > { %v7755_v41 = vpack.c.bf16 %v2171_v40, %v2170_v39 }
 0xbd5   : > { %v1978_v43 = vsel %vm1258_vm7, %v1977_v42, -inf }
 0xbd6   : > { %1979 = vmax.xlane.f32.xlu1 %v1978_v43 }
 0xbe7   : > { %1989 = vrot.lane.b32.xlu1 %v8705_v11, %s10038_s5  ;;  %v1176_v11 = vld [vmem:[%s10092_s29 + $0x38] sm:$0xff]  ;;  %s10104_s5 = smov 64  }
 0xbe8   : > { %v7743_v53 = vpack.c.bf16 %v1176_v11, %v1175_v52 }
 0xbea   : > { %7744 = vmatpush3.bf16.msra.mxu1 %v7743_v53 }
 0xbeb   : > { %7757 = vmatprep.subr.bf16.mxu1 %v8349_v31 }
 0xc63   : > { %v1980_v44 = vpop.xlane.xlu1 %1979 }
 0xc64   : > { %v1981_v45 = vsub.f32 %v1977_v42, %v1980_v44  ;;  %v6664_v42 = vld [vmem:[%s10098_s15] ss:$0 sm:$0xff]  ;;  %s10112_s15 = sld [smem:[#allocation31_spill]] }
 0xc66   : > { %v1982_v46 = vmul.f32 1.442695, %v1981_v45 }
 0xc67   : > { %v1990_v47 = vpop.permute.xlu1 %1989 }
 0xc68   : > { %8174 = vpow2.f32 %v1982_v46  ;;  %7269 = vmatpush3.msra.mxu0 %v1990_v47 }
 0xc69   : > { %7745 = vmatprep.subr.bf16.mxu0 %v8349_v31 }
 0xc72   : > { %v8175_v49 = vpop.eup %8174 }
 0xc73   : > { %v1984_v50 = vsel %vm1258_vm7, %v8175_v49, 0.0 }
 0xc74   : > { %1985 = vadd.xlane.f32.xlu0 %v1984_v50 }
 0xca0   : > { %v1893_v54 = vpop.f32.mrb[8].mxu0 }
 0xca1   : > { %v1897_v55 = vadd.f32 %v1893_v54, %v8773_v12  ;;  %v7262_v56 = vpop.f32.mrb[9].mxu0  ;;  %v7764_v12 = vpack.c.bf16 %v2257_v10, %v2256_v9 }
 0xd01   : > { %v1986_v57 = vpop.xlane.xlu0 %1985 }
 0xd02   : > { %8176 = vrcp.f32 %v1986_v57 }
 0xd0c   : > { %v8177_v58 = vpop.eup %8176 }
 0xd0d   : > { %v1988_v59 = vmul.f32 %v8177_v58, %v8175_v49 }
 0xd0f   : > { %7271 = vmatmul.mubr.msk.f32.vlgmr.msra.gmra.mrb[10].mxu0 %vm1258_vm7, %v1988_v59 }
 0xd10   : > { %7296 = vmatprep.mubr.msk.f32.mxu0 %vm8350_vm1, %v8347_v16  ;;  %7747 = vmatpush3.bf16.msra.mxu0 %v7746_v29 }
 0xd11   : > { %7748 = vmatprep.subr.bf16.mxu0 %v8349_v31 }
 0xde2   : > { %v2061_v60 = vpop.f32.mrb[10].mxu0 }
 0xde3   : > { %v7272_v61 = vpop.f32.mrb[11].mxu0  ;;  %7278 = vmatmul.mubr.msk.f32.vlgmr.msra.gmra.mrb[16].mxu1 %vm1180_vm2, %v2061_v60 }
 0xde4   : > { %7315 = vmatprep.mubr.msk.f32.mxu1 %vm8350_vm1, %v8347_v16  ;;  %7759 = vmatpush3.bf16.msra.mxu1 %v7758_v3 }
 0xde5   : > { %7760 = vmatprep.subr.bf16.mxu1 %v8349_v31 }
 0xde8   : > { %7762 = vmatpush3.bf16.msra.mxu1 %v7761_v6 }
 0xde9   : > { %7763 = vmatprep.subr.bf16.mxu1 %v8349_v31 }
 0xdec   : > { %7765 = vmatpush3.bf16.msra.mxu1 %v7764_v12 }
 0xded   : > { %7766 = vmatprep.subr.bf16.mxu1 %v8349_v31 }
 0xdf0   : > { %7768 = vmatpush3.bf16.msra.mxu1 %v7767_v15 }
 0xdf1   : > { %7773 = vmatprep.subr.bf16.mxu1 %v8349_v31 }
 0xdf3   : > { %7316 = vmatmul.mubr.msk.f32.vlgmr.msra.gmra.mrb[18].mxu1 %vm890_vm0, %v860_v17 }
 0xdf4   : > { %7318 = vmatprep.mubr.msk.f32.mxu1 %vm8350_vm1, %v8347_v16 }
 0xdf7   : > { %7319 = vmatmul.mubr.msk.f32.gmra.mrb[20].mxu1 %vm890_vm0, %v861_v18 }
 0xdf8   : > { %7321 = vmatprep.mubr.msk.f32.mxu1 %vm8350_vm1, %v8347_v16 }
 0xdfb   : > { %7322 = vmatmul.mubr.msk.f32.gmra.mrb[22].mxu1 %vm890_vm0, %v862_v37 }
 0xdfc   : > { %7339 = vmatprep.mubr.msk.f32.mxu1 %vm8350_vm1, %v8347_v16 }
 0xeb6   : > { %v2134_v19 = vpop.f32.mrb[16].mxu1 }
 0xeb7   : > { %v2138_v22 = vadd.f32 %v2134_v19, %v1897_v55  ;;  %v7279_v23 = vpop.f32.mrb[17].mxu1  ;;  %v6661_v55 = vld [vmem:[%s10100_s11] ss:$0 sm:$0xff] }
 0xeb9   : > { %v2146_v24 = vadd.f32 %v6660_v21, %v2138_v22 }
 0xebb   : > { %v8869_v25 = vadd.f32 %v2146_v24, %v8557_v0  ;;  %v2166_v0 = vld [vmem:[%s10097_s12 + $0x10] sm:$0xff]  ;;  %s10117_s12 = sld [smem:[#allocation35_spill]] }
 0xebc   : > { %v7749_v33 = vpack.c.bf16 %v2167_v30, %v2166_v0 }
 0xebd   : > { %v2149_v26 = vmul.f32 %v8869_v25, %v8869_v25 }
 0xebe   : > { %7750 = vmatpush3.bf16.msra.mxu0 %v7749_v33 }
 0xebf   : > { %v2150_v63 = vsel %vm890_vm0, %v2149_v26, 0.0  ;;  %7751 = vmatprep.subr.bf16.mxu0 %v8349_v31 }
 0xec0   : > { %2151 = vadd.xlane.f32.xlu0 %v2150_v63 }
 0xec2   : > { %7753 = vmatpush3.bf16.msra.mxu0 %v7752_v36 }
 0xec3   : > { %7754 = vmatprep.subr.bf16.mxu0 %v8349_v31 }
 0xec6   : > { %7756 = vmatpush3.bf16.msra.mxu0 %v7755_v41  ;;  %v2342_v43 = vpop.f32.mrb[18].mxu1 }
 0xec7   : > { %7769 = vmatprep.subr.bf16.mxu0 %v8349_v31  ;;  %v7317_v44 = vpop.f32.mrb[19].mxu1  ;;  %v2343_v45 = vadd.f32 %v6664_v42, %v2342_v43 }
 0xeca   : > { %v2347_v46 = vpop.f32.mrb[20].mxu1 }
 0xecb   : > { %v2348_v47 = vadd.f32 %v6664_v42, %v2347_v46  ;;  %v7320_v49 = vpop.f32.mrb[21].mxu1 }
 0xecd   : > { %v8909_v50 = vpack.i.bf16 %v2348_v47, %v2343_v45  ;;  %v7770_v57 = vpack.c.bf16 %v2348_v47, %v2343_v45 }
 0xece   : > { %v2352_v60 = vpop.f32.mrb[22].mxu1 }
 0xecf   : > { %v8929_v61 = vadd.f32 %v6664_v42, %v2352_v60  ;;  %v7323_v62 = vpop.f32.mrb[23].mxu1 }
 0xed1   : > { %2549 = vrot.lane.b32.xlu1 %v8929_v61, %s10099_s25 }
 0xed6   : > { %8091 = vrot.lane.b32.xlu0 %v8909_v50, %s10099_s25 }
 0xeda   : > { %2876 = vrot.lane.b32.xlu0 %v8929_v61, %s10093_s2 }
 0xf43   : > { %v2550_v13 = vpop.permute.xlu1 %2549 }
 0xf4d   : > { %v2152_v52 = vpop.xlane.xlu0 %2151 }
 0xf4e   : > { %v2153_v11 = vmul.f32 0.015625, %v2152_v52 }
 0xf50   : > { %v2154_v53 = vadd.f32 1e-06, %v2153_v11 }
 0xf51   : > { %v8092_v1 = vpop.permute.xlu0 %8091 }
 0xf52   : > { %8178 = vrsqrt.f32 %v2154_v53  ;;  %v8094_v2 = vunpack.i.h.bf16 %v8092_v1  ;;  %v8093_v3 = vunpack.i.l.bf16 %v8092_v1 }
 0xf54   : > { %v7777_v9 = vpack.c.bf16 %v8094_v2, %v8093_v3 }
 0xf55   : > { %v2877_v21 = vpop.permute.xlu0 %2876 }
 0xf5c   : > { %v8179_v54 = vpop.eup %8178 }
 0xf5d   : > { %v2156_v56 = vmul.f32 %v8179_v54, %v8869_v25 }
 0xf5f   : > { %v2163_v58 = vmul.f32 %v6661_v55, %v2156_v56 }
 0xf61   : > { %7297 = vmatmul.mubr.msk.f32.vlgmr.msra.gmra.mrb[12].mxu0 %vm890_vm0, %v2163_v58 }
 0xf62   : > { %7772 = vmatpush3.bf16.xpose.msk.msra.mxu0 %vm8919_vm8, %v7770_v57  ;;  %7330 = vmatprep.mubr.msk.f32.mxu0 %vm8350_vm1, %v8347_v16 }
 0xf63   : > { %7328 = vmatprep.subr.mxu0 %v8347_v16 }
 0xf6a   : > { %7329 = vmatpush3.xpose.msk.msra.mxu0 %vm1180_vm2, %v8929_v61 }
 0xf6b   : > { %7776 = vmatprep.subr.bf16.mxu0 %v8349_v31 }
0x1034   : > { %v2248_v6 = vpop.f32.mrb[12].mxu0 }
0x1035   : > { %v8941_v10 = vadd.f32 %v6662_v5, %v2248_v6  ;;  %v7298_v12 = vpop.f32.mrb[13].mxu0 }
0x1037   : > { %2543 = vrot.lane.b32.xlu1 %v8941_v10, %s10099_s25  ;;  %7331 = vmatmul.mubr.msk.f32.vlgmr.msra.gmra.mrb[14].mxu0 %vm1180_vm2, %v8941_v10 }
0x1038   : > { %7779 = vmatpush3.bf16.xpose.msk.msra.mxu0 %vm8919_vm8, %v7777_v9  ;;  %7348 = vmatprep.mubr.msk.f32.mxu0 %vm8350_vm1, %v8347_v16 }
0x1039   : > { %7346 = vmatprep.subr.mxu0 %v8347_v16 }
0x103b   : > { %8096 = vrot.lane.b32.xlu1 %v8909_v50, %s10093_s2 }
0x103f   : > { %2870 = vrot.lane.b32.xlu1 %v8941_v10, %s10093_s2 }
0x1040   : > { %7347 = vmatpush3.xpose.msk.msra.mxu0 %vm1180_vm2, %v2550_v13 }
0x1041   : > { %7789 = vmatprep.subr.bf16.mxu0 %v8349_v31 }
0x10a9   : > { %v2544_v14 = vpop.permute.xlu1 %2543 }
0x10aa   : > { %7349 = vmatmul.mubr.msk.f32.vlgmr.msra.gmra.mrb[16].mxu0 %vm1180_vm2, %v2544_v14 }
0x10ab   : > { %7380 = vmatprep.mubr.msk.f32.mxu0 %vm8350_vm1, %v8347_v16 }
0x10ad   : > { %v8097_v15 = vpop.permute.xlu1 %8096 }
0x10ae   : > { %v8099_v17 = vunpack.i.h.bf16 %v8097_v15  ;;  %v8098_v18 = vunpack.i.l.bf16 %v8097_v15 }
0x10b0   : > { %v7790_v19 = vpack.c.bf16 %v8099_v17, %v8098_v18 }
0x10b1   : > { %v2871_v22 = vpop.permute.xlu1 %2870 }
0x10b2   : > { %7792 = vmatpush3.bf16.xpose.msk.msra.mxu0 %vm8919_vm8, %v7790_v19 }
0x10b3   : > { %7378 = vmatprep.subr.mxu0 %v8347_v16 }
0x10ba   : > { %7379 = vmatpush3.xpose.msk.msra.mxu0 %vm1180_vm2, %v2877_v21 }
0x10bb   : > { %7799 = vmatprep.subr.bf16.mxu0 %v8349_v31 }
0x10bd   : > { %7381 = vmatmul.mubr.msk.f32.vlgmr.msra.gmra.mrb[18].mxu0 %vm1180_vm2, %v2871_v22  ;;  %v2358_v22 = vld [vmem:[%s10108_s16 + $0x10] sm:$0xff] }
0x10be   : > { %7405 = vmatprep.mubr.msk.f32.mxu0 %vm8350_vm1, %v8347_v16 }
0x110a   : > { %v2442_v23 = vpop.f32.mrb[14].mxu0 }
0x110b   : > { %v2446_v24 = vmul.f32 0.25, %v2442_v23  ;;  %v7332_v26 = vpop.f32.mrb[15].mxu0  ;;  %v2359_v23 = vld [vmem:[%s10108_s16 + $0x18] sm:$0xff] }
0x110d   : > { %v2448_v63 = vsel %vm2447_vm9, %v2446_v24, -inf }
0x110e   : > { %2449 = vmax.xlane.f32.xlu0 %v2448_v63 }
0x117d   : > { %v2625_v27 = vpop.f32.mrb[16].mxu0 }
0x117e   : > { %v2629_v28 = vmul.f32 0.25, %v2625_v27  ;;  %v7350_v29 = vpop.f32.mrb[17].mxu0 }
0x117f   : > { %v2357_v29 = vld [vmem:[%s10108_s16 + $0x8] sm:$0xff] }
0x1180   : > { %v2630_v0 = vsel %vm2447_vm9, %v2629_v28, -inf }
0x1181   : > { %2631 = vmax.xlane.f32.xlu1 %v2630_v0 }
0x1190   : > { %v2952_v30 = vpop.f32.mrb[18].mxu0 }
0x1191   : > { %v7382_v33 = vpop.f32.mrb[19].mxu0  ;;  %v2956_v40 = vmul.f32 0.25, %v2952_v30 }
0x1192   : > { %8101 = vrot.lane.b32.xlu1 %v8909_v50, %s10104_s5 }
0x1193   : > { %v2957_v41 = vsel %vm2447_vm9, %v2956_v40, -inf }
0x1196   : > { %8106 = vrot.lane.b32.xlu1 %v8909_v50, %s10105_s8 }
0x119a   : > { %2645 = vrot.lane.b32.xlu1 %v8929_v61, %s10105_s8 }
0x119b   : > { %v2450_v34 = vpop.xlane.xlu0 %2449 }
0x119c   : > { %v2451_v7 = vsub.f32 %v2446_v24, %v2450_v34  ;;  %v7784_v24 = vpack.c.bf16 %v2359_v23, %v2358_v22 }
0x119e   : > { %v2452_v36 = vmul.f32 1.442695, %v2451_v7  ;;  %3131 = vrot.lane.b32.xlu1 %v8929_v61, %s10106_s1 }
0x11a0   : > { %8180 = vpow2.f32 %v2452_v36 }
0x11aa   : > { %v8181_v37 = vpop.eup %8180 }
0x11ab   : > { %v2454_v39 = vsel %vm2447_vm9, %v8181_v37, 0.0 }
0x11ac   : > { %2455 = vadd.xlane.f32.xlu0 %v2454_v39 }
0x11c2   : > { %2958 = vmax.xlane.f32.xlu1 %v2957_v41 }
0x11d3   : > { %2972 = vrot.lane.b32.xlu1 %v8929_v61, %s10107_s27 }
0x120e   : > { %v2632_v42 = vpop.xlane.xlu1 %2631 }
0x120f   : > { %v2633_v43 = vsub.f32 %v2629_v28, %v2632_v42  ;;  %v2356_v28 = vld [vmem:[%s10108_s16] sm:$0xff] }
0x1210   : > { %v7787_v30 = vpack.c.bf16 %v2357_v29, %v2356_v28 }
0x1211   : > { %v2634_v44 = vmul.f32 1.442695, %v2633_v43 }
0x1212   : > { %v8102_v45 = vpop.permute.xlu1 %8101 }
0x1213   : > { %8182 = vpow2.f32 %v2634_v44  ;;  %v8104_v46 = vunpack.i.h.bf16 %v8102_v45  ;;  %v8103_v47 = vunpack.i.l.bf16 %v8102_v45 }
0x1215   : > { %v7774_v49 = vpack.c.bf16 %v8104_v46, %v8103_v47  ;;  %v2360_v46 = vld [vmem:[%s10108_s16 + $0x20] sm:$0xff]  ;;  %v2361_v47 = vld [vmem:[%s10108_s16 + $0x28] sm:$0xff] }
0x1216   : > { %v8107_v53 = vpop.permute.xlu1 %8106 }
0x1217   : > { %7775 = vmatpush3.bf16.msra.mxu1 %v7774_v49  ;;  %v8109_v5 = vunpack.i.h.bf16 %v8107_v53  ;;  %v8108_v6 = vunpack.i.l.bf16 %v8107_v53  ;;  %v7797_v49 = vpack.c.bf16 %v2361_v47, %v2360_v46  ;;  %v3413_v47 = vld [vmem:[%s9999_s19 + $0x40] sm:$0xff] }
0x1218   : > { %7337 = vmatprep.subr.mxu1 %v8347_v16 }
0x1219   : > { %v7781_v12 = vpack.c.bf16 %v8109_v5, %v8108_v6 }
0x121a   : > { %v2646_v54 = vpop.permute.xlu1 %2645 }
0x121d   : > { %v8183_v52 = vpop.eup %8182 }
0x121e   : > { %v2636_v11 = vsel %vm2447_vm9, %v8183_v52, 0.0  ;;  %v3132_v55 = vpop.permute.xlu1 %3131 }
0x121f   : > { %2637 = vadd.xlane.f32.xlu0 %v2636_v11 }
0x1235   : > { %2463 = vrot.lane.b32.xlu0 %v8929_v61, %s10104_s5 }
0x1239   : > { %8111 = vrot.lane.b32.xlu0 %v8909_v50, %s10106_s1  ;;  %v2456_v1 = vpop.xlane.xlu0 %2455 }
0x123d   : > { %3125 = vrot.lane.b32.xlu0 %v8941_v10, %s10106_s1 }
0x124f   : > { %v2959_v56 = vpop.xlane.xlu1 %2958 }
0x1250   : > { %v2960_v57 = vsub.f32 %v2956_v40, %v2959_v56 }
0x1252   : > { %v2961_v58 = vmul.f32 1.442695, %v2960_v57 }
0x1253   : > { %v2973_v40 = vpop.permute.xlu1 %2972 }
0x1254   : > { %8184 = vpow2.f32 %v2961_v58 }
0x1255   : > { %8186 = vrcp.f32 %v2456_v1 }
0x125e   : > { %v8991_v60 = vpop.eup %8184 }
0x125f   : > { %v2963_v62 = vsel %vm2447_vm9, %v8991_v60, 0.0  ;;  %v8187_v3 = vpop.eup %8186 }
0x1260   : > { %2964 = vadd.xlane.f32.xlu0 %v2963_v62  ;;  %v2458_v9 = vmul.f32 %v8187_v3, %v8181_v37 }
0x1276   : > { %8116 = vrot.lane.b32.xlu0 %v8909_v50, %s10107_s27 }
0x12ac   : > { %v2638_v2 = vpop.xlane.xlu0 %2637 }
0x12ad   : > { %8188 = vrcp.f32 %v2638_v2 }
0x12b0   : > { %v2464_v10 = vpop.permute.xlu0 %2463 }
0x12b1   : > { %7338 = vmatpush3.msk.msra.mxu1 %vm2470_vm10, %v2464_v10  ;;  %v2363_v10 = vld [vmem:[%s10108_s16 + $0x38] sm:$0xff] }
0x12b2   : > { %7340 = vmatmul.mubr.msk.f32.vlgmr.msra.gmra.mrb[24].mxu1 %vm2447_vm9, %v2458_v9  ;;  %7780 = vmatprep.subr.bf16.mxu1 %v8349_v31 }
0x12b3   : > { %7782 = vmatpush3.bf16.msra.mxu1 %v7781_v12  ;;  %7357 = vmatprep.mubr.msk.f32.mxu1 %vm8350_vm1, %v8347_v16 }
0x12b4   : > { %v8112_v13 = vpop.permute.xlu0 %8111  ;;  %7355 = vmatprep.subr.mxu1 %v8347_v16 }
0x12b5   : > { %v8114_v14 = vunpack.i.h.bf16 %v8112_v13  ;;  %v8113_v15 = vunpack.i.l.bf16 %v8112_v13 }
0x12b7   : > { %v8189_v17 = vpop.eup %8188  ;;  %v7800_v18 = vpack.c.bf16 %v8114_v14, %v8113_v15  ;;  %7356 = vmatpush3.msk.msra.mxu1 %vm2470_vm10, %v2646_v54 }
0x12b8   : > { %v2640_v19 = vmul.f32 %v8189_v17, %v8183_v52  ;;  %7783 = vmatprep.subr.bf16.mxu1 %v8349_v31  ;;  %v3126_v21 = vpop.permute.xlu0 %3125 }
0x12b9   : > { %7802 = vmatpush3.bf16.xpose.msk.msra.mxu0 %vm8919_vm8, %v7800_v18 }
0x12ba   : > { %7358 = vmatmul.mubr.msk.f32.vlgmr.msra.gmra.mrb[26].mxu1 %vm2447_vm9, %v2640_v19  ;;  %7403 = vmatprep.subr.mxu0 %v8347_v16 }
0x12bb   : > { %7364 = vmatprep.mubr.msk.f32.mxu1 %vm8350_vm1, %v8347_v16  ;;  %7785 = vmatpush3.bf16.msra.mxu1 %v7784_v24  ;;  %v6696_v24 = vld [vmem:[%s10110_s17] ss:$0 sm:$0xff] }
0x12bc   : > { %7786 = vmatprep.subr.bf16.mxu1 %v8349_v31 }
0x12c1   : > { %7404 = vmatpush3.xpose.msk.msra.mxu0 %vm1180_vm2, %v3132_v55 }
0x12c4   : > { %7406 = vmatmul.mubr.msk.f32.vlgmr.msra.gmra.mrb[20].mxu0 %vm1180_vm2, %v3126_v21 }
0x12ed   : > { %v2965_v26 = vpop.xlane.xlu0 %2964 }
0x12ee   : > { %8190 = vrcp.f32 %v2965_v26 }
0x12f1   : > { %v8117_v0 = vpop.permute.xlu0 %8116 }
0x12f2   : > { %v8119_v33 = vunpack.i.h.bf16 %v8117_v0  ;;  %v8118_v34 = vunpack.i.l.bf16 %v8117_v0 }
0x12f4   : > { %v7794_v37 = vpack.c.bf16 %v8119_v33, %v8118_v34  ;;  %v3408_v33 = vld [vmem:[%s9999_s19 + $0x18] sm:$0xff] }
0x12f8   : > { %v8191_v39 = vpop.eup %8190 }
0x12f9   : > { %v2967_v41 = vmul.f32 %v8191_v39, %v8991_v60  ;;  %v3412_v39 = vld [vmem:[%s9999_s19 + $0x38] sm:$0xff] }
0x1385   : > { %v2539_v63 = vpop.f32.mrb[24].mxu1 }
0x1386   : > { %v7341_v27 = vpop.f32.mrb[25].mxu1 }
0x138d   : > { %v2720_v7 = vpop.f32.mrb[26].mxu1 }
0x138e   : > { %v7359_v36 = vpop.f32.mrb[27].mxu1  ;;  %7365 = vmatmul.mubr.msk.f32.vlgmr.msra.gmra.mrb[28].mxu1 %vm1180_vm2, %v2720_v7  ;;  %v3407_v7 = vld [vmem:[%s9999_s19 + $0x10] sm:$0xff] }
0x138f   : > { %7788 = vmatpush3.bf16.msra.mxu1 %v7787_v30  ;;  %7371 = vmatprep.mubr.msk.f32.mxu1 %vm8350_vm1, %v8347_v16  ;;  %v3406_v30 = vld [vmem:[%s9999_s19 + $0x8] sm:$0xff] }
0x1390   : > { %7793 = vmatprep.subr.bf16.mxu1 %v8349_v31  ;;  %v7809_v34 = vpack.c.bf16 %v3408_v33, %v3406_v30  ;;  %v3531_v30 = vld [vmem:[%s10001_s21 + $0x30] sm:$0xff]  ;;  %v3532_v33 = vld [vmem:[%s10001_s21 + $0x38] sm:$0xff] }
0x1392   : > { %7372 = vmatmul.mubr.msk.f32.vlgmr.msra.gmra.mrb[30].mxu1 %vm1180_vm2, %v2539_v63 }
0x1393   : > { %7795 = vmatpush3.bf16.msra.mxu1 %v7794_v37  ;;  %7389 = vmatprep.mubr.msk.f32.mxu1 %vm8350_vm1, %v8347_v16  ;;  %v3410_v37 = vld [vmem:[%s9999_s19 + $0x28] sm:$0xff] }
0x1394   : > { %7387 = vmatprep.subr.mxu1 %v8347_v16 }
0x1397   : > { %7388 = vmatpush3.msk.msra.mxu1 %vm2470_vm10, %v2973_v40  ;;  %v3207_v42 = vpop.f32.mrb[20].mxu0  ;;  %v7813_v40 = vpack.c.bf16 %v3412_v39, %v3410_v37  ;;  %v3534_v39 = vld [vmem:[%s10001_s21 + $0x48] sm:$0xff] }
0x1398   : > { %7390 = vmatmul.mubr.msk.f32.vlgmr.msra.gmra.mrb[32].mxu1 %vm2447_vm9, %v2967_v41  ;;  %v3211_v43 = vmul.f32 0.25, %v3207_v42  ;;  %v7407_v44 = vpop.f32.mrb[21].mxu0  ;;  %7796 = vmatprep.subr.bf16.mxu1 %v8349_v31  ;;  %v3409_v41 = vld [vmem:[%s9999_s19 + $0x20] sm:$0xff]  ;;  %v3411_v42 = vld [vmem:[%s9999_s19 + $0x30] sm:$0xff] }
0x1399   : > { %7396 = vmatprep.mubr.msk.f32.mxu1 %vm8350_vm1, %v8347_v16  ;;  %7798 = vmatpush3.bf16.msra.mxu1 %v7797_v49  ;;  %v3414_v44 = vld [vmem:[%s9999_s19 + $0x48] sm:$0xff]  ;;  %v3415_v49 = vld [vmem:[%s9999_s19 + $0x50] sm:$0xff] }
0x139a   : > { %v3212_v45 = vsel %vm2447_vm9, %v3211_v43, -inf  ;;  %7803 = vmatprep.subr.bf16.mxu1 %v8349_v31 }
0x139b   : > { %3213 = vmax.xlane.f32.xlu1 %v3212_v45  ;;  %v3416_v45 = vld [vmem:[%s9999_s19 + $0x58] sm:$0xff] }
0x139c   : > { %v7817_v46 = vpack.c.bf16 %v3416_v45, %v3414_v44  ;;  %v3535_v44 = vld [vmem:[%s10001_s21 + $0x50] sm:$0xff]  ;;  %v3536_v45 = vld [vmem:[%s10001_s21 + $0x58] sm:$0xff] }
0x13ac   : > { %3227 = vrot.lane.b32.xlu1 %v8929_v61, %s10109_s13 }
0x1428   : > { %v3214_v52 = vpop.xlane.xlu1 %3213 }
0x1429   : > { %v3215_v11 = vsub.f32 %v3211_v43, %v3214_v52  ;;  %v7815_v43 = vpack.c.bf16 %v3411_v42, %v3409_v41  ;;  %v7819_v52 = vpack.c.bf16 %v3415_v49, %v3413_v47  ;;  %v3552_v41 = vld [vmem:[%s10001_s21 + $0xd8] sm:$0xff]  ;;  %v3554_v47 = vld [vmem:[%s10001_s21 + $0xe8] sm:$0xff]  ;;  %v7847_v49 = vpack.c.bf16 %v3536_v45, %v3535_v44 }
0x142a   : > { %v6707_v45 = vld [vmem:[%s10083_s28 + $0xa8] sm:$0xff] }
0x142b   : > { %v3216_v53 = vmul.f32 1.442695, %v3215_v11  ;;  %v3418_v11 = vld [vmem:[%s9999_s19 + $0x68] sm:$0xff] }
0x142c   : > { %v3228_v14 = vpop.permute.xlu1 %3227 }
0x142d   : > { %8192 = vpow2.f32 %v3216_v53  ;;  %v3420_v53 = vld [vmem:[%s9999_s19 + $0x78] sm:$0xff] }
0x1437   : > { %v8193_v54 = vpop.eup %8192 }
0x1438   : > { %v3218_v55 = vsel %vm2447_vm9, %v8193_v54, 0.0 }
0x1439   : > { %3219 = vadd.xlane.f32.xlu0 %v3218_v55  ;;  %v3417_v55 = vld [vmem:[%s9999_s19 + $0x60] sm:$0xff] }
0x144f   : > { %8121 = vrot.lane.b32.xlu0 %v8909_v50, %s10109_s13  ;;  %v2362_v50 = vld [vmem:[%s10108_s16 + $0x30] sm:$0xff]  ;;  %s10114_s16 = sld [smem:[#allocation30_spill]] }
0x1450   : > { %v7807_v13 = vpack.c.bf16 %v2363_v10, %v2362_v50  ;;  %v3525_v50 = vld [vmem:[%s10001_s21] sm:$0xff]  ;;  %v3526_v10 = vld [vmem:[%s10001_s21 + $0x8] sm:$0xff] }
0x1461   : > { %v2793_v61 = vpop.f32.mrb[28].mxu1 }
0x1462   : > { %v7366_v56 = vpop.f32.mrb[29].mxu1 }
0x1465   : > { %v2866_v57 = vpop.f32.mrb[30].mxu1 }
0x1466   : > { %v2867_v58 = vadd.f32 %v2866_v57, %v2793_v61  ;;  %v7373_v60 = vpop.f32.mrb[31].mxu1  ;;  %v3419_v61 = vld [vmem:[%s9999_s19 + $0x70] sm:$0xff] }
0x1467   : > { %v7823_v56 = vpack.c.bf16 %v3419_v61, %v3417_v55  ;;  %v3556_v55 = vld [vmem:[%s10001_s21 + $0xf8] sm:$0xff] }
0x146b   : > { %v3047_v62 = vpop.f32.mrb[32].mxu1 }
0x146c   : > { %v7391_v1 = vpop.f32.mrb[33].mxu1  ;;  %7397 = vmatmul.mubr.msk.f32.vlgmr.msra.gmra.mrb[34].mxu1 %vm1180_vm2, %v3047_v62 }
0x146d   : > { %7414 = vmatprep.mubr.msk.f32.mxu1 %vm8350_vm1, %v8347_v16  ;;  %v6697_v1 = vld [vmem:[%s9998_s18] ss:$0 sm:$0xff] }
0x14c6   : > { %v3220_v2 = vpop.xlane.xlu0 %3219 }
0x14c7   : > { %8194 = vrcp.f32 %v3220_v2 }
0x14ca   : > { %v8122_v3 = vpop.permute.xlu0 %8121 }
0x14cb   : > { %v8124_v5 = vunpack.i.h.bf16 %v8122_v3  ;;  %v8123_v6 = vunpack.i.l.bf16 %v8122_v3 }
0x14cd   : > { %v7804_v9 = vpack.c.bf16 %v8124_v5, %v8123_v6  ;;  %v3541_v5 = vld [vmem:[%s10001_s21 + $0x80] sm:$0xff]  ;;  %v3542_v6 = vld [vmem:[%s10001_s21 + $0x88] sm:$0xff] }
0x14cf   : > { %7805 = vmatpush3.bf16.msra.mxu1 %v7804_v9  ;;  %v7825_v9 = vpack.c.bf16 %v3542_v6, %v3541_v5 }
0x14d0   : > { %7412 = vmatprep.subr.mxu1 %v8347_v16 }
0x14d1   : > { %v8195_v12 = vpop.eup %8194  ;;  %7826 = vmatprep.subr.bf16.mxu0 %v7825_v9 }
0x14d2   : > { %v3222_v15 = vmul.f32 %v8195_v12, %v8193_v54  ;;  %v7821_v54 = vpack.c.bf16 %v3420_v53, %v3418_v11  ;;  %v7827_v12 = vpack.c.bf16 %v3526_v10, %v3525_v50  ;;  %v3537_v11 = vld [vmem:[%s10001_s21 + $0x60] sm:$0xff]  ;;  %v3538_v53 = vld [vmem:[%s10001_s21 + $0x68] sm:$0xff] }
0x14d3   : > { %7413 = vmatpush3.msk.msra.mxu1 %vm2470_vm10, %v3228_v14  ;;  %v3544_v14 = vld [vmem:[%s10001_s21 + $0x98] sm:$0xff]  ;;  %v7851_v61 = vpack.c.bf16 %v3538_v53, %v3537_v11  ;;  %v6711_v53 = vld [vmem:[%s10083_s28 + $0xc8] sm:$0xff] }
0x14d4   : > { %7415 = vmatmul.mubr.msk.f32.vlgmr.msra.gmra.mrb[36].mxu1 %vm2447_vm9, %v3222_v15  ;;  %7806 = vmatprep.subr.bf16.mxu1 %v8349_v31 }
0x14d5   : > { %7808 = vmatpush3.bf16.msra.mxu1 %v7807_v13  ;;  %7421 = vmatprep.mubr.msk.f32.mxu1 %vm8350_vm1, %v8347_v16  ;;  %v3543_v13 = vld [vmem:[%s10001_s21 + $0x90] sm:$0xff] }
0x14d6   : > { %7810 = vmatprep.subr.bf16.mxu1 %v7809_v34  ;;  %7828 = vmatpush3.bf16.msra.mxu0 %v7827_v12  ;;  %v7829_v15 = vpack.c.bf16 %v3544_v14, %v3543_v13  ;;  %v7839_v34 = vpack.c.bf16 %v3532_v33, %v3531_v30 }
0x14d8   : > { %7830 = vmatprep.subr.bf16.mxu0 %v7829_v15 }
0x153f   : > { %v3120_v17 = vpop.f32.mrb[34].mxu1 }
0x1540   : > { %v3124_v18 = vadd.f32 %v3120_v17, %v2867_v58  ;;  %v7398_v19 = vpop.f32.mrb[35].mxu1  ;;  %v3527_v17 = vld [vmem:[%s10001_s21 + $0x10] sm:$0xff] }
0x15a7   : > { %v3302_v21 = vpop.f32.mrb[36].mxu1 }
0x15a8   : > { %v7416_v22 = vpop.f32.mrb[37].mxu1  ;;  %7422 = vmatmul.mubr.msk.f32.vlgmr.msra.gmra.mrb[38].mxu1 %vm1180_vm2, %v3302_v21  ;;  %v3545_v21 = vld [vmem:[%s10001_s21 + $0xa0] sm:$0xff] }
0x15a9   : > { %3500 = vmatprep.mubr.f32.mxu1 %v8347_v16  ;;  %v3546_v22 = vld [vmem:[%s10001_s21 + $0xa8] sm:$0xff] }
0x167b   : > { %v3375_v23 = vpop.f32.mrb[38].mxu1 }
0x167c   : > { %v3379_v26 = vadd.f32 %v3375_v23, %v3124_v18  ;;  %v7423_v63 = vpop.f32.mrb[39].mxu1  ;;  %v3528_v18 = vld [vmem:[%s10001_s21 + $0x18] sm:$0xff]  ;;  %v7833_v23 = vpack.c.bf16 %v3546_v22, %v3545_v21 }
0x167d   : > { %v7831_v19 = vpack.c.bf16 %v3528_v18, %v3527_v17 }
0x167e   : > { %v3387_v27 = vadd.f32 %v6696_v24, %v3379_v26  ;;  %v3529_v24 = vld [vmem:[%s10001_s21 + $0x20] sm:$0xff]  ;;  %v3530_v26 = vld [vmem:[%s10001_s21 + $0x28] sm:$0xff] }
0x167f   : > { %7832 = vmatpush3.bf16.msra.mxu0 %v7831_v19  ;;  %v7835_v63 = vpack.c.bf16 %v3530_v26, %v3529_v24 }
0x1680   : > { %v9074_v28 = vadd.f32 %v3387_v27, %v8869_v25  ;;  %v3405_v25 = vld [vmem:[%s9999_s19] sm:$0xff]  ;;  %7834 = vmatprep.subr.bf16.mxu0 %v7833_v23  ;;  %v3547_v27 = vld [vmem:[%s10001_s21 + $0xb0] sm:$0xff] }
0x1681   : > { %v7811_v36 = vpack.c.bf16 %v3407_v7, %v3405_v25  ;;  %v3549_v25 = vld [vmem:[%s10001_s21 + $0xc0] sm:$0xff]  ;;  %v3550_v7 = vld [vmem:[%s10001_s21 + $0xc8] sm:$0xff] }
0x1682   : > { %v3390_v29 = vmul.f32 %v9074_v28, %v9074_v28  ;;  %v7841_v37 = vpack.c.bf16 %v3550_v7, %v3549_v25  ;;  %v6699_v25 = vld [vmem:[%s10002_s22] ss:$0 sm:$0xff] }
0x1683   : > { %7812 = vmatpush1.bf16.msra.mxu1 %v7811_v36  ;;  %7836 = vmatpush3.bf16.msra.mxu0 %v7835_v63  ;;  %v3533_v36 = vld [vmem:[%s10001_s21 + $0x40] sm:$0xff] }
0x1684   : > { %v3391_v0 = vsel %vm890_vm0, %v3390_v29, 0.0  ;;  %7814 = vmatprep.subr.bf16.mxu1 %v7813_v40  ;;  %v3548_v29 = vld [vmem:[%s10001_s21 + $0xb8] sm:$0xff]  ;;  %v3551_v40 = vld [vmem:[%s10001_s21 + $0xd0] sm:$0xff]  ;;  %v7843_v42 = vpack.c.bf16 %v3534_v39, %v3533_v36 }
0x1685   : > { %3392 = vadd.xlane.f32.xlu1 %v3391_v0  ;;  %v7837_v0 = vpack.c.bf16 %v3548_v29, %v3547_v27 }
0x1687   : > { %7816 = vmatpush1.bf16.msra.mxu1 %v7815_v43  ;;  %7838 = vmatprep.subr.bf16.mxu0 %v7837_v0  ;;  %v7845_v43 = vpack.c.bf16 %v3552_v41, %v3551_v40  ;;  %v6703_v40 = vld [vmem:[%s10083_s28 + $0x88] sm:$0xff]  ;;  %v6705_v41 = vld [vmem:[%s10083_s28 + $0x98] sm:$0xff] }
0x1688   : > { %7818 = vmatprep.subr.bf16.mxu1 %v7817_v46  ;;  %7840 = vmatpush3.bf16.msra.mxu0 %v7839_v34  ;;  %v3553_v46 = vld [vmem:[%s10001_s21 + $0xe0] sm:$0xff] }
0x1689   : > { %7842 = vmatprep.subr.bf16.mxu0 %v7841_v37 }
0x168b   : > { %7820 = vmatpush1.bf16.msra.mxu1 %v7819_v52  ;;  %v7849_v52 = vpack.c.bf16 %v3554_v47, %v3553_v46  ;;  %v6709_v46 = vld [vmem:[%s10083_s28 + $0xb8] sm:$0xff] }
0x168c   : > { %7822 = vmatprep.subr.bf16.mxu1 %v7821_v54  ;;  %7844 = vmatpush3.bf16.msra.mxu0 %v7843_v42  ;;  %v3555_v54 = vld [vmem:[%s10001_s21 + $0xf0] sm:$0xff]  ;;  %v7857_v42 = vpack.c.bf16 %v6705_v41, %v6703_v40  ;;  %v7861_v47 = vpack.c.bf16 %v6709_v46, %v6707_v45 }
0x168d   : > { %7846 = vmatprep.subr.bf16.mxu0 %v7845_v43  ;;  %v6704_v43 = vld [vmem:[%s10083_s28 + $0x90] sm:$0xff] }
0x168f   : > { %7824 = vmatpush1.bf16.msra.mxu1 %v7823_v56  ;;  %v7853_v56 = vpack.c.bf16 %v3556_v55, %v3555_v54  ;;  %v6713_v54 = vld [vmem:[%s10083_s28 + $0xd8] sm:$0xff] }
0x1690   : > { %7848 = vmatpush3.bf16.msra.mxu0 %v7847_v49  ;;  %7858 = vmatprep.subr.bf16.mxu1 %v7857_v42  ;;  %v6706_v49 = vld [vmem:[%s10083_s28 + $0xa0] sm:$0xff]  ;;  %v7865_v55 = vpack.c.bf16 %v6713_v54, %v6711_v53 }
0x1691   : > { %7850 = vmatprep.subr.bf16.mxu0 %v7849_v52  ;;  %v6708_v52 = vld [vmem:[%s10083_s28 + $0xb0] sm:$0xff] }
0x1692   : > { %v7863_v11 = vpack.c.bf16 %v6708_v52, %v6706_v49 }
0x1694   : > { %7852 = vmatpush3.bf16.msra.mxu0 %v7851_v61  ;;  %v6710_v61 = vld [vmem:[%s10083_s28 + $0xc0] sm:$0xff] }
0x1695   : > { %7854 = vmatprep.subr.bf16.mxu0 %v7853_v56  ;;  %v6712_v56 = vld [vmem:[%s10083_s28 + $0xd0] sm:$0xff] }
0x1712   : > { %v3393_v57 = vpop.xlane.xlu1 %3392 }
0x1713   : > { %v3394_v58 = vmul.f32 0.015625, %v3393_v57  ;;  %v3539_v57 = vld [vmem:[%s10001_s21 + $0x70] sm:$0xff] }
0x1715   : > { %v3395_v60 = vadd.f32 1e-06, %v3394_v58  ;;  %v3540_v58 = vld [vmem:[%s10001_s21 + $0x78] sm:$0xff] }
0x1717   : > { %8196 = vrsqrt.f32 %v3395_v60  ;;  %v7855_v60 = vpack.c.bf16 %v3540_v58, %v3539_v57  ;;  %v7867_v57 = vpack.c.bf16 %v6712_v56, %v6710_v61  ;;  %v6715_v58 = vld [vmem:[%s10083_s28 + $0xe8] sm:$0xff] }
0x1719   : > { %7856 = vmatpush3.bf16.msra.mxu0 %v7855_v60  ;;  %v6717_v60 = vld [vmem:[%s10083_s28 + $0xf8] sm:$0xff] }
0x171a   : > { %7885 = vmatprep.subr.bf16.mxu0 %v8349_v31 }
0x1721   : > { %v8197_v62 = vpop.eup %8196 }
0x1722   : > { %v3397_v2 = vmul.f32 %v8197_v62, %v9074_v28  ;;  %v3421_v62 = vld [vmem:[%s10000_s20] sm:$0x3] }
0x1724   : > { %v3404_v3 = vmul.f32 %v6697_v1, %v3397_v2  ;;  %v3426_v1 = vrot.slane %v3421_v62, %v8674_v51  ;;  %v3430_v2 = vrot.slane %v3421_v62, %v8700_v8  ;;  %v7869_v62 = vpack.c.bf16 %v6717_v60, %v6715_v58  ;;  %v6724_v58 = vld [vmem:[%s10092_s29 + $0x50] sm:$0xff]  ;;  %v6725_v60 = vld [vmem:[%s10092_s29 + $0x58] sm:$0xff] }
0x1726   : > { %6698 = vmatmul.mubr.msk.f32.vlgmr.msra.gmra.mrb[40].mxu1 %vm890_vm0, %v3404_v3 }
0x1727   : > { %3750 = vmatprep.mubr.f32.mxu1 %v8347_v16 }
0x17f9   : > { %v3502_v3 = vpop.f32.mrb[40].mxu1 }
0x17fa   : > { %v3503_v5 = vadd.f32 %v3502_v3, %v3426_v1  ;;  %v3504_v6 = vpop.f32.mrb[41].mxu1  ;;  %v6714_v1 = vld [vmem:[%s10083_s28 + $0xe0] sm:$0xff] }
0x17fb   : > { %v3505_v9 = vadd.f32 %v3504_v6, %v3430_v2  ;;  %v6716_v2 = vld [vmem:[%s10083_s28 + $0xf0] sm:$0xff] }
0x17fc   : > { %v3507_v50 = vmul.f32 %v3503_v5, %v3503_v5  ;;  %v7871_v3 = vpack.c.bf16 %v6716_v2, %v6714_v1 }
0x17fd   : > { %v3508_v10 = vmul.f32 %v3505_v9, %v3505_v9 }
0x17fe   : > { %v3509_v12 = vmul.f32 %v3507_v50, %v3503_v5 }
0x17ff   : > { %v3510_v13 = vmul.f32 %v3508_v10, %v3505_v9  ;;  %v6701_v10 = vld [vmem:[%s10087_s0 + $0x1] ss:$0 sm:$0xff] }
0x1800   : > { %v3511_v14 = vmul.f32 0.044715, %v3509_v12 }
0x1801   : > { %v3512_v15 = vmul.f32 0.044715, %v3510_v13 }
0x1802   : > { %v3513_v17 = vadd.f32 %v3511_v14, %v3503_v5 }
0x1803   : > { %v3514_v18 = vadd.f32 %v3512_v15, %v3505_v9 }
0x1804   : > { %v3515_v19 = vmul.f32 0.7978846, %v3513_v17 }
0x1805   : > { %v3516_v21 = vmul.f32 0.7978846, %v3514_v18 }
0x1806   : > { %8198 = vtanh.f32 %v3515_v19 }
0x1807   : > { %8200 = vtanh.f32 %v3516_v21  ;;  %v8246_v21 = vld [vmem:[%s10085_s6] sm:$0xff] }
0x1810   : > { %v8199_v22 = vpop.eup %8198 }
0x1811   : > { %v8201_v23 = vpop.eup %8200  ;;  %v3519_v24 = vadd.f32 1.0, %v8199_v22 }
0x1812   : > { %v3520_v26 = vadd.f32 1.0, %v8201_v23  ;;  %v8247_v23 = vld [vmem:[%s10090_s10] sm:$0xff] }
0x1813   : > { %v3521_v63 = vmul.f32 0.5, %v3519_v24 }
0x1814   : > { %v3522_v27 = vmul.f32 0.5, %v3520_v26 }
0x1815   : > { %v3523_v0 = vmul.f32 %v3521_v63, %v3503_v5 }
0x1816   : > { %v3524_v29 = vmul.f32 %v3522_v27, %v3505_v9 }
0x1818   : > { %3621 = vmatprep.mubr.f32.mxu0 %v3524_v29 }
0x1819   : > { %3622 = vmatmul.mubr.f32.vlgmr.msra.gmra.mrb[22].mxu0 %v3523_v0 }
0x181a   : > { %7887 = vmatpush3.bf16.msra.mxu0 %v8622_v32  ;;  %7459 = vmatprep.mubr.msk.f32.mxu0 %vm8350_vm1, %v8347_v16 }
0x181b   : > { %7888 = vmatprep.subr.bf16.mxu0 %v8349_v31 }
0x181e   : > { %7890 = vmatpush3.bf16.msra.mxu0 %v8632_v35 }
0x181f   : > { %7891 = vmatprep.subr.bf16.mxu0 %v8349_v31 }
0x1822   : > { %7893 = vmatpush3.bf16.msra.mxu0 %v8642_v38 }
0x1823   : > { %7894 = vmatprep.subr.bf16.mxu0 %v8349_v31 }
0x1826   : > { %7896 = vmatpush3.bf16.msra.mxu0 %v8664_v48 }
0x1827   : > { %7467 = vmatprep.subr.mxu0 %v8347_v16 }
0x18ec   : > { %v7017_v30 = vpop.f32.mrb[22].mxu0 }
0x18ed   : > { %v7018_v33 = vpop.f32.mrb[23].mxu0 }
0x18ee   : > { %v7019_v34 = vadd.f32 %v7018_v33, %v7017_v30 }
0x18f0   : > { %v3627_v7 = vadd.f32 %v7019_v34, %v9074_v28  ;;  %v6702_v28 = vld [vmem:[%s10083_s28 + $0x80] sm:$0xff] }
0x18f1   : > { %v7859_v44 = vpack.c.bf16 %v6704_v43, %v6702_v28 }
0x18f2   : > { %v9249_v36 = vadd.f32 %v6699_v25, %v3627_v7 }
0x18f3   : > { %7860 = vmatpush1.bf16.msra.mxu1 %v7859_v44 }
0x18f4   : > { %v3638_v37 = vmul.f32 %v9249_v36, %v9249_v36  ;;  %7862 = vmatprep.subr.bf16.mxu1 %v7861_v47 }
0x18f6   : > { %v3639_v39 = vsel %vm890_vm0, %v3638_v37, 0.0 }
0x18f7   : > { %3640 = vadd.xlane.f32.xlu0 %v3639_v39  ;;  %7864 = vmatpush1.bf16.msra.mxu1 %v7863_v11 }
0x18f8   : > { %7866 = vmatprep.subr.bf16.mxu1 %v7865_v55 }
0x18fb   : > { %7868 = vmatpush1.bf16.msra.mxu1 %v7867_v57 }
0x18fc   : > { %7870 = vmatprep.subr.bf16.mxu1 %v7869_v62  ;;  %v7898_v62 = vpack.c.bf16 %v6725_v60, %v6724_v58 }
0x18ff   : > { %7872 = vmatpush1.bf16.msra.mxu1 %v7871_v3 }
0x1900   : > { %7873 = vmatprep.subr.bf16.mxu1 %v8349_v31 }
0x1984   : > { %v3641_v5 = vpop.xlane.xlu0 %3640 }
0x1985   : > { %v3642_v6 = vmul.f32 0.015625, %v3641_v5 }
0x1987   : > { %v3643_v9 = vadd.f32 1e-06, %v3642_v6  ;;  %v6722_v6 = vld [vmem:[%s10092_s29 + $0x40] sm:$0xff] }
0x1989   : > { %8202 = vrsqrt.f32 %v3643_v9  ;;  %v6723_v9 = vld [vmem:[%s10092_s29 + $0x48] sm:$0xff] }
0x1993   : > { %v8203_v50 = vpop.eup %8202 }
0x1994   : > { %v3645_v12 = vmul.f32 %v8203_v50, %v9249_v36 }
0x1996   : > { %v3652_v13 = vmul.f32 %v6701_v10, %v3645_v12  ;;  %v7901_v12 = vpack.c.bf16 %v6723_v9, %v6722_v6 }
0x1998   : > { %6719 = vmatmul.mubr.msk.f32.vlgmr.msra.gmra.mrb[42].mxu1 %vm890_vm0, %v3652_v13 }
0x1999   : > { %7875 = vmatpush3.bf16.msra.mxu1 %v8622_v32  ;;  %7440 = vmatprep.mubr.msk.f32.mxu1 %vm8350_vm1, %v8347_v16  ;;  %v6718_v32 = vld [vmem:[%s10089_s3 + $0x2] sm:$0x3] }
0x199a   : > { %7876 = vmatprep.subr.bf16.mxu1 %v8349_v31  ;;  %v3676_v14 = vrot.slane %v6718_v32, %v8674_v51 }
0x199d   : > { %7878 = vmatpush3.bf16.msra.mxu1 %v8632_v35  ;;  %v3680_v35 = vrot.slane %v6718_v32, %v8700_v8 }
0x199e   : > { %7879 = vmatprep.subr.bf16.mxu1 %v8349_v31 }
0x19a1   : > { %7881 = vmatpush3.bf16.msra.mxu1 %v8642_v38 }
0x19a2   : > { %7882 = vmatprep.subr.bf16.mxu1 %v8349_v31 }
0x19a5   : > { %7884 = vmatpush3.bf16.msra.mxu1 %v8664_v48 }
0x19a6   : > { %7462 = vmatprep.subr.mxu1 %v8347_v16 }
0x1a6b   : > { %v3752_v15 = vpop.f32.mrb[42].mxu1 }
0x1a6c   : > { %v3753_v17 = vadd.f32 %v3752_v15, %v3676_v14  ;;  %v3754_v18 = vpop.f32.mrb[43].mxu1 }
0x1a6d   : > { %v9327_v38 = vadd.f32 %v3754_v18, %v3680_v35 }
0x1a6e   : > { %3834 = vrot.lane.b32.xlu0 %v3753_v17, %s10104_s5  ;;  %7441 = vmatmul.mubr.msk.f32.vlgmr.msra.gmra.mrb[44].mxu1 %vm890_vm0, %v3753_v17  ;;  %v3757_v22 = vmul.f32 %v8246_v21, %v3753_v17  ;;  %v3833_v30 = vmul.f32 %v3753_v17, %v8693_v4 }
0x1a6f   : > { %7464 = vmatprep.mubr.msk.f32.mxu1 %vm8350_vm1, %v8347_v16 }
0x1ae0   : > { %v3835_v48 = vpop.permute.xlu0 %3834 }
0x1ae1   : > { %7460 = vmatmul.mubr.msk.f32.vlgmr.msra.gmra.mrb[24].mxu0 %vm890_vm0, %v3835_v48 }
0x1ae2   : > { %7468 = vmatpush3.msra.mxu0 %v9327_v38  ;;  %7469 = vmatprep.mubr.msk.f32.mxu0 %vm8350_vm1, %v8347_v16 }
0x1ae3   : > { %7477 = vmatprep.subr.mxu0 %v8347_v16 }
0x1b41   : > { %v3827_v19 = vpop.f32.mrb[44].mxu1 }
0x1b42   : > { %v3831_v24 = vmul.f32 %v8247_v23, %v3827_v19  ;;  %v7442_v26 = vpop.f32.mrb[45].mxu1 }
0x1b44   : > { %v9340_v63 = vadd.f32 %v3831_v24, %v3757_v22 }
0x1bb4   : > { %v3904_v27 = vpop.f32.mrb[24].mxu0 }
0x1bb5   : > { %v3908_v29 = vmul.f32 %v8247_v23, %v3904_v27  ;;  %v7461_v0 = vpop.f32.mrb[25].mxu0 }
0x1bb7   : > { %3910 = vrot.lane.b32.xlu1 %v3908_v29, %s10104_s5 }
0x1c29   : > { %v3911_v33 = vpop.permute.xlu1 %3910 }
0x1c2a   : > { %v9344_v34 = vadd.f32 %v3911_v33, %v3833_v30 }
0x1c2c   : > { %4089 = vrot.lane.b32.xlu0 %v9344_v34, %s10105_s8  ;;  %3924 = vrot.lane.b32.xlu1 %v9344_v34, %s10104_s5 }
0x1c30   : > { %4087 = vrot.lane.b32.xlu1 %v9340_v63, %s10099_s25 }
0x1c9e   : > { %v3925_v25 = vpop.permute.xlu1 %3924  ;;  %v4090_v7 = vpop.permute.xlu0 %4089 }
0x1c9f   : > { %7463 = vmatpush3.xpose.msk.msra.mxu1 %vm1180_vm2, %v3925_v25 }
0x1ca0   : > { %7472 = vmatprep.subr.mxu1 %v8347_v16 }
0x1ca2   : > { %7465 = vmatmul.mubr.msk.f32.vlgmr.msra.gmra.mrb[46].mxu1 %vm1180_vm2, %v9340_v63  ;;  %v4088_v4 = vpop.permute.xlu1 %4087 }
0x1ca3   : > { %7473 = vmatpush3.xpose.msk.msra.mxu1 %vm1180_vm2, %v4090_v7  ;;  %7474 = vmatprep.mubr.msk.f32.mxu1 %vm8350_vm1, %v8347_v16 }
0x1ca4   : > { %7897 = vmatprep.subr.bf16.mxu1 %v8349_v31 }
0x1ca6   : > { %7475 = vmatmul.mubr.msk.f32.vlgmr.msra.gmra.mrb[48].mxu1 %vm1180_vm2, %v4088_v4 }
0x1ca7   : > { %7486 = vmatprep.mubr.msk.f32.mxu1 %vm8350_vm1, %v8347_v16  ;;  %7899 = vmatpush3.bf16.msra.mxu1 %v7898_v62 }
0x1ca8   : > { %7496 = vmatprep.subr.mxu1 %v8347_v16 }
0x1d75   : > { %v3997_v37 = vpop.f32.mrb[46].mxu1 }
0x1d76   : > { %v4001_v39 = vmul.f32 0.25, %v3997_v37  ;;  %v7466_v40 = vpop.f32.mrb[47].mxu1  ;;  %v6726_v37 = vld [vmem:[%s10092_s29 + $0x60] sm:$0xff] }
0x1d78   : > { %v4002_v41 = vadd.f32 %v4001_v39, %v8718_v20 }
0x1d79   : > { %v4161_v42 = vpop.f32.mrb[48].mxu1 }
0x1d7a   : > { %v4165_v28 = vmul.f32 0.25, %v4161_v42  ;;  %v7476_v43 = vpop.f32.mrb[49].mxu1  ;;  %v4003_v44 = vsel %vm1258_vm7, %v4002_v41, -inf }
0x1d7b   : > { %4004 = vmax.xlane.f32.xlu0 %v4003_v44 }
0x1d7c   : > { %v4166_v45 = vadd.f32 %v4165_v28, %v8718_v20 }
0x1d7e   : > { %v4167_v46 = vsel %vm1258_vm7, %v4166_v45, -inf }
0x1d7f   : > { %4168 = vmax.xlane.f32.xlu1 %v4167_v46 }
0x1d90   : > { %4179 = vrot.lane.b32.xlu1 %v9327_v38, %s10099_s25 }
0x1d94   : > { %4401 = vrot.lane.b32.xlu1 %v9340_v63, %s10093_s2 }
0x1e08   : > { %v4005_v47 = vpop.xlane.xlu0 %4004 }
0x1e09   : > { %v4006_v49 = vsub.f32 %v4002_v41, %v4005_v47 }
0x1e0b   : > { %v4007_v52 = vmul.f32 1.442695, %v4006_v49 }
0x1e0c   : > { %v4169_v11 = vpop.xlane.xlu1 %4168 }
0x1e0d   : > { %8204 = vpow2.f32 %v4007_v52  ;;  %v4170_v53 = vsub.f32 %v4166_v45, %v4169_v11 }
0x1e0f   : > { %v4171_v54 = vmul.f32 1.442695, %v4170_v53 }
0x1e10   : > { %v4180_v50 = vpop.permute.xlu1 %4179 }
0x1e11   : > { %8206 = vpow2.f32 %v4171_v54 }
0x1e14   : > { %v4402_v35 = vpop.permute.xlu1 %4401 }
0x1e17   : > { %v8205_v55 = vpop.eup %8204 }
0x1e18   : > { %v4009_v61 = vsel %vm1258_vm7, %v8205_v55, 0.0 }
0x1e19   : > { %4010 = vadd.xlane.f32.xlu0 %v4009_v61 }
0x1e1b   : > { %v8207_v56 = vpop.eup %8206 }
0x1e1c   : > { %v4173_v57 = vsel %vm1258_vm7, %v8207_v56, 0.0 }
0x1e1d   : > { %4174 = vadd.xlane.f32.xlu0 %v4173_v57 }
0x1e33   : > { %4403 = vrot.lane.b32.xlu0 %v9344_v34, %s10107_s27 }
0x1ea6   : > { %v4011_v1 = vpop.xlane.xlu0 %4010 }
0x1ea7   : > { %8208 = vrcp.f32 %v4011_v1 }
0x1eaa   : > { %v4175_v2 = vpop.xlane.xlu0 %4174 }
0x1eab   : > { %8210 = vrcp.f32 %v4175_v2 }
0x1eae   : > { %v4404_v17 = vpop.permute.xlu0 %4403 }
0x1eb1   : > { %v8209_v3 = vpop.eup %8208 }
0x1eb2   : > { %v4013_v5 = vmul.f32 %v8209_v3, %v8205_v55 }
0x1eb4   : > { %7470 = vmatmul.mubr.msk.f32.vlgmr.msra.gmra.mrb[26].mxu0 %vm1258_vm7, %v4013_v5 }
0x1eb5   : > { %v8211_v10 = vpop.eup %8210  ;;  %7478 = vmatpush3.msra.mxu0 %v4180_v50  ;;  %7479 = vmatprep.mubr.msk.f32.mxu0 %vm8350_vm1, %v8347_v16  ;;  %v6761_v50 = vld [vmem:[%s9994_s14 + $0x40] sm:$0xff] }
0x1eb6   : > { %v4177_v13 = vmul.f32 %v8211_v10, %v8207_v56  ;;  %7900 = vmatprep.subr.bf16.mxu0 %v8349_v31  ;;  %v6762_v10 = vld [vmem:[%s9994_s14 + $0x48] sm:$0xff] }
0x1eb8   : > { %7480 = vmatmul.mubr.msk.f32.vlgmr.msra.gmra.mrb[28].mxu0 %vm1258_vm7, %v4177_v13  ;;  %v7922_v13 = vpack.c.bf16 %v6762_v10, %v6761_v50 }
0x1eb9   : > { %7902 = vmatpush3.bf16.msra.mxu0 %v7901_v12  ;;  %7493 = vmatprep.mubr.msk.f32.mxu0 %vm8350_vm1, %v8347_v16  ;;  %v6763_v12 = vld [vmem:[%s9994_s14 + $0x50] sm:$0xff] }
0x1eba   : > { %7501 = vmatprep.subr.mxu0 %v8347_v16 }
0x1f87   : > { %v4083_v32 = vpop.f32.mrb[26].mxu0 }
0x1f88   : > { %v7471_v14 = vpop.f32.mrb[27].mxu0  ;;  %7494 = vmatmul.mubr.msk.f32.vlgmr.msra.gmra.mrb[30].mxu0 %vm1180_vm2, %v4083_v32  ;;  %v6764_v32 = vld [vmem:[%s9994_s14 + $0x58] sm:$0xff] }
0x1f89   : > { %7503 = vmatprep.mubr.msk.f32.mxu0 %vm8350_vm1, %v8347_v16  ;;  %v7925_v14 = vpack.c.bf16 %v6764_v32, %v6763_v12 }
0x1f8b   : > { %v4251_v15 = vpop.f32.mrb[28].mxu0 }
0x1f8c   : > { %v7481_v18 = vpop.f32.mrb[29].mxu0  ;;  %7487 = vmatmul.mubr.msk.f32.vlgmr.msra.gmra.mrb[50].mxu1 %vm1180_vm2, %v4251_v15  ;;  %v6765_v15 = vld [vmem:[%s9994_s14 + $0x60] sm:$0xff] }
0x1f8d   : > { %7497 = vmatpush3.xpose.msk.msra.mxu1 %vm1180_vm2, %v4404_v17  ;;  %7498 = vmatprep.mubr.msk.f32.mxu1 %vm8350_vm1, %v8347_v16  ;;  %v6766_v17 = vld [vmem:[%s9994_s14 + $0x68] sm:$0xff] }
0x1f8e   : > { %7903 = vmatprep.subr.bf16.mxu1 %v8349_v31  ;;  %v7928_v18 = vpack.c.bf16 %v6766_v17, %v6765_v15 }
0x1f90   : > { %7499 = vmatmul.mubr.msk.f32.vlgmr.msra.gmra.mrb[52].mxu1 %vm1180_vm2, %v4402_v35  ;;  %v6767_v35 = vld [vmem:[%s9994_s14 + $0x70] sm:$0xff] }
0x1f91   : > { %7510 = vmatprep.mubr.msk.f32.mxu1 %vm8350_vm1, %v8347_v16 }
0x205b   : > { %v4397_v48 = vpop.f32.mrb[30].mxu0 }
0x205c   : > { %v7495_v19 = vpop.f32.mrb[31].mxu0 }
0x205f   : > { %v4324_v21 = vpop.f32.mrb[50].mxu1 }
0x2060   : > { %v9407_v22 = vadd.f32 %v4397_v48, %v4324_v21  ;;  %v7488_v23 = vpop.f32.mrb[51].mxu1  ;;  %v6768_v48 = vld [vmem:[%s9994_s14 + $0x78] sm:$0xff]  ;;  %v8248_v21 = vld [vmem:[%s8854_s26] sm:$0xff] }
0x2061   : > { %v7931_v19 = vpack.c.bf16 %v6768_v48, %v6767_v35  ;;  %v8250_v23 = vld [vmem:[%s8854_s26 + $0x10] sm:$0x1] }
0x2063   : > { %v4475_v24 = vpop.f32.mrb[52].mxu1 }
0x2064   : > { %v4479_v26 = vmul.f32 0.25, %v4475_v24  ;;  %v7500_v27 = vpop.f32.mrb[53].mxu1 }
0x2066   : > { %v4480_v29 = vadd.f32 %v4479_v26, %v8718_v20  ;;  %v6747_v26 = vld [vmem:[%s10096_s23 + $0x1] ss:$0 sm:$0xff] }
0x2068   : > { %v4481_v0 = vsel %vm1258_vm7, %v4480_v29, -inf }
0x2069   : > { %4482 = vmax.xlane.f32.xlu1 %v4481_v0 }
0x207a   : > { %4644 = vrot.lane.b32.xlu1 %v9344_v34, %s10109_s13  ;;  %v6727_v34 = vld [vmem:[%s10092_s29 + $0x68] sm:$0xff] }
0x207e   : > { %4642 = vrot.lane.b32.xlu1 %v9340_v63, %s10106_s1  ;;  %v7904_v63 = vpack.c.bf16 %v6727_v34, %v6726_v37  ;;  %v6753_v34 = vld [vmem:[%s10111_s4 + $0x58] sm:$0xff] }
0x2080   : > { %7905 = vmatpush3.bf16.msra.mxu1 %v7904_v63 }
0x2081   : > { %7518 = vmatprep.subr.mxu1 %v8347_v16 }
0x20f6   : > { %v4483_v30 = vpop.xlane.xlu1 %4482 }
0x20f7   : > { %v4484_v33 = vsub.f32 %v4480_v29, %v4483_v30 }
0x20f9   : > { %v4485_v25 = vmul.f32 1.442695, %v4484_v33 }
0x20fa   : > { %v4645_v42 = vpop.permute.xlu1 %4644 }
0x20fb   : > { %8212 = vpow2.f32 %v4485_v25 }
0x20fe   : > { %v4643_v43 = vpop.permute.xlu1 %4642 }
0x2105   : > { %v8213_v7 = vpop.eup %8212 }
0x2106   : > { %v4487_v4 = vsel %vm1258_vm7, %v8213_v7, 0.0 }
0x2107   : > { %4488 = vadd.xlane.f32.xlu0 %v4487_v4  ;;  %v6751_v4 = vld [vmem:[%s10111_s4 + $0x48] sm:$0xff] }
0x211d   : > { %4492 = vrot.lane.b32.xlu0 %v9327_v38, %s10093_s2 }
0x2194   : > { %v4489_v39 = vpop.xlane.xlu0 %4488 }
0x2195   : > { %8214 = vrcp.f32 %v4489_v39  ;;  %v6754_v39 = vld [vmem:[%s10111_s4 + $0x60] sm:$0xff] }
0x2198   : > { %v4493_v40 = vpop.permute.xlu0 %4492 }
0x2199   : > { %7502 = vmatpush3.msra.mxu0 %v4493_v40  ;;  %v6755_v40 = vld [vmem:[%s10111_s4 + $0x68] sm:$0xff] }
0x219a   : > { %7513 = vmatprep.subr.mxu0 %v8347_v16 }
0x219f   : > { %v8215_v41 = vpop.eup %8214 }
0x21a0   : > { %v4491_v28 = vmul.f32 %v8215_v41, %v8213_v7  ;;  %v6750_v7 = vld [vmem:[%s10111_s4 + $0x40] sm:$0xff]  ;;  %v7916_v41 = vpack.c.bf16 %v6755_v40, %v6754_v39 }
0x21a1   : > { %v7910_v37 = vpack.c.bf16 %v6751_v4, %v6750_v7 }
0x21a2   : > { %7504 = vmatmul.mubr.msk.f32.vlgmr.msra.gmra.mrb[32].mxu0 %vm1258_vm7, %v4491_v28  ;;  %v6757_v28 = vld [vmem:[%s10111_s4 + $0x78] sm:$0xff] }
0x21a3   : > { %7514 = vmatpush3.xpose.msk.msra.mxu0 %vm1180_vm2, %v4645_v42  ;;  %7515 = vmatprep.mubr.msk.f32.mxu0 %vm8350_vm1, %v8347_v16  ;;  %v6756_v42 = vld [vmem:[%s10111_s4 + $0x70] sm:$0xff] }
0x21a4   : > { %7906 = vmatprep.subr.bf16.mxu0 %v8349_v31 }
0x21a6   : > { %7516 = vmatmul.mubr.msk.f32.vlgmr.msra.gmra.mrb[34].mxu0 %vm1180_vm2, %v4643_v43  ;;  %v7919_v43 = vpack.c.bf16 %v6757_v28, %v6756_v42 }
0x21a7   : > { %7527 = vmatprep.mubr.msk.f32.mxu0 %vm8350_vm1, %v8347_v16 }
0x2275   : > { %v4564_v44 = vpop.f32.mrb[32].mxu0 }
0x2276   : > { %v7505_v45 = vpop.f32.mrb[33].mxu0  ;;  %7511 = vmatmul.mubr.msk.f32.vlgmr.msra.gmra.mrb[54].mxu1 %vm1180_vm2, %v4564_v44  ;;  %v6770_v44 = vld [vmem:[%s10112_s15 + $0x1] ss:$0 sm:$0xff]  ;;  %s10123_s15 = smov %s10122_s7 }
0x2277   : > { %7520 = vmatprep.mubr.msk.f32.mxu1 %vm8350_vm1, %v8347_v16 }
0x2279   : > { %v4716_v46 = vpop.f32.mrb[34].mxu0 }
0x227a   : > { %v4720_v47 = vmul.f32 0.25, %v4716_v46  ;;  %v7517_v49 = vpop.f32.mrb[35].mxu0 }
0x227c   : > { %v4721_v52 = vadd.f32 %v4720_v47, %v8718_v20  ;;  %v6728_v20 = vld [vmem:[%s10092_s29 + $0x70] sm:$0xff] }
0x227e   : > { %v4722_v11 = vsel %vm1258_vm7, %v4721_v52, -inf }
0x227f   : > { %4723 = vmax.xlane.f32.xlu0 %v4722_v11 }
0x2295   : > { %4733 = vrot.lane.b32.xlu0 %v9327_v38, %s10106_s1  ;;  %v6729_v38 = vld [vmem:[%s10092_s29 + $0x78] sm:$0xff] }
0x2296   : > { %v7907_v58 = vpack.c.bf16 %v6729_v38, %v6728_v20 }
0x2298   : > { %7908 = vmatpush3.bf16.msra.mxu0 %v7907_v58 }
0x2299   : > { %7921 = vmatprep.subr.bf16.mxu0 %v8349_v31 }
0x230c   : > { %v4724_v53 = vpop.xlane.xlu0 %4723 }
0x230d   : > { %v4725_v54 = vsub.f32 %v4721_v52, %v4724_v53 }
0x230f   : > { %v4726_v55 = vmul.f32 1.442695, %v4725_v54 }
0x2310   : > { %v4734_v61 = vpop.permute.xlu0 %4733 }
0x2311   : > { %8216 = vpow2.f32 %v4726_v55  ;;  %7519 = vmatpush3.msra.mxu1 %v4734_v61 }
0x2312   : > { %7909 = vmatprep.subr.bf16.mxu1 %v8349_v31 }
0x231b   : > { %v8217_v56 = vpop.eup %8216 }
0x231c   : > { %v4728_v57 = vsel %vm1258_vm7, %v8217_v56, 0.0 }
0x231d   : > { %4729 = vadd.xlane.f32.xlu1 %v4728_v57 }
0x2349   : > { %v4637_v60 = vpop.f32.mrb[54].mxu1 }
0x234a   : > { %v4641_v62 = vadd.f32 %v4637_v60, %v9407_v22  ;;  %v7512_v1 = vpop.f32.mrb[55].mxu1  ;;  %v8249_v22 = vld [vmem:[%s8854_s26 + $0x8] sm:$0xff]  ;;  %s10113_s26 = sld [smem:[#allocation28_spill]] }
0x2350   : > { %v6749_v58 = vld [vmem:[%s10113_s26 + $0x1] ss:$0 sm:$0xff] }
0x23aa   : > { %v4730_v2 = vpop.xlane.xlu1 %4729 }
0x23ab   : > { %8218 = vrcp.f32 %v4730_v2 }
0x23b5   : > { %v8219_v3 = vpop.eup %8218 }
0x23b6   : > { %v4732_v5 = vmul.f32 %v8219_v3, %v8217_v56 }
0x23b8   : > { %7521 = vmatmul.mubr.msk.f32.vlgmr.msra.gmra.mrb[56].mxu1 %vm1258_vm7, %v4732_v5 }
0x23b9   : > { %7546 = vmatprep.mubr.msk.f32.mxu1 %vm8350_vm1, %v8347_v16  ;;  %7911 = vmatpush3.bf16.msra.mxu1 %v7910_v37 }
0x23ba   : > { %7912 = vmatprep.subr.bf16.mxu1 %v8349_v31 }
0x248b   : > { %v4805_v6 = vpop.f32.mrb[56].mxu1 }
0x248c   : > { %v7522_v9 = vpop.f32.mrb[57].mxu1  ;;  %7528 = vmatmul.mubr.msk.f32.vlgmr.msra.gmra.mrb[36].mxu0 %vm1180_vm2, %v4805_v6  ;;  %v6759_v6 = vld [vmem:[%s10114_s16 + $0x1] ss:$0 sm:$0xff] }
0x248d   : > { %7565 = vmatprep.mubr.msk.f32.mxu0 %vm8350_vm1, %v8347_v16  ;;  %7923 = vmatpush3.bf16.msra.mxu0 %v7922_v13 }
0x248e   : > { %7924 = vmatprep.subr.bf16.mxu0 %v8349_v31 }
0x2491   : > { %7926 = vmatpush3.bf16.msra.mxu0 %v7925_v14 }
0x2492   : > { %7927 = vmatprep.subr.bf16.mxu0 %v8349_v31 }
0x2495   : > { %7929 = vmatpush3.bf16.msra.mxu0 %v7928_v18 }
0x2496   : > { %7930 = vmatprep.subr.bf16.mxu0 %v8349_v31 }
0x2499   : > { %7932 = vmatpush3.bf16.msra.mxu0 %v7931_v19 }
0x249a   : > { %7937 = vmatprep.subr.bf16.mxu0 %v8349_v31 }
0x249c   : > { %7566 = vmatmul.mubr.msk.f32.vlgmr.msra.gmra.mrb[38].mxu0 %vm890_vm0, %v8248_v21 }
0x249d   : > { %7568 = vmatprep.mubr.msk.f32.mxu0 %vm8350_vm1, %v8347_v16 }
0x24a0   : > { %7569 = vmatmul.mubr.msk.f32.gmra.mrb[40].mxu0 %vm890_vm0, %v8249_v22 }
0x24a1   : > { %7571 = vmatprep.mubr.msk.f32.mxu0 %vm8350_vm1, %v8347_v16 }
0x24a4   : > { %7572 = vmatmul.mubr.msk.f32.gmra.mrb[42].mxu0 %vm890_vm0, %v8250_v23 }
0x24a5   : > { %7589 = vmatprep.mubr.msk.f32.mxu0 %vm8350_vm1, %v8347_v16 }
0x255f   : > { %v4878_v24 = vpop.f32.mrb[36].mxu0 }
0x2560   : > { %v4882_v27 = vadd.f32 %v4878_v24, %v4641_v62  ;;  %v7529_v29 = vpop.f32.mrb[37].mxu0 }
0x2562   : > { %v4891_v0 = vadd.f32 %v6747_v26, %v4882_v27 }
0x2564   : > { %v9501_v30 = vadd.f32 %v4891_v0, %v9249_v36  ;;  %v6752_v36 = vld [vmem:[%s10111_s4 + $0x50] sm:$0xff] }
0x2565   : > { %v7913_v63 = vpack.c.bf16 %v6753_v34, %v6752_v36 }
0x2566   : > { %v4895_v33 = vmul.f32 %v9501_v30, %v9501_v30 }
0x2567   : > { %7914 = vmatpush3.bf16.msra.mxu1 %v7913_v63 }
0x2568   : > { %v4896_v25 = vsel %vm890_vm0, %v4895_v33, 0.0  ;;  %7915 = vmatprep.subr.bf16.mxu1 %v8349_v31 }
0x2569   : > { %4897 = vadd.xlane.f32.xlu1 %v4896_v25 }
0x256b   : > { %7917 = vmatpush3.bf16.msra.mxu1 %v7916_v41 }
0x256c   : > { %7918 = vmatprep.subr.bf16.mxu1 %v8349_v31 }
0x256f   : > { %7920 = vmatpush3.bf16.msra.mxu1 %v7919_v43  ;;  %v5083_v45 = vpop.f32.mrb[38].mxu0 }
0x2570   : > { %7933 = vmatprep.subr.bf16.mxu1 %v8349_v31  ;;  %v7567_v46 = vpop.f32.mrb[39].mxu0  ;;  %v5084_v47 = vadd.f32 %v6770_v44, %v5083_v45 }
0x2573   : > { %v5088_v49 = vpop.f32.mrb[40].mxu0 }
0x2574   : > { %v5089_v52 = vadd.f32 %v6770_v44, %v5088_v49  ;;  %v7570_v11 = vpop.f32.mrb[41].mxu0 }
0x2576   : > { %v9537_v53 = vpack.i.bf16 %v5089_v52, %v5084_v47  ;;  %v7934_v62 = vpack.c.bf16 %v5089_v52, %v5084_v47 }
0x2577   : > { %v5093_v54 = vpop.f32.mrb[42].mxu0 }
0x2578   : > { %v9541_v55 = vadd.f32 %v6770_v44, %v5093_v54  ;;  %v7573_v61 = vpop.f32.mrb[43].mxu0 }
0x257a   : > { %8126 = vrot.lane.b32.xlu1 %v9537_v53, %s10099_s25  ;;  %5289 = vrot.lane.b32.xlu0 %v9541_v55, %s10099_s25 }
0x257e   : > { %8131 = vrot.lane.b32.xlu1 %v9537_v53, %s10093_s2 }
0x25ec   : > { %v5290_v13 = vpop.permute.xlu0 %5289 }
0x25f6   : > { %v4898_v56 = vpop.xlane.xlu1 %4897 }
0x25f7   : > { %v4899_v57 = vmul.f32 0.015625, %v4898_v56 }
0x25f9   : > { %v4900_v20 = vadd.f32 1e-06, %v4899_v57 }
0x25fa   : > { %v8127_v2 = vpop.permute.xlu1 %8126 }
0x25fb   : > { %8220 = vrsqrt.f32 %v4900_v20  ;;  %v8129_v3 = vunpack.i.h.bf16 %v8127_v2  ;;  %v8128_v5 = vunpack.i.l.bf16 %v8127_v2 }
0x25fd   : > { %v7941_v12 = vpack.c.bf16 %v8129_v3, %v8128_v5 }
0x25fe   : > { %v8132_v32 = vpop.permute.xlu1 %8131 }
0x25ff   : > { %v8134_v14 = vunpack.i.h.bf16 %v8132_v32  ;;  %v8133_v15 = vunpack.i.l.bf16 %v8132_v32 }
0x2601   : > { %v7954_v17 = vpack.c.bf16 %v8134_v14, %v8133_v15 }
0x2605   : > { %v8221_v38 = vpop.eup %8220 }
0x2606   : > { %v4902_v60 = vmul.f32 %v8221_v38, %v9501_v30 }
0x2608   : > { %v4909_v1 = vmul.f32 %v6749_v58, %v4902_v60 }
0x260a   : > { %7547 = vmatmul.mubr.msk.f32.vlgmr.msra.gmra.mrb[58].mxu1 %vm890_vm0, %v4909_v1 }
0x260b   : > { %7936 = vmatpush3.bf16.xpose.msk.msra.mxu1 %vm8919_vm8, %v7934_v62  ;;  %7580 = vmatprep.mubr.msk.f32.mxu1 %vm8350_vm1, %v8347_v16 }
0x260c   : > { %7578 = vmatprep.subr.mxu1 %v8347_v16 }
0x2613   : > { %7579 = vmatpush3.xpose.msk.msra.mxu1 %vm1180_vm2, %v9541_v55 }
0x2614   : > { %7940 = vmatprep.subr.bf16.mxu1 %v8349_v31 }
0x26dd   : > { %v4996_v9 = vpop.f32.mrb[58].mxu1 }
0x26de   : > { %v9563_v50 = vadd.f32 %v6759_v6, %v4996_v9  ;;  %v7548_v10 = vpop.f32.mrb[59].mxu1 }
0x26e0   : > { %5610 = vrot.lane.b32.xlu1 %v9563_v50, %s10093_s2  ;;  %5283 = vrot.lane.b32.xlu0 %v9563_v50, %s10099_s25  ;;  %s10116_s25 = sld [smem:[#allocation33_spill]] }
0x26e1   : > { %7581 = vmatmul.mubr.msk.f32.vlgmr.msra.gmra.mrb[60].mxu1 %vm1180_vm2, %v9563_v50 }
0x26e2   : > { %7943 = vmatpush3.bf16.xpose.msk.msra.mxu1 %vm8919_vm8, %v7941_v12  ;;  %7598 = vmatprep.mubr.msk.f32.mxu1 %vm8350_vm1, %v8347_v16 }
0x26e3   : > { %7596 = vmatprep.subr.mxu1 %v8347_v16 }
0x26e4   : > { %5616 = vrot.lane.b32.xlu0 %v9541_v55, %s10093_s2 }
0x26ea   : > { %7597 = vmatpush3.xpose.msk.msra.mxu1 %vm1180_vm2, %v5290_v13 }
0x26eb   : > { %7953 = vmatprep.subr.bf16.mxu1 %v8349_v31 }
0x2752   : > { %v5284_v18 = vpop.permute.xlu0 %5283  ;;  %v5611_v48 = vpop.permute.xlu1 %5610 }
0x2753   : > { %7599 = vmatmul.mubr.msk.f32.vlgmr.msra.gmra.mrb[62].mxu1 %vm1180_vm2, %v5284_v18 }
0x2754   : > { %7956 = vmatpush3.bf16.xpose.msk.msra.mxu1 %vm8919_vm8, %v7954_v17  ;;  %7630 = vmatprep.mubr.msk.f32.mxu1 %vm8350_vm1, %v8347_v16 }
0x2755   : > { %7628 = vmatprep.subr.mxu1 %v8347_v16 }
0x2756   : > { %v5617_v35 = vpop.permute.xlu0 %5616 }
0x275c   : > { %7629 = vmatpush3.xpose.msk.msra.mxu1 %vm1180_vm2, %v5617_v35 }
0x275d   : > { %7963 = vmatprep.subr.bf16.mxu1 %v8349_v31 }
0x275f   : > { %7631 = vmatmul.mubr.msk.f32.vlgmr.msra.gmra.mrb[64].mxu1 %vm1180_vm2, %v5611_v48 }
0x2760   : > { %7655 = vmatprep.mubr.msk.f32.mxu1 %vm8350_vm1, %v8347_v16 }
0x27b4   : > { %v5184_v19 = vpop.f32.mrb[60].mxu1 }
0x27b5   : > { %v5188_v21 = vmul.f32 0.25, %v5184_v19  ;;  %v7582_v22 = vpop.f32.mrb[61].mxu1 }
0x27b7   : > { %v5189_v23 = vsel %vm2447_vm9, %v5188_v21, -inf }
0x27b8   : > { %5190 = vmax.xlane.f32.xlu0 %v5189_v23 }
0x2826   : > { %v5365_v24 = vpop.f32.mrb[62].mxu1 }
0x2827   : > { %v5369_v26 = vmul.f32 0.25, %v5365_v24  ;;  %v7600_v27 = vpop.f32.mrb[63].mxu1 }
0x2829   : > { %v5370_v29 = vsel %vm2447_vm9, %v5369_v26, -inf }
0x282a   : > { %5371 = vmax.xlane.f32.xlu1 %v5370_v29 }
0x2832   : > { %v5692_v0 = vpop.f32.mrb[64].mxu1 }
0x2833   : > { %v7632_v33 = vpop.f32.mrb[65].mxu1  ;;  %v5696_v34 = vmul.f32 0.25, %v5692_v0 }
0x2835   : > { %v5697_v63 = vsel %vm2447_vm9, %v5696_v34, -inf }
0x283b   : > { %8136 = vrot.lane.b32.xlu1 %v9537_v53, %s10104_s5 }
0x283f   : > { %8141 = vrot.lane.b32.xlu1 %v9537_v53, %s10105_s8 }
0x2843   : > { %5385 = vrot.lane.b32.xlu1 %v9541_v55, %s10105_s8  ;;  %s10121_s8 = sld [smem:[#allocation34_spill]] }
0x2845   : > { %v5191_v25 = vpop.xlane.xlu0 %5190 }
0x2846   : > { %v5192_v7 = vsub.f32 %v5188_v21, %v5191_v25 }
0x2847   : > { %5871 = vrot.lane.b32.xlu1 %v9541_v55, %s10106_s1 }
0x2848   : > { %v5193_v4 = vmul.f32 1.442695, %v5192_v7 }
0x284a   : > { %8222 = vpow2.f32 %v5193_v4 }
0x2854   : > { %v8223_v37 = vpop.eup %8222 }
0x2855   : > { %v5195_v36 = vsel %vm2447_vm9, %v8223_v37, 0.0 }
0x2856   : > { %5196 = vadd.xlane.f32.xlu0 %v5195_v36 }
0x286b   : > { %5698 = vmax.xlane.f32.xlu1 %v5697_v63 }
0x287c   : > { %5712 = vrot.lane.b32.xlu1 %v9541_v55, %s10107_s27 }
0x28b7   : > { %v5372_v39 = vpop.xlane.xlu1 %5371 }
0x28b8   : > { %v5373_v40 = vsub.f32 %v5369_v26, %v5372_v39 }
0x28ba   : > { %v5374_v41 = vmul.f32 1.442695, %v5373_v40 }
0x28bb   : > { %v8137_v42 = vpop.permute.xlu1 %8136 }
0x28bc   : > { %8224 = vpow2.f32 %v5374_v41  ;;  %v8139_v28 = vunpack.i.h.bf16 %v8137_v42  ;;  %v8138_v43 = vunpack.i.l.bf16 %v8137_v42 }
0x28be   : > { %v7938_v44 = vpack.c.bf16 %v8139_v28, %v8138_v43 }
0x28bf   : > { %v8142_v47 = vpop.permute.xlu1 %8141 }
0x28c0   : > { %7939 = vmatpush3.bf16.msra.mxu0 %v7938_v44  ;;  %v8144_v60 = vunpack.i.h.bf16 %v8142_v47  ;;  %v8143_v62 = vunpack.i.l.bf16 %v8142_v47 }
0x28c1   : > { %7587 = vmatprep.subr.mxu0 %v8347_v16 }
0x28c2   : > { %v7945_v3 = vpack.c.bf16 %v8144_v60, %v8143_v62 }
0x28c3   : > { %v5386_v49 = vpop.permute.xlu1 %5385 }
0x28c6   : > { %v8225_v45 = vpop.eup %8224 }
0x28c7   : > { %v5376_v46 = vsel %vm2447_vm9, %v8225_v45, 0.0  ;;  %v5872_v52 = vpop.permute.xlu1 %5871 }
0x28c8   : > { %5377 = vadd.xlane.f32.xlu0 %v5376_v46 }
0x28de   : > { %5204 = vrot.lane.b32.xlu0 %v9541_v55, %s10104_s5  ;;  %s10115_s5 = sld [smem:[#allocation32_spill]] }
0x28e2   : > { %8146 = vrot.lane.b32.xlu0 %v9537_v53, %s10106_s1 }
0x28e3   : > { %v5197_v20 = vpop.xlane.xlu0 %5196 }
0x28e4   : > { %v6776_v32 = vld [vmem:[%s10115_s5 + $0x50] sm:$0xff]  ;;  %v6777_v59 = vld [vmem:[%s10115_s5 + $0x58] sm:$0xff]  ;;  %v6774_v35 = vld [vmem:[%s10115_s5 + $0x40] sm:$0xff] }
0x28e5   : > { %v7948_v14 = vpack.c.bf16 %v6777_v59, %v6776_v32  ;;  %v6775_v48 = vld [vmem:[%s10115_s5 + $0x48] sm:$0xff]  ;;  %v6778_v36 = vld [vmem:[%s10115_s5 + $0x60] sm:$0xff] }
0x28e6   : > { %5865 = vrot.lane.b32.xlu0 %v9563_v50, %s10106_s1  ;;  %v7951_v21 = vpack.c.bf16 %v6775_v48, %v6774_v35  ;;  %v6819_v48 = vld [vmem:[%s9999_s19 + $0xa8] sm:$0xff] }
0x28f8   : > { %v5699_v11 = vpop.xlane.xlu1 %5698 }
0x28f9   : > { %v5700_v54 = vsub.f32 %v5696_v34, %v5699_v11  ;;  %v6779_v34 = vld [vmem:[%s10115_s5 + $0x68] sm:$0xff] }
0x28fa   : > { %v7961_v63 = vpack.c.bf16 %v6779_v34, %v6778_v36  ;;  %v6826_v36 = vld [vmem:[%s9999_s19 + $0xe0] sm:$0xff]  ;;  %v6828_v34 = vld [vmem:[%s9999_s19 + $0xf0] sm:$0xff] }
0x28fb   : > { %v5701_v61 = vmul.f32 1.442695, %v5700_v54 }
0x28fc   : > { %v5713_v0 = vpop.permute.xlu1 %5712 }
0x28fd   : > { %8226 = vpow2.f32 %v5701_v61 }
0x28fe   : > { %8228 = vrcp.f32 %v5197_v20 }
0x2907   : > { %v9613_v56 = vpop.eup %8226 }
0x2908   : > { %v5703_v57 = vsel %vm2447_vm9, %v9613_v56, 0.0  ;;  %v8229_v58 = vpop.eup %8228 }
0x2909   : > { %5704 = vadd.xlane.f32.xlu0 %v5703_v57  ;;  %v5199_v1 = vmul.f32 %v8229_v58, %v8223_v37  ;;  %v6781_v57 = vld [vmem:[%s10115_s5 + $0x78] sm:$0xff] }
0x291f   : > { %8151 = vrot.lane.b32.xlu0 %v9537_v53, %s10107_s27  ;;  %s10118_s27 = sld [smem:[#allocation9_spill]] }
0x2925   : > { %s9891_s17 = sand.u32 1, %s10118_s27  }
0x2926   : > { %s6636_s2 = sshll.u32 %s9891_s17, 3  ;;  %s6494_s24 = scalar_lea.sflag [#allocation5], %s9891_s17 }
0x2927   : > { %s846_s1 = scalar_lea.vmem [#allocation4], %s6636_s2 }
0x2928   : > { %s6520_s4 = sshll.u32 %s846_s1, 4  ;;  %s6521_s4 = int_to_ptr.vmem [resolvable:$true] %s6520_s4 }
0x2929   : > { %s8251_s26 = scalar_lea.vmem %s6521_s4, 128 }
0x292a   : > { %p8252_p11 = scmp.ne.s32.totalorder %s6521_s4, %s8251_s26 }
0x292c   : > { %p8253_p12 = pnand %p8252_p11, %p8539_p5 }
0x292e   : > { %p8254_p13 = pneg %p8253_p12 }
0x2955   : > { %v5378_v38 = vpop.xlane.xlu0 %5377 }
0x2956   : > { %8230 = vrcp.f32 %v5378_v38 }
0x2959   : > { %v5205_v2 = vpop.permute.xlu0 %5204 }
0x295a   : > { %7588 = vmatpush3.msk.msra.mxu0 %vm2470_vm10, %v5205_v2 }
0x295b   : > { %7590 = vmatmul.mubr.msk.f32.vlgmr.msra.gmra.mrb[44].mxu0 %vm2447_vm9, %v5199_v1  ;;  %7944 = vmatprep.subr.bf16.mxu0 %v8349_v31 }
0x295c   : > { %7946 = vmatpush3.bf16.msra.mxu0 %v7945_v3  ;;  %7607 = vmatprep.mubr.msk.f32.mxu0 %vm8350_vm1, %v8347_v16 }
0x295d   : > { %v8147_v5 = vpop.permute.xlu0 %8146  ;;  %7605 = vmatprep.subr.mxu0 %v8347_v16 }
0x295e   : > { %v8149_v6 = vunpack.i.h.bf16 %v8147_v5  ;;  %v8148_v9 = vunpack.i.l.bf16 %v8147_v5 }
0x2960   : > { %v8231_v50 = vpop.eup %8230  ;;  %v7964_v10 = vpack.c.bf16 %v8149_v6, %v8148_v9  ;;  %7606 = vmatpush3.msk.msra.mxu0 %vm2470_vm10, %v5386_v49  ;;  %v6811_v9 = vld [vmem:[%s10116_s25 + $0x1] ss:$0 sm:$0xff]  ;;  %s8359_s25 = smov [#allocation4]  }
0x2961   : > { %v5380_v12 = vmul.f32 %v8231_v50, %v8225_v45  ;;  %7947 = vmatprep.subr.bf16.mxu0 %v8349_v31  ;;  %v5866_v13 = vpop.permute.xlu0 %5865 }
0x2962   : > { %7966 = vmatpush3.bf16.xpose.msk.msra.mxu1 %vm8919_vm8, %v7964_v10 }
0x2963   : > { %7608 = vmatmul.mubr.msk.f32.vlgmr.msra.gmra.mrb[46].mxu0 %vm2447_vm9, %v5380_v12  ;;  %7653 = vmatprep.subr.mxu1 %v8347_v16 }
0x2964   : > { %7614 = vmatprep.mubr.msk.f32.mxu0 %vm8350_vm1, %v8347_v16  ;;  %7949 = vmatpush3.bf16.msra.mxu0 %v7948_v14  ;;  %v6815_v14 = vld [vmem:[%s9999_s19 + $0x88] sm:$0xff] }
0x2965   : > { %7950 = vmatprep.subr.bf16.mxu0 %v8349_v31 }
0x296a   : > { %7654 = vmatpush3.xpose.msk.msra.mxu1 %vm1180_vm2, %v5872_v52 }
0x296d   : > { %7656 = vmatmul.mubr.msk.f32.vlgmr.msra.gmra.mrb[66].mxu1 %vm1180_vm2, %v5866_v13 }
0x2996   : > { %v5705_v15 = vpop.xlane.xlu0 %5704 }
0x2997   : > { %8232 = vrcp.f32 %v5705_v15  ;;  %v6817_v15 = vld [vmem:[%s9999_s19 + $0x98] sm:$0xff] }
0x299a   : > { %v8152_v19 = vpop.permute.xlu0 %8151 }
0x299b   : > { %v8154_v22 = vunpack.i.h.bf16 %v8152_v19  ;;  %v8153_v23 = vunpack.i.l.bf16 %v8152_v19  ;;  %v6821_v19 = vld [vmem:[%s9999_s19 + $0xb8] sm:$0xff] }
0x299d   : > { %v7958_v27 = vpack.c.bf16 %v8154_v22, %v8153_v23  ;;  %v6818_v22 = vld [vmem:[%s9999_s19 + $0xa0] sm:$0xff]  ;;  %v6820_v23 = vld [vmem:[%s9999_s19 + $0xb0] sm:$0xff] }
0x29a1   : > { %v8233_v29 = vpop.eup %8232 }
0x29a2   : > { %v5707_v33 = vmul.f32 %v8233_v29, %v9613_v56 }
0x2a2e   : > { %v5279_v17 = vpop.f32.mrb[44].mxu0 }
0x2a2f   : > { %v7591_v18 = vpop.f32.mrb[45].mxu0 }
0x2a30   : > { %v6816_v18 = vld [vmem:[%s9999_s19 + $0x90] sm:$0xff] }
0x2a36   : > { %v5460_v24 = vpop.f32.mrb[46].mxu0 }
0x2a37   : > { %v7609_v26 = vpop.f32.mrb[47].mxu0  ;;  %7615 = vmatmul.mubr.msk.f32.vlgmr.msra.gmra.mrb[48].mxu0 %vm1180_vm2, %v5460_v24  ;;  %v7979_v24 = vpack.c.bf16 %v6820_v23, %v6818_v22  ;;  %v6844_v23 = vld [vmem:[%s10001_s21 + $0x160] sm:$0xff] }
0x2a38   : > { %7952 = vmatpush3.bf16.msra.mxu0 %v7951_v21  ;;  %7621 = vmatprep.mubr.msk.f32.mxu0 %vm8350_vm1, %v8347_v16  ;;  %v7977_v21 = vpack.c.bf16 %v6821_v19, %v6819_v48  ;;  %v6823_v26 = vld [vmem:[%s9999_s19 + $0xc8] sm:$0xff]  ;;  %v6860_v48 = vld [vmem:[%s10001_s21 + $0x1e0] sm:$0xff] }
0x2a39   : > { %7957 = vmatprep.subr.bf16.mxu0 %v8349_v31  ;;  %v6861_v19 = vld [vmem:[%s10001_s21 + $0x1e8] sm:$0xff] }
0x2a3a   : > { %v8013_v22 = vpack.c.bf16 %v6861_v19, %v6860_v48 }
0x2a3b   : > { %7622 = vmatmul.mubr.msk.f32.vlgmr.msra.gmra.mrb[50].mxu0 %vm1180_vm2, %v5279_v17  ;;  %v7973_v17 = vpack.c.bf16 %v6817_v15, %v6815_v14  ;;  %v6858_v14 = vld [vmem:[%s10001_s21 + $0x1d0] sm:$0xff]  ;;  %v6859_v15 = vld [vmem:[%s10001_s21 + $0x1d8] sm:$0xff] }
0x2a3c   : > { %7959 = vmatpush3.bf16.msra.mxu0 %v7958_v27  ;;  %7639 = vmatprep.mubr.msk.f32.mxu0 %vm8350_vm1, %v8347_v16  ;;  %v6825_v27 = vld [vmem:[%s9999_s19 + $0xd8] sm:$0xff] }
0x2a3d   : > { %7637 = vmatprep.subr.mxu0 %v8347_v16  ;;  %v7981_v29 = vpack.c.bf16 %v6825_v27, %v6823_v26  ;;  %v6862_v26 = vld [vmem:[%s10001_s21 + $0x1f0] sm:$0xff]  ;;  %v6863_v27 = vld [vmem:[%s10001_s21 + $0x1f8] sm:$0xff] }
0x2a40   : > { %7638 = vmatpush3.msk.msra.mxu0 %vm2470_vm10, %v5713_v0  ;;  %v5947_v25 = vpop.f32.mrb[66].mxu1  ;;  %v6822_v0 = vld [vmem:[%s9999_s19 + $0xc0] sm:$0xff] }
0x2a41   : > { %7640 = vmatmul.mubr.msk.f32.vlgmr.msra.gmra.mrb[52].mxu0 %vm2447_vm9, %v5707_v33  ;;  %v5951_v7 = vmul.f32 0.25, %v5947_v25  ;;  %v7657_v4 = vpop.f32.mrb[67].mxu1  ;;  %7960 = vmatprep.subr.bf16.mxu0 %v8349_v31  ;;  %v6824_v33 = vld [vmem:[%s9999_s19 + $0xd0] sm:$0xff] }
0x2a42   : > { %7646 = vmatprep.mubr.msk.f32.mxu0 %vm8350_vm1, %v8347_v16  ;;  %7962 = vmatpush3.bf16.msra.mxu0 %v7961_v63  ;;  %v7983_v25 = vpack.c.bf16 %v6824_v33, %v6822_v0  ;;  %v6829_v4 = vld [vmem:[%s9999_s19 + $0xf8] sm:$0xff]  ;;  %v7987_v63 = vpack.c.bf16 %v6828_v34, %v6826_v36  ;;  %v8017_v0 = vpack.c.bf16 %v6863_v27, %v6862_v26  ;;  %v6846_v33 = vld [vmem:[%s10001_s21 + $0x170] sm:$0xff] }
0x2a43   : > { %v5952_v37 = vsel %vm2447_vm9, %v5951_v7, -inf  ;;  %7967 = vmatprep.subr.bf16.mxu0 %v8349_v31 }
0x2a44   : > { %5953 = vmax.xlane.f32.xlu1 %v5952_v37 }
0x2a55   : > { %5967 = vrot.lane.b32.xlu1 %v9541_v55, %s10109_s13 }
0x2ad1   : > { %v5954_v39 = vpop.xlane.xlu1 %5953 }
0x2ad2   : > { %v5955_v40 = vsub.f32 %v5951_v7, %v5954_v39  ;;  %v6827_v7 = vld [vmem:[%s9999_s19 + $0xe8] sm:$0xff] }
0x2ad3   : > { %v7985_v37 = vpack.c.bf16 %v6829_v4, %v6827_v7  ;;  %v6830_v4 = vld [vmem:[%s10000_s20 + $0x2] sm:$0x3] }
0x2ad4   : > { %v5956_v41 = vmul.f32 1.442695, %v5955_v40  ;;  %v6174_v36 = vrot.slane %v6830_v4, %v8700_v8 }
0x2ad5   : > { %v5968_v58 = vpop.permute.xlu1 %5967 }
0x2ad6   : > { %8234 = vpow2.f32 %v5956_v41 }
0x2ae0   : > { %v8235_v42 = vpop.eup %8234 }
0x2ae1   : > { %v5958_v28 = vsel %vm2447_vm9, %v8235_v42, 0.0 }
0x2ae2   : > { %5959 = vadd.xlane.f32.xlu0 %v5958_v28  ;;  %v6813_v28 = vld [vmem:[%s9998_s18 + $0x1] ss:$0 sm:$0xff] }
0x2af8   : > { %8156 = vrot.lane.b32.xlu0 %v9537_v53, %s10109_s13  ;;  %v6780_v53 = vld [vmem:[%s10115_s5 + $0x70] sm:$0xff]  ;;  %s10119_s13 = sld [smem:[#allocation12_spill]]  ;;  %s8255_s5 = sshll.u32 %s8359_s25, 4  ;;  %s8256_s5 = int_to_ptr.vmem [resolvable:$false] %s8255_s5 }
0x2af9   : > { %v7971_v38 = vpack.c.bf16 %v6781_v57, %v6780_v53  ;;  %v6852_v57 = vld [vmem:[%s10001_s21 + $0x1a0] sm:$0xff]  ;;  %p8258_p0 = scmp.lt.s32.totalorder %s6521_s4, %s8256_s5 }
0x2afe   : > { %s6871_s27 = sshll.u32 %s10119_s13, 7 }
0x2aff   : > { %s9907_s30 = scalar_lea.hbm %s10122_s7, %s6871_s27 }
0x2b0a   : > { %v5533_v55 = vpop.f32.mrb[48].mxu0 }
0x2b0b   : > { %v7616_v43 = vpop.f32.mrb[49].mxu0 }
0x2b0e   : > { %v5606_v44 = vpop.f32.mrb[50].mxu0 }
0x2b0f   : > { %v5607_v45 = vadd.f32 %v5606_v44, %v5533_v55  ;;  %v7623_v46 = vpop.f32.mrb[51].mxu0  ;;  %v6848_v44 = vld [vmem:[%s10001_s21 + $0x180] sm:$0xff] }
0x2b14   : > { %v5787_v47 = vpop.f32.mrb[52].mxu0 }
0x2b15   : > { %v7641_v49 = vpop.f32.mrb[53].mxu0  ;;  %7647 = vmatmul.mubr.msk.f32.vlgmr.msra.gmra.mrb[54].mxu0 %vm1180_vm2, %v5787_v47  ;;  %v6832_v47 = vld [vmem:[%s10001_s21 + $0x100] sm:$0xff] }
0x2b16   : > { %7664 = vmatprep.mubr.msk.f32.mxu0 %vm8350_vm1, %v8347_v16  ;;  %v6833_v49 = vld [vmem:[%s10001_s21 + $0x108] sm:$0xff] }
0x2b6f   : > { %v5960_v52 = vpop.xlane.xlu0 %5959 }
0x2b70   : > { %8236 = vrcp.f32 %v5960_v52  ;;  %v7991_v52 = vpack.c.bf16 %v6833_v49, %v6832_v47 }
0x2b73   : > { %v8157_v11 = vpop.permute.xlu0 %8156 }
0x2b74   : > { %v8159_v54 = vunpack.i.h.bf16 %v8157_v11  ;;  %v8158_v61 = vunpack.i.l.bf16 %v8157_v11  ;;  %v6851_v11 = vld [vmem:[%s10001_s21 + $0x198] sm:$0xff] }
0x2b76   : > { %v7968_v56 = vpack.c.bf16 %v8159_v54, %v8158_v61  ;;  %v6834_v61 = vld [vmem:[%s10001_s21 + $0x110] sm:$0xff] }
0x2b78   : > { %7969 = vmatpush3.bf16.msra.mxu0 %v7968_v56  ;;  %v6835_v56 = vld [vmem:[%s10001_s21 + $0x118] sm:$0xff] }
0x2b79   : > { %7662 = vmatprep.subr.mxu0 %v8347_v16  ;;  %v7995_v53 = vpack.c.bf16 %v6835_v56, %v6834_v61 }
0x2b7a   : > { %v8237_v20 = vpop.eup %8236 }
0x2b7b   : > { %v5962_v60 = vmul.f32 %v8237_v20, %v8235_v42  ;;  %v6853_v20 = vld [vmem:[%s10001_s21 + $0x1a8] sm:$0xff] }
0x2b7c   : > { %7663 = vmatpush3.msk.msra.mxu0 %vm2470_vm10, %v5968_v58  ;;  %v6836_v58 = vld [vmem:[%s10001_s21 + $0x120] sm:$0xff] }
0x2b7d   : > { %7665 = vmatmul.mubr.msk.f32.vlgmr.msra.gmra.mrb[56].mxu0 %vm2447_vm9, %v5962_v60  ;;  %7970 = vmatprep.subr.bf16.mxu0 %v8349_v31  ;;  %v6837_v60 = vld [vmem:[%s10001_s21 + $0x128] sm:$0xff] }
0x2b7e   : > { %7972 = vmatpush3.bf16.msra.mxu0 %v7971_v38  ;;  %7671 = vmatprep.mubr.msk.f32.mxu0 %vm8350_vm1, %v8347_v16  ;;  %v7997_v38 = vpack.c.bf16 %v6853_v20, %v6852_v57 }
0x2b7f   : > { %7974 = vmatprep.subr.bf16.mxu0 %v7973_v17 }
0x2be8   : > { %v5860_v62 = vpop.f32.mrb[54].mxu0 }
0x2be9   : > { %v5864_v1 = vadd.f32 %v5860_v62, %v5607_v45  ;;  %v7648_v2 = vpop.f32.mrb[55].mxu0  ;;  %v6849_v45 = vld [vmem:[%s10001_s21 + $0x188] sm:$0xff]  ;;  %v7999_v62 = vpack.c.bf16 %v6837_v60, %v6836_v58 }
0x2bea   : > { %v7989_v46 = vpack.c.bf16 %v6849_v45, %v6848_v44  ;;  %v6855_v2 = vld [vmem:[%s10001_s21 + $0x1b8] sm:$0xff] }
0x2bec   : > { %7990 = vmatprep.subr.bf16.mxu1 %v7989_v46 }
0x2bed   : > { %7992 = vmatpush3.bf16.msra.mxu1 %v7991_v52 }
0x2c50   : > { %v6042_v3 = vpop.f32.mrb[56].mxu0 }
0x2c51   : > { %v7666_v5 = vpop.f32.mrb[57].mxu0  ;;  %7672 = vmatmul.mubr.msk.f32.vlgmr.msra.gmra.mrb[58].mxu0 %vm1180_vm2, %v6042_v3 }
0x2c52   : > { %6244 = vmatprep.mubr.f32.mxu0 %v8347_v16  ;;  %v6838_v5 = vld [vmem:[%s10001_s21 + $0x130] sm:$0xff] }
0x2d24   : > { %v6115_v6 = vpop.f32.mrb[58].mxu0 }
0x2d25   : > { %v6119_v50 = vadd.f32 %v6115_v6, %v5864_v1  ;;  %v7673_v10 = vpop.f32.mrb[59].mxu0  ;;  %v6854_v1 = vld [vmem:[%s10001_s21 + $0x1b0] sm:$0xff]  ;;  %v6839_v6 = vld [vmem:[%s10001_s21 + $0x138] sm:$0xff] }
0x2d26   : > { %v8001_v3 = vpack.c.bf16 %v6855_v2, %v6854_v1  ;;  %v6857_v10 = vld [vmem:[%s10001_s21 + $0x1c8] sm:$0xff]  ;;  %v6399_v2 = vld [vmem:[%s10117_s12] sm:$0xff] }
0x2d27   : > { %v6128_v12 = vadd.f32 %v6811_v9, %v6119_v50  ;;  %v8003_v9 = vpack.c.bf16 %v6839_v6, %v6838_v5  ;;  %v6856_v50 = vld [vmem:[%s10001_s21 + $0x1c0] sm:$0xff]  ;;  %v6402_v6 = vld [vmem:[%s10117_s12 + $0x18] sm:$0xff] }
0x2d29   : > { %v9696_v13 = vadd.f32 %v6128_v12, %v9501_v30  ;;  %v6814_v30 = vld [vmem:[%s9999_s19 + $0x80] sm:$0xff] }
0x2d2a   : > { %v7975_v35 = vpack.c.bf16 %v6816_v18, %v6814_v30  ;;  %v6840_v12 = vld [vmem:[%s10001_s21 + $0x140] sm:$0xff]  ;;  %v8009_v30 = vpack.c.bf16 %v6859_v15, %v6858_v14  ;;  %v6842_v18 = vld [vmem:[%s10001_s21 + $0x150] sm:$0xff] }
0x2d2b   : > { %v6132_v32 = vmul.f32 %v9696_v13, %v9696_v13 }
0x2d2c   : > { %7976 = vmatpush1.bf16.msra.mxu0 %v7975_v35  ;;  %v6843_v35 = vld [vmem:[%s10001_s21 + $0x158] sm:$0xff] }
0x2d2d   : > { %v6133_v59 = vsel %vm890_vm0, %v6132_v32, 0.0  ;;  %7978 = vmatprep.subr.bf16.mxu0 %v7977_v21  ;;  %v8005_v32 = vpack.c.bf16 %v6857_v10, %v6856_v50  ;;  %v8011_v21 = vpack.c.bf16 %v6843_v35, %v6842_v18  ;;  %v6403_v50 = vld [vmem:[%s10117_s12 + $0x20] sm:$0xff]  ;;  %v6404_v10 = vld [vmem:[%s10117_s12 + $0x28] sm:$0xff] }
0x2d2e   : > { %6134 = vadd.xlane.f32.xlu1 %v6133_v59  ;;  %v6841_v59 = vld [vmem:[%s10001_s21 + $0x148] sm:$0xff]  ;;  %v6866_v18 = vld [vmem:[%s10121_s8] ss:$0 sm:$0xff]  ;;  %s8257_s8 = scalar_lea.vmem %s8256_s5, 256 }
0x2d2f   : > { %v8007_v17 = vpack.c.bf16 %v6841_v59, %v6840_v12  ;;  %v8028_v12 = vpack.c.bf16 %v6404_v10, %v6403_v50  ;;  %v6406_v59 = vld [vmem:[%s10117_s12 + $0x38] sm:$0xff]  ;;  %p8259_p1 = scmp.lt.s32.totalorder %s8257_s8, %s8251_s26 }
0x2d30   : > { %7980 = vmatpush1.bf16.msra.mxu0 %v7979_v24  ;;  %v6845_v24 = vld [vmem:[%s10001_s21 + $0x168] sm:$0xff] }
0x2d31   : > { %7982 = vmatprep.subr.bf16.mxu0 %v7981_v29  ;;  %v8015_v29 = vpack.c.bf16 %v6845_v24, %v6844_v23  ;;  %p8260_p2 = por %p8259_p1, %p8258_p0 }
0x2d33   : > { %p8261_p3 = pnand %p8260_p2, %p8254_p13 }
0x2d34   : > { %7984 = vmatpush1.bf16.msra.mxu0 %v7983_v25  ;;  %v6847_v25 = vld [vmem:[%s10001_s21 + $0x178] sm:$0xff] }
0x2d35   : > { %7986 = vmatprep.subr.bf16.mxu0 %v7985_v37  ;;  %v8019_v7 = vpack.c.bf16 %v6847_v25, %v6846_v33  ;;  %v6170_v37 = vrot.slane %v6830_v4, %v8674_v51 }
0x2d38   : > { %7988 = vmatpush1.bf16.msra.mxu0 %v7987_v63 }
0x2d39   : > { %8021 = vmatprep.subr.bf16.mxu0 %v8349_v31 }
0x2dbb   : > { %v6135_v39 = vpop.xlane.xlu1 %6134 }
0x2dbc   : > { %v6136_v40 = vmul.f32 0.015625, %v6135_v39 }
0x2dbe   : > { %v6137_v41 = vadd.f32 1e-06, %v6136_v40 }
0x2dc0   : > { %8238 = vrsqrt.f32 %v6137_v41 }
0x2dca   : > { %v8239_v42 = vpop.eup %8238 }
0x2dcb   : > { %v6139_v55 = vmul.f32 %v8239_v42, %v9696_v13 }
0x2dcd   : > { %v6146_v43 = vmul.f32 %v6813_v28, %v6139_v55 }
0x2dcf   : > { %6831 = vmatmul.mubr.msk.f32.vlgmr.msra.gmra.mrb[60].mxu0 %vm890_vm0, %v6146_v43 }
0x2dd0   : > { %7690 = vmatprep.mubr.msk.f32.mxu0 %vm8350_vm1, %v8347_v16  ;;  %v6850_v16 = vld [vmem:[%s10001_s21 + $0x190] sm:$0xff] }
0x2dd1   : > { %v7993_v54 = vpack.c.bf16 %v6851_v11, %v6850_v16 }
0x2dd3   : > { %7994 = vmatprep.subr.bf16.mxu1 %v7993_v54 }
0x2dd4   : > { %7996 = vmatpush3.bf16.msra.mxu1 %v7995_v53 }
0x2dd5   : > { %7998 = vmatprep.subr.bf16.mxu1 %v7997_v38  ;;  %v6865_v38 = vld [vmem:[%s10002_s22 + $0x1] ss:$0 sm:$0xff] }
0x2dd8   : > { %8000 = vmatpush3.bf16.msra.mxu1 %v7999_v62 }
0x2dd9   : > { %8002 = vmatprep.subr.bf16.mxu1 %v8001_v3  ;;  %v6400_v3 = vld [vmem:[%s10117_s12 + $0x8] sm:$0xff] }
0x2dda   : > { %v8022_v5 = vpack.c.bf16 %v6400_v3, %v6399_v2 }
0x2ddc   : > { %8004 = vmatpush3.bf16.msra.mxu1 %v8003_v9  ;;  %8023 = vmatpush3.bf16.msra.mxu0 %v8022_v5 }
0x2ddd   : > { %8006 = vmatprep.subr.bf16.mxu1 %v8005_v32  ;;  %8024 = vmatprep.subr.bf16.mxu0 %v8349_v31  ;;  %v6405_v32 = vld [vmem:[%s10117_s12 + $0x30] sm:$0xff] }
0x2dde   : > { %v8031_v14 = vpack.c.bf16 %v6406_v59, %v6405_v32 }
0x2de0   : > { %8008 = vmatpush3.bf16.msra.mxu1 %v8007_v17 }
0x2de1   : > { %8010 = vmatprep.subr.bf16.mxu1 %v8009_v30 }
0x2de4   : > { %8012 = vmatpush3.bf16.msra.mxu1 %v8011_v21 }
0x2de5   : > { %8014 = vmatprep.subr.bf16.mxu1 %v8013_v22 }
0x2de8   : > { %8016 = vmatpush3.bf16.msra.mxu1 %v8015_v29 }
0x2de9   : > { %8018 = vmatprep.subr.bf16.mxu1 %v8017_v0 }
0x2dec   : > { %8020 = vmatpush3.bf16.msra.mxu1 %v8019_v7 }
0x2ea2   : > { %v6246_v34 = vpop.f32.mrb[60].mxu0 }
0x2ea3   : > { %v6247_v63 = vadd.f32 %v6246_v34, %v6170_v37  ;;  %v6248_v39 = vpop.f32.mrb[61].mxu0 }
0x2ea4   : > { %v6249_v40 = vadd.f32 %v6248_v39, %v6174_v36 }
0x2ea5   : > { %v6251_v41 = vmul.f32 %v6247_v63, %v6247_v63 }
0x2ea6   : > { %v6252_v42 = vmul.f32 %v6249_v40, %v6249_v40 }
0x2ea7   : > { %v6253_v28 = vmul.f32 %v6251_v41, %v6247_v63 }
0x2ea8   : > { %v6254_v55 = vmul.f32 %v6252_v42, %v6249_v40 }
0x2ea9   : > { %v6255_v43 = vmul.f32 0.044715, %v6253_v28 }
0x2eaa   : > { %v6256_v44 = vmul.f32 0.044715, %v6254_v55 }
0x2eab   : > { %v6257_v45 = vadd.f32 %v6255_v43, %v6247_v63 }
0x2eac   : > { %v6258_v46 = vadd.f32 %v6256_v44, %v6249_v40 }
0x2ead   : > { %v6259_v47 = vmul.f32 0.7978846, %v6257_v45 }
0x2eae   : > { %v6260_v49 = vmul.f32 0.7978846, %v6258_v46 }
0x2eaf   : > { %8240 = vtanh.f32 %v6259_v47 }
0x2eb0   : > { %8242 = vtanh.f32 %v6260_v49 }
0x2eb9   : > { %v8241_v52 = vpop.eup %8240 }
0x2eba   : > { %v8243_v51 = vpop.eup %8242  ;;  %v6263_v16 = vadd.f32 1.0, %v8241_v52 }
0x2ebb   : > { %v6264_v8 = vadd.f32 1.0, %v8243_v51 }
0x2ebc   : > { %v6265_v11 = vmul.f32 0.5, %v6263_v16 }
0x2ebd   : > { %v6266_v54 = vmul.f32 0.5, %v6264_v8 }
0x2ebe   : > { %v6267_v56 = vmul.f32 %v6265_v11, %v6247_v63 }
0x2ebf   : > { %v6268_v61 = vmul.f32 %v6266_v54, %v6249_v40 }
0x2ec1   : > { %6366 = vmatprep.mubr.f32.mxu1 %v6268_v61 }
0x2ec2   : > { %6367 = vmatmul.mubr.f32.vlgmr.msra.gmra.mrb[68].mxu1 %v6267_v56 }
0x2f95   : > { %v7162_v53 = vpop.f32.mrb[68].mxu1 }
0x2f96   : > { %v7163_v57 = vpop.f32.mrb[69].mxu1 }
0x2f97   : > { %v7164_v20 = vadd.f32 %v7163_v57, %v7162_v53 }
0x2f99   : > { %v6372_v58 = vadd.f32 %v7164_v20, %v9696_v13  ;;  %v6401_v13 = vld [vmem:[%s10117_s12 + $0x10] sm:$0xff] }
0x2f9a   : > { %v8025_v9 = vpack.c.bf16 %v6402_v6, %v6401_v13 }
0x2f9b   : > { %v6381_v60 = vadd.f32 %v6865_v38, %v6372_v58 }
0x2f9c   : > { %8026 = vmatpush3.bf16.msra.mxu0 %v8025_v9 }
0x2f9d   : > { %v6383_v62 = vmul.f32 %v6381_v60, %v6381_v60  ;;  %8027 = vmatprep.subr.bf16.mxu0 %v8349_v31 }
0x2f9f   : > { %v6384_v1 = vsel %vm890_vm0, %v6383_v62, 0.0 }
0x2fa0   : > { %6385 = vadd.xlane.f32.xlu0 %v6384_v1  ;;  %8029 = vmatpush3.bf16.msra.mxu0 %v8028_v12 }
0x2fa1   : > { %8030 = vmatprep.subr.bf16.mxu0 %v8349_v31 }
0x2fa4   : > { %8032 = vmatpush3.bf16.msra.mxu0 %v8031_v14 }
0x302d   : > { %v6386_v15 = vpop.xlane.xlu0 %6385 }
0x302e   : > { %v6387_v17 = vmul.f32 0.015625, %v6386_v15 }
0x3030   : > { %v6388_v30 = vadd.f32 1e-06, %v6387_v17 }
0x3032   : > { %8244 = vrsqrt.f32 %v6388_v30 }
0x303c   : > { %v8245_v31 = vpop.eup %8244 }
0x303d   : > { %v6390_v35 = vmul.f32 %v8245_v31, %v6381_v60 }
0x303f   : > { %v6397_v48 = vmul.f32 %v6866_v18, %v6390_v35 }
0x3041   : > { %7691 = vmatmul.mubr.msk.f32.vlgmr.msra.gmra.mrb[62].mxu0 %vm890_vm0, %v6397_v48  ;;  %6398 = vst.msk [vmem:[%s846_s1] sm:$0xff] %vm890_vm0, %v6397_v48 }
0x3042   : > { %8264 = shalt.err (!%p8261_p3)
}
0x3043   : > { %s8265_s1 = scalar_lea.hbm %s9907_s30, 128  ;;  %s8269_s7 = scalar_lea.hbm %s10123_s15, 256 }
0x3044   : > { %p8266_p4 = scmp.ne.s32.totalorder %s9907_s30, %s8265_s1  ;;  %p8270_p9 = scmp.lt.u32.totalorder %s9907_s30, %s10123_s15 }
0x3045   : > { %p8271_p10 = scmp.lt.u32.totalorder %s8269_s7, %s8265_s1  ;;  %p8273_p12 = scmp.lt.u32.totalorder %s8265_s1, %s9907_s30 }
0x3046   : > { %p8267_p7 = pnand %p8266_p4, %p8539_p5 }
0x3047   : > { %p8272_p11 = por %p8271_p10, %p8270_p9 }
0x3048   : > { %p8268_p8 = pneg %p8267_p7 }
0x3049   : > { %p8274_p13 = por %p8273_p12, %p8272_p11 }
0x304b   : > { %p8275_p0 = pnand %p8274_p13, %p8268_p8 }
0x304d   : > { %8278 = shalt.err (!%p8275_p0)
}
0x304e   : > { %8035 = dma.vmem_to_hbm [thread:$0]  (%p8539_p5), %s6521_s4, 128, %s9907_s30, %s6494_s24  }
0x304f   : > { %s10124_s9 = sld [smem:[#allocation36_spill]]  ;;  %s839_s11 = scalar_lea.vmem [#allocation2], %s6636_s2 }
0x3050   : > { %s6507_s7 = sshll.u32 %s839_s11, 4  ;;  %s10125_s5 = sld [smem:[#allocation37_spill]]  ;;  %s9939_s7 = int_to_ptr.vmem [resolvable:$true] %s6507_s7 }
0x3051   : > { %s6489_s30 = scalar_lea.sflag [#allocation3], %s9891_s17  ;;  %s8279_s4 = scalar_lea.vmem %s9939_s7, 128 }
0x3052   : > { %p8280_p1 = scmp.ne.s32.totalorder %s9939_s7, %s8279_s4  ;;  %s8360_s2 = smov [#allocation2]  }
0x3053   : > { %s8283_s24 = sshll.u32 %s8360_s2, 4  ;;  %s8284_s24 = int_to_ptr.vmem [resolvable:$false] %s8283_s24 }
0x3054   : > { %p8281_p2 = pnand %p8280_p1, %p8539_p5  ;;  %s8285_s13 = scalar_lea.vmem %s8284_s24, 256 }
0x3055   : > { %v6867_v19 = vld [vmem:[%s10124_s9] ss:$0 sm:$0xff]  ;;  %p8286_p4 = scmp.lt.s32.totalorder %s9939_s7, %s8284_s24  ;;  %p8287_p7 = scmp.lt.s32.totalorder %s8285_s13, %s8279_s4 }
0x3056   : > { %s9937_s0 = scalar_lea.hbm %s10125_s5, %s6871_s27  ;;  %p8282_p3 = pneg %p8281_p2 }
0x3057   : > { %p8288_p8 = por %p8287_p7, %p8286_p4 }
0x3059   : > { %p8289_p9 = pnand %p8288_p8, %p8282_p3 }
0x3114   : > { %v6483_v21 = vpop.f32.mrb[62].mxu0 }
0x3115   : > { %v6484_v22 = vadd.f32 %v6867_v19, %v6483_v21  ;;  %v7692_v23 = vpop.f32.mrb[63].mxu0 }
0x3117   : > { %6487 = vst [vmem:[%s839_s11] sm:$0xff] %v6484_v22 }
0x3118   : > { %8292 = shalt.err (!%p8289_p9)
}
0x3119   : > { %s8293_s17 = scalar_lea.hbm %s9937_s0, 128  ;;  %s8297_s8 = scalar_lea.hbm %s10125_s5, 256 }
0x311a   : > { %p8294_p10 = scmp.ne.s32.totalorder %s9937_s0, %s8293_s17  ;;  %p8298_p13 = scmp.lt.u32.totalorder %s9937_s0, %s10125_s5 }
0x311b   : > { %p8299_p0 = scmp.lt.u32.totalorder %s8297_s8, %s8293_s17  ;;  %p8301_p2 = scmp.lt.u32.totalorder %s8293_s17, %s9937_s0 }
0x311c   : > { %p8295_p11 = pnand %p8294_p10, %p8539_p5 }
0x311d   : > { %p8300_p1 = por %p8299_p0, %p8298_p13 }
0x311e   : > { %p8296_p12 = pneg %p8295_p11 }
0x311f   : > { %p8302_p3 = por %p8301_p2, %p8300_p1 }
0x3121   : > { %p8303_p4 = pnand %p8302_p3, %p8296_p12 }
0x3123   : > { %8306 = shalt.err (!%p8303_p4)
}
0x3124   : > { %8034 = dma.vmem_to_hbm [thread:$0]  (%p8539_p5), %s9939_s7, 128, %s9937_s0, %s6489_s30  }
0x3125 PF: > { %s10126_s1 = sld [smem:[#allocation11_spill]]  ;;  %s10127_s25 = sld [smem:[#allocation8_spill]] }
0x312b   : > { %p8045_p7 = scmp.ge.s32.totalorder %s10126_s1, 2  ;;  %s6532_s2 = sand.u32 1, %s10127_s25  }
0x312c   : > { %s6533_s24 = scalar_lea.sflag [#allocation3], %s6532_s2 }
0x312d   : > { %p8039_p8 = pnand %p8045_p7, %p8543_p6 }
0x312f   : > { %8324 = dma.done.wait (!%p8039_p8), %s6533_s24, 128  }
0x3130   : > { %8326 = vsyncadd (!%p8039_p8), %s6533_s24, 4294967168  ;;  %s6542_s13 = scalar_lea.sflag [#allocation5], %s6532_s2 }
0x3131   : > { %8328 = dma.done.wait (!%p8039_p8), %s6542_s13, 128  }
0x3132   : > { %8330 = vsyncadd (!%p8039_p8), %s6542_s13, 4294967168  ;;  %s10129_s30 = sld [smem:[#allocation13_spill]]  ;;  %s10130_s7 = sld [smem:[#allocation9_spill]] }
0x3133   : > { %s10131_s4 = sld [smem:[#allocation10_spill]]  ;;  %s10132_s8 = sld [smem:[#allocation14_spill]] }
0x3138   : > { %p41_p5 = scmp.ge.s32.totalorder %s10129_s30, 4  }
0x313a   :  { %43 = sbr.rel (!%p41_p5) target bundleno = 28 (0x1c), region = 199 }
0x3141   :  { %6547 = vsyncpa [#allocation3], 1 }
0x3142   :  { %6549 = vsyncpa [#allocation3 + $0x1], 1 }
0x3143   :  { %6550 = vsyncpa [#allocation5], 1 }
0x3144   :  { %6552 = vsyncpa [#allocation5 + $0x1], 1 }

</bundles_post_ra>
